<compile_context>
chip_gen: v7x
topology: tpu7x:2x2x1
jax: 0.10.0
libtpu: 0.0.40
codegen_flags: <defaults>
</compile_context>

<pallas_src>
import numpy as np
import jax
import jax.numpy as jnp
from jax.experimental import pallas as pl
from jax.experimental.pallas import tpu as pltpu

CROP_H0, CROP_H1 = 35, 223     # -> 188-row crop window
CROP_W0, CROP_W1 = 32, 220     # -> 188-col crop window
POOL_OUT = 112
FEAT_DIM = 512


# ----------------------------------------------------------------------------
# crop + adaptive average pool, expressed as out = P_h @ X @ P_w^T
# (crop window baked into the pool matrices as zero columns -> no slice copy)
# ----------------------------------------------------------------------------
def _pool_matrices(h_img, w_img):
    """(P_h, P_w^T) reproducing crop[35:223, 32:220] + AdaptiveAvgPool2d((112,112))."""
    def mat(full, c0, c1, out_size):
        in_size = c1 - c0
        p = np.zeros((out_size, full), dtype=np.float32)
        for i in range(out_size):
            s = (i * in_size) // out_size
            e = -((-(i + 1) * in_size) // out_size)   # ceil((i+1)*in/out)
            p[i, c0 + s:c0 + e] = 1.0 / (e - s)
        return p
    ph = mat(h_img, CROP_H0, CROP_H1, POOL_OUT)          # (112, H)
    pw_t = mat(w_img, CROP_W0, CROP_W1, POOL_OUT).T      # (W, 112), pre-transposed
    return (jnp.asarray(ph).astype(jnp.bfloat16),
            jnp.asarray(pw_t).astype(jnp.bfloat16))


def _pool_kernel(x_ref, xh_ref, ph_ref, pwt_ref, o_ref):
    ph = ph_ref[...]                       # (112, H)  bf16
    pwt = pwt_ref[...]                     # (W, 112)  bf16
    pb, h_img, w_img = x_ref.shape
    for s, ref in enumerate((x_ref, xh_ref)):
        x = ref[...].astype(jnp.bfloat16)                        # (pb, H, W)
        # W-contraction as ONE big 2-D MXU matmul: (pb*H, W) @ (W, 112), f32 acc.
        tmp = jnp.dot(x.reshape(pb * h_img, w_img), pwt,
                      preferred_element_type=jnp.float32)
        tmp = tmp.reshape(pb, h_img, POOL_OUT).astype(jnp.bfloat16)
        # H-contraction per plane (pb is a tiny static count -> unrolled loop,
        # no (pb,112,H) broadcast copies of ph are ever materialized).
        for p in range(pb):
            o_ref[s, p] = jnp.dot(ph, tmp[p],
                                  preferred_element_type=jnp.float32
                                  ).astype(o_ref.dtype)


def adaptive_pool_pair(x_planes, xh_planes, ph, pw_t):
    """(N, H, W) f32 planes for x and x_hat -> (2, N, 112, 112) bf16 pooled planes."""
    n, h_img, w_img = x_planes.shape
    pb = n // 2 if (n % 2 == 0 and n >= 2) else n   # >=2 grid steps so megacore shards
    return pl.pallas_call(
        _pool_kernel,
        out_shape=jax.ShapeDtypeStruct((2, n, POOL_OUT, POOL_OUT), jnp.bfloat16),
        grid=(n // pb,),
        in_specs=[pl.BlockSpec((pb, h_img, w_img), lambda i: (i, 0, 0)),
                  pl.BlockSpec((pb, h_img, w_img), lambda i: (i, 0, 0)),
                  pl.BlockSpec((POOL_OUT, h_img), lambda i: (0, 0)),
                  pl.BlockSpec((w_img, POOL_OUT), lambda i: (0, 0))],
        out_specs=pl.BlockSpec((2, pb, POOL_OUT, POOL_OUT), lambda i: (0, i, 0, 0)),
        compiler_params=pltpu.CompilerParams(dimension_semantics=("parallel",)),
    )(x_planes, xh_planes, ph, pw_t)


# ----------------------------------------------------------------------------
# Synthetic "facenet": flatten -> K-tiled bf16 matmul to 512-d embedding
# ----------------------------------------------------------------------------
def _linear_kernel(a_ref, w_ref, o_ref):
    @pl.when(pl.program_id(1) == 0)
    def _():
        o_ref[...] = jnp.zeros_like(o_ref)

    o_ref[...] += jnp.dot(a_ref[...], w_ref[...],
                          preferred_element_type=jnp.float32)


def linear_embed(a, w, *, tk=12544, n_split=2):
    # tk=12544 -> K/tk = 3 reduction steps instead of 28: the 38.5 MB bf16 weight
    # stream is the whole cost of the forward, so big K tiles amortize the ~0.35 us
    # per-grid-step overhead.  n_split=2 keeps the first ("parallel") axis shardable
    # across v7x's 2 TensorCores; single-TC chips (v5e/v6e) can pass n_split=1.
    # Weight tile (tk, 512/n_split) bf16 = 6.4 MB -> 12.8 MB double-buffered; the
    # explicit vmem_limit covers v5e's 16 MiB scoped default with headroom.
    m, k = a.shape
    k2, n = w.shape
    assert k == k2 and k % tk == 0 and n % (n_split * 128) == 0
    tn = n // n_split
    return pl.pallas_call(
        _linear_kernel,
        out_shape=jax.ShapeDtypeStruct((m, n), jnp.float32),
        grid=(n_split, k // tk),
        in_specs=[pl.BlockSpec((m, tk), lambda j, kk: (0, kk)),
                  pl.BlockSpec((tk, tn), lambda j, kk: (kk, j))],
        out_specs=pl.BlockSpec((m, tn), lambda j, kk: (0, j)),
        compiler_params=pltpu.CompilerParams(
            dimension_semantics=("parallel", "arbitrary"),
            vmem_limit_bytes=32 * 1024 * 1024),
    )(a, w)


# ----------------------------------------------------------------------------
# mean(|cosine_similarity(x_feats, x_hat_feats, dim=1)|)  -> scalar
# ----------------------------------------------------------------------------
def _cosine_loss_kernel(a_ref, b_ref, o_ref):
    a = a_ref[...]                                         # (B, D)
    b = b_ref[...]                                         # (B, D)
    dot = jnp.sum(a * b, axis=1, keepdims=True)            # (B, 1)
    na = jnp.sqrt(jnp.sum(a * a, axis=1, keepdims=True))
    nb = jnp.sqrt(jnp.sum(b * b, axis=1, keepdims=True))
    cos = dot / jnp.maximum(na * nb, 1e-8)                 # torch eps=1e-8 rule
    o_ref[...] = jnp.mean(jnp.abs(cos)).reshape(1, 1)


def cosine_id_loss(a, b):
    m, d = a.shape
    return pl.pallas_call(
        _cosine_loss_kernel,
        out_shape=jax.ShapeDtypeStruct((1, 1), jnp.float32),
        in_specs=[pl.BlockSpec((m, d), lambda: (0, 0)),
                  pl.BlockSpec((m, d), lambda: (0, 0))],
        out_specs=pl.BlockSpec((1, 1), lambda: (0, 0)),
    )(a, b)


# ----------------------------------------------------------------------------
# IDLoss wrapper: pool x & x_hat in one launch -> shared feature matmul -> loss
# ----------------------------------------------------------------------------
@jax.jit
def id_loss_forward(x, x_hat, params):
    b, c, h, w = x.shape
    # crop folded into the pool matrices; no image-level concat/slice/astype copies
    pooled = adaptive_pool_pair(x.reshape(b * c, h, w),
                                x_hat.reshape(b * c, h, w),
                                params["ph"], params["pw_t"])    # (2, b*c, 112, 112) bf16
    flat = pooled.reshape(2 * b, c * POOL_OUT * POOL_OUT)        # (2b, 37632) bf16
    feats = linear_embed(flat, params["w_feat"])                 # (2b, 512) f32
    return cosine_id_loss(feats[:b], feats[b:])[0, 0]


if __name__ == "__main__":
    B, C, H, W = 2, 3, 224, 224          # crop [35:223, 32:220] requires H>=223, W>=220
    key = jax.random.PRNGKey(0)
    kx, kxh = jax.random.split(key)
    x = jax.random.normal(kx, (B, C, H, W), dtype=jnp.float32)
    x_hat = jax.random.normal(kxh, (B, C, H, W), dtype=jnp.float32)

    ph, pw_t = _pool_matrices(H, W)
    params = {
        "ph": ph,
        "pw_t": pw_t,
        # deterministic synthetic facenet embedding weights (bf16 halves the
        # dominant HBM stream; matmul still accumulates in f32)
        "w_feat": (0.02 * jax.random.normal(
            jax.random.PRNGKey(42),
            (C * POOL_OUT * POOL_OUT, FEAT_DIM), dtype=jnp.float32)
        ).astype(jnp.bfloat16),
    }

    loss = id_loss_forward(x, x_hat, params)
    jax.block_until_ready(loss)
    assert loss.shape == () and jnp.isfinite(loss)
    print("KERNEL_OK")
</pallas_src>

<mosaic_0001>
module attributes {stable_mosaic.version = 11 : i64} {
  func.func @_linear_kernel(%arg0: i32, %arg1: i32, %arg2: memref<4x12544xbf16, #tpu.memory_space<vmem>>, %arg3: memref<12544x256xbf16, #tpu.memory_space<vmem>>, %arg4: memref<4x256xf32, #tpu.memory_space<vmem>>) attributes {dimension_semantics = [#tpu.dimension_semantics<parallel>, #tpu.dimension_semantics<arbitrary>], iteration_bounds = array<i64: 2, 3>, scalar_prefetch = 0 : i64, scratch_operands = 0 : i64, tpu.core_type = #tpu.core_type<tc>, window_params = [{transform_indices = @transform_0, window_bounds = array<i64: 4, 12544>}, {transform_indices = @transform_1, window_bounds = array<i64: 12544, 256>}, {transform_indices = @transform_2, window_bounds = array<i64: 4, 256>}]} {
    %c0_i32 = arith.constant 0 : i32
    %0 = arith.cmpi eq, %arg1, %c0_i32 : i32
    %1 = arith.extui %0 : i1 to i32
    %c0_i32_0 = arith.constant 0 : i32
    %2 = arith.cmpi ne, %1, %c0_i32_0 : i32
    scf.if %2 {
      %cst_8 = arith.constant 0.000000e+00 : f32
      %9 = vector.broadcast %cst_8 : f32 to vector<4x256xf32>
      %c0_9 = arith.constant 0 : index
      %c0_10 = arith.constant 0 : index
      %10 = vector.load %arg4[%c0_9, %c0_10] : memref<4x256xf32, #tpu.memory_space<vmem>>, vector<4x256xf32>
      tpu.vector_store %arg4[%c0_9, %c0_10], %9 {strides = array<i32>} : memref<4x256xf32, #tpu.memory_space<vmem>>, vector<4x256xf32>,
    } else {
    }
    %c0 = arith.constant 0 : index
    %c0_1 = arith.constant 0 : index
    %3 = vector.load %arg4[%c0, %c0_1] : memref<4x256xf32, #tpu.memory_space<vmem>>, vector<4x256xf32>
    %c0_2 = arith.constant 0 : index
    %c0_3 = arith.constant 0 : index
    %4 = vector.load %arg2[%c0_2, %c0_3] : memref<4x12544xbf16, #tpu.memory_space<vmem>>, vector<4x12544xbf16>
    %c0_4 = arith.constant 0 : index
    %c0_5 = arith.constant 0 : index
    %5 = vector.load %arg3[%c0_4, %c0_5] : memref<12544x256xbf16, #tpu.memory_space<vmem>>, vector<12544x256xbf16>
    %cst = arith.constant dense<0.000000e+00> : vector<4x256xf32>
    %6 = tpu.matmul %4, %5, %cst {dimension_numbers = #tpu.dot_dimension_numbers<[1], [0], [0], [1], [0, 0, 1, 1], [], []>} : vector<4x12544xbf16>, vector<12544x256xbf16>, vector<4x256xf32> -> vector<4x256xf32>
    %7 = arith.addf %3, %6 : vector<4x256xf32>
    %c0_6 = arith.constant 0 : index
    %c0_7 = arith.constant 0 : index
    %8 = vector.load %arg4[%c0_6, %c0_7] : memref<4x256xf32, #tpu.memory_space<vmem>>, vector<4x256xf32>
    tpu.vector_store %arg4[%c0_6, %c0_7], %7 {strides = array<i32>} : memref<4x256xf32, #tpu.memory_space<vmem>>, vector<4x256xf32>,
    return
  }
  func.func @transform_0(%arg0: i32, %arg1: i32) -> (i32, i32) {
    %c0_i32 = arith.constant 0 : i32
    %c0_i32_0 = arith.constant 0 : i32
    return %c0_i32, %arg1 : i32, i32
  }
  func.func @transform_1(%arg0: i32, %arg1: i32) -> (i32, i32) {
    %c0_i32 = arith.constant 0 : i32
    return %arg1, %arg0 : i32, i32
  }
  func.func @transform_2(%arg0: i32, %arg1: i32) -> (i32, i32) {
    %c0_i32 = arith.constant 0 : i32
    %c0_i32_0 = arith.constant 0 : i32
    return %c0_i32, %arg0 : i32, i32
  }
}

module attributes {stable_mosaic.version = 11 : i64} {
  func.func @_pool_kernel(%arg0: i32, %arg1: memref<3x224x224xf32, #tpu.memory_space<vmem>>, %arg2: memref<3x224x224xf32, #tpu.memory_space<vmem>>, %arg3: memref<112x224xbf16, #tpu.memory_space<vmem>>, %arg4: memref<224x112xbf16, #tpu.memory_space<vmem>>, %arg5: memref<2x3x112x112xbf16, #tpu.memory_space<vmem>>) attributes {dimension_semantics = [#tpu.dimension_semantics<parallel>], iteration_bounds = array<i64: 2>, scalar_prefetch = 0 : i64, scratch_operands = 0 : i64, tpu.core_type = #tpu.core_type<tc>, window_params = [{transform_indices = @transform_0, window_bounds = array<i64: 3, 224, 224>}, {transform_indices = @transform_1, window_bounds = array<i64: 3, 224, 224>}, {pipeline_mode = #tpu.pipeline_mode<synchronous>, transform_indices = @transform_2, window_bounds = array<i64: 112, 224>}, {pipeline_mode = #tpu.pipeline_mode<synchronous>, transform_indices = @transform_3, window_bounds = array<i64: 224, 112>}, {transform_indices = @transform_4, window_bounds = array<i64: 2, 3, 112, 112>}]} {
    %c0 = arith.constant 0 : index
    %c0_0 = arith.constant 0 : index
    %0 = vector.load %arg3[%c0, %c0_0] : memref<112x224xbf16, #tpu.memory_space<vmem>>, vector<112x224xbf16>
    %c0_1 = arith.constant 0 : index
    %c0_2 = arith.constant 0 : index
    %1 = vector.load %arg4[%c0_1, %c0_2] : memref<224x112xbf16, #tpu.memory_space<vmem>>, vector<224x112xbf16>
    %c0_3 = arith.constant 0 : index
    %c0_4 = arith.constant 0 : index
    %c0_5 = arith.constant 0 : index
    %2 = vector.load %arg1[%c0_3, %c0_4, %c0_5] : memref<3x224x224xf32, #tpu.memory_space<vmem>>, vector<3x224x224xf32>
    %3 = arith.truncf %2 : vector<3x224x224xf32> to vector<3x224x224xbf16>
    %4 = vector.shape_cast %3 : vector<3x224x224xbf16> to vector<672x224xbf16>
    %cst = arith.constant dense<0.000000e+00> : vector<672x112xf32>
    %5 = tpu.matmul %4, %1, %cst {dimension_numbers = #tpu.dot_dimension_numbers<[1], [0], [0], [1], [0, 0, 1, 1], [], []>} : vector<672x224xbf16>, vector<224x112xbf16>, vector<672x112xf32> -> vector<672x112xf32>
    %6 = vector.shape_cast %5 : vector<672x112xf32> to vector<3x224x112xf32>
    %7 = arith.truncf %6 : vector<3x224x112xf32> to vector<3x224x112xbf16>
    %8 = vector.extract_strided_slice %7 {offsets = [0, 0, 0], sizes = [1, 224, 112], strides = [1, 1, 1]} : vector<3x224x112xbf16> to vector<1x224x112xbf16>
    %9 = vector.shape_cast %8 : vector<1x224x112xbf16> to vector<224x112xbf16>
    %cst_6 = arith.constant dense<0.000000e+00> : vector<112x112xf32>
    %10 = tpu.matmul %0, %9, %cst_6 {dimension_numbers = #tpu.dot_dimension_numbers<[1], [0], [0], [1], [0, 0, 1, 1], [], []>} : vector<112x224xbf16>, vector<224x112xbf16>, vector<112x112xf32> -> vector<112x112xf32>
    %11 = arith.truncf %10 : vector<112x112xf32> to vector<112x112xbf16>
    %c0_7 = arith.constant 0 : index
    %c0_8 = arith.constant 0 : index
    %c0_9 = arith.constant 0 : index
    %c0_10 = arith.constant 0 : index
    %12 = vector.load %arg5[%c0_7, %c0_8, %c0_9, %c0_10] : memref<2x3x112x112xbf16, #tpu.memory_space<vmem>>, vector<1x1x112x112xbf16>
    %13 = vector.shape_cast %12 : vector<1x1x112x112xbf16> to vector<112x112xbf16>
    %14 = vector.shape_cast %11 : vector<112x112xbf16> to vector<1x1x112x112xbf16>
    tpu.vector_store %arg5[%c0_7, %c0_8, %c0_9, %c0_10], %14 {strides = array<i32>} : memref<2x3x112x112xbf16, #tpu.memory_space<vmem>>, vector<1x1x112x112xbf16>,
    %15 = vector.extract_strided_slice %7 {offsets = [1, 0, 0], sizes = [1, 224, 112], strides = [1, 1, 1]} : vector<3x224x112xbf16> to vector<1x224x112xbf16>
    %16 = vector.shape_cast %15 : vector<1x224x112xbf16> to vector<224x112xbf16>
    %cst_11 = arith.constant dense<0.000000e+00> : vector<112x112xf32>
    %17 = tpu.matmul %0, %16, %cst_11 {dimension_numbers = #tpu.dot_dimension_numbers<[1], [0], [0], [1], [0, 0, 1, 1], [], []>} : vector<112x224xbf16>, vector<224x112xbf16>, vector<112x112xf32> -> vector<112x112xf32>
    %18 = arith.truncf %17 : vector<112x112xf32> to vector<112x112xbf16>
    %c0_12 = arith.constant 0 : index
    %c1 = arith.constant 1 : index
    %c0_13 = arith.constant 0 : index
    %c0_14 = arith.constant 0 : index
    %19 = vector.load %arg5[%c0_12, %c1, %c0_13, %c0_14] : memref<2x3x112x112xbf16, #tpu.memory_space<vmem>>, vector<1x1x112x112xbf16>
    %20 = vector.shape_cast %19 : vector<1x1x112x112xbf16> to vector<112x112xbf16>
    %21 = vector.shape_cast %18 : vector<112x112xbf16> to vector<1x1x112x112xbf16>
    tpu.vector_store %arg5[%c0_12, %c1, %c0_13, %c0_14], %21 {strides = array<i32>} : memref<2x3x112x112xbf16, #tpu.memory_space<vmem>>, vector<1x1x112x112xbf16>,
    %22 = vector.extract_strided_slice %7 {offsets = [2, 0, 0], sizes = [1, 224, 112], strides = [1, 1, 1]} : vector<3x224x112xbf16> to vector<1x224x112xbf16>
    %23 = vector.shape_cast %22 : vector<1x224x112xbf16> to vector<224x112xbf16>
    %cst_15 = arith.constant dense<0.000000e+00> : vector<112x112xf32>
    %24 = tpu.matmul %0, %23, %cst_15 {dimension_numbers = #tpu.dot_dimension_numbers<[1], [0], [0], [1], [0, 0, 1, 1], [], []>} : vector<112x224xbf16>, vector<224x112xbf16>, vector<112x112xf32> -> vector<112x112xf32>
    %25 = arith.truncf %24 : vector<112x112xf32> to vector<112x112xbf16>
    %c0_16 = arith.constant 0 : index
    %c2 = arith.constant 2 : index
    %c0_17 = arith.constant 0 : index
    %c0_18 = arith.constant 0 : index
    %26 = vector.load %arg5[%c0_16, %c2, %c0_17, %c0_18] : memref<2x3x112x112xbf16, #tpu.memory_space<vmem>>, vector<1x1x112x112xbf16>
    %27 = vector.shape_cast %26 : vector<1x1x112x112xbf16> to vector<112x112xbf16>
    %28 = vector.shape_cast %25 : vector<112x112xbf16> to vector<1x1x112x112xbf16>
    tpu.vector_store %arg5[%c0_16, %c2, %c0_17, %c0_18], %28 {strides = array<i32>} : memref<2x3x112x112xbf16, #tpu.memory_space<vmem>>, vector<1x1x112x112xbf16>,
    %c0_19 = arith.constant 0 : index
    %c0_20 = arith.constant 0 : index
    %c0_21 = arith.constant 0 : index
    %29 = vector.load %arg2[%c0_19, %c0_20, %c0_21] : memref<3x224x224xf32, #tpu.memory_space<vmem>>, vector<3x224x224xf32>
    %30 = arith.truncf %29 : vector<3x224x224xf32> to vector<3x224x224xbf16>
    %31 = vector.shape_cast %30 : vector<3x224x224xbf16> to vector<672x224xbf16>
    %cst_22 = arith.constant dense<0.000000e+00> : vector<672x112xf32>
    %32 = tpu.matmul %31, %1, %cst_22 {dimension_numbers = #tpu.dot_dimension_numbers<[1], [0], [0], [1], [0, 0, 1, 1], [], []>} : vector<672x224xbf16>, vector<224x112xbf16>, vector<672x112xf32> -> vector<672x112xf32>
    %33 = vector.shape_cast %32 : vector<672x112xf32> to vector<3x224x112xf32>
    %34 = arith.truncf %33 : vector<3x224x112xf32> to vector<3x224x112xbf16>
    %35 = vector.extract_strided_slice %34 {offsets = [0, 0, 0], sizes = [1, 224, 112], strides = [1, 1, 1]} : vector<3x224x112xbf16> to vector<1x224x112xbf16>
    %36 = vector.shape_cast %35 : vector<1x224x112xbf16> to vector<224x112xbf16>
    %cst_23 = arith.constant dense<0.000000e+00> : vector<112x112xf32>
    %37 = tpu.matmul %0, %36, %cst_23 {dimension_numbers = #tpu.dot_dimension_numbers<[1], [0], [0], [1], [0, 0, 1, 1], [], []>} : vector<112x224xbf16>, vector<224x112xbf16>, vector<112x112xf32> -> vector<112x112xf32>
    %38 = arith.truncf %37 : vector<112x112xf32> to vector<112x112xbf16>
    %c1_24 = arith.constant 1 : index
    %c0_25 = arith.constant 0 : index
    %c0_26 = arith.constant 0 : index
    %c0_27 = arith.constant 0 : index
    %39 = vector.load %arg5[%c1_24, %c0_25, %c0_26, %c0_27] : memref<2x3x112x112xbf16, #tpu.memory_space<vmem>>, vector<1x1x112x112xbf16>
    %40 = vector.shape_cast %39 : vector<1x1x112x112xbf16> to vector<112x112xbf16>
    %41 = vector.shape_cast %38 : vector<112x112xbf16> to vector<1x1x112x112xbf16>
    tpu.vector_store %arg5[%c1_24, %c0_25, %c0_26, %c0_27], %41 {strides = array<i32>} : memref<2x3x112x112xbf16, #tpu.memory_space<vmem>>, vector<1x1x112x112xbf16>,
    %42 = vector.extract_strided_slice %34 {offsets = [1, 0, 0], sizes = [1, 224, 112], strides = [1, 1, 1]} : vector<3x224x112xbf16> to vector<1x224x112xbf16>
    %43 = vector.shape_cast %42 : vector<1x224x112xbf16> to vector<224x112xbf16>
    %cst_28 = arith.constant dense<0.000000e+00> : vector<112x112xf32>
    %44 = tpu.matmul %0, %43, %cst_28 {dimension_numbers = #tpu.dot_dimension_numbers<[1], [0], [0], [1], [0, 0, 1, 1], [], []>} : vector<112x224xbf16>, vector<224x112xbf16>, vector<112x112xf32> -> vector<112x112xf32>
    %45 = arith.truncf %44 : vector<112x112xf32> to vector<112x112xbf16>
    %c1_29 = arith.constant 1 : index
    %c1_30 = arith.constant 1 : index
    %c0_31 = arith.constant 0 : index
    %c0_32 = arith.constant 0 : index
    %46 = vector.load %arg5[%c1_29, %c1_30, %c0_31, %c0_32] : memref<2x3x112x112xbf16, #tpu.memory_space<vmem>>, vector<1x1x112x112xbf16>
    %47 = vector.shape_cast %46 : vector<1x1x112x112xbf16> to vector<112x112xbf16>
    %48 = vector.shape_cast %45 : vector<112x112xbf16> to vector<1x1x112x112xbf16>
    tpu.vector_store %arg5[%c1_29, %c1_30, %c0_31, %c0_32], %48 {strides = array<i32>} : memref<2x3x112x112xbf16, #tpu.memory_space<vmem>>, vector<1x1x112x112xbf16>,
    %49 = vector.extract_strided_slice %34 {offsets = [2, 0, 0], sizes = [1, 224, 112], strides = [1, 1, 1]} : vector<3x224x112xbf16> to vector<1x224x112xbf16>
    %50 = vector.shape_cast %49 : vector<1x224x112xbf16> to vector<224x112xbf16>
    %cst_33 = arith.constant dense<0.000000e+00> : vector<112x112xf32>
    %51 = tpu.matmul %0, %50, %cst_33 {dimension_numbers = #tpu.dot_dimension_numbers<[1], [0], [0], [1], [0, 0, 1, 1], [], []>} : vector<112x224xbf16>, vector<224x112xbf16>, vector<112x112xf32> -> vector<112x112xf32>
    %52 = arith.truncf %51 : vector<112x112xf32> to vector<112x112xbf16>
    %c1_34 = arith.constant 1 : index
    %c2_35 = arith.constant 2 : index
    %c0_36 = arith.constant 0 : index
    %c0_37 = arith.constant 0 : index
    %53 = vector.load %arg5[%c1_34, %c2_35, %c0_36, %c0_37] : memref<2x3x112x112xbf16, #tpu.memory_space<vmem>>, vector<1x1x112x112xbf16>
    %54 = vector.shape_cast %53 : vector<1x1x112x112xbf16> to vector<112x112xbf16>
    %55 = vector.shape_cast %52 : vector<112x112xbf16> to vector<1x1x112x112xbf16>
    tpu.vector_store %arg5[%c1_34, %c2_35, %c0_36, %c0_37], %55 {strides = array<i32>} : memref<2x3x112x112xbf16, #tpu.memory_space<vmem>>, vector<1x1x112x112xbf16>,
    return
  }
  func.func @transform_0(%arg0: i32) -> (i32, i32, i32) {
    %c0_i32 = arith.constant 0 : i32
    %c0_i32_0 = arith.constant 0 : i32
    %c0_i32_1 = arith.constant 0 : i32
    return %arg0, %c0_i32, %c0_i32_0 : i32, i32, i32
  }
  func.func @transform_1(%arg0: i32) -> (i32, i32, i32) {
    %c0_i32 = arith.constant 0 : i32
    %c0_i32_0 = arith.constant 0 : i32
    %c0_i32_1 = arith.constant 0 : i32
    return %arg0, %c0_i32, %c0_i32_0 : i32, i32, i32
  }
  func.func @transform_2(%arg0: i32) -> (i32, i32) {
    %c0_i32 = arith.constant 0 : i32
    %c0_i32_0 = arith.constant 0 : i32
    %c0_i32_1 = arith.constant 0 : i32
    return %c0_i32, %c0_i32_0 : i32, i32
  }
  func.func @transform_3(%arg0: i32) -> (i32, i32) {
    %c0_i32 = arith.constant 0 : i32
    %c0_i32_0 = arith.constant 0 : i32
    %c0_i32_1 = arith.constant 0 : i32
    return %c0_i32, %c0_i32_0 : i32, i32
  }
  func.func @transform_4(%arg0: i32) -> (i32, i32, i32, i32) {
    %c0_i32 = arith.constant 0 : i32
    %c0_i32_0 = arith.constant 0 : i32
    %c0_i32_1 = arith.constant 0 : i32
    %c0_i32_2 = arith.constant 0 : i32
    return %c0_i32, %arg0, %c0_i32_0, %c0_i32_1 : i32, i32, i32, i32
  }
}

module attributes {stable_mosaic.version = 11 : i64} {
  func.func @_cosine_loss_kernel(%arg0: memref<2x512xf32, #tpu.memory_space<vmem>>, %arg1: memref<2x512xf32, #tpu.memory_space<vmem>>, %arg2: memref<1x1xf32, #tpu.memory_space<vmem>>) attributes {dimension_semantics = [], scalar_prefetch = 0 : i64, scratch_operands = 0 : i64, tpu.core_type = #tpu.core_type<tc>} {
    %c0 = arith.constant 0 : index
    %c0_0 = arith.constant 0 : index
    %0 = vector.load %arg0[%c0, %c0_0] : memref<2x512xf32, #tpu.memory_space<vmem>>, vector<2x512xf32>
    %c0_1 = arith.constant 0 : index
    %c0_2 = arith.constant 0 : index
    %1 = vector.load %arg1[%c0_1, %c0_2] : memref<2x512xf32, #tpu.memory_space<vmem>>, vector<2x512xf32>
    %2 = arith.mulf %0, %1 : vector<2x512xf32>
    %cst = arith.constant dense<0.000000e+00> : vector<2xf32>
    %3 = vector.multi_reduction <add>, %2, %cst [1] : vector<2x512xf32> to vector<2xf32>
    %4 = vector.shape_cast %3 : vector<2xf32> to vector<2x1xf32>
    %5 = arith.mulf %0, %0 : vector<2x512xf32>
    %cst_3 = arith.constant dense<0.000000e+00> : vector<2xf32>
    %6 = vector.multi_reduction <add>, %5, %cst_3 [1] : vector<2x512xf32> to vector<2xf32>
    %7 = vector.shape_cast %6 : vector<2xf32> to vector<2x1xf32>
    %8 = math.sqrt %7 : vector<2x1xf32>
    %9 = arith.mulf %1, %1 : vector<2x512xf32>
    %cst_4 = arith.constant dense<0.000000e+00> : vector<2xf32>
    %10 = vector.multi_reduction <add>, %9, %cst_4 [1] : vector<2x512xf32> to vector<2xf32>
    %11 = vector.shape_cast %10 : vector<2xf32> to vector<2x1xf32>
    %12 = math.sqrt %11 : vector<2x1xf32>
    %13 = arith.mulf %8, %12 : vector<2x1xf32>
    %cst_5 = arith.constant 9.99999993E-9 : f32
    %14 = vector.broadcast %cst_5 : f32 to vector<2x1xf32>
    %15 = arith.maximumf %13, %14 : vector<2x1xf32>
    %16 = arith.divf %4, %15 : vector<2x1xf32>
    %17 = math.absf %16 : vector<2x1xf32>
    %18 = vector.shape_cast %17 : vector<2x1xf32> to vector<1x2x1xf32>
    %cst_6 = arith.constant dense<0.000000e+00> : vector<1xf32>
    %19 = vector.multi_reduction <add>, %18, %cst_6 [1, 2] : vector<1x2x1xf32> to vector<1xf32>
    %20 = vector.shape_cast %19 : vector<1xf32> to vector<1x1x1xf32>
    %21 = vector.extract %20[0, 0, 0] : f32 from vector<1x1x1xf32>
    %cst_7 = arith.constant 2.000000e+00 : f32
    %22 = arith.divf %21, %cst_7 : f32
    %23 = vector.broadcast %22 : f32 to vector<1x1xf32>
    %c0_8 = arith.constant 0 : index
    %c0_9 = arith.constant 0 : index
    %24 = vector.load %arg2[%c0_8, %c0_9] : memref<1x1xf32, #tpu.memory_space<vmem>>, vector<1x1xf32>
    tpu.vector_store %arg2[%c0_8, %c0_9], %23 {strides = array<i32>} : memref<1x1xf32, #tpu.memory_space<vmem>>, vector<1x1xf32>,
    return
  }
}

</mosaic_0001>

<bundles_post_ra>
// kernel: id_loss_forward.5
= control target key start
LH: loop header
LB: loop body
LE: loop exit
PB: predicated region body
PF: predicated region fallthrough
CT: control target
= control target key end

     0   :  { %v20_v1 = vlaneseq  ;;  %v195_v3 = vmov 1983009808   ;;  %s242_s0 = inlined_call_operand.vmem [shape: f32[2,512], index: 0, kind: input, shape index: {}]   ;;  %s243_s1 = inlined_call_operand.vmem [shape: f32[2,512], index: 1, kind: input, shape index: {}]   ;;  %s244_s2 = inlined_call_operand.hbm [shape: f32[1,1], index: 2, kind: output, shape index: {}]  }
   0x1   :  { %v12_v0 = vld [vmem:[%s242_s0] sm:$0xff]  ;;  %v18_v4 = vunpack.c.l.s4 %v195_v3 }
   0x2   :  { %v13_v2 = vld [vmem:[%s243_s1] sm:$0xff]  ;;  %v47_v5 = vmul.f32 %v12_v0, %v12_v0 }
   0x3   :  { %v86_v6 = vmul.f32 %v13_v2, %v13_v2 }
   0x4   :  { %7 = vsyncpa [#allocation3], 0  ;;  %v21_v7 = vshrl.u32 %v20_v1, 7  ;;  %v14_v8 = vmul.f32 %v13_v2, %v12_v0  ;;  %v19_v9 = vunpack.c.0.s8 %v18_v4  ;;  %v49_v10 = vcombine.high %v47_v5, %v47_v5  ;;  %s196_s0 = smov [#allocation2]  }
   0x5   :  { %v88_v11 = vcombine.high %v86_v6, %v86_v6  ;;  %vm37_vm0 = vcmask 1041408   ;;  %vm130_vm5 = vcmask 1024   ;;  %s153_s1 = sshll.u32 %s196_s0, 4  ;;  %vm145_vm6 = vcmask 0   ;;  %s154_s1 = int_to_ptr.vmem [resolvable:$true] %s153_s1 }
   0x6   :  { %v16_v12 = vcombine.high %v14_v8, %v14_v8  ;;  %v22_v13 = vsub.s32 %v19_v9, %v21_v7  ;;  %s171_s15 = scalar_lea.vmem %s154_s1, 16  ;;  %s175_s16 = scalar_lea.vmem %s154_s1, 32 }
   0x7   :  { %p172_p0 = scmp.ne.s32.totalorder %s154_s1, %s171_s15  ;;  %p176_p1 = scmp.lt.s32.totalorder %s154_s1, %s154_s1 }
   0x8   :  { %v56_v14 = vrot.slane %v47_v5, %v22_v13  ;;  %v63_v15 = vrot.slane %v49_v10, %v22_v13  ;;  %v95_v16 = vrot.slane %v86_v6, %v22_v13  ;;  %v102_v17 = vrot.slane %v88_v11, %v22_v13  ;;  %p177_p2 = scmp.lt.s32.totalorder %s175_s16, %s171_s15 }
   0x9   :  { %v23_v18 = vrot.slane %v14_v8, %v22_v13  ;;  %v30_v19 = vrot.slane %v16_v12, %v22_v13 }
   0xa   :  { %v64_v20 = vcombine.high %v56_v14, %v56_v14  ;;  %v65_v21 = vcombine.high %v63_v15, %v63_v15  ;;  %v70_v22 = vsel %vm37_vm0, %v56_v14, 0.0  ;;  %v73_v23 = vsel %vm37_vm0, %v63_v15, 0.0  ;;  %p178_p3 = por %p177_p2, %p176_p1 }
   0xb   :  { %v103_v24 = vcombine.high %v95_v16, %v95_v16  ;;  %v109_v25 = vsel %vm37_vm0, %v95_v16, 0.0  ;;  %v104_v27 = vcombine.high %v102_v17, %v102_v17  ;;  %v31_v28 = vcombine.high %v23_v18, %v23_v18 }
   0xc   :  { %v71_v26 = vsel %vm37_vm0, %v64_v20, 0.0  ;;  %v32_v29 = vcombine.high %v30_v19, %v30_v19  ;;  %v112_v32 = vsel %vm37_vm0, %v102_v17, 0.0  ;;  %v38_v33 = vsel %vm37_vm0, %v23_v18, 0.0  ;;  %p179_p4 = pnand %p178_p3, %p172_p0 }
   0xd   :  { %v72_v30 = vadd.f32 %v71_v26, %v70_v22  ;;  %v110_v31 = vsel %vm37_vm0, %v103_v24, 0.0  ;;  %v75_v34 = vsel %vm37_vm0, %v65_v21, 0.0  ;;  %v39_v36 = vsel %vm37_vm0, %v31_v28, 0.0 }
   0xe   :  { %v111_v35 = vadd.f32 %v110_v31, %v109_v25  ;;  %v41_v37 = vsel %vm37_vm0, %v30_v19, 0.0  ;;  %v40_v39 = vadd.f32 %v39_v36, %v38_v33  ;;  %v114_v41 = vsel %vm37_vm0, %v104_v27, 0.0 }
   0xf   :  { %v74_v38 = vadd.f32 %v73_v23, %v72_v30  ;;  %v43_v42 = vsel %vm37_vm0, %v32_v29, 0.0 }
  0x10   :  { %v113_v40 = vadd.f32 %v112_v32, %v111_v35  ;;  %v42_v44 = vadd.f32 %v41_v37, %v40_v39 }
  0x11   :  { %v76_v43 = vadd.f32 %v75_v34, %v74_v38 }
  0x12   :  { %v115_v45 = vadd.f32 %v114_v41, %v113_v40  ;;  %v44_v46 = vadd.f32 %v43_v42, %v42_v44 }
  0x13   :  { %77 = vadd.xlane.f32.xlu0 %v76_v43 }
  0x14   :  { %45 = vadd.xlane.f32.xlu1 %v44_v46 }
  0x17   :  { %116 = vadd.xlane.f32.xlu0 %v115_v45 }
  0xa0   :  { %v78_v47 = vpop.xlane.xlu0 %77 }
  0xa1   :  { %165 = vrsqrt.f32 %v78_v47  ;;  %vm81_vm1 = vcmp.eq.f32.partialorder %v78_v47, inf  ;;  %v84_v54 = vand.u32 2147483648, %v78_v47  ;;  %vm83_vm3 = vcmp.eq.f32.partialorder %v78_v47, 0.0  ;;  %v46_v61 = vpop.xlane.xlu1 %45 }
  0xa4   :  { %v117_v48 = vpop.xlane.xlu0 %116 }
  0xa5   :  { %167 = vrsqrt.f32 %v117_v48  ;;  %vm120_vm2 = vcmp.eq.f32.partialorder %v117_v48, inf  ;;  %v123_v55 = vand.u32 2147483648, %v117_v48  ;;  %vm122_vm4 = vcmp.eq.f32.partialorder %v117_v48, 0.0 }
  0xab   :  { %v166_v49 = vpop.eup %165 }
  0xac   :  { %v80_v50 = vmul.f32 %v166_v49, %v78_v47 }
  0xae   :  { %v82_v52 = vsel %vm81_vm1, %v78_v47, %v80_v50 }
  0xaf   :  { %v168_v51 = vpop.eup %167  ;;  %v85_v57 = vsel %vm83_vm3, %v84_v54, %v82_v52 }
  0xb0   :  { %v119_v53 = vmul.f32 %v168_v51, %v117_v48 }
  0xb2   :  { %v121_v56 = vsel %vm120_vm2, %v117_v48, %v119_v53 }
  0xb3   :  { %v124_v58 = vsel %vm122_vm4, %v123_v55, %v121_v56 }
  0xb4   :  { %v125_v59 = vmul.f32 %v124_v58, %v85_v57 }
  0xb6   :  { %v126_v60 = vmax.f32 %v125_v59, 1e-08 }
  0xb8   :  { %169 = vrcp.f32 %v126_v60 }
  0xc2   :  { %v170_v62 = vpop.eup %169 }
  0xc3   :  { %v128_v63 = vmul.f32 %v170_v62, %v46_v61 }
  0xc5   :  { %v129_v0 = vand.u32 2147483647, %v128_v63 }
  0xc7   :  { %v131_v1 = vsel %vm130_vm5, %v129_v0, 0.0 }
  0xc8   :  { %132 = vadd.xlane.f32.xlu1 %v131_v1 }
 0x155   :  { %v133_v2 = vpop.xlane.xlu1 %132 }
 0x156   :  { %v134_v3 = vrot.slane %v133_v2, 4 }
 0x158   :  { %v135_v4 = vadd.f32 %v134_v3, %v133_v2 }
 0x15a   :  { %v136_v5 = vrot.slane %v135_v4, 2 }
 0x15c   :  { %v137_v6 = vadd.f32 %v136_v5, %v135_v4 }
 0x15e   :  { %v138_v7 = vrot.slane %v137_v6, 1 }
 0x160   :  { %v139_v8 = vadd.f32 %v138_v7, %v137_v6 }
 0x162   :  { %161 = vpush %v139_v8 }
 0x193   :  { %s162_s13 = spop %161 }
 0x194   :  { %s143_s14 = smul.f32 0.5, %s162_s13 }
 0x196   :  { %v144_v9 = vstv %s143_s14 }
 0x197   :  { %146 = vst.msk [vmem:[#allocation2] sm:$0x1] %vm145_vm6, %v144_v9 }
 0x198   :  { %182 = shalt.err (!%p179_p4)
}
 0x199   :  { %s183_s19 = scalar_lea.hbm %s244_s2, 16 }
 0x19a   :  { %p184_p5 = scmp.ne.s32.totalorder %s244_s2, %s183_s19  ;;  %p187_p6 = scmp.lt.u32.totalorder %s183_s19, %s244_s2 }
 0x19c   :  { %p189_p7 = pnand %p187_p6, %p184_p5 }
 0x19e   :  { %192 = shalt.err (!%p189_p7)
}
 0x19f   :  { %156 = dma.vmem_to_hbm [thread:$0]  %s154_s1, 16, %s244_s2, [#allocation3]  }
 0x1a0   :  { %193 = dma.done.wait [#allocation3], 16  }
 0x1a1   :  { %194 = vsyncadd [#allocation3], 4294967280 }
 0x1a2   :  { %160 = vsyncpa [#allocation3], 1 }

// kernel: id_loss_forward.3
= control target key start
LH: loop header
LB: loop body
LE: loop exit
PB: predicated region body
PF: predicated region fallthrough
CT: control target
= control target key end

     0   :  { %9 = vsyncpa [#allocation3], 0  ;;  %s5486_s0 = inlined_call_operand.hbm [shape: f32[6,224,224], index: 0, kind: input, shape index: {}]   ;;  %s5487_s1 = inlined_call_operand.hbm [shape: f32[6,224,224], index: 1, kind: input, shape index: {}]   ;;  %s5488_s2 = inlined_call_operand.hbm [shape: bf16[112,224], index: 2, kind: input, shape index: {}]   ;;  %s5489_s3 = inlined_call_operand.hbm [shape: bf16[224,112], index: 3, kind: input, shape index: {}]   ;;  %s5490_s4 = inlined_call_operand.vmem [shape: bf16[2,6,112,112], index: 4, kind: output, shape index: {}]  }
   0x1   :  { %11 = vsyncpa [#allocation3 + $0x1], 0 }
   0x2   :  { %12 = vsyncpa [#allocation5], 0 }
   0x3   :  { %14 = vsyncpa [#allocation5 + $0x1], 0 }
   0x4   :  { %15 = vsyncpa [#allocation8], 0  ;;  %s4272_s15 = smov 0   ;;  %s4274_s16 = smov 0  }
   0x5   :  { %s4276_s17 = smov 0   ;;  %s4278_s18 = smov 0  }
   0x6 LB: > { %s4291_s19 = sadd.s32 4294967295, %s4234_s18   ;;  %p41_p0 = scmp.ne.s32.totalorder %s4226_s16, %s4222_s15  ;;  %s4234_s18 = sphi %s4278_s18, %s5509_s18   ;;  %s4230_s17 = sphi %s4276_s17, %s5508_s17   ;;  %s4226_s16 = sphi %s4274_s16, %s5507_s16   ;;  %s4222_s15 = sphi %s4272_s15, %s5506_s15  }
   0x7   : > { %p5491_p1 = scmp.eq.s32.totalorder %s4291_s19, 0  ;;  %p3523_p3 = scmp.ge.s32.totalorder %s4234_s18, 1 }
   0x8   : > { %p146_p4 = scmp.lt.s32.totalorder %s4234_s18, 3  ;;  %s4236_s22 = smov [#allocation6]  }
   0x9   : > { %p4300_p5 = por %p5491_p1, %p41_p0  ;;  %s158_s23 = sshll.u32 %s4236_s22, 4  ;;  %s159_s23 = int_to_ptr.vmem [resolvable:$true] %s158_s23 }
   0xa   : > { %p4304_p6 = pnand %p3523_p3, %p146_p4  ;;  %s4237_s25 = smov [#allocation7]  }
   0xb   : > { %s5494_s20 = scalar_select %p4300_p5, 1, 0 }
   0xc   : > { %s5495_s21 = scalar_select %p4304_p6, 1, 0 }
   0xd   : > { %p3946_p7 = pneg %p4304_p6  ;;  %s171_s26 = sshll.u32 %s4237_s25, 4  ;;  %s172_s26 = int_to_ptr.vmem [resolvable:$true] %s171_s26 }
   0xe   : > { %s4072_s29 = scalar_lea.hbm %s5488_s2, 1792 }
   0xf   : > { %p4312_p8 = pnand %p3946_p7, %p5491_p1  ;;  %p4073_p9 = scmp.ne.s32.totalorder %s5488_s2, %s4072_s29 }
  0x10   : > { %p4079_p13 = scmp.lt.u32.totalorder %s4072_s29, %s5488_s2 }
  0x11   : > { %p4074_p10 = pneg %p4312_p8 }
  0x13   : > { %p4075_p11 = pnand %p4074_p10, %p4073_p9 }
  0x15   : > { %p4076_p12 = pneg %p4075_p11 }
  0x17   : > { %p4081_p0 = pnand %p4079_p13, %p4076_p12 }
  0x19   : > { %4084 = shalt.err (!%p4081_p0)
}
  0x1a   : > { %s4085_s8 = scalar_lea.vmem %s159_s23, 1792  ;;  %p4093_p1 = scmp.lt.s32.totalorder %s159_s23, %s159_s23 }
  0x1b   : > { %p4086_p3 = scmp.ne.s32.totalorder %s159_s23, %s4085_s8  ;;  %p4094_p2 = scmp.lt.s32.totalorder %s4085_s8, %s4085_s8 }
  0x1d   : > { %p4088_p4 = pnand %p4086_p3, %p4074_p10  ;;  %p4095_p5 = por %p4094_p2, %p4093_p1 }
  0x1f   : > { %p4089_p7 = pneg %p4088_p4 }
  0x21   : > { %p4096_p6 = pnand %p4095_p5, %p4089_p7 }
  0x23   : > { %4099 = shalt.err (!%p4096_p6)
}
  0x24   : > { %s4238_s9 = smov 128   ;;  %s4239_s10 = smov 8  }
  0x25   : > { %3949 = dma.hbm_to_vmem [thread:$0]  (!%p4312_p8), %s5488_s2, 1792, %s159_s23, [#allocation5], %s4238_s9, %s4238_s9, %s4239_s10  }
  0x26   : > { %s4100_s15 = scalar_lea.hbm %s5489_s3, 1792 }
  0x27   : > { %p4101_p1 = scmp.ne.s32.totalorder %s5489_s3, %s4100_s15  ;;  %p4107_p6 = scmp.lt.u32.totalorder %s4100_s15, %s5489_s3 }
  0x29   : > { %p4103_p2 = pnand %p4101_p1, %p4074_p10 }
  0x2b   : > { %p4104_p5 = pneg %p4103_p2 }
  0x2d   : > { %p4109_p9 = pnand %p4107_p6, %p4104_p5 }
  0x2f   : > { %4112 = shalt.err (!%p4109_p9)
}
  0x30   : > { %s4113_s23 = scalar_lea.vmem %s172_s26, 1792  ;;  %p4121_p0 = scmp.lt.s32.totalorder %s172_s26, %s172_s26 }
  0x31   : > { %p4114_p11 = scmp.ne.s32.totalorder %s172_s26, %s4113_s23  ;;  %p4122_p3 = scmp.lt.s32.totalorder %s4113_s23, %s4113_s23 }
  0x33   : > { %p4116_p12 = pnand %p4114_p11, %p4074_p10  ;;  %p4123_p4 = por %p4122_p3, %p4121_p0 }
  0x35   : > { %p4117_p13 = pneg %p4116_p12 }
  0x37   : > { %p4124_p7 = pnand %p4123_p4, %p4117_p13 }
  0x39   : > { %4127 = shalt.err (!%p4124_p7)
}
  0x3a   : > { %s4240_s29 = smov 64   ;;  %s4241_s30 = smov 4  }
  0x3b   : > { %3952 = dma.hbm_to_vmem [thread:$0]  (!%p4312_p8), %s5489_s3, 1792, %s172_s26, [#allocation8], %s4240_s29, %s4240_s29, %s4241_s30  }
  0x3c   : > { %s4359_s7 = sadd.s32 1, %s4234_s18   ;;  %s28_s9 = sadd.s32 1, %s4230_s17 }
  0x3d   : > { %s25_s8 = ssub.s32 %s4234_s18, %s4359_s7  ;;  %p35_p1 = scmp.ne.s32.totalorder %s4230_s17, %s4226_s16 }
  0x3e   : > { %p26_p10 = scmp.eq.s32.totalorder %s25_s8, 0  ;;  %p36_p2 = scmp.eq.s32.totalorder %s4234_s18, 0 }
  0x3f   : > { %p5497_p6 = scmp.eq.s32.totalorder %s4291_s19, 1  ;;  %p3962_p11 = scmp.lt.s32.totalorder %s4234_s18, 2 }
  0x40   : > { %s4368_s10 = scalar_select %p26_p10, %s4230_s17, %s28_s9  }
  0x41   : > { %p37_p5 = por %p36_p2, %p35_p1  ;;  %p4372_p9 = por %p5497_p6, %p35_p1 }
  0x42   : > { %s185_s11 = sand.u32 1, %s4230_s17   ;;  %s3963_s12 = smul.u32 21504, %s4234_s18 }
  0x43   : > { %s4378_s26 = smul.u32 1344, %s185_s11  ;;  %p4381_p8 = pnand %p3962_p11, %p37_p5 }
  0x44   : > { %s4390_s22 = scalar_lea.hbm %s5486_s0, %s3963_s12  ;;  %s207_s28 = sand.u32 1, %s4234_s18  }
  0x45   : > { %s189_s25 = scalar_lea.vmem [#allocation2], %s4378_s26  ;;  %s4396_s23 = scalar_lea.sflag [#allocation3], %s185_s11 }
  0x46   : > { %s197_s27 = sshll.u32 %s189_s25, 4  ;;  %s4128_s29 = scalar_lea.hbm %s4390_s22, 21504  ;;  %s4393_s27 = int_to_ptr.vmem [resolvable:$true] %s197_s27 }
  0x47   : > { %p4129_p12 = scmp.ne.s32.totalorder %s4390_s22, %s4128_s29  ;;  %p4130_p13 = pneg %p4381_p8 }
  0x48   : > { %s4133_s6 = scalar_lea.hbm %s5486_s0, 43008  ;;  %p4134_p4 = scmp.lt.u32.totalorder %s4390_s22, %s5486_s0 }
  0x49   : > { %p4131_p0 = pnand %p4130_p13, %p4129_p12  ;;  %p4135_p7 = scmp.lt.u32.totalorder %s4133_s6, %s4128_s29 }
  0x4a   : > { %p4137_p1 = scmp.lt.u32.totalorder %s4128_s29, %s4390_s22 }
  0x4b   : > { %p4132_p3 = pneg %p4131_p0  ;;  %p4136_p10 = por %p4135_p7, %p4134_p4 }
  0x4d   : > { %p4138_p2 = por %p4137_p1, %p4136_p10 }
  0x4f   : > { %p4139_p5 = pnand %p4138_p2, %p4132_p3 }
  0x51   : > { %4142 = shalt.err (!%p4139_p5)
}
  0x52   : > { %s4143_s11 = scalar_lea.vmem %s4393_s27, 21504  ;;  %s4242_s14 = smov [#allocation2]  }
  0x53   : > { %p4144_p6 = scmp.ne.s32.totalorder %s4393_s27, %s4143_s11  ;;  %s4148_s15 = sshll.u32 %s4242_s14, 4  ;;  %s4149_s15 = int_to_ptr.vmem [resolvable:$false] %s4148_s15 }
  0x54   : > { %s4150_s25 = scalar_lea.vmem %s4149_s15, 43008  ;;  %p4151_p0 = scmp.lt.s32.totalorder %s4393_s27, %s4149_s15 }
  0x55   : > { %p4146_p11 = pnand %p4144_p6, %p4130_p13  ;;  %p4152_p4 = scmp.lt.s32.totalorder %s4150_s25, %s4143_s11 }
  0x57   : > { %p4147_p12 = pneg %p4146_p11  ;;  %p4153_p7 = por %p4152_p4, %p4151_p0 }
  0x59   : > { %p4154_p10 = pnand %p4153_p7, %p4147_p12 }
  0x5b   : > { %4157 = shalt.err (!%p4154_p10)
}
  0x5c   : > { %s4243_s29 = smov 256   ;;  %s4244_s30 = smov 16  }
  0x5d   : > { %3956 = dma.hbm_to_vmem [thread:$0]  (!%p4381_p8), %s4390_s22, 21504, %s4393_s27, %s4396_s23, %s4243_s29, %s4243_s29, %s4244_s30  }
  0x5e   : > { %s4432_s8 = scalar_lea.hbm %s5487_s1, %s3963_s12  ;;  %s211_s9 = scalar_lea.vmem [#allocation4], %s4378_s26 }
  0x5f   : > { %s219_s11 = sshll.u32 %s211_s9, 4  ;;  %s4439_s14 = scalar_lea.sflag [#allocation5], %s207_s28  ;;  %s4435_s11 = int_to_ptr.vmem [resolvable:$true] %s219_s11 }
  0x60   : > { %s4158_s15 = scalar_lea.hbm %s4432_s8, 21504  ;;  %s4163_s27 = scalar_lea.hbm %s5487_s1, 43008 }
  0x61   : > { %p4159_p3 = scmp.ne.s32.totalorder %s4432_s8, %s4158_s15  ;;  %p4164_p5 = scmp.lt.u32.totalorder %s4432_s8, %s5487_s1 }
  0x62   : > { %p4165_p6 = scmp.lt.u32.totalorder %s4163_s27, %s4158_s15  ;;  %p4167_p12 = scmp.lt.u32.totalorder %s4158_s15, %s4432_s8 }
  0x63   : > { %p4161_p1 = pnand %p4159_p3, %p4130_p13 }
  0x64   : > { %p4166_p11 = por %p4165_p6, %p4164_p5 }
  0x65   : > { %p4162_p2 = pneg %p4161_p1 }
  0x66   : > { %p4168_p0 = por %p4167_p12, %p4166_p11 }
  0x68   : > { %p4169_p4 = pnand %p4168_p0, %p4162_p2 }
  0x6a   : > { %4172 = shalt.err (!%p4169_p4)
}
  0x6b   : > { %s4173_s18 = scalar_lea.vmem %s4435_s11, 21504  ;;  %s4245_s26 = smov [#allocation4]  }
  0x6c   : > { %p4174_p7 = scmp.ne.s32.totalorder %s4435_s11, %s4173_s18  ;;  %s4178_s28 = sshll.u32 %s4245_s26, 4  ;;  %s4179_s28 = int_to_ptr.vmem [resolvable:$false] %s4178_s28 }
  0x6d   : > { %s4180_s5 = scalar_lea.vmem %s4179_s28, 43008  ;;  %p4181_p1 = scmp.lt.s32.totalorder %s4435_s11, %s4179_s28 }
  0x6e   : > { %p4176_p10 = pnand %p4174_p7, %p4130_p13  ;;  %p4182_p5 = scmp.lt.s32.totalorder %s4180_s5, %s4173_s18 }
  0x70   : > { %p4177_p3 = pneg %p4176_p10  ;;  %p4183_p6 = por %p4182_p5, %p4181_p1 }
  0x72   : > { %p4184_p11 = pnand %p4183_p6, %p4177_p3 }
  0x74   : > { %4187 = shalt.err (!%p4184_p11)
}
  0x75   : > { %3959 = dma.hbm_to_vmem [thread:$0]  (!%p4381_p8), %s4432_s8, 21504, %s4435_s11, %s4439_s14, %s4243_s29, %s4243_s29, %s4244_s30  }
  0x76   : > { %p5500_p13 = scmp.ne.s32.totalorder %s5495_s21, 0 }
  0x77   : > { %s4471_s6 = sand.u32 (!%p5500_p13), 1, %s4226_s16   ;;  %p5501_p2 = scmp.ne.s32.totalorder (!%p5500_p13), %s5494_s20, 0 }
  0x78   : > { %231 = sbr.rel (%p5500_p13) target bundleno = 1617 (0x651), region = 36  ;;  %s234_s15 = scalar_lea.sflag (!%p5500_p13), [#allocation3], %s4471_s6 }
  0x79   : > { %s3931_s9 = smul.u32 (!%p5500_p13), 1344, %s4471_s6 }
  0x7b   : > { %s4475_s22 = scalar_lea.vmem (!%p5500_p13), [#allocation2], %s3931_s9 }
  0x7f   : > { %4205 = dma.done.wait (%p5501_p2), %s234_s15, 21504  }
  0x80   : > { %4207 = vsyncadd (%p5501_p2), %s234_s15, 4294945792  ;;  %s242_s13 = sand.u32 1, %s4291_s19   ;;  %s4482_s29 = scalar_lea.vmem [#allocation4], %s3931_s9 }
  0x81   : > { %s243_s21 = scalar_lea.sflag [#allocation5], %s242_s13 }
  0x82   : > { %4209 = dma.done.wait (%p5501_p2), %s243_s21, 21504  }
  0x83   : > { %4211 = vsyncadd (%p5501_p2), %s243_s21, 4294945792  ;;  %p5502_p8 = scmp.eq.s32.totalorder %s4291_s19, 0 }
  0x85   : > { %4213 = dma.done.wait (%p5502_p8), [#allocation5], 1792   ;;  %p5503_p12 = pmov %p5502_p8 }
  0x86   : > { %p5504_p0 = pmov %p5502_p8 }
  0x87   : > { %4215 = vsyncadd (%p5503_p12), [#allocation5], 4294965504 }
  0x88   : > { %4217 = dma.done.wait (%p5504_p0), [#allocation8], 1792   ;;  %p5505_p4 = pmov %p5504_p0 }
  0x89   : > { %v4246_v0 = vmov 0   ;;  %v4009_v1 = vld [vmem:[#allocation7] sm:$0xff]   ;;  %v4010_v2 = vld [vmem:[#allocation7 + $0x8] sm:$0xff]   ;;  %v4011_v3 = vld [vmem:[#allocation7 + $0x10] sm:$0xff]   ;;  %vm665_vm0 = vcmask 785408   ;;  %s3932_s20 = smul.u32 336, %s4471_s6 }
  0x8a   : > { %4219 = vsyncadd (%p5505_p4), [#allocation8], 4294965504  ;;  %792 = vmatprep.subr.bf16.mxu0 %v4246_v0  ;;  %1287 = vmatprep.subr.bf16.mxu1 %v4246_v0  ;;  %v4012_v4 = vld [vmem:[#allocation7 + $0x18] sm:$0xff]   ;;  %v4013_v5 = vld [vmem:[#allocation7 + $0x20] sm:$0xff]   ;;  %vm1432_vm1 = vcmask 912384   ;;  %s3967_s8 = smul.u32 (%p4372_p9), 168, %s4291_s19 }
  0x8b   : > { %793 = vmatpush1.bf16.msra.mxu0 %v4009_v1  ;;  %v330_v6 = vld [vmem:[%s4475_s22 + $0x8] sm:$0xff]  ;;  %v332_v7 = vld [vmem:[%s4475_s22 + $0x18] sm:$0xff]  ;;  %v4015_v10 = vld [vmem:[#allocation7 + $0x30] sm:$0xff]   ;;  %s4838_s30 = scalar_lea.vmem [#allocation9], %s3932_s20 }
  0x8c   : > { %794 = vmatprep.subr.bf16.mxu0 %v4246_v0  ;;  %v498_v8 = vpack.c.bf16 %v332_v7, %v330_v6  ;;  %v4014_v9 = vld [vmem:[#allocation7 + $0x28] sm:$0xff]   ;;  %v4016_v11 = vld [vmem:[#allocation7 + $0x38] sm:$0xff]   ;;  %v4017_v12 = vld [vmem:[#allocation7 + $0x40] sm:$0xff]   ;;  %s5396_s14 = scalar_lea.vmem (%p4372_p9), %s5490_s4, %s3967_s8 }
  0x8d   : > { %v4018_v13 = vld [vmem:[#allocation7 + $0x48] sm:$0xff]   ;;  %v4019_v14 = vld [vmem:[#allocation7 + $0x50] sm:$0xff]   ;;  %v4020_v15 = vld [vmem:[#allocation7 + $0x58] sm:$0xff]  }
  0x8e   : > { %3546 = vmatprep.mubr.msk.bf16.mxu0 %vm665_vm0, %v498_v8  ;;  %v4021_v16 = vld [vmem:[#allocation7 + $0x60] sm:$0xff]   ;;  %v4022_v17 = vld [vmem:[#allocation7 + $0x68] sm:$0xff]   ;;  %v329_v18 = vld [vmem:[%s4475_s22] sm:$0xff] }
  0x8f   : > { %795 = vmatpush1.bf16.msra.mxu0 %v4010_v2  ;;  %v331_v19 = vld [vmem:[%s4475_s22 + $0x10] sm:$0xff]  ;;  %v334_v20 = vld [vmem:[%s4475_s22 + $0x28] sm:$0xff]  ;;  %v336_v21 = vld [vmem:[%s4475_s22 + $0x38] sm:$0xff] }
  0x90   : > { %796 = vmatprep.subr.bf16.mxu0 %v4246_v0  ;;  %v497_v22 = vpack.c.bf16 %v331_v19, %v329_v18  ;;  %v500_v23 = vpack.c.bf16 %v336_v21, %v334_v20  ;;  %v333_v24 = vld [vmem:[%s4475_s22 + $0x20] sm:$0xff]  ;;  %v335_v25 = vld [vmem:[%s4475_s22 + $0x30] sm:$0xff]  ;;  %v338_v26 = vld [vmem:[%s4475_s22 + $0x48] sm:$0xff] }
  0x91   : > { %v340_v27 = vld [vmem:[%s4475_s22 + $0x58] sm:$0xff]  ;;  %v499_v28 = vpack.c.bf16 %v335_v25, %v333_v24  ;;  %v337_v30 = vld [vmem:[%s4475_s22 + $0x40] sm:$0xff]  ;;  %v339_v31 = vld [vmem:[%s4475_s22 + $0x50] sm:$0xff] }
  0x92   : > { %v502_v29 = vpack.c.bf16 %v340_v27, %v338_v26  ;;  %v342_v32 = vld [vmem:[%s4475_s22 + $0x68] sm:$0xff]  ;;  %v344_v33 = vld [vmem:[%s4475_s22 + $0x78] sm:$0xff]  ;;  %v501_v34 = vpack.c.bf16 %v339_v31, %v337_v30  ;;  %v341_v36 = vld [vmem:[%s4475_s22 + $0x60] sm:$0xff] }
  0x93   : > { %797 = vmatpush1.bf16.msra.mxu0 %v4011_v3  ;;  %v504_v35 = vpack.c.bf16 %v344_v33, %v342_v32  ;;  %v343_v37 = vld [vmem:[%s4475_s22 + $0x70] sm:$0xff]  ;;  %v346_v38 = vld [vmem:[%s4475_s22 + $0x88] sm:$0xff]  ;;  %v348_v39 = vld [vmem:[%s4475_s22 + $0x98] sm:$0xff] }
  0x94   : > { %798 = vmatprep.subr.bf16.mxu0 %v4246_v0  ;;  %v503_v40 = vpack.c.bf16 %v343_v37, %v341_v36  ;;  %v506_v41 = vpack.c.bf16 %v348_v39, %v346_v38  ;;  %v345_v42 = vld [vmem:[%s4475_s22 + $0x80] sm:$0xff]  ;;  %v347_v43 = vld [vmem:[%s4475_s22 + $0x90] sm:$0xff]  ;;  %v350_v44 = vld [vmem:[%s4475_s22 + $0xa8] sm:$0xff] }
  0x95   : > { %v352_v45 = vld [vmem:[%s4475_s22 + $0xb8] sm:$0xff]  ;;  %v505_v46 = vpack.c.bf16 %v347_v43, %v345_v42  ;;  %v349_v48 = vld [vmem:[%s4475_s22 + $0xa0] sm:$0xff]  ;;  %v351_v49 = vld [vmem:[%s4475_s22 + $0xb0] sm:$0xff] }
  0x96   : > { %v508_v47 = vpack.c.bf16 %v352_v45, %v350_v44  ;;  %v354_v50 = vld [vmem:[%s4475_s22 + $0xc8] sm:$0xff]  ;;  %v356_v51 = vld [vmem:[%s4475_s22 + $0xd8] sm:$0xff]  ;;  %v507_v52 = vpack.c.bf16 %v351_v49, %v349_v48  ;;  %v353_v54 = vld [vmem:[%s4475_s22 + $0xc0] sm:$0xff] }
  0x97   : > { %799 = vmatpush1.bf16.msra.mxu0 %v4012_v4  ;;  %v510_v53 = vpack.c.bf16 %v356_v51, %v354_v50  ;;  %v355_v55 = vld [vmem:[%s4475_s22 + $0xd0] sm:$0xff]  ;;  %v358_v56 = vld [vmem:[%s4475_s22 + $0xe8] sm:$0xff]  ;;  %v360_v57 = vld [vmem:[%s4475_s22 + $0xf8] sm:$0xff] }
  0x98   : > { %800 = vmatprep.subr.bf16.mxu0 %v4246_v0  ;;  %v509_v58 = vpack.c.bf16 %v355_v55, %v353_v54  ;;  %v512_v59 = vpack.c.bf16 %v360_v57, %v358_v56  ;;  %v357_v60 = vld [vmem:[%s4475_s22 + $0xe0] sm:$0xff]  ;;  %v359_v61 = vld [vmem:[%s4475_s22 + $0xf0] sm:$0xff]  ;;  %v362_v62 = vld [vmem:[%s4475_s22 + $0x108] sm:$0xff] }
  0x99   : > { %v364_v63 = vld [vmem:[%s4475_s22 + $0x118] sm:$0xff]  ;;  %v511_v1 = vpack.c.bf16 %v359_v61, %v357_v60  ;;  %v361_v3 = vld [vmem:[%s4475_s22 + $0x100] sm:$0xff]  ;;  %v363_v4 = vld [vmem:[%s4475_s22 + $0x110] sm:$0xff] }
  0x9a   : > { %v514_v2 = vpack.c.bf16 %v364_v63, %v362_v62  ;;  %v368_v6 = vld [vmem:[%s4475_s22 + $0x138] sm:$0xff]  ;;  %v513_v7 = vpack.c.bf16 %v363_v4, %v361_v3  ;;  %v373_v21 = vld [vmem:[%s4475_s22 + $0x160] sm:$0xff] }
  0x9b   : > { %801 = vmatpush1.bf16.msra.mxu0 %v4013_v5  ;;  %v366_v5 = vld [vmem:[%s4475_s22 + $0x128] sm:$0xff]  ;;  %v376_v18 = vld [vmem:[%s4475_s22 + $0x178] sm:$0xff]  ;;  %v377_v27 = vld [vmem:[%s4475_s22 + $0x180] sm:$0xff] }
  0x9c   : > { %802 = vmatprep.subr.bf16.mxu0 %v4246_v0  ;;  %v516_v8 = vpack.c.bf16 %v368_v6, %v366_v5  ;;  %v380_v24 = vld [vmem:[%s4475_s22 + $0x198] sm:$0xff]  ;;  %v381_v33 = vld [vmem:[%s4475_s22 + $0x1a0] sm:$0xff] }
  0x9d   : > { %v384_v30 = vld [vmem:[%s4475_s22 + $0x1b8] sm:$0xff]  ;;  %v385_v39 = vld [vmem:[%s4475_s22 + $0x1c0] sm:$0xff] }
  0x9e   : > { %v388_v36 = vld [vmem:[%s4475_s22 + $0x1d8] sm:$0xff]  ;;  %v389_v45 = vld [vmem:[%s4475_s22 + $0x1e0] sm:$0xff] }
  0x9f   : > { %803 = vmatpush1.bf16.msra.mxu0 %v4014_v9  ;;  %v365_v9 = vld [vmem:[%s4475_s22 + $0x120] sm:$0xff]  ;;  %v392_v42 = vld [vmem:[%s4475_s22 + $0x1f8] sm:$0xff] }
  0xa0   : > { %804 = vmatprep.subr.bf16.mxu0 %v4246_v0  ;;  %v396_v48 = vld [vmem:[%s4475_s22 + $0x218] sm:$0xff]  ;;  %v393_v51 = vld [vmem:[%s4475_s22 + $0x200] sm:$0xff] }
  0xa1   : > { %v400_v54 = vld [vmem:[%s4475_s22 + $0x238] sm:$0xff]  ;;  %v397_v57 = vld [vmem:[%s4475_s22 + $0x220] sm:$0xff] }
  0xa2   : > { %v404_v60 = vld [vmem:[%s4475_s22 + $0x258] sm:$0xff]  ;;  %v401_v63 = vld [vmem:[%s4475_s22 + $0x240] sm:$0xff] }
  0xa3   : > { %805 = vmatpush1.bf16.msra.mxu0 %v4015_v10  ;;  %v367_v10 = vld [vmem:[%s4475_s22 + $0x130] sm:$0xff]  ;;  %v408_v3 = vld [vmem:[%s4475_s22 + $0x278] sm:$0xff]  ;;  %v405_v6 = vld [vmem:[%s4475_s22 + $0x260] sm:$0xff] }
  0xa4   : > { %806 = vmatprep.subr.bf16.mxu0 %v4246_v0 }
  0xa7   : > { %807 = vmatpush1.bf16.msra.mxu0 %v4016_v11  ;;  %v370_v11 = vld [vmem:[%s4475_s22 + $0x148] sm:$0xff] }
  0xa8   : > { %808 = vmatprep.subr.bf16.mxu0 %v4246_v0 }
  0xab   : > { %809 = vmatpush1.bf16.msra.mxu0 %v4017_v12  ;;  %v372_v12 = vld [vmem:[%s4475_s22 + $0x158] sm:$0xff] }
  0xac   : > { %810 = vmatprep.subr.bf16.mxu0 %v4246_v0 }
  0xaf   : > { %811 = vmatpush1.bf16.msra.mxu0 %v4018_v13  ;;  %v515_v13 = vpack.c.bf16 %v367_v10, %v365_v9  ;;  %v412_v9 = vld [vmem:[%s4475_s22 + $0x298] sm:$0xff] }
  0xb0   : > { %812 = vmatprep.subr.bf16.mxu0 %v4246_v0 }
  0xb3   : > { %813 = vmatpush1.bf16.msra.mxu0 %v4019_v14  ;;  %v518_v14 = vpack.c.bf16 %v372_v12, %v370_v11  ;;  %v409_v12 = vld [vmem:[%s4475_s22 + $0x280] sm:$0xff] }
  0xb4   : > { %814 = vmatprep.subr.bf16.mxu0 %v4246_v0 }
  0xb7   : > { %815 = vmatpush1.bf16.msra.mxu0 %v4020_v15  ;;  %v369_v15 = vld [vmem:[%s4475_s22 + $0x140] sm:$0xff] }
  0xb8   : > { %816 = vmatprep.subr.bf16.mxu0 %v4246_v0 }
  0xbb   : > { %817 = vmatpush1.bf16.msra.mxu0 %v4021_v16  ;;  %v371_v16 = vld [vmem:[%s4475_s22 + $0x150] sm:$0xff] }
  0xbc   : > { %818 = vmatprep.subr.bf16.mxu0 %v4246_v0  ;;  %v517_v19 = vpack.c.bf16 %v371_v16, %v369_v15  ;;  %v416_v15 = vld [vmem:[%s4475_s22 + $0x2b8] sm:$0xff] }
  0xbf   : > { %819 = vmatpush1.bf16.msra.mxu0 %v4022_v17  ;;  %v374_v17 = vld [vmem:[%s4475_s22 + $0x168] sm:$0xff] }
  0xc0   : > { %2556 = vmatprep.subr.bf16.mxu0 %v4246_v0  ;;  %v520_v20 = vpack.c.bf16 %v376_v18, %v374_v17  ;;  %v413_v18 = vld [vmem:[%s4475_s22 + $0x2a0] sm:$0xff] }
  0xc2   : > { %825 = vmatmul.mubr.bf16.vlgmr.msra.gmra.mrb[0].mxu0 %v497_v22  ;;  %v375_v22 = vld [vmem:[%s4475_s22 + $0x170] sm:$0xff] }
  0xc3   : > { %3547 = vmatprep.mubr.msk.bf16.mxu0 %vm665_vm0, %v500_v23  ;;  %v378_v23 = vld [vmem:[%s4475_s22 + $0x188] sm:$0xff]  ;;  %v519_v25 = vpack.c.bf16 %v375_v22, %v373_v21  ;;  %v420_v21 = vld [vmem:[%s4475_s22 + $0x2d8] sm:$0xff] }
  0xc4   : > { %v522_v26 = vpack.c.bf16 %v380_v24, %v378_v23  ;;  %v417_v24 = vld [vmem:[%s4475_s22 + $0x2c0] sm:$0xff] }
  0xca   : > { %833 = vmatmul.mubr.bf16.gmra.mrb[4].mxu0 %v499_v28  ;;  %v379_v28 = vld [vmem:[%s4475_s22 + $0x190] sm:$0xff] }
  0xcb   : > { %3548 = vmatprep.mubr.msk.bf16.mxu0 %vm665_vm0, %v502_v29  ;;  %v382_v29 = vld [vmem:[%s4475_s22 + $0x1a8] sm:$0xff]  ;;  %v521_v31 = vpack.c.bf16 %v379_v28, %v377_v27  ;;  %v424_v27 = vld [vmem:[%s4475_s22 + $0x2f8] sm:$0xff] }
  0xcc   : > { %v524_v32 = vpack.c.bf16 %v384_v30, %v382_v29  ;;  %v421_v30 = vld [vmem:[%s4475_s22 + $0x2e0] sm:$0xff] }
  0xd2   : > { %841 = vmatmul.mubr.bf16.gmra.mrb[8].mxu0 %v501_v34  ;;  %v383_v34 = vld [vmem:[%s4475_s22 + $0x1b0] sm:$0xff] }
  0xd3   : > { %3549 = vmatprep.mubr.msk.bf16.mxu0 %vm665_vm0, %v504_v35  ;;  %v386_v35 = vld [vmem:[%s4475_s22 + $0x1c8] sm:$0xff]  ;;  %v523_v37 = vpack.c.bf16 %v383_v34, %v381_v33  ;;  %v428_v33 = vld [vmem:[%s4475_s22 + $0x318] sm:$0xff] }
  0xd4   : > { %v526_v38 = vpack.c.bf16 %v388_v36, %v386_v35  ;;  %v425_v36 = vld [vmem:[%s4475_s22 + $0x300] sm:$0xff] }
  0xda   : > { %849 = vmatmul.mubr.bf16.gmra.mrb[12].mxu0 %v503_v40  ;;  %v387_v40 = vld [vmem:[%s4475_s22 + $0x1d0] sm:$0xff] }
  0xdb   : > { %3550 = vmatprep.mubr.msk.bf16.mxu0 %vm665_vm0, %v506_v41  ;;  %v390_v41 = vld [vmem:[%s4475_s22 + $0x1e8] sm:$0xff]  ;;  %v525_v43 = vpack.c.bf16 %v387_v40, %v385_v39  ;;  %v432_v39 = vld [vmem:[%s4475_s22 + $0x338] sm:$0xff] }
  0xdc   : > { %v528_v44 = vpack.c.bf16 %v392_v42, %v390_v41  ;;  %v429_v42 = vld [vmem:[%s4475_s22 + $0x320] sm:$0xff] }
  0xe2   : > { %857 = vmatmul.mubr.bf16.gmra.mrb[16].mxu0 %v505_v46  ;;  %v391_v46 = vld [vmem:[%s4475_s22 + $0x1f0] sm:$0xff] }
  0xe3   : > { %3551 = vmatprep.mubr.msk.bf16.mxu0 %vm665_vm0, %v508_v47  ;;  %v394_v47 = vld [vmem:[%s4475_s22 + $0x208] sm:$0xff]  ;;  %v527_v49 = vpack.c.bf16 %v391_v46, %v389_v45  ;;  %v436_v45 = vld [vmem:[%s4475_s22 + $0x358] sm:$0xff] }
  0xe4   : > { %v530_v50 = vpack.c.bf16 %v396_v48, %v394_v47  ;;  %v4644_v48 = vld [vmem:[#allocation6 + $0x4] ss:$8 sps:$4 sm:$0xff]  }
  0xe5   : > { %3602 = vmatprep.mubr.msk.bf16.mxu1 %vm665_vm0, %v4644_v48 }
  0xea   : > { %865 = vmatmul.mubr.bf16.gmra.mrb[20].mxu0 %v507_v52  ;;  %v395_v52 = vld [vmem:[%s4475_s22 + $0x210] sm:$0xff] }
  0xeb   : > { %3552 = vmatprep.mubr.msk.bf16.mxu0 %vm665_vm0, %v510_v53  ;;  %v398_v53 = vld [vmem:[%s4475_s22 + $0x228] sm:$0xff]  ;;  %v529_v55 = vpack.c.bf16 %v395_v52, %v393_v51  ;;  %v440_v52 = vld [vmem:[%s4475_s22 + $0x378] sm:$0xff] }
  0xec   : > { %v532_v56 = vpack.c.bf16 %v400_v54, %v398_v53  ;;  %v438_v51 = vld [vmem:[%s4475_s22 + $0x368] sm:$0xff] }
  0xed   : > { %v552_v54 = vpack.c.bf16 %v440_v52, %v438_v51  ;;  %v464_v51 = vld [vmem:[%s4475_s22 + $0x438] sm:$0xff] }
  0xf2   : > { %873 = vmatmul.mubr.bf16.gmra.mrb[24].mxu0 %v509_v58  ;;  %v399_v58 = vld [vmem:[%s4475_s22 + $0x230] sm:$0xff] }
  0xf3   : > { %3553 = vmatprep.mubr.msk.bf16.mxu0 %vm665_vm0, %v512_v59  ;;  %v402_v59 = vld [vmem:[%s4475_s22 + $0x248] sm:$0xff]  ;;  %v531_v61 = vpack.c.bf16 %v399_v58, %v397_v57  ;;  %v444_v58 = vld [vmem:[%s4475_s22 + $0x398] sm:$0xff] }
  0xf4   : > { %v534_v62 = vpack.c.bf16 %v404_v60, %v402_v59  ;;  %v442_v57 = vld [vmem:[%s4475_s22 + $0x388] sm:$0xff] }
  0xfa   : > { %881 = vmatmul.mubr.bf16.gmra.mrb[28].mxu0 %v511_v1  ;;  %v403_v1 = vld [vmem:[%s4475_s22 + $0x250] sm:$0xff] }
  0xfb   : > { %3554 = vmatprep.mubr.msk.bf16.mxu0 %vm665_vm0, %v514_v2  ;;  %v406_v2 = vld [vmem:[%s4475_s22 + $0x268] sm:$0xff]  ;;  %v533_v4 = vpack.c.bf16 %v403_v1, %v401_v63  ;;  %v554_v63 = vpack.c.bf16 %v444_v58, %v442_v57 }
  0xfc   : > { %v536_v5 = vpack.c.bf16 %v408_v3, %v406_v2  ;;  %v441_v3 = vld [vmem:[%s4475_s22 + $0x380] sm:$0xff] }
 0x102   : > { %889 = vmatmul.mubr.bf16.gmra.mrb[32].mxu0 %v513_v7  ;;  %v407_v7 = vld [vmem:[%s4475_s22 + $0x270] sm:$0xff] }
 0x103   : > { %3555 = vmatprep.mubr.msk.bf16.mxu0 %vm665_vm0, %v516_v8  ;;  %v410_v8 = vld [vmem:[%s4475_s22 + $0x288] sm:$0xff]  ;;  %v535_v10 = vpack.c.bf16 %v407_v7, %v405_v6  ;;  %v448_v6 = vld [vmem:[%s4475_s22 + $0x3b8] sm:$0xff] }
 0x104   : > { %v538_v11 = vpack.c.bf16 %v412_v9, %v410_v8 }
 0x10a   : > { %897 = vmatmul.mubr.bf16.gmra.mrb[36].mxu0 %v515_v13  ;;  %v411_v13 = vld [vmem:[%s4475_s22 + $0x290] sm:$0xff] }
 0x10b   : > { %3556 = vmatprep.mubr.msk.bf16.mxu0 %vm665_vm0, %v518_v14  ;;  %v414_v14 = vld [vmem:[%s4475_s22 + $0x2a8] sm:$0xff]  ;;  %v537_v16 = vpack.c.bf16 %v411_v13, %v409_v12 }
 0x10c   : > { %v540_v17 = vpack.c.bf16 %v416_v15, %v414_v14  ;;  %v445_v14 = vld [vmem:[%s4475_s22 + $0x3a0] sm:$0xff]  ;;  %v447_v15 = vld [vmem:[%s4475_s22 + $0x3b0] sm:$0xff] }
 0x112   : > { %905 = vmatmul.mubr.bf16.gmra.mrb[40].mxu0 %v517_v19  ;;  %v415_v19 = vld [vmem:[%s4475_s22 + $0x2b0] sm:$0xff] }
 0x113   : > { %3557 = vmatprep.mubr.msk.bf16.mxu0 %vm665_vm0, %v520_v20  ;;  %v418_v20 = vld [vmem:[%s4475_s22 + $0x2c8] sm:$0xff]  ;;  %v539_v22 = vpack.c.bf16 %v415_v19, %v413_v18 }
 0x114   : > { %v542_v23 = vpack.c.bf16 %v420_v21, %v418_v20  ;;  %v555_v20 = vpack.c.bf16 %v447_v15, %v445_v14 }
 0x11a   : > { %913 = vmatmul.mubr.bf16.gmra.mrb[44].mxu0 %v519_v25  ;;  %v419_v25 = vld [vmem:[%s4475_s22 + $0x2d0] sm:$0xff] }
 0x11b   : > { %3558 = vmatprep.mubr.msk.bf16.mxu0 %vm665_vm0, %v522_v26  ;;  %v422_v26 = vld [vmem:[%s4475_s22 + $0x2e8] sm:$0xff]  ;;  %v541_v28 = vpack.c.bf16 %v419_v25, %v417_v24  ;;  %v449_v25 = vld [vmem:[%s4475_s22 + $0x3c0] sm:$0xff] }
 0x11c   : > { %v544_v29 = vpack.c.bf16 %v424_v27, %v422_v26  ;;  %v451_v26 = vld [vmem:[%s4475_s22 + $0x3d0] sm:$0xff]  ;;  %v454_v27 = vld [vmem:[%s4475_s22 + $0x3e8] sm:$0xff] }
 0x122   : > { %921 = vmatmul.mubr.bf16.gmra.mrb[48].mxu0 %v521_v31  ;;  %v423_v31 = vld [vmem:[%s4475_s22 + $0x2f0] sm:$0xff] }
 0x123   : > { %3559 = vmatprep.mubr.msk.bf16.mxu0 %vm665_vm0, %v524_v32  ;;  %v426_v32 = vld [vmem:[%s4475_s22 + $0x308] sm:$0xff]  ;;  %v543_v34 = vpack.c.bf16 %v423_v31, %v421_v30  ;;  %v557_v31 = vpack.c.bf16 %v451_v26, %v449_v25 }
 0x124   : > { %v546_v35 = vpack.c.bf16 %v428_v33, %v426_v32 }
 0x12a   : > { %929 = vmatmul.mubr.bf16.gmra.mrb[52].mxu0 %v523_v37  ;;  %v427_v37 = vld [vmem:[%s4475_s22 + $0x310] sm:$0xff] }
 0x12b   : > { %3560 = vmatprep.mubr.msk.bf16.mxu0 %vm665_vm0, %v526_v38  ;;  %v430_v38 = vld [vmem:[%s4475_s22 + $0x328] sm:$0xff]  ;;  %v545_v40 = vpack.c.bf16 %v427_v37, %v425_v36  ;;  %v453_v36 = vld [vmem:[%s4475_s22 + $0x3e0] sm:$0xff]  ;;  %v455_v37 = vld [vmem:[%s4475_s22 + $0x3f0] sm:$0xff] }
 0x12c   : > { %v548_v41 = vpack.c.bf16 %v432_v39, %v430_v38  ;;  %v458_v38 = vld [vmem:[%s4475_s22 + $0x408] sm:$0xff]  ;;  %v460_v39 = vld [vmem:[%s4475_s22 + $0x418] sm:$0xff] }
 0x132   : > { %937 = vmatmul.mubr.bf16.gmra.mrb[56].mxu0 %v525_v43  ;;  %v431_v43 = vld [vmem:[%s4475_s22 + $0x330] sm:$0xff] }
 0x133   : > { %3561 = vmatprep.mubr.msk.bf16.mxu0 %vm665_vm0, %v528_v44  ;;  %v434_v44 = vld [vmem:[%s4475_s22 + $0x348] sm:$0xff]  ;;  %v547_v46 = vpack.c.bf16 %v431_v43, %v429_v42  ;;  %v559_v42 = vpack.c.bf16 %v455_v37, %v453_v36 }
 0x134   : > { %v550_v47 = vpack.c.bf16 %v436_v45, %v434_v44  ;;  %v562_v44 = vpack.c.bf16 %v460_v39, %v458_v38 }
 0x13a   : > { %945 = vmatmul.mubr.bf16.gmra.mrb[60].mxu0 %v527_v49  ;;  %v433_v49 = vld [vmem:[%s4475_s22 + $0x340] sm:$0xff] }
 0x13b   : > { %3562 = vmatprep.mubr.msk.bf16.mxu0 %vm665_vm0, %v530_v50  ;;  %v435_v50 = vld [vmem:[%s4475_s22 + $0x350] sm:$0xff] }
 0x13c   : > { %v549_v53 = vpack.c.bf16 %v435_v50, %v433_v49  ;;  %v459_v49 = vld [vmem:[%s4475_s22 + $0x410] sm:$0xff]  ;;  %v462_v50 = vld [vmem:[%s4475_s22 + $0x428] sm:$0xff] }
 0x142   : > { %953 = vmatmul.mubr.bf16.gmra.mrb[64].mxu0 %v529_v55  ;;  %v437_v55 = vld [vmem:[%s4475_s22 + $0x360] sm:$0xff] }
 0x143   : > { %3563 = vmatprep.mubr.msk.bf16.mxu0 %vm665_vm0, %v532_v56  ;;  %v439_v56 = vld [vmem:[%s4475_s22 + $0x370] sm:$0xff] }
 0x14a   : > { %961 = vmatmul.mubr.bf16.gmra.mrb[68].mxu0 %v531_v61  ;;  %v551_v61 = vpack.c.bf16 %v439_v56, %v437_v55  ;;  %v564_v56 = vpack.c.bf16 %v464_v51, %v462_v50 }
 0x14b   : > { %3564 = vmatprep.mubr.msk.bf16.mxu0 %vm665_vm0, %v534_v62 }
 0x152   : > { %969 = vmatmul.mubr.bf16.gmra.mrb[72].mxu0 %v533_v4  ;;  %v443_v4 = vld [vmem:[%s4475_s22 + $0x390] sm:$0xff] }
 0x153   : > { %3565 = vmatprep.mubr.msk.bf16.mxu0 %vm665_vm0, %v536_v5  ;;  %v446_v5 = vld [vmem:[%s4475_s22 + $0x3a8] sm:$0xff]  ;;  %v553_v9 = vpack.c.bf16 %v443_v4, %v441_v3 }
 0x15a   : > { %977 = vmatmul.mubr.bf16.gmra.mrb[76].mxu0 %v535_v10 }
 0x15b   : > { %3566 = vmatprep.mubr.msk.bf16.mxu0 %vm665_vm0, %v538_v11  ;;  %v556_v11 = vpack.c.bf16 %v448_v6, %v446_v5 }
 0x162   : > { %985 = vmatmul.mubr.bf16.gmra.mrb[80].mxu0 %v537_v16  ;;  %v450_v16 = vld [vmem:[%s4475_s22 + $0x3c8] sm:$0xff] }
 0x163   : > { %3567 = vmatprep.mubr.msk.bf16.mxu0 %vm665_vm0, %v540_v17  ;;  %v452_v17 = vld [vmem:[%s4475_s22 + $0x3d8] sm:$0xff] }
 0x16a   : > { %993 = vmatmul.mubr.bf16.gmra.mrb[84].mxu0 %v539_v22  ;;  %v558_v22 = vpack.c.bf16 %v452_v17, %v450_v16 }
 0x16b   : > { %3568 = vmatprep.mubr.msk.bf16.mxu0 %vm665_vm0, %v542_v23 }
 0x172   : > { %1001 = vmatmul.mubr.bf16.gmra.mrb[88].mxu0 %v541_v28  ;;  %v456_v28 = vld [vmem:[%s4475_s22 + $0x3f8] sm:$0xff] }
 0x173   : > { %3569 = vmatprep.mubr.msk.bf16.mxu0 %vm665_vm0, %v544_v29  ;;  %v560_v33 = vpack.c.bf16 %v456_v28, %v454_v27 }
 0x17a   : > { %1009 = vmatmul.mubr.bf16.gmra.mrb[92].mxu0 %v543_v34 }
 0x17b   : > { %3570 = vmatprep.mubr.msk.bf16.mxu0 %vm665_vm0, %v546_v35 }
 0x182   : > { %1017 = vmatmul.mubr.bf16.gmra.mrb[96].mxu0 %v545_v40 }
 0x183   : > { %3571 = vmatprep.mubr.msk.bf16.mxu0 %vm665_vm0, %v548_v41 }
 0x18a   : > { %1025 = vmatmul.mubr.bf16.gmra.mrb[100].mxu0 %v547_v46 }
 0x18b   : > { %3572 = vmatprep.mubr.msk.bf16.mxu0 %vm665_vm0, %v550_v47  ;;  %v457_v47 = vld [vmem:[%s4475_s22 + $0x400] sm:$0xff] }
 0x192   : > { %1033 = vmatmul.mubr.bf16.gmra.mrb[104].mxu0 %v549_v53 }
 0x193   : > { %3573 = vmatprep.mubr.msk.bf16.mxu0 %vm665_vm0, %v552_v54  ;;  %v561_v54 = vpack.c.bf16 %v459_v49, %v457_v47 }
 0x195   : > { %v826_v59 = vpop.f32.mrb[0].mxu0 }
 0x196   : > { %v828_v60 = vpop.f32.mrb[1].mxu0 }
 0x197   : > { %v829_v62 = vpop.f32.mrb[2].mxu0  ;;  %v463_v60 = vld [vmem:[%s4475_s22 + $0x430] sm:$0xff] }
 0x198   : > { %v1161_v1 = vpack.c.bf16 %v829_v62, %v826_v59  ;;  %v831_v2 = vpop.f32.mrb[3].mxu0  ;;  %v461_v59 = vld [vmem:[%s4475_s22 + $0x420] sm:$0xff]  ;;  %v468_v62 = vld [vmem:[%s4475_s22 + $0x458] sm:$0xff] }
 0x199   : > { %v563_v2 = vpack.c.bf16 %v463_v60, %v461_v59 }
 0x19a   : > { %1041 = vmatmul.mubr.bf16.gmra.mrb[108].mxu0 %v551_v61  ;;  %1288 = vmatpush1.bf16.msra.mxu1 %v1161_v1  ;;  %v466_v61 = vld [vmem:[%s4475_s22 + $0x448] sm:$0xff] }
 0x19b   : > { %3574 = vmatprep.mubr.msk.bf16.mxu0 %vm665_vm0, %v554_v63  ;;  %1289 = vmatprep.subr.bf16.mxu1 %v4246_v0  ;;  %v566_v4 = vpack.c.bf16 %v468_v62, %v466_v61 }
 0x19d   : > { %v834_v7 = vpop.f32.mrb[4].mxu0 }
 0x19e   : > { %v836_v8 = vpop.f32.mrb[5].mxu0 }
 0x19f   : > { %v837_v10 = vpop.f32.mrb[6].mxu0  ;;  %v467_v8 = vld [vmem:[%s4475_s22 + $0x450] sm:$0xff] }
 0x1a0   : > { %v1162_v12 = vpack.c.bf16 %v837_v10, %v834_v7  ;;  %v839_v13 = vpop.f32.mrb[7].mxu0  ;;  %v465_v7 = vld [vmem:[%s4475_s22 + $0x440] sm:$0xff]  ;;  %v472_v10 = vld [vmem:[%s4475_s22 + $0x478] sm:$0xff] }
 0x1a1   : > { %v565_v13 = vpack.c.bf16 %v467_v8, %v465_v7 }
 0x1a2   : > { %1049 = vmatmul.mubr.bf16.gmra.mrb[112].mxu0 %v553_v9  ;;  %1290 = vmatpush1.bf16.msra.mxu1 %v1162_v12  ;;  %v470_v9 = vld [vmem:[%s4475_s22 + $0x468] sm:$0xff] }
 0x1a3   : > { %3575 = vmatprep.mubr.msk.bf16.mxu0 %vm665_vm0, %v556_v11  ;;  %1291 = vmatprep.subr.bf16.mxu1 %v4246_v0  ;;  %v568_v15 = vpack.c.bf16 %v472_v10, %v470_v9 }
 0x1a5   : > { %v842_v18 = vpop.f32.mrb[8].mxu0 }
 0x1a6   : > { %v844_v19 = vpop.f32.mrb[9].mxu0 }
 0x1a7   : > { %v845_v21 = vpop.f32.mrb[10].mxu0  ;;  %v471_v19 = vld [vmem:[%s4475_s22 + $0x470] sm:$0xff] }
 0x1a8   : > { %v1163_v23 = vpack.c.bf16 %v845_v21, %v842_v18  ;;  %v847_v24 = vpop.f32.mrb[11].mxu0  ;;  %v469_v18 = vld [vmem:[%s4475_s22 + $0x460] sm:$0xff]  ;;  %v476_v21 = vld [vmem:[%s4475_s22 + $0x498] sm:$0xff] }
 0x1a9   : > { %v567_v24 = vpack.c.bf16 %v471_v19, %v469_v18 }
 0x1aa   : > { %1057 = vmatmul.mubr.bf16.gmra.mrb[116].mxu0 %v555_v20  ;;  %1292 = vmatpush1.bf16.msra.mxu1 %v1163_v23  ;;  %v474_v20 = vld [vmem:[%s4475_s22 + $0x488] sm:$0xff] }
 0x1ab   : > { %3576 = vmatprep.mubr.msk.bf16.mxu0 %vm665_vm0, %v558_v22  ;;  %1293 = vmatprep.subr.bf16.mxu1 %v4246_v0  ;;  %v570_v26 = vpack.c.bf16 %v476_v21, %v474_v20 }
 0x1ad   : > { %v850_v29 = vpop.f32.mrb[12].mxu0 }
 0x1ae   : > { %v852_v30 = vpop.f32.mrb[13].mxu0 }
 0x1af   : > { %v853_v32 = vpop.f32.mrb[14].mxu0  ;;  %v475_v30 = vld [vmem:[%s4475_s22 + $0x490] sm:$0xff] }
 0x1b0   : > { %v1164_v34 = vpack.c.bf16 %v853_v32, %v850_v29  ;;  %v855_v35 = vpop.f32.mrb[15].mxu0  ;;  %v473_v29 = vld [vmem:[%s4475_s22 + $0x480] sm:$0xff]  ;;  %v480_v32 = vld [vmem:[%s4475_s22 + $0x4b8] sm:$0xff] }
 0x1b1   : > { %v569_v35 = vpack.c.bf16 %v475_v30, %v473_v29 }
 0x1b2   : > { %1065 = vmatmul.mubr.bf16.gmra.mrb[120].mxu0 %v557_v31  ;;  %1294 = vmatpush1.bf16.msra.mxu1 %v1164_v34  ;;  %v478_v31 = vld [vmem:[%s4475_s22 + $0x4a8] sm:$0xff] }
 0x1b3   : > { %3577 = vmatprep.mubr.msk.bf16.mxu0 %vm665_vm0, %v560_v33  ;;  %1295 = vmatprep.subr.bf16.mxu1 %v4246_v0  ;;  %v572_v37 = vpack.c.bf16 %v480_v32, %v478_v31  ;;  %v4747_v32 = vld [vmem:[#allocation6 + $0x10] ss:$8 sps:$4 sm:$0xff]  }
 0x1b5   : > { %v858_v40 = vpop.f32.mrb[16].mxu0 }
 0x1b6   : > { %v860_v41 = vpop.f32.mrb[17].mxu0 }
 0x1b7   : > { %v861_v43 = vpop.f32.mrb[18].mxu0  ;;  %v479_v41 = vld [vmem:[%s4475_s22 + $0x4b0] sm:$0xff] }
 0x1b8   : > { %v1165_v45 = vpack.c.bf16 %v861_v43, %v858_v40  ;;  %v863_v46 = vpop.f32.mrb[19].mxu0  ;;  %v477_v40 = vld [vmem:[%s4475_s22 + $0x4a0] sm:$0xff]  ;;  %v484_v43 = vld [vmem:[%s4475_s22 + $0x4d8] sm:$0xff] }
 0x1b9   : > { %v571_v46 = vpack.c.bf16 %v479_v41, %v477_v40  ;;  %v4759_v40 = vld [vmem:[#allocation6 + $0x34] ss:$8 sps:$4 sm:$0xff]  }
 0x1ba   : > { %1073 = vmatmul.mubr.bf16.gmra.mrb[124].mxu0 %v559_v42  ;;  %1296 = vmatpush1.bf16.msra.mxu1 %v1165_v45  ;;  %v482_v42 = vld [vmem:[%s4475_s22 + $0x4c8] sm:$0xff] }
 0x1bb   : > { %3578 = vmatprep.mubr.msk.bf16.mxu0 %vm665_vm0, %v562_v44  ;;  %1297 = vmatprep.subr.bf16.mxu1 %v4246_v0  ;;  %v574_v49 = vpack.c.bf16 %v484_v43, %v482_v42 }
 0x1bd   : > { %v866_v52 = vpop.f32.mrb[20].mxu0 }
 0x1be   : > { %v868_v53 = vpop.f32.mrb[21].mxu0 }
 0x1bf   : > { %v869_v55 = vpop.f32.mrb[22].mxu0  ;;  %v483_v53 = vld [vmem:[%s4475_s22 + $0x4d0] sm:$0xff] }
 0x1c0   : > { %v1166_v57 = vpack.c.bf16 %v869_v55, %v866_v52  ;;  %v871_v58 = vpop.f32.mrb[23].mxu0  ;;  %v481_v52 = vld [vmem:[%s4475_s22 + $0x4c0] sm:$0xff]  ;;  %v488_v55 = vld [vmem:[%s4475_s22 + $0x4f8] sm:$0xff] }
 0x1c1   : > { %v573_v58 = vpack.c.bf16 %v483_v53, %v481_v52 }
 0x1c2   : > { %1081 = vmatmul.mubr.bf16.gmra.mrb[128].mxu0 %v561_v54  ;;  %1298 = vmatpush1.bf16.msra.mxu1 %v1166_v57  ;;  %v486_v54 = vld [vmem:[%s4475_s22 + $0x4e8] sm:$0xff] }
 0x1c3   : > { %3579 = vmatprep.mubr.msk.bf16.mxu0 %vm665_vm0, %v564_v56  ;;  %1299 = vmatprep.subr.bf16.mxu1 %v4246_v0  ;;  %v576_v60 = vpack.c.bf16 %v488_v55, %v486_v54  ;;  %v4773_v54 = vld [vmem:[#allocation6 + $0x40] ss:$8 sps:$4 sm:$0xff]   ;;  %v4775_v55 = vld [vmem:[#allocation6 + $0x54] ss:$8 sps:$4 sm:$0xff]  }
 0x1c5   : > { %v874_v63 = vpop.f32.mrb[24].mxu0 }
 0x1c6   : > { %v876_v1 = vpop.f32.mrb[25].mxu0 }
 0x1c7   : > { %v877_v3 = vpop.f32.mrb[26].mxu0  ;;  %v487_v1 = vld [vmem:[%s4475_s22 + $0x4f0] sm:$0xff] }
 0x1c8   : > { %v1167_v5 = vpack.c.bf16 %v877_v3, %v874_v63  ;;  %v879_v6 = vpop.f32.mrb[27].mxu0  ;;  %v485_v63 = vld [vmem:[%s4475_s22 + $0x4e0] sm:$0xff]  ;;  %v492_v3 = vld [vmem:[%s4475_s22 + $0x518] sm:$0xff] }
 0x1c9   : > { %v575_v6 = vpack.c.bf16 %v487_v1, %v485_v63 }
 0x1ca   : > { %1089 = vmatmul.mubr.bf16.gmra.mrb[132].mxu0 %v563_v2  ;;  %1300 = vmatpush1.bf16.msra.mxu1 %v1167_v5  ;;  %v490_v2 = vld [vmem:[%s4475_s22 + $0x508] sm:$0xff] }
 0x1cb   : > { %3580 = vmatprep.mubr.msk.bf16.mxu0 %vm665_vm0, %v566_v4  ;;  %1301 = vmatprep.subr.bf16.mxu1 %v4246_v0  ;;  %v578_v8 = vpack.c.bf16 %v492_v3, %v490_v2 }
 0x1cd   : > { %v882_v11 = vpop.f32.mrb[28].mxu0 }
 0x1ce   : > { %v884_v12 = vpop.f32.mrb[29].mxu0 }
 0x1cf   : > { %v885_v14 = vpop.f32.mrb[30].mxu0  ;;  %v491_v12 = vld [vmem:[%s4475_s22 + $0x510] sm:$0xff] }
 0x1d0   : > { %v1168_v16 = vpack.c.bf16 %v885_v14, %v882_v11  ;;  %v887_v17 = vpop.f32.mrb[31].mxu0  ;;  %v489_v11 = vld [vmem:[%s4475_s22 + $0x500] sm:$0xff]  ;;  %v496_v14 = vld [vmem:[%s4475_s22 + $0x538] sm:$0xff] }
 0x1d1   : > { %v577_v17 = vpack.c.bf16 %v491_v12, %v489_v11 }
 0x1d2   : > { %1097 = vmatmul.mubr.bf16.gmra.mrb[136].mxu0 %v565_v13  ;;  %1302 = vmatpush1.bf16.msra.mxu1 %v1168_v16  ;;  %v494_v13 = vld [vmem:[%s4475_s22 + $0x528] sm:$0xff] }
 0x1d3   : > { %3581 = vmatprep.mubr.msk.bf16.mxu0 %vm665_vm0, %v568_v15  ;;  %1303 = vmatprep.subr.bf16.mxu1 %v4246_v0  ;;  %v580_v19 = vpack.c.bf16 %v496_v14, %v494_v13 }
 0x1d5   : > { %v890_v22 = vpop.f32.mrb[32].mxu0 }
 0x1d6   : > { %v892_v23 = vpop.f32.mrb[33].mxu0 }
 0x1d7   : > { %v893_v25 = vpop.f32.mrb[34].mxu0  ;;  %v4738_v23 = vld [vmem:[#allocation6 + $0x14] ss:$8 sps:$4 sm:$0xff]  }
 0x1d8   : > { %v1169_v27 = vpack.c.bf16 %v893_v25, %v890_v22  ;;  %v895_v28 = vpop.f32.mrb[35].mxu0  ;;  %v4736_v22 = vld [vmem:[#allocation6] ss:$8 sps:$4 sm:$0xff]   ;;  %v495_v25 = vld [vmem:[%s4475_s22 + $0x530] sm:$0xff] }
 0x1da   : > { %1105 = vmatmul.mubr.bf16.gmra.mrb[140].mxu0 %v567_v24  ;;  %1304 = vmatpush1.bf16.msra.mxu1 %v1169_v27  ;;  %v493_v24 = vld [vmem:[%s4475_s22 + $0x520] sm:$0xff] }
 0x1db   : > { %3582 = vmatprep.mubr.msk.bf16.mxu0 %vm665_vm0, %v570_v26  ;;  %1305 = vmatprep.subr.bf16.mxu1 %v4246_v0  ;;  %v579_v28 = vpack.c.bf16 %v495_v25, %v493_v24 }
 0x1dd   : > { %v898_v33 = vpop.f32.mrb[36].mxu0 }
 0x1de   : > { %v900_v34 = vpop.f32.mrb[37].mxu0 }
 0x1df   : > { %v901_v36 = vpop.f32.mrb[38].mxu0 }
 0x1e0   : > { %v1170_v38 = vpack.c.bf16 %v901_v36, %v898_v33  ;;  %v903_v39 = vpop.f32.mrb[39].mxu0  ;;  %v4749_v33 = vld [vmem:[#allocation6 + $0x24] ss:$8 sps:$4 sm:$0xff]  }
 0x1e1   : > { %v4757_v39 = vld [vmem:[#allocation6 + $0x20] ss:$8 sps:$4 sm:$0xff]  }
 0x1e2   : > { %1113 = vmatmul.mubr.bf16.gmra.mrb[144].mxu0 %v569_v35  ;;  %1306 = vmatpush1.bf16.msra.mxu1 %v1170_v38 }
 0x1e3   : > { %3583 = vmatprep.mubr.msk.bf16.mxu0 %vm665_vm0, %v572_v37  ;;  %1307 = vmatprep.subr.bf16.mxu1 %v4246_v0 }
 0x1e5   : > { %v906_v44 = vpop.f32.mrb[40].mxu0 }
 0x1e6   : > { %v908_v45 = vpop.f32.mrb[41].mxu0 }
 0x1e7   : > { %v909_v47 = vpop.f32.mrb[42].mxu0 }
 0x1e8   : > { %v1171_v50 = vpack.c.bf16 %v909_v47, %v906_v44  ;;  %v911_v51 = vpop.f32.mrb[43].mxu0  ;;  %v4767_v47 = vld [vmem:[#allocation6 + $0x44] ss:$8 sps:$4 sm:$0xff]  }
 0x1ea   : > { %1121 = vmatmul.mubr.bf16.gmra.mrb[148].mxu0 %v571_v46  ;;  %1308 = vmatpush1.bf16.msra.mxu1 %v1171_v50  ;;  %v4765_v46 = vld [vmem:[#allocation6 + $0x30] ss:$8 sps:$4 sm:$0xff]  }
 0x1eb   : > { %3584 = vmatprep.mubr.msk.bf16.mxu0 %vm665_vm0, %v574_v49  ;;  %1309 = vmatprep.subr.bf16.mxu1 %v4246_v0 }
 0x1ed   : > { %v914_v56 = vpop.f32.mrb[44].mxu0 }
 0x1ee   : > { %v916_v57 = vpop.f32.mrb[45].mxu0 }
 0x1ef   : > { %v917_v59 = vpop.f32.mrb[46].mxu0 }
 0x1f0   : > { %v1172_v61 = vpack.c.bf16 %v917_v59, %v914_v56  ;;  %v919_v62 = vpop.f32.mrb[47].mxu0 }
 0x1f1   : > { %v4783_v62 = vld [vmem:[#allocation6 + $0x64] ss:$8 sps:$4 sm:$0xff]  }
 0x1f2   : > { %1129 = vmatmul.mubr.bf16.gmra.mrb[152].mxu0 %v573_v58  ;;  %1310 = vmatpush1.bf16.msra.mxu1 %v1172_v61  ;;  %v4781_v61 = vld [vmem:[#allocation6 + $0x50] ss:$8 sps:$4 sm:$0xff]  }
 0x1f3   : > { %3585 = vmatprep.mubr.msk.bf16.mxu0 %vm665_vm0, %v576_v60  ;;  %1311 = vmatprep.subr.bf16.mxu1 %v4246_v0 }
 0x1f5   : > { %v922_v4 = vpop.f32.mrb[48].mxu0 }
 0x1f6   : > { %v924_v5 = vpop.f32.mrb[49].mxu0 }
 0x1f7   : > { %v925_v7 = vpop.f32.mrb[50].mxu0  ;;  %v4789_v5 = vld [vmem:[#allocation6 + $0x60] ss:$8 sps:$4 sm:$0xff]  }
 0x1f8   : > { %v1173_v9 = vpack.c.bf16 %v925_v7, %v922_v4  ;;  %v927_v10 = vpop.f32.mrb[51].mxu0 }
 0x1fa   : > { %1137 = vmatmul.mubr.bf16.gmra.mrb[156].mxu0 %v575_v6  ;;  %1312 = vmatpush1.bf16.msra.mxu1 %v1173_v9 }
 0x1fb   : > { %3586 = vmatprep.mubr.msk.bf16.mxu0 %vm665_vm0, %v578_v8  ;;  %1313 = vmatprep.subr.bf16.mxu1 %v4246_v0 }
 0x1fd   : > { %v930_v15 = vpop.f32.mrb[52].mxu0 }
 0x1fe   : > { %v932_v16 = vpop.f32.mrb[53].mxu0 }
 0x1ff   : > { %v933_v18 = vpop.f32.mrb[54].mxu0 }
 0x200   : > { %v1174_v20 = vpack.c.bf16 %v933_v18, %v930_v15  ;;  %v935_v21 = vpop.f32.mrb[55].mxu0 }
 0x202   : > { %1145 = vmatmul.mubr.bf16.gmra.mrb[160].mxu0 %v577_v17  ;;  %1314 = vmatpush1.bf16.msra.mxu1 %v1174_v20 }
 0x203   : > { %3587 = vmatprep.mubr.msk.bf16.mxu0 %vm665_vm0, %v580_v19  ;;  %1447 = vmatprep.subr.bf16.mxu1 %v4246_v0 }
 0x205   : > { %v938_v26 = vpop.f32.mrb[56].mxu0  ;;  %1320 = vmatmul.mubr.bf16.vlgmr.msra.gmra.mrb[0].mxu1 %v4736_v22 }
 0x206   : > { %v940_v27 = vpop.f32.mrb[57].mxu0  ;;  %3603 = vmatprep.mubr.msk.bf16.mxu1 %vm665_vm0, %v4738_v23 }
 0x207   : > { %v941_v29 = vpop.f32.mrb[58].mxu0 }
 0x208   : > { %v1175_v30 = vpack.c.bf16 %v941_v29, %v938_v26  ;;  %v943_v31 = vpop.f32.mrb[59].mxu0 }
 0x20a   : > { %1153 = vmatmul.mubr.bf16.gmra.mrb[164].mxu0 %v579_v28  ;;  %1448 = vmatpush1.bf16.msra.mxu1 %v1175_v30 }
 0x20b   : > { %1449 = vmatprep.subr.bf16.mxu1 %v4246_v0  ;;  %3735 = vmatprep.mubr.msk.bf16.mxu0 %vm665_vm0, %v4644_v48 }
 0x20d   : > { %v946_v34 = vpop.f32.mrb[60].mxu0  ;;  %1328 = vmatmul.mubr.bf16.gmra.mrb[4].mxu1 %v4747_v32 }
 0x20e   : > { %v948_v35 = vpop.f32.mrb[61].mxu0  ;;  %3604 = vmatprep.mubr.msk.bf16.mxu1 %vm665_vm0, %v4749_v33 }
 0x20f   : > { %v949_v36 = vpop.f32.mrb[62].mxu0 }
 0x210   : > { %v1176_v37 = vpack.c.bf16 %v949_v36, %v946_v34  ;;  %v951_v38 = vpop.f32.mrb[63].mxu0 }
 0x212   : > { %1450 = vmatpush1.bf16.msra.mxu1 %v1176_v37 }
 0x213   : > { %1451 = vmatprep.subr.bf16.mxu1 %v4246_v0 }
 0x215   : > { %v954_v41 = vpop.f32.mrb[64].mxu0  ;;  %1336 = vmatmul.mubr.bf16.gmra.mrb[8].mxu1 %v4757_v39 }
 0x216   : > { %v956_v42 = vpop.f32.mrb[65].mxu0  ;;  %3605 = vmatprep.mubr.msk.bf16.mxu1 %vm665_vm0, %v4759_v40 }
 0x217   : > { %v957_v43 = vpop.f32.mrb[66].mxu0 }
 0x218   : > { %v1177_v44 = vpack.c.bf16 %v957_v43, %v954_v41  ;;  %v959_v45 = vpop.f32.mrb[67].mxu0 }
 0x21a   : > { %1452 = vmatpush1.bf16.msra.mxu1 %v1177_v44 }
 0x21b   : > { %1453 = vmatprep.subr.bf16.mxu1 %v4246_v0 }
 0x21d   : > { %v962_v49 = vpop.f32.mrb[68].mxu0  ;;  %1344 = vmatmul.mubr.bf16.gmra.mrb[12].mxu1 %v4765_v46 }
 0x21e   : > { %v964_v50 = vpop.f32.mrb[69].mxu0  ;;  %3606 = vmatprep.mubr.msk.bf16.mxu1 %vm665_vm0, %v4767_v47 }
 0x21f   : > { %v965_v51 = vpop.f32.mrb[70].mxu0 }
 0x220   : > { %v1178_v52 = vpack.c.bf16 %v965_v51, %v962_v49  ;;  %v967_v53 = vpop.f32.mrb[71].mxu0 }
 0x222   : > { %1454 = vmatpush1.bf16.msra.mxu1 %v1178_v52 }
 0x223   : > { %1455 = vmatprep.subr.bf16.mxu1 %v4246_v0 }
 0x225   : > { %v970_v56 = vpop.f32.mrb[72].mxu0  ;;  %1352 = vmatmul.mubr.bf16.gmra.mrb[16].mxu1 %v4773_v54 }
 0x226   : > { %v972_v57 = vpop.f32.mrb[73].mxu0  ;;  %3607 = vmatprep.mubr.msk.bf16.mxu1 %vm665_vm0, %v4775_v55 }
 0x227   : > { %v973_v58 = vpop.f32.mrb[74].mxu0 }
 0x228   : > { %v1179_v59 = vpack.c.bf16 %v973_v58, %v970_v56  ;;  %v975_v60 = vpop.f32.mrb[75].mxu0 }
 0x22a   : > { %1456 = vmatpush1.bf16.msra.mxu1 %v1179_v59 }
 0x22b   : > { %1457 = vmatprep.subr.bf16.mxu1 %v4246_v0 }
 0x22d   : > { %v978_v63 = vpop.f32.mrb[76].mxu0  ;;  %1360 = vmatmul.mubr.bf16.gmra.mrb[20].mxu1 %v4781_v61 }
 0x22e   : > { %v980_v1 = vpop.f32.mrb[77].mxu0  ;;  %3608 = vmatprep.mubr.msk.bf16.mxu1 %vm665_vm0, %v4783_v62 }
 0x22f   : > { %v981_v2 = vpop.f32.mrb[78].mxu0 }
 0x230   : > { %v1180_v3 = vpack.c.bf16 %v981_v2, %v978_v63  ;;  %v983_v4 = vpop.f32.mrb[79].mxu0 }
 0x232   : > { %1458 = vmatpush1.bf16.msra.mxu1 %v1180_v3 }
 0x233   : > { %1459 = vmatprep.subr.bf16.mxu1 %v4246_v0 }
 0x235   : > { %v986_v6 = vpop.f32.mrb[80].mxu0  ;;  %1368 = vmatmul.mubr.bf16.gmra.mrb[24].mxu1 %v4789_v5 }
 0x236   : > { %v988_v7 = vpop.f32.mrb[81].mxu0  ;;  %3623 = vmatprep.mubr.msk.bf16.mxu1 %vm665_vm0, %v4644_v48 }
 0x237   : > { %v989_v8 = vpop.f32.mrb[82].mxu0 }
 0x238   : > { %v1181_v9 = vpack.c.bf16 %v989_v8, %v986_v6  ;;  %v991_v10 = vpop.f32.mrb[83].mxu0 }
 0x23a   : > { %1460 = vmatpush1.bf16.msra.mxu1 %v1181_v9 }
 0x23b   : > { %1461 = vmatprep.subr.bf16.mxu1 %v4246_v0 }
 0x23d   : > { %v994_v11 = vpop.f32.mrb[84].mxu0 }
 0x23e   : > { %v996_v12 = vpop.f32.mrb[85].mxu0 }
 0x23f   : > { %v997_v13 = vpop.f32.mrb[86].mxu0 }
 0x240   : > { %v1182_v14 = vpack.c.bf16 %v997_v13, %v994_v11  ;;  %v999_v15 = vpop.f32.mrb[87].mxu0 }
 0x242   : > { %1462 = vmatpush1.bf16.msra.mxu1 %v1182_v14 }
 0x243   : > { %1463 = vmatprep.subr.bf16.mxu1 %v4246_v0 }
 0x245   : > { %v1002_v16 = vpop.f32.mrb[88].mxu0 }
 0x246   : > { %v1004_v17 = vpop.f32.mrb[89].mxu0 }
 0x247   : > { %v1005_v18 = vpop.f32.mrb[90].mxu0 }
 0x248   : > { %v1183_v19 = vpack.c.bf16 %v1005_v18, %v1002_v16  ;;  %v1007_v20 = vpop.f32.mrb[91].mxu0 }
 0x24a   : > { %1464 = vmatpush1.bf16.msra.mxu1 %v1183_v19 }
 0x24b   : > { %1465 = vmatprep.subr.bf16.mxu1 %v4246_v0 }
 0x24d   : > { %v1010_v21 = vpop.f32.mrb[92].mxu0 }
 0x24e   : > { %v1012_v24 = vpop.f32.mrb[93].mxu0 }
 0x24f   : > { %v1013_v25 = vpop.f32.mrb[94].mxu0 }
 0x250   : > { %v1184_v26 = vpack.c.bf16 %v1013_v25, %v1010_v21  ;;  %v1015_v27 = vpop.f32.mrb[95].mxu0 }
 0x252   : > { %1466 = vmatpush1.bf16.msra.mxu1 %v1184_v26 }
 0x253   : > { %1467 = vmatprep.subr.bf16.mxu1 %v4246_v0 }
 0x255   : > { %v1018_v28 = vpop.f32.mrb[96].mxu0 }
 0x256   : > { %v1020_v29 = vpop.f32.mrb[97].mxu0 }
 0x257   : > { %v1021_v30 = vpop.f32.mrb[98].mxu0 }
 0x258   : > { %v1185_v31 = vpack.c.bf16 %v1021_v30, %v1018_v28  ;;  %v1023_v34 = vpop.f32.mrb[99].mxu0 }
 0x25a   : > { %1468 = vmatpush1.bf16.msra.mxu1 %v1185_v31 }
 0x25b   : > { %1469 = vmatprep.subr.bf16.mxu1 %v4246_v0 }
 0x25d   : > { %v1026_v35 = vpop.f32.mrb[100].mxu0 }
 0x25e   : > { %v1028_v36 = vpop.f32.mrb[101].mxu0 }
 0x25f   : > { %v1029_v37 = vpop.f32.mrb[102].mxu0 }
 0x260   : > { %v1186_v38 = vpack.c.bf16 %v1029_v37, %v1026_v35  ;;  %v1031_v41 = vpop.f32.mrb[103].mxu0 }
 0x262   : > { %1470 = vmatpush1.bf16.msra.mxu1 %v1186_v38 }
 0x263   : > { %1471 = vmatprep.subr.bf16.mxu1 %v4246_v0 }
 0x265   : > { %v1034_v42 = vpop.f32.mrb[104].mxu0 }
 0x266   : > { %v1036_v43 = vpop.f32.mrb[105].mxu0 }
 0x267   : > { %v1037_v44 = vpop.f32.mrb[106].mxu0 }
 0x268   : > { %v1187_v45 = vpack.c.bf16 %v1037_v44, %v1034_v42  ;;  %v1039_v49 = vpop.f32.mrb[107].mxu0 }
 0x26a   : > { %1472 = vmatpush1.bf16.msra.mxu1 %v1187_v45 }
 0x26b   : > { %1473 = vmatprep.subr.bf16.mxu1 %v4246_v0 }
 0x26d   : > { %v1042_v50 = vpop.f32.mrb[108].mxu0 }
 0x26e   : > { %v1044_v51 = vpop.f32.mrb[109].mxu0 }
 0x26f   : > { %v1045_v52 = vpop.f32.mrb[110].mxu0 }
 0x270   : > { %v1188_v53 = vpack.c.bf16 %v1045_v52, %v1042_v50  ;;  %v1047_v56 = vpop.f32.mrb[111].mxu0 }
 0x272   : > { %1474 = vmatpush1.bf16.msra.mxu1 %v1188_v53 }
 0x273   : > { %1607 = vmatprep.subr.bf16.mxu1 %v4246_v0 }
 0x275   : > { %v1050_v57 = vpop.f32.mrb[112].mxu0  ;;  %1480 = vmatmul.mubr.bf16.vlgmr.msra.gmra.mrb[28].mxu1 %v4736_v22 }
 0x276   : > { %v1052_v58 = vpop.f32.mrb[113].mxu0  ;;  %3624 = vmatprep.mubr.msk.bf16.mxu1 %vm665_vm0, %v4738_v23 }
 0x277   : > { %v1053_v59 = vpop.f32.mrb[114].mxu0 }
 0x278   : > { %v1189_v60 = vpack.c.bf16 %v1053_v59, %v1050_v57  ;;  %v1055_v63 = vpop.f32.mrb[115].mxu0 }
 0x27a   : > { %1608 = vmatpush1.bf16.msra.mxu1 %v1189_v60 }
 0x27b   : > { %1609 = vmatprep.subr.bf16.mxu1 %v4246_v0 }
 0x27d   : > { %v1058_v1 = vpop.f32.mrb[116].mxu0  ;;  %1488 = vmatmul.mubr.bf16.gmra.mrb[32].mxu1 %v4747_v32 }
 0x27e   : > { %v1060_v2 = vpop.f32.mrb[117].mxu0  ;;  %3625 = vmatprep.mubr.msk.bf16.mxu1 %vm665_vm0, %v4749_v33 }
 0x27f   : > { %v1061_v3 = vpop.f32.mrb[118].mxu0 }
 0x280   : > { %v1190_v4 = vpack.c.bf16 %v1061_v3, %v1058_v1  ;;  %v1063_v6 = vpop.f32.mrb[119].mxu0 }
 0x282   : > { %1610 = vmatpush1.bf16.msra.mxu1 %v1190_v4 }
 0x283   : > { %1611 = vmatprep.subr.bf16.mxu1 %v4246_v0 }
 0x285   : > { %v1066_v7 = vpop.f32.mrb[120].mxu0  ;;  %1496 = vmatmul.mubr.bf16.gmra.mrb[36].mxu1 %v4757_v39 }
 0x286   : > { %v1068_v8 = vpop.f32.mrb[121].mxu0  ;;  %3626 = vmatprep.mubr.msk.bf16.mxu1 %vm665_vm0, %v4759_v40 }
 0x287   : > { %v1069_v9 = vpop.f32.mrb[122].mxu0 }
 0x288   : > { %v1191_v10 = vpack.c.bf16 %v1069_v9, %v1066_v7  ;;  %v1071_v11 = vpop.f32.mrb[123].mxu0 }
 0x28a   : > { %1612 = vmatpush1.bf16.msra.mxu1 %v1191_v10 }
 0x28b   : > { %1613 = vmatprep.subr.bf16.mxu1 %v4246_v0 }
 0x28d   : > { %v1074_v12 = vpop.f32.mrb[124].mxu0  ;;  %1504 = vmatmul.mubr.bf16.gmra.mrb[40].mxu1 %v4765_v46 }
 0x28e   : > { %v1076_v13 = vpop.f32.mrb[125].mxu0  ;;  %3627 = vmatprep.mubr.msk.bf16.mxu1 %vm665_vm0, %v4767_v47 }
 0x28f   : > { %v1077_v14 = vpop.f32.mrb[126].mxu0 }
 0x290   : > { %v1192_v15 = vpack.c.bf16 %v1077_v14, %v1074_v12  ;;  %v1079_v16 = vpop.f32.mrb[127].mxu0 }
 0x292   : > { %1614 = vmatpush1.bf16.msra.mxu1 %v1192_v15 }
 0x293   : > { %1615 = vmatprep.subr.bf16.mxu1 %v4246_v0 }
 0x295   : > { %v1082_v17 = vpop.f32.mrb[128].mxu0  ;;  %1512 = vmatmul.mubr.bf16.gmra.mrb[44].mxu1 %v4773_v54 }
 0x296   : > { %v1084_v18 = vpop.f32.mrb[129].mxu0  ;;  %3628 = vmatprep.mubr.msk.bf16.mxu1 %vm665_vm0, %v4775_v55 }
 0x297   : > { %v1085_v19 = vpop.f32.mrb[130].mxu0 }
 0x298   : > { %v1193_v20 = vpack.c.bf16 %v1085_v19, %v1082_v17  ;;  %v1087_v21 = vpop.f32.mrb[131].mxu0 }
 0x29a   : > { %1616 = vmatpush1.bf16.msra.mxu1 %v1193_v20 }
 0x29b   : > { %1617 = vmatprep.subr.bf16.mxu1 %v4246_v0 }
 0x29d   : > { %v1090_v24 = vpop.f32.mrb[132].mxu0  ;;  %1520 = vmatmul.mubr.bf16.gmra.mrb[48].mxu1 %v4781_v61 }
 0x29e   : > { %v1092_v25 = vpop.f32.mrb[133].mxu0  ;;  %3629 = vmatprep.mubr.msk.bf16.mxu1 %vm665_vm0, %v4783_v62 }
 0x29f   : > { %v1093_v26 = vpop.f32.mrb[134].mxu0 }
 0x2a0   : > { %v1194_v27 = vpack.c.bf16 %v1093_v26, %v1090_v24  ;;  %v1095_v28 = vpop.f32.mrb[135].mxu0 }
 0x2a2   : > { %1618 = vmatpush1.bf16.msra.mxu1 %v1194_v27 }
 0x2a3   : > { %1619 = vmatprep.subr.bf16.mxu1 %v4246_v0 }
 0x2a5   : > { %v1098_v29 = vpop.f32.mrb[136].mxu0  ;;  %1528 = vmatmul.mubr.bf16.gmra.mrb[52].mxu1 %v4789_v5 }
 0x2a6   : > { %v1100_v30 = vpop.f32.mrb[137].mxu0  ;;  %3658 = vmatprep.mubr.msk.bf16.mxu1 %vm665_vm0, %v4644_v48 }
 0x2a7   : > { %v1101_v31 = vpop.f32.mrb[138].mxu0 }
 0x2a8   : > { %v1195_v34 = vpack.c.bf16 %v1101_v31, %v1098_v29  ;;  %v1103_v35 = vpop.f32.mrb[139].mxu0  ;;  %v4044_v31 = vld [vmem:[#allocation7] sm:$0xff]  }
 0x2aa   : > { %1620 = vmatpush1.bf16.msra.mxu1 %v1195_v34 }
 0x2ab   : > { %1621 = vmatprep.subr.bf16.mxu1 %v4246_v0 }
 0x2ad   : > { %v1106_v36 = vpop.f32.mrb[140].mxu0 }
 0x2ae   : > { %v1108_v37 = vpop.f32.mrb[141].mxu0 }
 0x2af   : > { %v1109_v38 = vpop.f32.mrb[142].mxu0  ;;  %v4045_v37 = vld [vmem:[#allocation7 + $0x8] sm:$0xff]  }
 0x2b0   : > { %v1196_v41 = vpack.c.bf16 %v1109_v38, %v1106_v36  ;;  %v1111_v42 = vpop.f32.mrb[143].mxu0 }
 0x2b2   : > { %1622 = vmatpush1.bf16.msra.mxu1 %v1196_v41 }
 0x2b3   : > { %1623 = vmatprep.subr.bf16.mxu1 %v4246_v0 }
 0x2b5   : > { %v1114_v43 = vpop.f32.mrb[144].mxu0 }
 0x2b6   : > { %v1116_v44 = vpop.f32.mrb[145].mxu0 }
 0x2b7   : > { %v1117_v45 = vpop.f32.mrb[146].mxu0 }
 0x2b8   : > { %v1197_v49 = vpack.c.bf16 %v1117_v45, %v1114_v43  ;;  %v1119_v50 = vpop.f32.mrb[147].mxu0  ;;  %v4047_v45 = vld [vmem:[#allocation7 + $0x18] sm:$0xff]  }
 0x2ba   : > { %1624 = vmatpush1.bf16.msra.mxu1 %v1197_v49 }
 0x2bb   : > { %1625 = vmatprep.subr.bf16.mxu1 %v4246_v0 }
 0x2bd   : > { %v1122_v48 = vpop.f32.mrb[148].mxu0 }
 0x2be   : > { %v1124_v51 = vpop.f32.mrb[149].mxu0 }
 0x2bf   : > { %v1125_v52 = vpop.f32.mrb[150].mxu0 }
 0x2c0   : > { %v1198_v53 = vpack.c.bf16 %v1125_v52, %v1122_v48  ;;  %v1127_v56 = vpop.f32.mrb[151].mxu0 }
 0x2c2   : > { %1626 = vmatpush1.bf16.msra.mxu1 %v1198_v53  ;;  %v4049_v53 = vld [vmem:[#allocation7 + $0x28] sm:$0xff]  }
 0x2c3   : > { %1627 = vmatprep.subr.bf16.mxu1 %v4246_v0 }
 0x2c5   : > { %v1130_v57 = vpop.f32.mrb[152].mxu0 }
 0x2c6   : > { %v1132_v58 = vpop.f32.mrb[153].mxu0 }
 0x2c7   : > { %v1133_v59 = vpop.f32.mrb[154].mxu0 }
 0x2c8   : > { %v1199_v60 = vpack.c.bf16 %v1133_v59, %v1130_v57  ;;  %v1135_v63 = vpop.f32.mrb[155].mxu0 }
 0x2c9   : > { %v4051_v63 = vld [vmem:[#allocation7 + $0x38] sm:$0xff]  }
 0x2ca   : > { %1628 = vmatpush1.bf16.msra.mxu1 %v1199_v60 }
 0x2cb   : > { %1629 = vmatprep.subr.bf16.mxu1 %v4246_v0 }
 0x2cd   : > { %v1138_v1 = vpop.f32.mrb[156].mxu0 }
 0x2ce   : > { %v1140_v2 = vpop.f32.mrb[157].mxu0 }
 0x2cf   : > { %v1141_v3 = vpop.f32.mrb[158].mxu0 }
 0x2d0   : > { %v1200_v4 = vpack.c.bf16 %v1141_v3, %v1138_v1  ;;  %v1143_v6 = vpop.f32.mrb[159].mxu0 }
 0x2d2   : > { %1630 = vmatpush1.bf16.msra.mxu1 %v1200_v4 }
 0x2d3   : > { %1631 = vmatprep.subr.bf16.mxu1 %v4246_v0 }
 0x2d5   : > { %v1146_v7 = vpop.f32.mrb[160].mxu0 }
 0x2d6   : > { %v1148_v8 = vpop.f32.mrb[161].mxu0 }
 0x2d7   : > { %v1149_v9 = vpop.f32.mrb[162].mxu0 }
 0x2d8   : > { %v1201_v10 = vpack.c.bf16 %v1149_v9, %v1146_v7  ;;  %v1151_v11 = vpop.f32.mrb[163].mxu0  ;;  %v1321_v12 = vpop.f32.mrb[0].mxu1  ;;  %v4053_v7 = vld [vmem:[#allocation7 + $0x48] sm:$0xff]  }
 0x2d9   : > { %v3843_v13 = vpack.c.bf16 %v1321_v12, %v1321_v12  ;;  %v1323_v14 = vpop.f32.mrb[1].mxu1  ;;  %v1770_v11 = vld [vmem:[%s4482_s29 + $0x18] sm:$0xff]  ;;  %v4055_v12 = vld [vmem:[#allocation7 + $0x58] sm:$0xff]  }
 0x2da   : > { %1632 = vmatpush1.bf16.msra.mxu1 %v1201_v10  ;;  %v1324_v15 = vpop.f32.mrb[2].mxu1  ;;  %v1768_v10 = vld [vmem:[%s4482_s29 + $0x8] sm:$0xff]  ;;  %v1769_v14 = vld [vmem:[%s4482_s29 + $0x10] sm:$0xff] }
 0x2db   : > { %1633 = vmatprep.subr.bf16.mxu1 %v4246_v0  ;;  %1433 = vst.msk [vmem:[%s4838_s30] sm:$0xf] %vm1432_vm1, %v3843_v13  ;;  %v3844_v16 = vpack.c.bf16 %v1324_v15, %v1324_v15  ;;  %v1326_v17 = vpop.f32.mrb[3].mxu1  ;;  %v1936_v13 = vpack.c.bf16 %v1770_v11, %v1768_v10  ;;  %v1772_v15 = vld [vmem:[%s4482_s29 + $0x28] sm:$0xff] }
 0x2dd   : > { %v1154_v18 = vpop.f32.mrb[164].mxu0  ;;  %1434 = vst.msk [vmem:[%s4838_s30 + $0x4] sm:$0xf] %vm1432_vm1, %v3844_v16  ;;  %v1774_v16 = vld [vmem:[%s4482_s29 + $0x38] sm:$0xff] }
 0x2de   : > { %v1156_v19 = vpop.f32.mrb[165].mxu0 }
 0x2df   : > { %v1157_v20 = vpop.f32.mrb[166].mxu0  ;;  %v1771_v19 = vld [vmem:[%s4482_s29 + $0x20] sm:$0xff] }
 0x2e0   : > { %v1202_v21 = vpack.c.bf16 %v1157_v20, %v1154_v18  ;;  %v1159_v24 = vpop.f32.mrb[167].mxu0  ;;  %v1329_v25 = vpop.f32.mrb[4].mxu1  ;;  %v4057_v18 = vld [vmem:[#allocation7 + $0x68] sm:$0xff]   ;;  %v1773_v20 = vld [vmem:[%s4482_s29 + $0x30] sm:$0xff] }
 0x2e1   : > { %v3845_v26 = vpack.c.bf16 %v1329_v25, %v1329_v25  ;;  %v1331_v27 = vpop.f32.mrb[5].mxu1  ;;  %v1778_v24 = vld [vmem:[%s4482_s29 + $0x58] sm:$0xff]  ;;  %v1937_v25 = vpack.c.bf16 %v1773_v20, %v1771_v19 }
 0x2e2   : > { %1634 = vmatpush1.bf16.msra.mxu1 %v1202_v21  ;;  %v1332_v28 = vpop.f32.mrb[6].mxu1  ;;  %v1776_v21 = vld [vmem:[%s4482_s29 + $0x48] sm:$0xff]  ;;  %v1775_v27 = vld [vmem:[%s4482_s29 + $0x40] sm:$0xff] }
 0x2e3   : > { %2145 = vmatprep.subr.bf16.mxu1 %v4246_v0  ;;  %1435 = vst.msk [vmem:[%s4838_s30 + $0x8] sm:$0xf] %vm1432_vm1, %v3845_v26  ;;  %v3846_v29 = vpack.c.bf16 %v1332_v28, %v1332_v28  ;;  %v1334_v30 = vpop.f32.mrb[7].mxu1  ;;  %v1940_v26 = vpack.c.bf16 %v1778_v24, %v1776_v21  ;;  %v1777_v28 = vld [vmem:[%s4482_s29 + $0x50] sm:$0xff]  ;;  %v1803_v24 = vld [vmem:[%s4482_s29 + $0x120] sm:$0xff] }
 0x2e4   : > { %v1782_v30 = vld [vmem:[%s4482_s29 + $0x78] sm:$0xff] }
 0x2e5   : > { %1640 = vmatmul.mubr.bf16.vlgmr.msra.gmra.mrb[56].mxu1 %v4736_v22  ;;  %1436 = vst.msk [vmem:[%s4838_s30 + $0xc] sm:$0xf] %vm1432_vm1, %v3846_v29  ;;  %v1780_v29 = vld [vmem:[%s4482_s29 + $0x68] sm:$0xff] }
 0x2e6   : > { %2146 = vmatpush1.bf16.msra.mxu1 %v4044_v31  ;;  %3659 = vmatprep.mubr.msk.bf16.mxu1 %vm665_vm0, %v4738_v23  ;;  %v4046_v23 = vld [vmem:[#allocation7 + $0x10] sm:$0xff]   ;;  %v1939_v31 = vpack.c.bf16 %v1777_v28, %v1775_v27  ;;  %v1810_v27 = vld [vmem:[%s4482_s29 + $0x158] sm:$0xff] }
 0x2e7   : > { %2147 = vmatprep.subr.bf16.mxu1 %v4246_v0 }
 0x2e8   : > { %v1337_v34 = vpop.f32.mrb[8].mxu1 }
 0x2e9   : > { %v3847_v35 = vpack.c.bf16 %v1337_v34, %v1337_v34  ;;  %v1339_v36 = vpop.f32.mrb[9].mxu1  ;;  %v1942_v34 = vpack.c.bf16 %v1782_v30, %v1780_v29 }
 0x2ea   : > { %2148 = vmatpush1.bf16.msra.mxu1 %v4045_v37  ;;  %v1340_v38 = vpop.f32.mrb[10].mxu1  ;;  %v1781_v36 = vld [vmem:[%s4482_s29 + $0x70] sm:$0xff]  ;;  %v1784_v37 = vld [vmem:[%s4482_s29 + $0x88] sm:$0xff] }
 0x2eb   : > { %2149 = vmatprep.subr.bf16.mxu1 %v4246_v0  ;;  %1437 = vst.msk [vmem:[%s4838_s30 + $0x10] sm:$0xf] %vm1432_vm1, %v3847_v35  ;;  %v3848_v22 = vpack.c.bf16 %v1340_v38, %v1340_v38  ;;  %v1342_v41 = vpop.f32.mrb[11].mxu1  ;;  %v1779_v35 = vld [vmem:[%s4482_s29 + $0x60] sm:$0xff]  ;;  %v1786_v38 = vld [vmem:[%s4482_s29 + $0x98] sm:$0xff] }
 0x2ec   : > { %v1944_v41 = vpack.c.bf16 %v1786_v38, %v1784_v37  ;;  %v1807_v38 = vld [vmem:[%s4482_s29 + $0x140] sm:$0xff] }
 0x2ed   : > { %1648 = vmatmul.mubr.bf16.gmra.mrb[60].mxu1 %v4747_v32  ;;  %1438 = vst.msk [vmem:[%s4838_s30 + $0x14] sm:$0xf] %vm1432_vm1, %v3848_v22  ;;  %v1941_v22 = vpack.c.bf16 %v1781_v36, %v1779_v35 }
 0x2ee   : > { %2150 = vmatpush1.bf16.msra.mxu1 %v4046_v23  ;;  %3660 = vmatprep.mubr.msk.bf16.mxu1 %vm665_vm0, %v4749_v33  ;;  %v4048_v33 = vld [vmem:[#allocation7 + $0x20] sm:$0xff]   ;;  %v1783_v23 = vld [vmem:[%s4482_s29 + $0x80] sm:$0xff] }
 0x2ef   : > { %2151 = vmatprep.subr.bf16.mxu1 %v4246_v0 }
 0x2f0   : > { %v1345_v42 = vpop.f32.mrb[12].mxu1 }
 0x2f1   : > { %v3849_v43 = vpack.c.bf16 %v1345_v42, %v1345_v42  ;;  %v1347_v44 = vpop.f32.mrb[13].mxu1  ;;  %v1785_v42 = vld [vmem:[%s4482_s29 + $0x90] sm:$0xff] }
 0x2f2   : > { %2152 = vmatpush1.bf16.msra.mxu1 %v4047_v45  ;;  %v1348_v49 = vpop.f32.mrb[14].mxu1  ;;  %v1790_v44 = vld [vmem:[%s4482_s29 + $0xb8] sm:$0xff]  ;;  %v1943_v45 = vpack.c.bf16 %v1785_v42, %v1783_v23 }
 0x2f3   : > { %2153 = vmatprep.subr.bf16.mxu1 %v4246_v0  ;;  %1439 = vst.msk [vmem:[%s4838_s30 + $0x18] sm:$0xf] %vm1432_vm1, %v3849_v43  ;;  %v3850_v32 = vpack.c.bf16 %v1348_v49, %v1348_v49  ;;  %v1350_v50 = vpop.f32.mrb[15].mxu1  ;;  %v1788_v43 = vld [vmem:[%s4482_s29 + $0xa8] sm:$0xff]  ;;  %v1814_v23 = vld [vmem:[%s4482_s29 + $0x178] sm:$0xff] }
 0x2f4   : > { %v1946_v49 = vpack.c.bf16 %v1790_v44, %v1788_v43  ;;  %v1789_v50 = vld [vmem:[%s4482_s29 + $0xb0] sm:$0xff] }
 0x2f5   : > { %1656 = vmatmul.mubr.bf16.gmra.mrb[64].mxu1 %v4757_v39  ;;  %1440 = vst.msk [vmem:[%s4838_s30 + $0x1c] sm:$0xf] %vm1432_vm1, %v3850_v32  ;;  %v1787_v32 = vld [vmem:[%s4482_s29 + $0xa0] sm:$0xff] }
 0x2f6   : > { %2154 = vmatpush1.bf16.msra.mxu1 %v4048_v33  ;;  %3661 = vmatprep.mubr.msk.bf16.mxu1 %vm665_vm0, %v4759_v40  ;;  %v4050_v40 = vld [vmem:[#allocation7 + $0x30] sm:$0xff]   ;;  %v1792_v33 = vld [vmem:[%s4482_s29 + $0xc8] sm:$0xff] }
 0x2f7   : > { %2155 = vmatprep.subr.bf16.mxu1 %v4246_v0 }
 0x2f8   : > { %v1353_v48 = vpop.f32.mrb[16].mxu1 }
 0x2f9   : > { %v3851_v51 = vpack.c.bf16 %v1353_v48, %v1353_v48  ;;  %v1355_v52 = vpop.f32.mrb[17].mxu1  ;;  %v1794_v48 = vld [vmem:[%s4482_s29 + $0xd8] sm:$0xff] }
 0x2fa   : > { %2156 = vmatpush1.bf16.msra.mxu1 %v4049_v53  ;;  %v1356_v56 = vpop.f32.mrb[18].mxu1  ;;  %v1948_v52 = vpack.c.bf16 %v1794_v48, %v1792_v33  ;;  %v1791_v53 = vld [vmem:[%s4482_s29 + $0xc0] sm:$0xff] }
 0x2fb   : > { %2157 = vmatprep.subr.bf16.mxu1 %v4246_v0  ;;  %1441 = vst.msk [vmem:[%s4838_s30 + $0x20] sm:$0xf] %vm1432_vm1, %v3851_v51  ;;  %v3852_v39 = vpack.c.bf16 %v1356_v56, %v1356_v56  ;;  %v1358_v57 = vpop.f32.mrb[19].mxu1  ;;  %v1945_v51 = vpack.c.bf16 %v1789_v50, %v1787_v32  ;;  %v1793_v56 = vld [vmem:[%s4482_s29 + $0xd0] sm:$0xff]  ;;  %v1811_v48 = vld [vmem:[%s4482_s29 + $0x160] sm:$0xff] }
 0x2fc   : > { %v1798_v57 = vld [vmem:[%s4482_s29 + $0xf8] sm:$0xff] }
 0x2fd   : > { %1664 = vmatmul.mubr.bf16.gmra.mrb[68].mxu1 %v4765_v46  ;;  %1442 = vst.msk [vmem:[%s4838_s30 + $0x24] sm:$0xf] %vm1432_vm1, %v3852_v39  ;;  %v1796_v39 = vld [vmem:[%s4482_s29 + $0xe8] sm:$0xff] }
 0x2fe   : > { %2158 = vmatpush1.bf16.msra.mxu1 %v4050_v40  ;;  %3662 = vmatprep.mubr.msk.bf16.mxu1 %vm665_vm0, %v4767_v47  ;;  %v4052_v47 = vld [vmem:[#allocation7 + $0x40] sm:$0xff]  }
 0x2ff   : > { %2159 = vmatprep.subr.bf16.mxu1 %v4246_v0 }
 0x300   : > { %v1361_v58 = vpop.f32.mrb[20].mxu1 }
 0x301   : > { %v3853_v59 = vpack.c.bf16 %v1361_v58, %v1361_v58  ;;  %v1363_v60 = vpop.f32.mrb[21].mxu1 }
 0x302   : > { %2160 = vmatpush1.bf16.msra.mxu1 %v4051_v63  ;;  %v1364_v1 = vpop.f32.mrb[22].mxu1  ;;  %v1947_v60 = vpack.c.bf16 %v1793_v56, %v1791_v53  ;;  %v1818_v53 = vld [vmem:[%s4482_s29 + $0x198] sm:$0xff] }
 0x303   : > { %2161 = vmatprep.subr.bf16.mxu1 %v4246_v0  ;;  %1443 = vst.msk [vmem:[%s4838_s30 + $0x28] sm:$0xf] %vm1432_vm1, %v3853_v59  ;;  %v3854_v46 = vpack.c.bf16 %v1364_v1, %v1364_v1  ;;  %v1366_v2 = vpop.f32.mrb[23].mxu1  ;;  %v1950_v1 = vpack.c.bf16 %v1798_v57, %v1796_v39 }
 0x305   : > { %1672 = vmatmul.mubr.bf16.gmra.mrb[72].mxu1 %v4773_v54  ;;  %1444 = vst.msk [vmem:[%s4838_s30 + $0x2c] sm:$0xf] %vm1432_vm1, %v3854_v46 }
 0x306   : > { %2162 = vmatpush1.bf16.msra.mxu1 %v4052_v47  ;;  %3663 = vmatprep.mubr.msk.bf16.mxu1 %vm665_vm0, %v4775_v55  ;;  %v4054_v55 = vld [vmem:[#allocation7 + $0x50] sm:$0xff]  }
 0x307   : > { %2163 = vmatprep.subr.bf16.mxu1 %v4246_v0  ;;  %v1795_v47 = vld [vmem:[%s4482_s29 + $0xe0] sm:$0xff] }
 0x308   : > { %v1369_v3 = vpop.f32.mrb[24].mxu1 }
 0x309   : > { %v3855_v4 = vpack.c.bf16 %v1369_v3, %v1369_v3  ;;  %v1371_v6 = vpop.f32.mrb[25].mxu1  ;;  %v1797_v3 = vld [vmem:[%s4482_s29 + $0xf0] sm:$0xff] }
 0x30a   : > { %2164 = vmatpush1.bf16.msra.mxu1 %v4053_v7  ;;  %v1372_v8 = vpop.f32.mrb[26].mxu1  ;;  %v1802_v6 = vld [vmem:[%s4482_s29 + $0x118] sm:$0xff] }
 0x30b   : > { %2165 = vmatprep.subr.bf16.mxu1 %v4246_v0  ;;  %1445 = vst.msk [vmem:[%s4838_s30 + $0x30] sm:$0xf] %vm1432_vm1, %v3855_v4  ;;  %v3856_v54 = vpack.c.bf16 %v1372_v8, %v1372_v8  ;;  %v1374_v9 = vpop.f32.mrb[27].mxu1  ;;  %v1800_v4 = vld [vmem:[%s4482_s29 + $0x108] sm:$0xff] }
 0x30c   : > { %v1949_v9 = vpack.c.bf16 %v1797_v3, %v1795_v47  ;;  %v1952_v10 = vpack.c.bf16 %v1802_v6, %v1800_v4  ;;  %v1822_v47 = vld [vmem:[%s4482_s29 + $0x1b8] sm:$0xff] }
 0x30d   : > { %1680 = vmatmul.mubr.bf16.gmra.mrb[76].mxu1 %v4781_v61  ;;  %1446 = vst.msk [vmem:[%s4838_s30 + $0x34] sm:$0xf] %vm1432_vm1, %v3856_v54  ;;  %v4056_v61 = vld [vmem:[#allocation7 + $0x60] sm:$0xff]  }
 0x30e   : > { %2166 = vmatpush1.bf16.msra.mxu1 %v4054_v55  ;;  %3664 = vmatprep.mubr.msk.bf16.mxu1 %vm665_vm0, %v4783_v62  ;;  %v1767_v62 = vld [vmem:[%s4482_s29] sm:$0xff] }
 0x30f   : > { %2167 = vmatprep.subr.bf16.mxu1 %v4246_v0  ;;  %v1935_v17 = vpack.c.bf16 %v1769_v14, %v1767_v62  ;;  %v1804_v62 = vld [vmem:[%s4482_s29 + $0x128] sm:$0xff]  ;;  %v1806_v14 = vld [vmem:[%s4482_s29 + $0x138] sm:$0xff] }
 0x310   : > { %v1954_v19 = vpack.c.bf16 %v1806_v14, %v1804_v62  ;;  %v1823_v14 = vld [vmem:[%s4482_s29 + $0x1c0] sm:$0xff] }
 0x312   : > { %2168 = vmatpush1.bf16.msra.mxu1 %v4055_v12 }
 0x313   : > { %2169 = vmatprep.subr.bf16.mxu1 %v4246_v0 }
 0x315   : > { %1688 = vmatmul.mubr.bf16.gmra.mrb[80].mxu1 %v4789_v5  ;;  %v1938_v5 = vpack.c.bf16 %v1774_v16, %v1772_v15 }
 0x316   : > { %2170 = vmatpush1.bf16.msra.mxu1 %v4056_v61  ;;  %3693 = vmatprep.mubr.msk.bf16.mxu1 %vm665_vm0, %v1936_v13  ;;  %v1799_v13 = vld [vmem:[%s4482_s29 + $0x100] sm:$0xff]  ;;  %v1801_v61 = vld [vmem:[%s4482_s29 + $0x110] sm:$0xff] }
 0x317   : > { %2171 = vmatprep.subr.bf16.mxu1 %v4246_v0 }
 0x31a   : > { %2172 = vmatpush1.bf16.msra.mxu1 %v4057_v18  ;;  %v1951_v18 = vpack.c.bf16 %v1801_v61, %v1799_v13  ;;  %v1826_v13 = vld [vmem:[%s4482_s29 + $0x1d8] sm:$0xff] }
 0x31d   : > { %2178 = vmatmul.mubr.bf16.vlgmr.msra.gmra.mrb[84].mxu1 %v1935_v17 }
 0x31e   : > { %3694 = vmatprep.mubr.msk.bf16.mxu1 %vm665_vm0, %v1938_v5 }
 0x325   : > { %2186 = vmatmul.mubr.bf16.gmra.mrb[88].mxu1 %v1937_v25  ;;  %v1805_v25 = vld [vmem:[%s4482_s29 + $0x130] sm:$0xff] }
 0x326   : > { %3695 = vmatprep.mubr.msk.bf16.mxu1 %vm665_vm0, %v1940_v26  ;;  %v1808_v26 = vld [vmem:[%s4482_s29 + $0x148] sm:$0xff] }
 0x327   : > { %v1956_v35 = vpack.c.bf16 %v1810_v27, %v1808_v26  ;;  %v1831_v27 = vld [vmem:[%s4482_s29 + $0x200] sm:$0xff] }
 0x32d   : > { %2194 = vmatmul.mubr.bf16.gmra.mrb[92].mxu1 %v1939_v31  ;;  %v1953_v31 = vpack.c.bf16 %v1805_v25, %v1803_v24  ;;  %v1834_v24 = vld [vmem:[%s4482_s29 + $0x218] sm:$0xff] }
 0x32e   : > { %3696 = vmatprep.mubr.msk.bf16.mxu1 %vm665_vm0, %v1942_v34 }
 0x335   : > { %2202 = vmatmul.mubr.bf16.gmra.mrb[96].mxu1 %v1941_v22  ;;  %v1809_v22 = vld [vmem:[%s4482_s29 + $0x150] sm:$0xff] }
 0x336   : > { %3697 = vmatprep.mubr.msk.bf16.mxu1 %vm665_vm0, %v1944_v41  ;;  %v1812_v41 = vld [vmem:[%s4482_s29 + $0x168] sm:$0xff] }
 0x337   : > { %v1958_v32 = vpack.c.bf16 %v1814_v23, %v1812_v41  ;;  %v1839_v23 = vld [vmem:[%s4482_s29 + $0x240] sm:$0xff] }
 0x33d   : > { %2210 = vmatmul.mubr.bf16.gmra.mrb[100].mxu1 %v1943_v45  ;;  %v1955_v45 = vpack.c.bf16 %v1809_v22, %v1807_v38  ;;  %v1842_v38 = vld [vmem:[%s4482_s29 + $0x258] sm:$0xff] }
 0x33e   : > { %3698 = vmatprep.mubr.msk.bf16.mxu1 %vm665_vm0, %v1946_v49 }
 0x345   : > { %2218 = vmatmul.mubr.bf16.gmra.mrb[104].mxu1 %v1945_v51  ;;  %v1813_v51 = vld [vmem:[%s4482_s29 + $0x170] sm:$0xff] }
 0x346   : > { %3699 = vmatprep.mubr.msk.bf16.mxu1 %vm665_vm0, %v1948_v52  ;;  %v1816_v52 = vld [vmem:[%s4482_s29 + $0x188] sm:$0xff] }
 0x348   : > { %v1481_v40 = vpop.f32.mrb[28].mxu1 }
 0x349   : > { %v3857_v58 = vpack.c.bf16 %v1481_v40, %v1481_v40  ;;  %v1483_v59 = vpop.f32.mrb[29].mxu1  ;;  %v1957_v40 = vpack.c.bf16 %v1813_v51, %v1811_v48  ;;  %v1850_v48 = vld [vmem:[%s4482_s29 + $0x298] sm:$0xff] }
 0x34a   : > { %v1484_v63 = vpop.f32.mrb[30].mxu1  ;;  %v1960_v59 = vpack.c.bf16 %v1818_v53, %v1816_v52  ;;  %v1847_v53 = vld [vmem:[%s4482_s29 + $0x280] sm:$0xff] }
 0x34b   : > { %3644 = vst.msk [vmem:[%s4838_s30 + $0x38] sm:$0xf] %vm1432_vm1, %v3857_v58  ;;  %v3858_v46 = vpack.c.bf16 %v1484_v63, %v1484_v63  ;;  %v1486_v2 = vpop.f32.mrb[31].mxu1 }
 0x34c   : > { %v1820_v2 = vld [vmem:[%s4482_s29 + $0x1a8] sm:$0xff] }
 0x34d   : > { %3645 = vst.msk [vmem:[%s4838_s30 + $0x3c] sm:$0xf] %vm1432_vm1, %v3858_v46  ;;  %2226 = vmatmul.mubr.bf16.gmra.mrb[108].mxu1 %v1947_v60  ;;  %v1817_v46 = vld [vmem:[%s4482_s29 + $0x190] sm:$0xff] }
 0x34e   : > { %3700 = vmatprep.mubr.msk.bf16.mxu1 %vm665_vm0, %v1950_v1  ;;  %v1815_v1 = vld [vmem:[%s4482_s29 + $0x180] sm:$0xff] }
 0x350   : > { %v1489_v7 = vpop.f32.mrb[32].mxu1 }
 0x351   : > { %v3859_v8 = vpack.c.bf16 %v1489_v7, %v1489_v7  ;;  %v1491_v54 = vpop.f32.mrb[33].mxu1  ;;  %v1959_v7 = vpack.c.bf16 %v1817_v46, %v1815_v1 }
 0x352   : > { %v1492_v55 = vpop.f32.mrb[34].mxu1  ;;  %v1962_v54 = vpack.c.bf16 %v1822_v47, %v1820_v2  ;;  %v1851_v47 = vld [vmem:[%s4482_s29 + $0x2a0] sm:$0xff] }
 0x353   : > { %3646 = vst.msk [vmem:[%s4838_s30 + $0x40] sm:$0xf] %vm1432_vm1, %v3859_v8  ;;  %v3860_v11 = vpack.c.bf16 %v1492_v55, %v1492_v55  ;;  %v1494_v12 = vpop.f32.mrb[35].mxu1 }
 0x354   : > { %v1824_v12 = vld [vmem:[%s4482_s29 + $0x1c8] sm:$0xff] }
 0x355   : > { %3647 = vst.msk [vmem:[%s4838_s30 + $0x44] sm:$0xf] %vm1432_vm1, %v3860_v11  ;;  %2234 = vmatmul.mubr.bf16.gmra.mrb[112].mxu1 %v1949_v9  ;;  %v1821_v11 = vld [vmem:[%s4482_s29 + $0x1b0] sm:$0xff]  ;;  %v1964_v62 = vpack.c.bf16 %v1826_v13, %v1824_v12  ;;  %v1855_v13 = vld [vmem:[%s4482_s29 + $0x2c0] sm:$0xff] }
 0x356   : > { %3701 = vmatprep.mubr.msk.bf16.mxu1 %vm665_vm0, %v1952_v10  ;;  %v1819_v10 = vld [vmem:[%s4482_s29 + $0x1a0] sm:$0xff] }
 0x357   : > { %v1961_v61 = vpack.c.bf16 %v1821_v11, %v1819_v10 }
 0x358   : > { %v1497_v15 = vpop.f32.mrb[36].mxu1 }
 0x359   : > { %v3861_v16 = vpack.c.bf16 %v1497_v15, %v1497_v15  ;;  %v1499_v17 = vpop.f32.mrb[37].mxu1  ;;  %v1825_v15 = vld [vmem:[%s4482_s29 + $0x1d0] sm:$0xff] }
 0x35a   : > { %v1500_v5 = vpop.f32.mrb[38].mxu1  ;;  %v1830_v17 = vld [vmem:[%s4482_s29 + $0x1f8] sm:$0xff] }
 0x35b   : > { %3648 = vst.msk [vmem:[%s4838_s30 + $0x48] sm:$0xf] %vm1432_vm1, %v3861_v16  ;;  %v3862_v20 = vpack.c.bf16 %v1500_v5, %v1500_v5  ;;  %v1502_v21 = vpop.f32.mrb[39].mxu1  ;;  %v1828_v16 = vld [vmem:[%s4482_s29 + $0x1e8] sm:$0xff] }
 0x35c   : > { %v1966_v5 = vpack.c.bf16 %v1830_v17, %v1828_v16  ;;  %v1832_v21 = vld [vmem:[%s4482_s29 + $0x208] sm:$0xff] }
 0x35d   : > { %3649 = vst.msk [vmem:[%s4838_s30 + $0x4c] sm:$0xf] %vm1432_vm1, %v3862_v20  ;;  %2242 = vmatmul.mubr.bf16.gmra.mrb[116].mxu1 %v1951_v18  ;;  %v1963_v18 = vpack.c.bf16 %v1825_v15, %v1823_v14  ;;  %v1829_v20 = vld [vmem:[%s4482_s29 + $0x1f0] sm:$0xff]  ;;  %v1968_v26 = vpack.c.bf16 %v1834_v24, %v1832_v21  ;;  %v1862_v14 = vld [vmem:[%s4482_s29 + $0x2f8] sm:$0xff]  ;;  %v1859_v24 = vld [vmem:[%s4482_s29 + $0x2e0] sm:$0xff] }
 0x35e   : > { %3702 = vmatprep.mubr.msk.bf16.mxu1 %vm665_vm0, %v1954_v19  ;;  %v1827_v19 = vld [vmem:[%s4482_s29 + $0x1e0] sm:$0xff] }
 0x35f   : > { %v1965_v25 = vpack.c.bf16 %v1829_v20, %v1827_v19 }
 0x360   : > { %v1505_v28 = vpop.f32.mrb[40].mxu1 }
 0x361   : > { %v3863_v29 = vpack.c.bf16 %v1505_v28, %v1505_v28  ;;  %v1507_v30 = vpop.f32.mrb[41].mxu1  ;;  %v1833_v28 = vld [vmem:[%s4482_s29 + $0x210] sm:$0xff] }
 0x362   : > { %v1508_v34 = vpop.f32.mrb[42].mxu1  ;;  %v1838_v30 = vld [vmem:[%s4482_s29 + $0x238] sm:$0xff] }
 0x363   : > { %3650 = vst.msk [vmem:[%s4838_s30 + $0x50] sm:$0xf] %vm1432_vm1, %v3863_v29  ;;  %v3864_v36 = vpack.c.bf16 %v1508_v34, %v1508_v34  ;;  %v1510_v37 = vpop.f32.mrb[43].mxu1  ;;  %v1836_v29 = vld [vmem:[%s4482_s29 + $0x228] sm:$0xff] }
 0x364   : > { %v1970_v34 = vpack.c.bf16 %v1838_v30, %v1836_v29  ;;  %v1840_v37 = vld [vmem:[%s4482_s29 + $0x248] sm:$0xff] }
 0x365   : > { %3651 = vst.msk [vmem:[%s4838_s30 + $0x54] sm:$0xf] %vm1432_vm1, %v3864_v36  ;;  %2250 = vmatmul.mubr.bf16.gmra.mrb[120].mxu1 %v1953_v31  ;;  %v1967_v31 = vpack.c.bf16 %v1833_v28, %v1831_v27  ;;  %v1837_v36 = vld [vmem:[%s4482_s29 + $0x230] sm:$0xff]  ;;  %v1972_v41 = vpack.c.bf16 %v1842_v38, %v1840_v37  ;;  %v1866_v27 = vld [vmem:[%s4482_s29 + $0x318] sm:$0xff]  ;;  %v1863_v38 = vld [vmem:[%s4482_s29 + $0x300] sm:$0xff] }
 0x366   : > { %3703 = vmatprep.mubr.msk.bf16.mxu1 %vm665_vm0, %v1956_v35  ;;  %v1835_v35 = vld [vmem:[%s4482_s29 + $0x220] sm:$0xff] }
 0x367   : > { %v1969_v22 = vpack.c.bf16 %v1837_v36, %v1835_v35 }
 0x368   : > { %v1513_v42 = vpop.f32.mrb[44].mxu1 }
 0x369   : > { %v3865_v43 = vpack.c.bf16 %v1513_v42, %v1513_v42  ;;  %v1515_v44 = vpop.f32.mrb[45].mxu1  ;;  %v1841_v42 = vld [vmem:[%s4482_s29 + $0x250] sm:$0xff] }
 0x36a   : > { %v1516_v49 = vpop.f32.mrb[46].mxu1  ;;  %v1846_v44 = vld [vmem:[%s4482_s29 + $0x278] sm:$0xff] }
 0x36b   : > { %3652 = vst.msk [vmem:[%s4838_s30 + $0x58] sm:$0xf] %vm1432_vm1, %v3865_v43  ;;  %v3866_v50 = vpack.c.bf16 %v1516_v49, %v1516_v49  ;;  %v1518_v33 = vpop.f32.mrb[47].mxu1  ;;  %v1844_v43 = vld [vmem:[%s4482_s29 + $0x268] sm:$0xff] }
 0x36c   : > { %v1974_v49 = vpack.c.bf16 %v1846_v44, %v1844_v43  ;;  %v1848_v33 = vld [vmem:[%s4482_s29 + $0x288] sm:$0xff] }
 0x36d   : > { %3653 = vst.msk [vmem:[%s4838_s30 + $0x5c] sm:$0xf] %vm1432_vm1, %v3866_v50  ;;  %2258 = vmatmul.mubr.bf16.gmra.mrb[124].mxu1 %v1955_v45  ;;  %v1971_v45 = vpack.c.bf16 %v1841_v42, %v1839_v23  ;;  %v1845_v50 = vld [vmem:[%s4482_s29 + $0x270] sm:$0xff]  ;;  %v1976_v52 = vpack.c.bf16 %v1850_v48, %v1848_v33  ;;  %v1870_v23 = vld [vmem:[%s4482_s29 + $0x338] sm:$0xff]  ;;  %v1867_v48 = vld [vmem:[%s4482_s29 + $0x320] sm:$0xff] }
 0x36e   : > { %3704 = vmatprep.mubr.msk.bf16.mxu1 %vm665_vm0, %v1958_v32  ;;  %v1843_v32 = vld [vmem:[%s4482_s29 + $0x260] sm:$0xff] }
 0x36f   : > { %v1973_v51 = vpack.c.bf16 %v1845_v50, %v1843_v32 }
 0x370   : > { %v1521_v56 = vpop.f32.mrb[48].mxu1 }
 0x371   : > { %v3867_v39 = vpack.c.bf16 %v1521_v56, %v1521_v56  ;;  %v1523_v57 = vpop.f32.mrb[49].mxu1  ;;  %v1849_v56 = vld [vmem:[%s4482_s29 + $0x290] sm:$0xff] }
 0x372   : > { %v1524_v58 = vpop.f32.mrb[50].mxu1  ;;  %v1854_v57 = vld [vmem:[%s4482_s29 + $0x2b8] sm:$0xff] }
 0x373   : > { %3654 = vst.msk [vmem:[%s4838_s30 + $0x60] sm:$0xf] %vm1432_vm1, %v3867_v39  ;;  %v3868_v60 = vpack.c.bf16 %v1524_v58, %v1524_v58  ;;  %v1526_v63 = vpop.f32.mrb[51].mxu1  ;;  %v1852_v39 = vld [vmem:[%s4482_s29 + $0x2a8] sm:$0xff] }
 0x374   : > { %v1978_v1 = vpack.c.bf16 %v1854_v57, %v1852_v39 }
 0x375   : > { %3655 = vst.msk [vmem:[%s4838_s30 + $0x64] sm:$0xf] %vm1432_vm1, %v3868_v60  ;;  %2266 = vmatmul.mubr.bf16.gmra.mrb[128].mxu1 %v1957_v40  ;;  %v1975_v60 = vpack.c.bf16 %v1849_v56, %v1847_v53  ;;  %v1874_v53 = vld [vmem:[%s4482_s29 + $0x358] sm:$0xff] }
 0x376   : > { %3705 = vmatprep.mubr.msk.bf16.mxu1 %vm665_vm0, %v1960_v59 }
 0x378   : > { %v1529_v3 = vpop.f32.mrb[52].mxu1 }
 0x379   : > { %v3869_v4 = vpack.c.bf16 %v1529_v3, %v1529_v3  ;;  %v1531_v6 = vpop.f32.mrb[53].mxu1  ;;  %v1853_v3 = vld [vmem:[%s4482_s29 + $0x2b0] sm:$0xff] }
 0x37a   : > { %v1532_v8 = vpop.f32.mrb[54].mxu1  ;;  %v1858_v6 = vld [vmem:[%s4482_s29 + $0x2d8] sm:$0xff] }
 0x37b   : > { %3656 = vst.msk [vmem:[%s4838_s30 + $0x68] sm:$0xf] %vm1432_vm1, %v3869_v4  ;;  %v3870_v9 = vpack.c.bf16 %v1532_v8, %v1532_v8  ;;  %v1534_v55 = vpop.f32.mrb[55].mxu1  ;;  %v1856_v4 = vld [vmem:[%s4482_s29 + $0x2c8] sm:$0xff] }
 0x37c   : > { %v1980_v10 = vpack.c.bf16 %v1858_v6, %v1856_v4 }
 0x37d   : > { %3657 = vst.msk [vmem:[%s4838_s30 + $0x6c] sm:$0xf] %vm1432_vm1, %v3870_v9  ;;  %2274 = vmatmul.mubr.bf16.gmra.mrb[132].mxu1 %v1959_v7  ;;  %v1977_v9 = vpack.c.bf16 %v1853_v3, %v1851_v47  ;;  %v1878_v47 = vld [vmem:[%s4482_s29 + $0x378] sm:$0xff] }
 0x37e   : > { %3706 = vmatprep.mubr.msk.bf16.mxu1 %vm665_vm0, %v1962_v54 }
 0x385   : > { %2282 = vmatmul.mubr.bf16.gmra.mrb[136].mxu1 %v1961_v61  ;;  %v1857_v61 = vld [vmem:[%s4482_s29 + $0x2d0] sm:$0xff] }
 0x386   : > { %3707 = vmatprep.mubr.msk.bf16.mxu1 %vm665_vm0, %v1964_v62  ;;  %v1860_v62 = vld [vmem:[%s4482_s29 + $0x2e8] sm:$0xff] }
 0x387   : > { %v1982_v19 = vpack.c.bf16 %v1862_v14, %v1860_v62 }
 0x38d   : > { %2290 = vmatmul.mubr.bf16.gmra.mrb[140].mxu1 %v1963_v18  ;;  %v1979_v18 = vpack.c.bf16 %v1857_v61, %v1855_v13  ;;  %v1882_v13 = vld [vmem:[%s4482_s29 + $0x398] sm:$0xff] }
 0x38e   : > { %3708 = vmatprep.mubr.msk.bf16.mxu1 %vm665_vm0, %v1966_v5 }
 0x395   : > { %2298 = vmatmul.mubr.bf16.gmra.mrb[144].mxu1 %v1965_v25  ;;  %v1861_v25 = vld [vmem:[%s4482_s29 + $0x2f0] sm:$0xff] }
 0x396   : > { %3709 = vmatprep.mubr.msk.bf16.mxu1 %vm665_vm0, %v1968_v26  ;;  %v1864_v26 = vld [vmem:[%s4482_s29 + $0x308] sm:$0xff] }
 0x397   : > { %v1984_v35 = vpack.c.bf16 %v1866_v27, %v1864_v26 }
 0x39d   : > { %2306 = vmatmul.mubr.bf16.gmra.mrb[148].mxu1 %v1967_v31  ;;  %v1981_v31 = vpack.c.bf16 %v1861_v25, %v1859_v24 }
 0x39e   : > { %3710 = vmatprep.mubr.msk.bf16.mxu1 %vm665_vm0, %v1970_v34 }
 0x3a5   : > { %2314 = vmatmul.mubr.bf16.gmra.mrb[152].mxu1 %v1969_v22  ;;  %v1865_v22 = vld [vmem:[%s4482_s29 + $0x310] sm:$0xff] }
 0x3a6   : > { %3711 = vmatprep.mubr.msk.bf16.mxu1 %vm665_vm0, %v1972_v41  ;;  %v1868_v41 = vld [vmem:[%s4482_s29 + $0x328] sm:$0xff] }
 0x3a7   : > { %v1986_v32 = vpack.c.bf16 %v1870_v23, %v1868_v41 }
 0x3ad   : > { %2322 = vmatmul.mubr.bf16.gmra.mrb[156].mxu1 %v1971_v45  ;;  %v1983_v45 = vpack.c.bf16 %v1865_v22, %v1863_v38 }
 0x3ae   : > { %3712 = vmatprep.mubr.msk.bf16.mxu1 %vm665_vm0, %v1974_v49 }
 0x3b5   : > { %2330 = vmatmul.mubr.bf16.gmra.mrb[160].mxu1 %v1973_v51  ;;  %v1869_v51 = vld [vmem:[%s4482_s29 + $0x330] sm:$0xff] }
 0x3b6   : > { %3713 = vmatprep.mubr.msk.bf16.mxu1 %vm665_vm0, %v1976_v52  ;;  %v1872_v52 = vld [vmem:[%s4482_s29 + $0x348] sm:$0xff] }
 0x3b8   : > { %v1641_v40 = vpop.f32.mrb[56].mxu1 }
 0x3b9   : > { %v3871_v58 = vpack.c.bf16 %v1641_v40, %v1641_v40  ;;  %v1643_v59 = vpop.f32.mrb[57].mxu1  ;;  %v1985_v40 = vpack.c.bf16 %v1869_v51, %v1867_v48 }
 0x3ba   : > { %v1644_v63 = vpop.f32.mrb[58].mxu1  ;;  %v1988_v59 = vpack.c.bf16 %v1874_v53, %v1872_v52 }
 0x3bb   : > { %3679 = vst.msk [vmem:[%s4838_s30 + $0x70] sm:$0xf] %vm1432_vm1, %v3871_v58  ;;  %v3872_v46 = vpack.c.bf16 %v1644_v63, %v1644_v63  ;;  %v1646_v2 = vpop.f32.mrb[59].mxu1 }
 0x3bc   : > { %v1876_v2 = vld [vmem:[%s4482_s29 + $0x368] sm:$0xff] }
 0x3bd   : > { %3680 = vst.msk [vmem:[%s4838_s30 + $0x74] sm:$0xf] %vm1432_vm1, %v3872_v46  ;;  %2338 = vmatmul.mubr.bf16.gmra.mrb[164].mxu1 %v1975_v60  ;;  %v1873_v46 = vld [vmem:[%s4482_s29 + $0x350] sm:$0xff] }
 0x3be   : > { %3714 = vmatprep.mubr.msk.bf16.mxu1 %vm665_vm0, %v1978_v1  ;;  %v1871_v1 = vld [vmem:[%s4482_s29 + $0x340] sm:$0xff] }
 0x3c0   : > { %v1649_v7 = vpop.f32.mrb[60].mxu1 }
 0x3c1   : > { %v3873_v8 = vpack.c.bf16 %v1649_v7, %v1649_v7  ;;  %v1651_v54 = vpop.f32.mrb[61].mxu1  ;;  %v1987_v7 = vpack.c.bf16 %v1873_v46, %v1871_v1 }
 0x3c2   : > { %v1652_v55 = vpop.f32.mrb[62].mxu1  ;;  %v1990_v54 = vpack.c.bf16 %v1878_v47, %v1876_v2 }
 0x3c3   : > { %3681 = vst.msk [vmem:[%s4838_s30 + $0x78] sm:$0xf] %vm1432_vm1, %v3873_v8  ;;  %v3874_v11 = vpack.c.bf16 %v1652_v55, %v1652_v55  ;;  %v1654_v12 = vpop.f32.mrb[63].mxu1 }
 0x3c4   : > { %v1880_v12 = vld [vmem:[%s4482_s29 + $0x388] sm:$0xff] }
 0x3c5   : > { %3682 = vst.msk [vmem:[%s4838_s30 + $0x7c] sm:$0xf] %vm1432_vm1, %v3874_v11  ;;  %2346 = vmatmul.mubr.bf16.gmra.mrb[168].mxu1 %v1977_v9  ;;  %v1877_v11 = vld [vmem:[%s4482_s29 + $0x370] sm:$0xff] }
 0x3c6   : > { %3715 = vmatprep.mubr.msk.bf16.mxu1 %vm665_vm0, %v1980_v10  ;;  %v1875_v10 = vld [vmem:[%s4482_s29 + $0x360] sm:$0xff] }
 0x3c7   : > { %v1989_v14 = vpack.c.bf16 %v1877_v11, %v1875_v10 }
 0x3c8   : > { %v1657_v15 = vpop.f32.mrb[64].mxu1 }
 0x3c9   : > { %v3875_v16 = vpack.c.bf16 %v1657_v15, %v1657_v15  ;;  %v1659_v17 = vpop.f32.mrb[65].mxu1 }
 0x3ca   : > { %v1660_v5 = vpop.f32.mrb[66].mxu1 }
 0x3cb   : > { %3683 = vst.msk [vmem:[%s4838_s30 + $0x80] sm:$0xf] %vm1432_vm1, %v3875_v16  ;;  %v3876_v20 = vpack.c.bf16 %v1660_v5, %v1660_v5  ;;  %v1662_v21 = vpop.f32.mrb[67].mxu1  ;;  %v1992_v16 = vpack.c.bf16 %v1882_v13, %v1880_v12  ;;  %v1879_v5 = vld [vmem:[%s4482_s29 + $0x380] sm:$0xff] }
 0x3cc   : > { %v1886_v21 = vld [vmem:[%s4482_s29 + $0x3b8] sm:$0xff]  ;;  %v1899_v13 = vld [vmem:[%s4482_s29 + $0x420] sm:$0xff] }
 0x3cd   : > { %3684 = vst.msk [vmem:[%s4838_s30 + $0x84] sm:$0xf] %vm1432_vm1, %v3876_v20  ;;  %2354 = vmatmul.mubr.bf16.gmra.mrb[172].mxu1 %v1979_v18  ;;  %v1884_v20 = vld [vmem:[%s4482_s29 + $0x3a8] sm:$0xff] }
 0x3ce   : > { %3716 = vmatprep.mubr.msk.bf16.mxu1 %vm665_vm0, %v1982_v19  ;;  %v1881_v19 = vld [vmem:[%s4482_s29 + $0x390] sm:$0xff] }
 0x3cf   : > { %v1991_v26 = vpack.c.bf16 %v1881_v19, %v1879_v5 }
 0x3d0   : > { %v1665_v28 = vpop.f32.mrb[68].mxu1 }
 0x3d1   : > { %v3877_v29 = vpack.c.bf16 %v1665_v28, %v1665_v28  ;;  %v1667_v30 = vpop.f32.mrb[69].mxu1  ;;  %v1994_v28 = vpack.c.bf16 %v1886_v21, %v1884_v20  ;;  %v1903_v21 = vld [vmem:[%s4482_s29 + $0x440] sm:$0xff] }
 0x3d2   : > { %v1668_v34 = vpop.f32.mrb[70].mxu1 }
 0x3d3   : > { %3685 = vst.msk [vmem:[%s4838_s30 + $0x88] sm:$0xf] %vm1432_vm1, %v3877_v29  ;;  %v3878_v36 = vpack.c.bf16 %v1668_v34, %v1668_v34  ;;  %v1670_v37 = vpop.f32.mrb[71].mxu1  ;;  %v1885_v34 = vld [vmem:[%s4482_s29 + $0x3b0] sm:$0xff] }
 0x3d5   : > { %3686 = vst.msk [vmem:[%s4838_s30 + $0x8c] sm:$0xf] %vm1432_vm1, %v3878_v36  ;;  %2362 = vmatmul.mubr.bf16.gmra.mrb[176].mxu1 %v1981_v31  ;;  %v1883_v31 = vld [vmem:[%s4482_s29 + $0x3a0] sm:$0xff]  ;;  %v1890_v36 = vld [vmem:[%s4482_s29 + $0x3d8] sm:$0xff] }
 0x3d6   : > { %3717 = vmatprep.mubr.msk.bf16.mxu1 %vm665_vm0, %v1984_v35  ;;  %v1888_v35 = vld [vmem:[%s4482_s29 + $0x3c8] sm:$0xff]  ;;  %v1993_v22 = vpack.c.bf16 %v1885_v34, %v1883_v31 }
 0x3d7   : > { %v1996_v23 = vpack.c.bf16 %v1890_v36, %v1888_v35  ;;  %v1907_v36 = vld [vmem:[%s4482_s29 + $0x460] sm:$0xff] }
 0x3d8   : > { %v1673_v42 = vpop.f32.mrb[72].mxu1 }
 0x3d9   : > { %v3879_v43 = vpack.c.bf16 %v1673_v42, %v1673_v42  ;;  %v1675_v44 = vpop.f32.mrb[73].mxu1 }
 0x3da   : > { %v1676_v49 = vpop.f32.mrb[74].mxu1  ;;  %v1887_v44 = vld [vmem:[%s4482_s29 + $0x3c0] sm:$0xff] }
 0x3db   : > { %3687 = vst.msk [vmem:[%s4838_s30 + $0x90] sm:$0xf] %vm1432_vm1, %v3879_v43  ;;  %v3880_v50 = vpack.c.bf16 %v1676_v49, %v1676_v49  ;;  %v1678_v33 = vpop.f32.mrb[75].mxu1  ;;  %v1892_v49 = vld [vmem:[%s4482_s29 + $0x3e8] sm:$0xff] }
 0x3dd   : > { %3688 = vst.msk [vmem:[%s4838_s30 + $0x94] sm:$0xf] %vm1432_vm1, %v3880_v50  ;;  %2370 = vmatmul.mubr.bf16.gmra.mrb[180].mxu1 %v1983_v45  ;;  %v1889_v45 = vld [vmem:[%s4482_s29 + $0x3d0] sm:$0xff] }
 0x3de   : > { %3718 = vmatprep.mubr.msk.bf16.mxu1 %vm665_vm0, %v1986_v32  ;;  %v1894_v32 = vld [vmem:[%s4482_s29 + $0x3f8] sm:$0xff]  ;;  %v1995_v48 = vpack.c.bf16 %v1889_v45, %v1887_v44 }
 0x3df   : > { %v1998_v52 = vpack.c.bf16 %v1894_v32, %v1892_v49  ;;  %v1911_v32 = vld [vmem:[%s4482_s29 + $0x480] sm:$0xff] }
 0x3e0   : > { %v1681_v56 = vpop.f32.mrb[76].mxu1 }
 0x3e1   : > { %v3881_v39 = vpack.c.bf16 %v1681_v56, %v1681_v56  ;;  %v1683_v57 = vpop.f32.mrb[77].mxu1 }
 0x3e2   : > { %v1684_v58 = vpop.f32.mrb[78].mxu1  ;;  %v1893_v57 = vld [vmem:[%s4482_s29 + $0x3f0] sm:$0xff] }
 0x3e3   : > { %3689 = vst.msk [vmem:[%s4838_s30 + $0x98] sm:$0xf] %vm1432_vm1, %v3881_v39  ;;  %v3882_v60 = vpack.c.bf16 %v1684_v58, %v1684_v58  ;;  %v1686_v63 = vpop.f32.mrb[79].mxu1  ;;  %v1891_v39 = vld [vmem:[%s4482_s29 + $0x3e0] sm:$0xff]  ;;  %v1898_v58 = vld [vmem:[%s4482_s29 + $0x418] sm:$0xff] }
 0x3e4   : > { %v1997_v63 = vpack.c.bf16 %v1893_v57, %v1891_v39 }
 0x3e5   : > { %3690 = vst.msk [vmem:[%s4838_s30 + $0x9c] sm:$0xf] %vm1432_vm1, %v3882_v60  ;;  %2378 = vmatmul.mubr.bf16.gmra.mrb[184].mxu1 %v1985_v40  ;;  %v1896_v40 = vld [vmem:[%s4482_s29 + $0x408] sm:$0xff] }
 0x3e6   : > { %3719 = vmatprep.mubr.msk.bf16.mxu1 %vm665_vm0, %v1988_v59  ;;  %v2000_v46 = vpack.c.bf16 %v1898_v58, %v1896_v40  ;;  %v1915_v58 = vld [vmem:[%s4482_s29 + $0x4a0] sm:$0xff] }
 0x3e8   : > { %v1689_v3 = vpop.f32.mrb[80].mxu1 }
 0x3e9   : > { %v3883_v4 = vpack.c.bf16 %v1689_v3, %v1689_v3  ;;  %v1691_v6 = vpop.f32.mrb[81].mxu1  ;;  %v1895_v3 = vld [vmem:[%s4482_s29 + $0x400] sm:$0xff] }
 0x3ea   : > { %v1692_v8 = vpop.f32.mrb[82].mxu1  ;;  %v1900_v6 = vld [vmem:[%s4482_s29 + $0x428] sm:$0xff] }
 0x3eb   : > { %3691 = vst.msk [vmem:[%s4838_s30 + $0xa0] sm:$0xf] %vm1432_vm1, %v3883_v4  ;;  %v3884_v9 = vpack.c.bf16 %v1692_v8, %v1692_v8  ;;  %v1694_v55 = vpop.f32.mrb[83].mxu1  ;;  %v1897_v4 = vld [vmem:[%s4482_s29 + $0x410] sm:$0xff] }
 0x3ed   : > { %3692 = vst.msk [vmem:[%s4838_s30 + $0xa4] sm:$0xf] %vm1432_vm1, %v3884_v9  ;;  %2386 = vmatmul.mubr.bf16.gmra.mrb[188].mxu1 %v1987_v7  ;;  %v1902_v7 = vld [vmem:[%s4482_s29 + $0x438] sm:$0xff]  ;;  %v1999_v9 = vpack.c.bf16 %v1897_v4, %v1895_v3 }
 0x3ee   : > { %3720 = vmatprep.mubr.msk.bf16.mxu1 %vm665_vm0, %v1990_v54  ;;  %v2002_v10 = vpack.c.bf16 %v1902_v7, %v1900_v6  ;;  %v1919_v7 = vld [vmem:[%s4482_s29 + $0x4c0] sm:$0xff] }
 0x3f0   : > { %v2179_v61 = vpop.f32.mrb[84].mxu1 }
 0x3f1   : > { %v2181_v62 = vpop.f32.mrb[85].mxu1 }
 0x3f2   : > { %v2182_v15 = vpop.f32.mrb[86].mxu1  ;;  %v1904_v62 = vld [vmem:[%s4482_s29 + $0x448] sm:$0xff] }
 0x3f3   : > { %v2514_v17 = vpack.c.bf16 %v2182_v15, %v2179_v61  ;;  %v2184_v18 = vpop.f32.mrb[87].mxu1  ;;  %v1901_v61 = vld [vmem:[%s4482_s29 + $0x430] sm:$0xff] }
 0x3f5   : > { %2557 = vmatpush1.bf16.msra.mxu0 %v2514_v17  ;;  %2394 = vmatmul.mubr.bf16.gmra.mrb[192].mxu1 %v1989_v14  ;;  %v1906_v14 = vld [vmem:[%s4482_s29 + $0x458] sm:$0xff]  ;;  %v2001_v17 = vpack.c.bf16 %v1901_v61, %v1899_v13 }
 0x3f6   : > { %2558 = vmatprep.subr.bf16.mxu0 %v4246_v0  ;;  %3721 = vmatprep.mubr.msk.bf16.mxu1 %vm665_vm0, %v1992_v16  ;;  %v2004_v5 = vpack.c.bf16 %v1906_v14, %v1904_v62  ;;  %v1923_v14 = vld [vmem:[%s4482_s29 + $0x4e0] sm:$0xff] }
 0x3f8   : > { %v2187_v24 = vpop.f32.mrb[88].mxu1 }
 0x3f9   : > { %v2189_v25 = vpop.f32.mrb[89].mxu1 }
 0x3fa   : > { %v2190_v27 = vpop.f32.mrb[90].mxu1  ;;  %v1908_v25 = vld [vmem:[%s4482_s29 + $0x468] sm:$0xff] }
 0x3fb   : > { %v2515_v29 = vpack.c.bf16 %v2190_v27, %v2187_v24  ;;  %v2192_v30 = vpop.f32.mrb[91].mxu1  ;;  %v1905_v24 = vld [vmem:[%s4482_s29 + $0x450] sm:$0xff] }
 0x3fd   : > { %2559 = vmatpush1.bf16.msra.mxu0 %v2515_v29  ;;  %2402 = vmatmul.mubr.bf16.gmra.mrb[196].mxu1 %v1991_v26  ;;  %v1910_v26 = vld [vmem:[%s4482_s29 + $0x478] sm:$0xff]  ;;  %v2003_v29 = vpack.c.bf16 %v1905_v24, %v1903_v21 }
 0x3fe   : > { %2560 = vmatprep.subr.bf16.mxu0 %v4246_v0  ;;  %3722 = vmatprep.mubr.msk.bf16.mxu1 %vm665_vm0, %v1994_v28  ;;  %v2006_v31 = vpack.c.bf16 %v1910_v26, %v1908_v25  ;;  %v1927_v26 = vld [vmem:[%s4482_s29 + $0x500] sm:$0xff] }
 0x400   : > { %v2195_v37 = vpop.f32.mrb[92].mxu1 }
 0x401   : > { %v2197_v38 = vpop.f32.mrb[93].mxu1 }
 0x402   : > { %v2198_v41 = vpop.f32.mrb[94].mxu1  ;;  %v1912_v38 = vld [vmem:[%s4482_s29 + $0x488] sm:$0xff] }
 0x403   : > { %v2516_v42 = vpack.c.bf16 %v2198_v41, %v2195_v37  ;;  %v2200_v43 = vpop.f32.mrb[95].mxu1  ;;  %v1909_v37 = vld [vmem:[%s4482_s29 + $0x470] sm:$0xff] }
 0x405   : > { %2561 = vmatpush1.bf16.msra.mxu0 %v2516_v42  ;;  %2410 = vmatmul.mubr.bf16.gmra.mrb[200].mxu1 %v1993_v22  ;;  %v1914_v22 = vld [vmem:[%s4482_s29 + $0x498] sm:$0xff]  ;;  %v2005_v42 = vpack.c.bf16 %v1909_v37, %v1907_v36 }
 0x406   : > { %2562 = vmatprep.subr.bf16.mxu0 %v4246_v0  ;;  %3723 = vmatprep.mubr.msk.bf16.mxu1 %vm665_vm0, %v1996_v23  ;;  %v2008_v44 = vpack.c.bf16 %v1914_v22, %v1912_v38  ;;  %v1931_v22 = vld [vmem:[%s4482_s29 + $0x520] sm:$0xff] }
 0x408   : > { %v2203_v50 = vpop.f32.mrb[96].mxu1 }
 0x409   : > { %v2205_v33 = vpop.f32.mrb[97].mxu1 }
 0x40a   : > { %v2206_v51 = vpop.f32.mrb[98].mxu1  ;;  %v1916_v33 = vld [vmem:[%s4482_s29 + $0x4a8] sm:$0xff] }
 0x40b   : > { %v2517_v53 = vpack.c.bf16 %v2206_v51, %v2203_v50  ;;  %v2208_v56 = vpop.f32.mrb[99].mxu1  ;;  %v1913_v50 = vld [vmem:[%s4482_s29 + $0x490] sm:$0xff] }
 0x40d   : > { %2563 = vmatpush1.bf16.msra.mxu0 %v2517_v53  ;;  %2418 = vmatmul.mubr.bf16.gmra.mrb[204].mxu1 %v1995_v48  ;;  %v1918_v48 = vld [vmem:[%s4482_s29 + $0x4b8] sm:$0xff]  ;;  %v2007_v53 = vpack.c.bf16 %v1913_v50, %v1911_v32 }
 0x40e   : > { %2564 = vmatprep.subr.bf16.mxu0 %v4246_v0  ;;  %3724 = vmatprep.mubr.msk.bf16.mxu1 %vm665_vm0, %v1998_v52  ;;  %v2010_v39 = vpack.c.bf16 %v1918_v48, %v1916_v33  ;;  %v5189_v48 = vld [vmem:[#allocation6 + $0x10] ss:$8 sps:$4 sm:$0xff]  }
 0x410   : > { %v2211_v59 = vpop.f32.mrb[100].mxu1 }
 0x411   : > { %v2213_v60 = vpop.f32.mrb[101].mxu1 }
 0x412   : > { %v2214_v1 = vpop.f32.mrb[102].mxu1  ;;  %v1920_v60 = vld [vmem:[%s4482_s29 + $0x4c8] sm:$0xff] }
 0x413   : > { %v2518_v2 = vpack.c.bf16 %v2214_v1, %v2211_v59  ;;  %v2216_v47 = vpop.f32.mrb[103].mxu1  ;;  %v1917_v59 = vld [vmem:[%s4482_s29 + $0x4b0] sm:$0xff] }
 0x415   : > { %2565 = vmatpush1.bf16.msra.mxu0 %v2518_v2  ;;  %2426 = vmatmul.mubr.bf16.gmra.mrb[208].mxu1 %v1997_v63  ;;  %v1922_v63 = vld [vmem:[%s4482_s29 + $0x4d8] sm:$0xff]  ;;  %v2009_v2 = vpack.c.bf16 %v1917_v59, %v1915_v58 }
 0x416   : > { %2566 = vmatprep.subr.bf16.mxu0 %v4246_v0  ;;  %3725 = vmatprep.mubr.msk.bf16.mxu1 %vm665_vm0, %v2000_v46  ;;  %v2012_v3 = vpack.c.bf16 %v1922_v63, %v1920_v60  ;;  %v5200_v59 = vld [vmem:[#allocation6 + $0x34] ss:$8 sps:$4 sm:$0xff]  }
 0x418   : > { %v2219_v8 = vpop.f32.mrb[104].mxu1 }
 0x419   : > { %v2221_v54 = vpop.f32.mrb[105].mxu1 }
 0x41a   : > { %v2222_v55 = vpop.f32.mrb[106].mxu1  ;;  %v1924_v54 = vld [vmem:[%s4482_s29 + $0x4e8] sm:$0xff] }
 0x41b   : > { %v2519_v11 = vpack.c.bf16 %v2222_v55, %v2219_v8  ;;  %v2224_v12 = vpop.f32.mrb[107].mxu1  ;;  %v1921_v8 = vld [vmem:[%s4482_s29 + $0x4d0] sm:$0xff] }
 0x41d   : > { %2567 = vmatpush1.bf16.msra.mxu0 %v2519_v11  ;;  %2434 = vmatmul.mubr.bf16.gmra.mrb[212].mxu1 %v1999_v9  ;;  %v1926_v9 = vld [vmem:[%s4482_s29 + $0x4f8] sm:$0xff]  ;;  %v2011_v11 = vpack.c.bf16 %v1921_v8, %v1919_v7 }
 0x41e   : > { %2568 = vmatprep.subr.bf16.mxu0 %v4246_v0  ;;  %3726 = vmatprep.mubr.msk.bf16.mxu1 %vm665_vm0, %v2002_v10  ;;  %v2014_v13 = vpack.c.bf16 %v1926_v9, %v1924_v54  ;;  %v5213_v54 = vld [vmem:[#allocation6 + $0x40] ss:$8 sps:$4 sm:$0xff]  }
 0x420   : > { %v2227_v15 = vpop.f32.mrb[108].mxu1 }
 0x421   : > { %v2229_v16 = vpop.f32.mrb[109].mxu1 }
 0x422   : > { %v2230_v18 = vpop.f32.mrb[110].mxu1  ;;  %v1928_v16 = vld [vmem:[%s4482_s29 + $0x508] sm:$0xff] }
 0x423   : > { %v2520_v19 = vpack.c.bf16 %v2230_v18, %v2227_v15  ;;  %v2232_v20 = vpop.f32.mrb[111].mxu1  ;;  %v1925_v15 = vld [vmem:[%s4482_s29 + $0x4f0] sm:$0xff] }
 0x425   : > { %2569 = vmatpush1.bf16.msra.mxu0 %v2520_v19  ;;  %2442 = vmatmul.mubr.bf16.gmra.mrb[216].mxu1 %v2001_v17  ;;  %v1930_v17 = vld [vmem:[%s4482_s29 + $0x518] sm:$0xff]  ;;  %v2013_v19 = vpack.c.bf16 %v1925_v15, %v1923_v14  ;;  %v5224_v14 = vld [vmem:[#allocation6 + $0x64] ss:$8 sps:$4 sm:$0xff]  }
 0x426   : > { %2570 = vmatprep.subr.bf16.mxu0 %v4246_v0  ;;  %3727 = vmatprep.mubr.msk.bf16.mxu1 %vm665_vm0, %v2004_v5  ;;  %v2016_v21 = vpack.c.bf16 %v1930_v17, %v1928_v16 }
 0x428   : > { %v2235_v27 = vpop.f32.mrb[112].mxu1 }
 0x429   : > { %v2237_v28 = vpop.f32.mrb[113].mxu1 }
 0x42a   : > { %v2238_v30 = vpop.f32.mrb[114].mxu1  ;;  %v1932_v28 = vld [vmem:[%s4482_s29 + $0x528] sm:$0xff] }
 0x42b   : > { %v2521_v34 = vpack.c.bf16 %v2238_v30, %v2235_v27  ;;  %v2240_v35 = vpop.f32.mrb[115].mxu1  ;;  %v1929_v27 = vld [vmem:[%s4482_s29 + $0x510] sm:$0xff] }
 0x42d   : > { %2571 = vmatpush1.bf16.msra.mxu0 %v2521_v34  ;;  %2450 = vmatmul.mubr.bf16.gmra.mrb[220].mxu1 %v2003_v29  ;;  %v1934_v29 = vld [vmem:[%s4482_s29 + $0x538] sm:$0xff]  ;;  %v2015_v34 = vpack.c.bf16 %v1929_v27, %v1927_v26 }
 0x42e   : > { %3728 = vmatprep.mubr.msk.bf16.mxu1 %vm665_vm0, %v2006_v31  ;;  %2572 = vmatprep.subr.bf16.mxu0 %v4246_v0  ;;  %v2018_v36 = vpack.c.bf16 %v1934_v29, %v1932_v28 }
 0x430   : > { %v2243_v41 = vpop.f32.mrb[116].mxu1 }
 0x431   : > { %v2245_v23 = vpop.f32.mrb[117].mxu1 }
 0x432   : > { %v2246_v43 = vpop.f32.mrb[118].mxu1 }
 0x433   : > { %v2522_v45 = vpack.c.bf16 %v2246_v43, %v2243_v41  ;;  %v2248_v49 = vpop.f32.mrb[119].mxu1  ;;  %v1933_v41 = vld [vmem:[%s4482_s29 + $0x530] sm:$0xff] }
 0x435   : > { %2458 = vmatmul.mubr.bf16.gmra.mrb[224].mxu1 %v2005_v42  ;;  %2573 = vmatpush1.bf16.msra.mxu0 %v2522_v45  ;;  %v5181_v42 = vld [vmem:[#allocation6] ss:$8 sps:$4 sm:$0xff]   ;;  %v5184_v45 = vld [vmem:[#allocation6 + $0x14] ss:$8 sps:$4 sm:$0xff]  }
 0x436   : > { %3729 = vmatprep.mubr.msk.bf16.mxu1 %vm665_vm0, %v2008_v44  ;;  %2574 = vmatprep.subr.bf16.mxu0 %v4246_v0  ;;  %v2017_v44 = vpack.c.bf16 %v1933_v41, %v1931_v22 }
 0x438   : > { %v2251_v51 = vpop.f32.mrb[120].mxu1 }
 0x439   : > { %v2253_v52 = vpop.f32.mrb[121].mxu1 }
 0x43a   : > { %v2254_v56 = vpop.f32.mrb[122].mxu1  ;;  %v5192_v52 = vld [vmem:[#allocation6 + $0x24] ss:$8 sps:$4 sm:$0xff]  }
 0x43b   : > { %v2523_v57 = vpack.c.bf16 %v2254_v56, %v2251_v51  ;;  %v2256_v40 = vpop.f32.mrb[123].mxu1 }
 0x43c   : > { %v5197_v40 = vld [vmem:[#allocation6 + $0x20] ss:$8 sps:$4 sm:$0xff]  }
 0x43d   : > { %2466 = vmatmul.mubr.bf16.gmra.mrb[228].mxu1 %v2007_v53  ;;  %2575 = vmatpush1.bf16.msra.mxu0 %v2523_v57 }
 0x43e   : > { %3730 = vmatprep.mubr.msk.bf16.mxu1 %vm665_vm0, %v2010_v39  ;;  %2576 = vmatprep.subr.bf16.mxu0 %v4246_v0 }
 0x440   : > { %v2259_v1 = vpop.f32.mrb[124].mxu1 }
 0x441   : > { %v2261_v46 = vpop.f32.mrb[125].mxu1 }
 0x442   : > { %v2262_v47 = vpop.f32.mrb[126].mxu1 }
 0x443   : > { %v2524_v4 = vpack.c.bf16 %v2262_v47, %v2259_v1  ;;  %v2264_v6 = vpop.f32.mrb[127].mxu1 }
 0x445   : > { %2474 = vmatmul.mubr.bf16.gmra.mrb[232].mxu1 %v2009_v2  ;;  %2577 = vmatpush1.bf16.msra.mxu0 %v2524_v4  ;;  %v5205_v2 = vld [vmem:[#allocation6 + $0x30] ss:$8 sps:$4 sm:$0xff]  }
 0x446   : > { %3731 = vmatprep.mubr.msk.bf16.mxu1 %vm665_vm0, %v2012_v3  ;;  %2578 = vmatprep.subr.bf16.mxu0 %v4246_v0  ;;  %v5208_v3 = vld [vmem:[#allocation6 + $0x44] ss:$8 sps:$4 sm:$0xff]  }
 0x448   : > { %v2267_v55 = vpop.f32.mrb[128].mxu1 }
 0x449   : > { %v2269_v10 = vpop.f32.mrb[129].mxu1 }
 0x44a   : > { %v2270_v12 = vpop.f32.mrb[130].mxu1 }
 0x44b   : > { %v2525_v61 = vpack.c.bf16 %v2270_v12, %v2267_v55  ;;  %v2272_v62 = vpop.f32.mrb[131].mxu1  ;;  %v5216_v55 = vld [vmem:[#allocation6 + $0x54] ss:$8 sps:$4 sm:$0xff]  }
 0x44d   : > { %2482 = vmatmul.mubr.bf16.gmra.mrb[236].mxu1 %v2011_v11  ;;  %2579 = vmatpush1.bf16.msra.mxu0 %v2525_v61  ;;  %v5221_v61 = vld [vmem:[#allocation6 + $0x50] ss:$8 sps:$4 sm:$0xff]  }
 0x44e   : > { %3732 = vmatprep.mubr.msk.bf16.mxu1 %vm665_vm0, %v2014_v13  ;;  %2580 = vmatprep.subr.bf16.mxu0 %v4246_v0 }
 0x450   : > { %v2275_v18 = vpop.f32.mrb[132].mxu1 }
 0x451   : > { %v2277_v5 = vpop.f32.mrb[133].mxu1 }
 0x452   : > { %v2278_v20 = vpop.f32.mrb[134].mxu1  ;;  %v5229_v5 = vld [vmem:[#allocation6 + $0x60] ss:$8 sps:$4 sm:$0xff]  }
 0x453   : > { %v2526_v24 = vpack.c.bf16 %v2278_v20, %v2275_v18  ;;  %v2280_v25 = vpop.f32.mrb[135].mxu1  ;;  %v5232_v20 = vld [vmem:[#allocation6 + $0x4] ss:$8 sps:$4 sm:$0xff]  }
 0x455   : > { %2490 = vmatmul.mubr.bf16.gmra.mrb[240].mxu1 %v2013_v19  ;;  %2581 = vmatpush1.bf16.msra.mxu0 %v2526_v24 }
 0x456   : > { %3733 = vmatprep.mubr.msk.bf16.mxu1 %vm665_vm0, %v2016_v21  ;;  %2582 = vmatprep.subr.bf16.mxu0 %v4246_v0 }
 0x458   : > { %v2283_v30 = vpop.f32.mrb[136].mxu1 }
 0x459   : > { %v2285_v31 = vpop.f32.mrb[137].mxu1 }
 0x45a   : > { %v2286_v35 = vpop.f32.mrb[138].mxu1 }
 0x45b   : > { %v2527_v37 = vpack.c.bf16 %v2286_v35, %v2283_v30  ;;  %v2288_v38 = vpop.f32.mrb[139].mxu1 }
 0x45d   : > { %2498 = vmatmul.mubr.bf16.gmra.mrb[244].mxu1 %v2015_v34  ;;  %2583 = vmatpush1.bf16.msra.mxu0 %v2527_v37 }
 0x45e   : > { %3734 = vmatprep.mubr.msk.bf16.mxu1 %vm665_vm0, %v2018_v36  ;;  %2716 = vmatprep.subr.bf16.mxu0 %v4246_v0 }
 0x460   : > { %v2291_v23 = vpop.f32.mrb[140].mxu1  ;;  %2589 = vmatmul.mubr.bf16.vlgmr.msra.gmra.mrb[168].mxu0 %v5181_v42 }
 0x461   : > { %v2293_v43 = vpop.f32.mrb[141].mxu1  ;;  %3736 = vmatprep.mubr.msk.bf16.mxu0 %vm665_vm0, %v5184_v45 }
 0x462   : > { %v2294_v49 = vpop.f32.mrb[142].mxu1 }
 0x463   : > { %v2528_v32 = vpack.c.bf16 %v2294_v49, %v2291_v23  ;;  %v2296_v50 = vpop.f32.mrb[143].mxu1 }
 0x465   : > { %2506 = vmatmul.mubr.bf16.gmra.mrb[248].mxu1 %v2017_v44  ;;  %2717 = vmatpush1.bf16.msra.mxu0 %v2528_v32 }
 0x466   : > { %2718 = vmatprep.subr.bf16.mxu0 %v4246_v0 }
 0x468   : > { %v2299_v33 = vpop.f32.mrb[144].mxu1  ;;  %2597 = vmatmul.mubr.bf16.gmra.mrb[172].mxu0 %v5189_v48 }
 0x469   : > { %v2301_v51 = vpop.f32.mrb[145].mxu1  ;;  %3737 = vmatprep.mubr.msk.bf16.mxu0 %vm665_vm0, %v5192_v52 }
 0x46a   : > { %v2302_v53 = vpop.f32.mrb[146].mxu1 }
 0x46b   : > { %v2529_v56 = vpack.c.bf16 %v2302_v53, %v2299_v33  ;;  %v2304_v39 = vpop.f32.mrb[147].mxu1 }
 0x46d   : > { %2719 = vmatpush1.bf16.msra.mxu0 %v2529_v56 }
 0x46e   : > { %2720 = vmatprep.subr.bf16.mxu0 %v4246_v0 }
 0x470   : > { %v2307_v57 = vpop.f32.mrb[148].mxu1  ;;  %2605 = vmatmul.mubr.bf16.gmra.mrb[176].mxu0 %v5197_v40 }
 0x471   : > { %v2309_v58 = vpop.f32.mrb[149].mxu1  ;;  %3738 = vmatprep.mubr.msk.bf16.mxu0 %vm665_vm0, %v5200_v59 }
 0x472   : > { %v2310_v60 = vpop.f32.mrb[150].mxu1 }
 0x473   : > { %v2530_v63 = vpack.c.bf16 %v2310_v60, %v2307_v57  ;;  %v2312_v1 = vpop.f32.mrb[151].mxu1 }
 0x475   : > { %2721 = vmatpush1.bf16.msra.mxu0 %v2530_v63 }
 0x476   : > { %2722 = vmatprep.subr.bf16.mxu0 %v4246_v0 }
 0x478   : > { %v2315_v46 = vpop.f32.mrb[152].mxu1  ;;  %2613 = vmatmul.mubr.bf16.gmra.mrb[180].mxu0 %v5205_v2 }
 0x479   : > { %v2317_v47 = vpop.f32.mrb[153].mxu1  ;;  %3739 = vmatprep.mubr.msk.bf16.mxu0 %vm665_vm0, %v5208_v3 }
 0x47a   : > { %v2318_v4 = vpop.f32.mrb[154].mxu1 }
 0x47b   : > { %v2531_v6 = vpack.c.bf16 %v2318_v4, %v2315_v46  ;;  %v2320_v7 = vpop.f32.mrb[155].mxu1 }
 0x47d   : > { %2723 = vmatpush1.bf16.msra.mxu0 %v2531_v6 }
 0x47e   : > { %2724 = vmatprep.subr.bf16.mxu0 %v4246_v0 }
 0x480   : > { %v2323_v8 = vpop.f32.mrb[156].mxu1  ;;  %2621 = vmatmul.mubr.bf16.gmra.mrb[184].mxu0 %v5213_v54 }
 0x481   : > { %v2325_v9 = vpop.f32.mrb[157].mxu1  ;;  %3740 = vmatprep.mubr.msk.bf16.mxu0 %vm665_vm0, %v5216_v55 }
 0x482   : > { %v2326_v10 = vpop.f32.mrb[158].mxu1 }
 0x483   : > { %v2532_v11 = vpack.c.bf16 %v2326_v10, %v2323_v8  ;;  %v2328_v12 = vpop.f32.mrb[159].mxu1 }
 0x485   : > { %2725 = vmatpush1.bf16.msra.mxu0 %v2532_v11 }
 0x486   : > { %2726 = vmatprep.subr.bf16.mxu0 %v4246_v0 }
 0x488   : > { %v2331_v13 = vpop.f32.mrb[160].mxu1  ;;  %2629 = vmatmul.mubr.bf16.gmra.mrb[188].mxu0 %v5221_v61 }
 0x489   : > { %v2333_v62 = vpop.f32.mrb[161].mxu1  ;;  %3741 = vmatprep.mubr.msk.bf16.mxu0 %vm665_vm0, %v5224_v14 }
 0x48a   : > { %v2334_v15 = vpop.f32.mrb[162].mxu1 }
 0x48b   : > { %v2533_v16 = vpack.c.bf16 %v2334_v15, %v2331_v13  ;;  %v2336_v17 = vpop.f32.mrb[163].mxu1 }
 0x48d   : > { %2727 = vmatpush1.bf16.msra.mxu0 %v2533_v16 }
 0x48e   : > { %2728 = vmatprep.subr.bf16.mxu0 %v4246_v0 }
 0x490   : > { %v2339_v18 = vpop.f32.mrb[164].mxu1  ;;  %2637 = vmatmul.mubr.bf16.gmra.mrb[192].mxu0 %v5229_v5 }
 0x491   : > { %v2341_v19 = vpop.f32.mrb[165].mxu1  ;;  %3770 = vmatprep.mubr.msk.bf16.mxu0 %vm665_vm0, %v5232_v20 }
 0x492   : > { %v2342_v21 = vpop.f32.mrb[166].mxu1 }
 0x493   : > { %v2534_v24 = vpack.c.bf16 %v2342_v21, %v2339_v18  ;;  %v2344_v25 = vpop.f32.mrb[167].mxu1 }
 0x495   : > { %2729 = vmatpush1.bf16.msra.mxu0 %v2534_v24 }
 0x496   : > { %2730 = vmatprep.subr.bf16.mxu0 %v4246_v0 }
 0x498   : > { %v2347_v26 = vpop.f32.mrb[168].mxu1 }
 0x499   : > { %v2349_v27 = vpop.f32.mrb[169].mxu1 }
 0x49a   : > { %v2350_v28 = vpop.f32.mrb[170].mxu1 }
 0x49b   : > { %v2535_v29 = vpack.c.bf16 %v2350_v28, %v2347_v26  ;;  %v2352_v30 = vpop.f32.mrb[171].mxu1 }
 0x49d   : > { %2731 = vmatpush1.bf16.msra.mxu0 %v2535_v29 }
 0x49e   : > { %2732 = vmatprep.subr.bf16.mxu0 %v4246_v0 }
 0x4a0   : > { %v2355_v31 = vpop.f32.mrb[172].mxu1 }
 0x4a1   : > { %v2357_v34 = vpop.f32.mrb[173].mxu1 }
 0x4a2   : > { %v2358_v35 = vpop.f32.mrb[174].mxu1 }
 0x4a3   : > { %v2536_v36 = vpack.c.bf16 %v2358_v35, %v2355_v31  ;;  %v2360_v37 = vpop.f32.mrb[175].mxu1 }
 0x4a5   : > { %2733 = vmatpush1.bf16.msra.mxu0 %v2536_v36 }
 0x4a6   : > { %2734 = vmatprep.subr.bf16.mxu0 %v4246_v0 }
 0x4a8   : > { %v2363_v38 = vpop.f32.mrb[176].mxu1 }
 0x4a9   : > { %v2365_v22 = vpop.f32.mrb[177].mxu1 }
 0x4aa   : > { %v2366_v41 = vpop.f32.mrb[178].mxu1 }
 0x4ab   : > { %v2537_v23 = vpack.c.bf16 %v2366_v41, %v2363_v38  ;;  %v2368_v43 = vpop.f32.mrb[179].mxu1 }
 0x4ad   : > { %2735 = vmatpush1.bf16.msra.mxu0 %v2537_v23 }
 0x4ae   : > { %2736 = vmatprep.subr.bf16.mxu0 %v4246_v0 }
 0x4b0   : > { %v2371_v44 = vpop.f32.mrb[180].mxu1 }
 0x4b1   : > { %v2373_v49 = vpop.f32.mrb[181].mxu1 }
 0x4b2   : > { %v2374_v32 = vpop.f32.mrb[182].mxu1 }
 0x4b3   : > { %v2538_v50 = vpack.c.bf16 %v2374_v32, %v2371_v44  ;;  %v2376_v33 = vpop.f32.mrb[183].mxu1 }
 0x4b5   : > { %2737 = vmatpush1.bf16.msra.mxu0 %v2538_v50 }
 0x4b6   : > { %2738 = vmatprep.subr.bf16.mxu0 %v4246_v0 }
 0x4b8   : > { %v2379_v51 = vpop.f32.mrb[184].mxu1 }
 0x4b9   : > { %v2381_v53 = vpop.f32.mrb[185].mxu1 }
 0x4ba   : > { %v2382_v56 = vpop.f32.mrb[186].mxu1 }
 0x4bb   : > { %v2539_v39 = vpack.c.bf16 %v2382_v56, %v2379_v51  ;;  %v2384_v57 = vpop.f32.mrb[187].mxu1 }
 0x4bd   : > { %2739 = vmatpush1.bf16.msra.mxu0 %v2539_v39 }
 0x4be   : > { %2740 = vmatprep.subr.bf16.mxu0 %v4246_v0 }
 0x4c0   : > { %v2387_v58 = vpop.f32.mrb[188].mxu1 }
 0x4c1   : > { %v2389_v60 = vpop.f32.mrb[189].mxu1 }
 0x4c2   : > { %v2390_v63 = vpop.f32.mrb[190].mxu1 }
 0x4c3   : > { %v2540_v1 = vpack.c.bf16 %v2390_v63, %v2387_v58  ;;  %v2392_v46 = vpop.f32.mrb[191].mxu1 }
 0x4c5   : > { %2741 = vmatpush1.bf16.msra.mxu0 %v2540_v1 }
 0x4c6   : > { %2742 = vmatprep.subr.bf16.mxu0 %v4246_v0 }
 0x4c8   : > { %v2395_v47 = vpop.f32.mrb[192].mxu1 }
 0x4c9   : > { %v2397_v4 = vpop.f32.mrb[193].mxu1 }
 0x4ca   : > { %v2398_v6 = vpop.f32.mrb[194].mxu1 }
 0x4cb   : > { %v2541_v7 = vpack.c.bf16 %v2398_v6, %v2395_v47  ;;  %v2400_v8 = vpop.f32.mrb[195].mxu1 }
 0x4cd   : > { %2743 = vmatpush1.bf16.msra.mxu0 %v2541_v7 }
 0x4ce   : > { %2876 = vmatprep.subr.bf16.mxu0 %v4246_v0 }
 0x4d0   : > { %v2403_v9 = vpop.f32.mrb[196].mxu1  ;;  %2749 = vmatmul.mubr.bf16.vlgmr.msra.gmra.mrb[196].mxu0 %v5181_v42 }
 0x4d1   : > { %v2405_v10 = vpop.f32.mrb[197].mxu1  ;;  %3771 = vmatprep.mubr.msk.bf16.mxu0 %vm665_vm0, %v5184_v45 }
 0x4d2   : > { %v2406_v11 = vpop.f32.mrb[198].mxu1 }
 0x4d3   : > { %v2542_v12 = vpack.c.bf16 %v2406_v11, %v2403_v9  ;;  %v2408_v13 = vpop.f32.mrb[199].mxu1 }
 0x4d5   : > { %2877 = vmatpush1.bf16.msra.mxu0 %v2542_v12 }
 0x4d6   : > { %2878 = vmatprep.subr.bf16.mxu0 %v4246_v0 }
 0x4d8   : > { %v2411_v62 = vpop.f32.mrb[200].mxu1  ;;  %2757 = vmatmul.mubr.bf16.gmra.mrb[200].mxu0 %v5189_v48 }
 0x4d9   : > { %v2413_v15 = vpop.f32.mrb[201].mxu1  ;;  %3772 = vmatprep.mubr.msk.bf16.mxu0 %vm665_vm0, %v5192_v52 }
 0x4da   : > { %v2414_v16 = vpop.f32.mrb[202].mxu1 }
 0x4db   : > { %v2543_v17 = vpack.c.bf16 %v2414_v16, %v2411_v62  ;;  %v2416_v18 = vpop.f32.mrb[203].mxu1 }
 0x4dd   : > { %2879 = vmatpush1.bf16.msra.mxu0 %v2543_v17 }
 0x4de   : > { %2880 = vmatprep.subr.bf16.mxu0 %v4246_v0 }
 0x4e0   : > { %v2419_v19 = vpop.f32.mrb[204].mxu1  ;;  %2765 = vmatmul.mubr.bf16.gmra.mrb[204].mxu0 %v5197_v40 }
 0x4e1   : > { %v2421_v21 = vpop.f32.mrb[205].mxu1  ;;  %3773 = vmatprep.mubr.msk.bf16.mxu0 %vm665_vm0, %v5200_v59 }
 0x4e2   : > { %v2422_v24 = vpop.f32.mrb[206].mxu1 }
 0x4e3   : > { %v2544_v25 = vpack.c.bf16 %v2422_v24, %v2419_v19  ;;  %v2424_v26 = vpop.f32.mrb[207].mxu1 }
 0x4e5   : > { %2881 = vmatpush1.bf16.msra.mxu0 %v2544_v25 }
 0x4e6   : > { %2882 = vmatprep.subr.bf16.mxu0 %v4246_v0 }
 0x4e8   : > { %v2427_v27 = vpop.f32.mrb[208].mxu1  ;;  %2773 = vmatmul.mubr.bf16.gmra.mrb[208].mxu0 %v5205_v2 }
 0x4e9   : > { %v2429_v28 = vpop.f32.mrb[209].mxu1  ;;  %3774 = vmatprep.mubr.msk.bf16.mxu0 %vm665_vm0, %v5208_v3 }
 0x4ea   : > { %v2430_v29 = vpop.f32.mrb[210].mxu1 }
 0x4eb   : > { %v2545_v30 = vpack.c.bf16 %v2430_v29, %v2427_v27  ;;  %v2432_v31 = vpop.f32.mrb[211].mxu1 }
 0x4ed   : > { %2883 = vmatpush1.bf16.msra.mxu0 %v2545_v30 }
 0x4ee   : > { %2884 = vmatprep.subr.bf16.mxu0 %v4246_v0 }
 0x4f0   : > { %v2435_v34 = vpop.f32.mrb[212].mxu1  ;;  %2781 = vmatmul.mubr.bf16.gmra.mrb[212].mxu0 %v5213_v54 }
 0x4f1   : > { %v2437_v35 = vpop.f32.mrb[213].mxu1  ;;  %3775 = vmatprep.mubr.msk.bf16.mxu0 %vm665_vm0, %v5216_v55 }
 0x4f2   : > { %v2438_v36 = vpop.f32.mrb[214].mxu1 }
 0x4f3   : > { %v2546_v37 = vpack.c.bf16 %v2438_v36, %v2435_v34  ;;  %v2440_v38 = vpop.f32.mrb[215].mxu1 }
 0x4f5   : > { %2885 = vmatpush1.bf16.msra.mxu0 %v2546_v37 }
 0x4f6   : > { %2886 = vmatprep.subr.bf16.mxu0 %v4246_v0 }
 0x4f8   : > { %v2443_v22 = vpop.f32.mrb[216].mxu1  ;;  %2789 = vmatmul.mubr.bf16.gmra.mrb[216].mxu0 %v5221_v61 }
 0x4f9   : > { %v2445_v41 = vpop.f32.mrb[217].mxu1  ;;  %3776 = vmatprep.mubr.msk.bf16.mxu0 %vm665_vm0, %v5224_v14 }
 0x4fa   : > { %v2446_v23 = vpop.f32.mrb[218].mxu1 }
 0x4fb   : > { %v2547_v43 = vpack.c.bf16 %v2446_v23, %v2443_v22  ;;  %v2448_v44 = vpop.f32.mrb[219].mxu1 }
 0x4fd   : > { %2887 = vmatpush1.bf16.msra.mxu0 %v2547_v43 }
 0x4fe   : > { %2888 = vmatprep.subr.bf16.mxu0 %v4246_v0 }
 0x500   : > { %v2451_v49 = vpop.f32.mrb[220].mxu1  ;;  %2797 = vmatmul.mubr.bf16.gmra.mrb[220].mxu0 %v5229_v5 }
 0x501   : > { %v2453_v32 = vpop.f32.mrb[221].mxu1  ;;  %3805 = vmatprep.mubr.msk.bf16.mxu0 %vm665_vm0, %v5232_v20 }
 0x502   : > { %v2454_v50 = vpop.f32.mrb[222].mxu1 }
 0x503   : > { %v2548_v33 = vpack.c.bf16 %v2454_v50, %v2451_v49  ;;  %v2456_v51 = vpop.f32.mrb[223].mxu1 }
 0x505   : > { %2889 = vmatpush1.bf16.msra.mxu0 %v2548_v33 }
 0x506   : > { %2890 = vmatprep.subr.bf16.mxu0 %v4246_v0 }
 0x508   : > { %v2459_v53 = vpop.f32.mrb[224].mxu1 }
 0x509   : > { %v2461_v56 = vpop.f32.mrb[225].mxu1 }
 0x50a   : > { %v2462_v39 = vpop.f32.mrb[226].mxu1 }
 0x50b   : > { %v2549_v57 = vpack.c.bf16 %v2462_v39, %v2459_v53  ;;  %v2464_v58 = vpop.f32.mrb[227].mxu1 }
 0x50d   : > { %2891 = vmatpush1.bf16.msra.mxu0 %v2549_v57 }
 0x50e   : > { %2892 = vmatprep.subr.bf16.mxu0 %v4246_v0 }
 0x510   : > { %v2467_v60 = vpop.f32.mrb[228].mxu1 }
 0x511   : > { %v2469_v63 = vpop.f32.mrb[229].mxu1 }
 0x512   : > { %v2470_v1 = vpop.f32.mrb[230].mxu1 }
 0x513   : > { %v2550_v46 = vpack.c.bf16 %v2470_v1, %v2467_v60  ;;  %v2472_v47 = vpop.f32.mrb[231].mxu1 }
 0x515   : > { %2893 = vmatpush1.bf16.msra.mxu0 %v2550_v46 }
 0x516   : > { %2894 = vmatprep.subr.bf16.mxu0 %v4246_v0 }
 0x518   : > { %v2475_v20 = vpop.f32.mrb[232].mxu1 }
 0x519   : > { %v2477_v4 = vpop.f32.mrb[233].mxu1 }
 0x51a   : > { %v2478_v6 = vpop.f32.mrb[234].mxu1 }
 0x51b   : > { %v2551_v7 = vpack.c.bf16 %v2478_v6, %v2475_v20  ;;  %v2480_v8 = vpop.f32.mrb[235].mxu1 }
 0x51d   : > { %2895 = vmatpush1.bf16.msra.mxu0 %v2551_v7 }
 0x51e   : > { %2896 = vmatprep.subr.bf16.mxu0 %v4246_v0 }
 0x520   : > { %v2483_v9 = vpop.f32.mrb[236].mxu1 }
 0x521   : > { %v2485_v10 = vpop.f32.mrb[237].mxu1 }
 0x522   : > { %v2486_v11 = vpop.f32.mrb[238].mxu1 }
 0x523   : > { %v2552_v12 = vpack.c.bf16 %v2486_v11, %v2483_v9  ;;  %v2488_v13 = vpop.f32.mrb[239].mxu1 }
 0x525   : > { %2897 = vmatpush1.bf16.msra.mxu0 %v2552_v12 }
 0x526   : > { %2898 = vmatprep.subr.bf16.mxu0 %v4246_v0 }
 0x528   : > { %v2491_v62 = vpop.f32.mrb[240].mxu1 }
 0x529   : > { %v2493_v15 = vpop.f32.mrb[241].mxu1 }
 0x52a   : > { %v2494_v16 = vpop.f32.mrb[242].mxu1 }
 0x52b   : > { %v2553_v17 = vpack.c.bf16 %v2494_v16, %v2491_v62  ;;  %v2496_v18 = vpop.f32.mrb[243].mxu1 }
 0x52d   : > { %2899 = vmatpush1.bf16.msra.mxu0 %v2553_v17 }
 0x52e   : > { %2900 = vmatprep.subr.bf16.mxu0 %v4246_v0 }
 0x530   : > { %v2499_v19 = vpop.f32.mrb[244].mxu1 }
 0x531   : > { %v2501_v21 = vpop.f32.mrb[245].mxu1 }
 0x532   : > { %v2502_v24 = vpop.f32.mrb[246].mxu1 }
 0x533   : > { %v2554_v25 = vpack.c.bf16 %v2502_v24, %v2499_v19  ;;  %v2504_v26 = vpop.f32.mrb[247].mxu1  ;;  %v2590_v27 = vpop.f32.mrb[168].mxu0 }
 0x534   : > { %v3885_v28 = vpack.c.bf16 %v2590_v27, %v2590_v27  ;;  %v2592_v29 = vpop.f32.mrb[169].mxu0 }
 0x535   : > { %2901 = vmatpush1.bf16.msra.mxu0 %v2554_v25  ;;  %v2593_v30 = vpop.f32.mrb[170].mxu0 }
 0x536   : > { %2902 = vmatprep.subr.bf16.mxu0 %v4246_v0  ;;  %3756 = vst.msk [vmem:[%s4838_s30 + $0xa8] sm:$0xf] %vm1432_vm1, %v3885_v28  ;;  %v3886_v31 = vpack.c.bf16 %v2593_v30, %v2593_v30  ;;  %v2595_v34 = vpop.f32.mrb[171].mxu0 }
 0x538   : > { %v2507_v35 = vpop.f32.mrb[248].mxu1  ;;  %3757 = vst.msk [vmem:[%s4838_s30 + $0xac] sm:$0xf] %vm1432_vm1, %v3886_v31 }
 0x539   : > { %v2509_v36 = vpop.f32.mrb[249].mxu1 }
 0x53a   : > { %v2510_v37 = vpop.f32.mrb[250].mxu1 }
 0x53b   : > { %v2555_v38 = vpack.c.bf16 %v2510_v37, %v2507_v35  ;;  %v2512_v22 = vpop.f32.mrb[251].mxu1  ;;  %v2598_v41 = vpop.f32.mrb[172].mxu0 }
 0x53c   : > { %v3887_v23 = vpack.c.bf16 %v2598_v41, %v2598_v41  ;;  %v2600_v43 = vpop.f32.mrb[173].mxu0 }
 0x53d   : > { %2903 = vmatpush1.bf16.msra.mxu0 %v2555_v38  ;;  %v2601_v44 = vpop.f32.mrb[174].mxu0 }
 0x53e   : > { %3758 = vst.msk [vmem:[%s4838_s30 + $0xb0] sm:$0xf] %vm1432_vm1, %v3887_v23  ;;  %v3888_v0 = vpack.c.bf16 %v2601_v44, %v2601_v44  ;;  %v2603_v49 = vpop.f32.mrb[175].mxu0 }
 0x540   : > { %2909 = vmatmul.mubr.bf16.vlgmr.msra.gmra.mrb[224].mxu0 %v5181_v42  ;;  %3759 = vst.msk [vmem:[%s4838_s30 + $0xb4] sm:$0xf] %vm1432_vm1, %v3888_v0 }
 0x541   : > { %3806 = vmatprep.mubr.msk.bf16.mxu0 %vm665_vm0, %v5184_v45 }
 0x543   : > { %v2606_v32 = vpop.f32.mrb[176].mxu0 }
 0x544   : > { %v3889_v50 = vpack.c.bf16 %v2606_v32, %v2606_v32  ;;  %v2608_v33 = vpop.f32.mrb[177].mxu0 }
 0x545   : > { %v2609_v51 = vpop.f32.mrb[178].mxu0 }
 0x546   : > { %3760 = vst.msk [vmem:[%s4838_s30 + $0xb8] sm:$0xf] %vm1432_vm1, %v3889_v50  ;;  %v3890_v53 = vpack.c.bf16 %v2609_v51, %v2609_v51  ;;  %v2611_v56 = vpop.f32.mrb[179].mxu0 }
 0x548   : > { %2917 = vmatmul.mubr.bf16.gmra.mrb[228].mxu0 %v5189_v48  ;;  %3761 = vst.msk [vmem:[%s4838_s30 + $0xbc] sm:$0xf] %vm1432_vm1, %v3890_v53 }
 0x549   : > { %3807 = vmatprep.mubr.msk.bf16.mxu0 %vm665_vm0, %v5192_v52 }
 0x54b   : > { %v2614_v42 = vpop.f32.mrb[180].mxu0 }
 0x54c   : > { %v3891_v39 = vpack.c.bf16 %v2614_v42, %v2614_v42  ;;  %v2616_v45 = vpop.f32.mrb[181].mxu0 }
 0x54d   : > { %v2617_v57 = vpop.f32.mrb[182].mxu0 }
 0x54e   : > { %3762 = vst.msk [vmem:[%s4838_s30 + $0xc0] sm:$0xf] %vm1432_vm1, %v3891_v39  ;;  %v3892_v58 = vpack.c.bf16 %v2617_v57, %v2617_v57  ;;  %v2619_v60 = vpop.f32.mrb[183].mxu0 }
 0x550   : > { %2925 = vmatmul.mubr.bf16.gmra.mrb[232].mxu0 %v5197_v40  ;;  %3763 = vst.msk [vmem:[%s4838_s30 + $0xc4] sm:$0xf] %vm1432_vm1, %v3892_v58 }
 0x551   : > { %3808 = vmatprep.mubr.msk.bf16.mxu0 %vm665_vm0, %v5200_v59 }
 0x553   : > { %v2622_v48 = vpop.f32.mrb[184].mxu0 }
 0x554   : > { %v3893_v63 = vpack.c.bf16 %v2622_v48, %v2622_v48  ;;  %v2624_v52 = vpop.f32.mrb[185].mxu0 }
 0x555   : > { %v2625_v1 = vpop.f32.mrb[186].mxu0 }
 0x556   : > { %3764 = vst.msk [vmem:[%s4838_s30 + $0xc8] sm:$0xf] %vm1432_vm1, %v3893_v63  ;;  %v3894_v46 = vpack.c.bf16 %v2625_v1, %v2625_v1  ;;  %v2627_v47 = vpop.f32.mrb[187].mxu0 }
 0x558   : > { %2933 = vmatmul.mubr.bf16.gmra.mrb[236].mxu0 %v5205_v2  ;;  %3765 = vst.msk [vmem:[%s4838_s30 + $0xcc] sm:$0xf] %vm1432_vm1, %v3894_v46 }
 0x559   : > { %3809 = vmatprep.mubr.msk.bf16.mxu0 %vm665_vm0, %v5208_v3 }
 0x55b   : > { %v2630_v40 = vpop.f32.mrb[188].mxu0 }
 0x55c   : > { %v3895_v20 = vpack.c.bf16 %v2630_v40, %v2630_v40  ;;  %v2632_v59 = vpop.f32.mrb[189].mxu0 }
 0x55d   : > { %v2633_v4 = vpop.f32.mrb[190].mxu0 }
 0x55e   : > { %3766 = vst.msk [vmem:[%s4838_s30 + $0xd0] sm:$0xf] %vm1432_vm1, %v3895_v20  ;;  %v3896_v6 = vpack.c.bf16 %v2633_v4, %v2633_v4  ;;  %v2635_v7 = vpop.f32.mrb[191].mxu0 }
 0x560   : > { %2941 = vmatmul.mubr.bf16.gmra.mrb[240].mxu0 %v5213_v54  ;;  %3767 = vst.msk [vmem:[%s4838_s30 + $0xd4] sm:$0xf] %vm1432_vm1, %v3896_v6 }
 0x561   : > { %3810 = vmatprep.mubr.msk.bf16.mxu0 %vm665_vm0, %v5216_v55 }
 0x563   : > { %v2638_v2 = vpop.f32.mrb[192].mxu0 }
 0x564   : > { %v3897_v8 = vpack.c.bf16 %v2638_v2, %v2638_v2  ;;  %v2640_v3 = vpop.f32.mrb[193].mxu0 }
 0x565   : > { %v2641_v9 = vpop.f32.mrb[194].mxu0 }
 0x566   : > { %3768 = vst.msk [vmem:[%s4838_s30 + $0xd8] sm:$0xf] %vm1432_vm1, %v3897_v8  ;;  %v3898_v10 = vpack.c.bf16 %v2641_v9, %v2641_v9  ;;  %v2643_v11 = vpop.f32.mrb[195].mxu0 }
 0x568   : > { %2949 = vmatmul.mubr.bf16.gmra.mrb[244].mxu0 %v5221_v61  ;;  %3769 = vst.msk [vmem:[%s4838_s30 + $0xdc] sm:$0xf] %vm1432_vm1, %v3898_v10 }
 0x569   : > { %3811 = vmatprep.mubr.msk.bf16.mxu0 %vm665_vm0, %v5224_v14 }
 0x570   : > { %2957 = vmatmul.mubr.bf16.gmra.mrb[248].mxu0 %v5229_v5 }
 0x5a3   : > { %v2750_v54 = vpop.f32.mrb[196].mxu0 }
 0x5a4   : > { %v3899_v55 = vpack.c.bf16 %v2750_v54, %v2750_v54  ;;  %v2752_v12 = vpop.f32.mrb[197].mxu0 }
 0x5a5   : > { %v2753_v13 = vpop.f32.mrb[198].mxu0 }
 0x5a6   : > { %3791 = vst.msk [vmem:[%s4838_s30 + $0xe0] sm:$0xf] %vm1432_vm1, %v3899_v55  ;;  %v3900_v62 = vpack.c.bf16 %v2753_v13, %v2753_v13  ;;  %v2755_v15 = vpop.f32.mrb[199].mxu0 }
 0x5a8   : > { %3792 = vst.msk [vmem:[%s4838_s30 + $0xe4] sm:$0xf] %vm1432_vm1, %v3900_v62 }
 0x5ab   : > { %v2758_v61 = vpop.f32.mrb[200].mxu0 }
 0x5ac   : > { %v3901_v16 = vpack.c.bf16 %v2758_v61, %v2758_v61  ;;  %v2760_v17 = vpop.f32.mrb[201].mxu0 }
 0x5ad   : > { %v2761_v18 = vpop.f32.mrb[202].mxu0 }
 0x5ae   : > { %3793 = vst.msk [vmem:[%s4838_s30 + $0xe8] sm:$0xf] %vm1432_vm1, %v3901_v16  ;;  %v3902_v14 = vpack.c.bf16 %v2761_v18, %v2761_v18  ;;  %v2763_v5 = vpop.f32.mrb[203].mxu0 }
 0x5b0   : > { %3794 = vst.msk [vmem:[%s4838_s30 + $0xec] sm:$0xf] %vm1432_vm1, %v3902_v14 }
 0x5b3   : > { %v2766_v19 = vpop.f32.mrb[204].mxu0 }
 0x5b4   : > { %v3903_v21 = vpack.c.bf16 %v2766_v19, %v2766_v19  ;;  %v2768_v24 = vpop.f32.mrb[205].mxu0 }
 0x5b5   : > { %v2769_v25 = vpop.f32.mrb[206].mxu0 }
 0x5b6   : > { %3795 = vst.msk [vmem:[%s4838_s30 + $0xf0] sm:$0xf] %vm1432_vm1, %v3903_v21  ;;  %v3904_v26 = vpack.c.bf16 %v2769_v25, %v2769_v25  ;;  %v2771_v27 = vpop.f32.mrb[207].mxu0 }
 0x5b8   : > { %3796 = vst.msk [vmem:[%s4838_s30 + $0xf4] sm:$0xf] %vm1432_vm1, %v3904_v26 }
 0x5bb   : > { %v2774_v28 = vpop.f32.mrb[208].mxu0 }
 0x5bc   : > { %v3905_v29 = vpack.c.bf16 %v2774_v28, %v2774_v28  ;;  %v2776_v30 = vpop.f32.mrb[209].mxu0 }
 0x5bd   : > { %v2777_v31 = vpop.f32.mrb[210].mxu0  ;;  %v3062_v30 = vld [vmem:[%s4838_s30] sm:$0xff] (%p4372_p9)  }
 0x5be   : > { %3797 = vst.msk [vmem:[%s4838_s30 + $0xf8] sm:$0xf] %vm1432_vm1, %v3905_v29  ;;  %v3906_v34 = vpack.c.bf16 %v2777_v31, %v2777_v31  ;;  %v2779_v35 = vpop.f32.mrb[211].mxu0  ;;  %v3066_v31 = vld [vmem:[%s4838_s30 + $0x8] sm:$0xff] (%p4372_p9)   ;;  %3063 = vst [vmem:[%s5396_s14] sm:$0xff] (%p4372_p9), %v3062_v30  }
 0x5bf   : > { %v3074_v35 = vld [vmem:[%s4838_s30 + $0x18] sm:$0xff] (%p4372_p9)   ;;  %3067 = vst [vmem:[%s5396_s14 + $0x8] sm:$0xff] (%p4372_p9), %v3066_v31  }
 0x5c0   : > { %3798 = vst.msk [vmem:[%s4838_s30 + $0xfc] sm:$0xf] %vm1432_vm1, %v3906_v34  ;;  %v3070_v34 = vld [vmem:[%s4838_s30 + $0x10] sm:$0xff] (%p4372_p9)   ;;  %3075 = vst [vmem:[%s5396_s14 + $0x18] sm:$0xff] (%p4372_p9), %v3074_v35  }
 0x5c1   : > { %3071 = vst [vmem:[%s5396_s14 + $0x10] sm:$0xff] (%p4372_p9), %v3070_v34  }
 0x5c3   : > { %v2782_v36 = vpop.f32.mrb[212].mxu0 }
 0x5c4   : > { %v3907_v37 = vpack.c.bf16 %v2782_v36, %v2782_v36  ;;  %v2784_v38 = vpop.f32.mrb[213].mxu0  ;;  %v3078_v36 = vld [vmem:[%s4838_s30 + $0x20] sm:$0xff] (%p4372_p9)  }
 0x5c5   : > { %v2785_v22 = vpop.f32.mrb[214].mxu0  ;;  %v3086_v38 = vld [vmem:[%s4838_s30 + $0x30] sm:$0xff] (%p4372_p9)   ;;  %3079 = vst [vmem:[%s5396_s14 + $0x20] sm:$0xff] (%p4372_p9), %v3078_v36  }
 0x5c6   : > { %3799 = vst.msk [vmem:[%s4838_s30 + $0x100] sm:$0xf] %vm1432_vm1, %v3907_v37  ;;  %v3908_v41 = vpack.c.bf16 %v2785_v22, %v2785_v22  ;;  %v2787_v23 = vpop.f32.mrb[215].mxu0  ;;  %v3082_v37 = vld [vmem:[%s4838_s30 + $0x28] sm:$0xff] (%p4372_p9)   ;;  %v3090_v22 = vld [vmem:[%s4838_s30 + $0x38] sm:$0xff] (%p4372_p9)   ;;  %3087 = vst [vmem:[%s5396_s14 + $0x30] sm:$0xff] (%p4372_p9), %v3086_v38  }
 0x5c7   : > { %v3098_v23 = vld [vmem:[%s4838_s30 + $0x48] sm:$0xff] (%p4372_p9)   ;;  %3083 = vst [vmem:[%s5396_s14 + $0x28] sm:$0xff] (%p4372_p9), %v3082_v37   ;;  %3091 = vst [vmem:[%s5396_s14 + $0x38] sm:$0xff] (%p4372_p9), %v3090_v22  }
 0x5c8   : > { %3800 = vst.msk [vmem:[%s4838_s30 + $0x104] sm:$0xf] %vm1432_vm1, %v3908_v41  ;;  %v3094_v41 = vld [vmem:[%s4838_s30 + $0x40] sm:$0xff] (%p4372_p9)   ;;  %3099 = vst [vmem:[%s5396_s14 + $0x48] sm:$0xff] (%p4372_p9), %v3098_v23  }
 0x5c9   : > { %3095 = vst [vmem:[%s5396_s14 + $0x40] sm:$0xff] (%p4372_p9), %v3094_v41  }
 0x5cb   : > { %v2790_v43 = vpop.f32.mrb[216].mxu0 }
 0x5cc   : > { %v3909_v44 = vpack.c.bf16 %v2790_v43, %v2790_v43  ;;  %v2792_v0 = vpop.f32.mrb[217].mxu0  ;;  %v3102_v43 = vld [vmem:[%s4838_s30 + $0x50] sm:$0xff] (%p4372_p9)  }
 0x5cd   : > { %v2793_v49 = vpop.f32.mrb[218].mxu0  ;;  %3103 = vst [vmem:[%s5396_s14 + $0x50] sm:$0xff] (%p4372_p9), %v3102_v43   ;;  %v3110_v0 = vld [vmem:[%s4838_s30 + $0x60] sm:$0xff] (%p4372_p9)  }
 0x5ce   : > { %3801 = vst.msk [vmem:[%s4838_s30 + $0x108] sm:$0xf] %vm1432_vm1, %v3909_v44  ;;  %v3910_v32 = vpack.c.bf16 %v2793_v49, %v2793_v49  ;;  %v2795_v50 = vpop.f32.mrb[219].mxu0  ;;  %v3106_v44 = vld [vmem:[%s4838_s30 + $0x58] sm:$0xff] (%p4372_p9)   ;;  %v3114_v49 = vld [vmem:[%s4838_s30 + $0x68] sm:$0xff] (%p4372_p9)   ;;  %3111 = vst [vmem:[%s5396_s14 + $0x60] sm:$0xff] (%p4372_p9), %v3110_v0  }
 0x5cf   : > { %3107 = vst [vmem:[%s5396_s14 + $0x58] sm:$0xff] (%p4372_p9), %v3106_v44   ;;  %3115 = vst [vmem:[%s5396_s14 + $0x68] sm:$0xff] (%p4372_p9), %v3114_v49   ;;  %v3122_v50 = vld [vmem:[%s4838_s30 + $0x78] sm:$0xff] (%p4372_p9)  }
 0x5d0   : > { %3802 = vst.msk [vmem:[%s4838_s30 + $0x10c] sm:$0xf] %vm1432_vm1, %v3910_v32  ;;  %v3118_v32 = vld [vmem:[%s4838_s30 + $0x70] sm:$0xff] (%p4372_p9)   ;;  %3123 = vst [vmem:[%s5396_s14 + $0x78] sm:$0xff] (%p4372_p9), %v3122_v50  }
 0x5d1   : > { %3119 = vst [vmem:[%s5396_s14 + $0x70] sm:$0xff] (%p4372_p9), %v3118_v32  }
 0x5d3   : > { %v2798_v33 = vpop.f32.mrb[220].mxu0 }
 0x5d4   : > { %v3911_v51 = vpack.c.bf16 %v2798_v33, %v2798_v33  ;;  %v2800_v53 = vpop.f32.mrb[221].mxu0  ;;  %v3126_v33 = vld [vmem:[%s4838_s30 + $0x80] sm:$0xff] (%p4372_p9)  }
 0x5d5   : > { %v2801_v56 = vpop.f32.mrb[222].mxu0  ;;  %3127 = vst [vmem:[%s5396_s14 + $0x80] sm:$0xff] (%p4372_p9), %v3126_v33   ;;  %v3134_v53 = vld [vmem:[%s4838_s30 + $0x90] sm:$0xff] (%p4372_p9)  }
 0x5d6   : > { %3803 = vst.msk [vmem:[%s4838_s30 + $0x110] sm:$0xf] %vm1432_vm1, %v3911_v51  ;;  %v3912_v42 = vpack.c.bf16 %v2801_v56, %v2801_v56  ;;  %v2803_v39 = vpop.f32.mrb[223].mxu0  ;;  %v3130_v51 = vld [vmem:[%s4838_s30 + $0x88] sm:$0xff] (%p4372_p9)   ;;  %v3138_v56 = vld [vmem:[%s4838_s30 + $0x98] sm:$0xff] (%p4372_p9)   ;;  %3135 = vst [vmem:[%s5396_s14 + $0x90] sm:$0xff] (%p4372_p9), %v3134_v53  }
 0x5d7   : > { %3131 = vst [vmem:[%s5396_s14 + $0x88] sm:$0xff] (%p4372_p9), %v3130_v51   ;;  %3139 = vst [vmem:[%s5396_s14 + $0x98] sm:$0xff] (%p4372_p9), %v3138_v56   ;;  %v3146_v39 = vld [vmem:[%s4838_s30 + $0xa8] sm:$0xff] (%p4372_p9)  }
 0x5d8   : > { %3804 = vst.msk [vmem:[%s4838_s30 + $0x114] sm:$0xf] %vm1432_vm1, %v3912_v42  ;;  %v3142_v42 = vld [vmem:[%s4838_s30 + $0xa0] sm:$0xff] (%p4372_p9)   ;;  %3147 = vst [vmem:[%s5396_s14 + $0x150] sm:$0xff] (%p4372_p9), %v3146_v39  }
 0x5d9   : > { %3143 = vst [vmem:[%s5396_s14 + $0xa0] sm:$0xff] (%p4372_p9), %v3142_v42  }
 0x613   : > { %v2910_v45 = vpop.f32.mrb[224].mxu0 }
 0x614   : > { %v3913_v57 = vpack.c.bf16 %v2910_v45, %v2910_v45  ;;  %v2912_v58 = vpop.f32.mrb[225].mxu0  ;;  %v3150_v45 = vld [vmem:[%s4838_s30 + $0xb0] sm:$0xff] (%p4372_p9)  }
 0x615   : > { %v2913_v60 = vpop.f32.mrb[226].mxu0  ;;  %3151 = vst [vmem:[%s5396_s14 + $0x158] sm:$0xff] (%p4372_p9), %v3150_v45   ;;  %v3158_v58 = vld [vmem:[%s4838_s30 + $0xc0] sm:$0xff] (%p4372_p9)  }
 0x616   : > { %3826 = vst.msk [vmem:[%s4838_s30 + $0x118] sm:$0xf] %vm1432_vm1, %v3913_v57  ;;  %v3914_v48 = vpack.c.bf16 %v2913_v60, %v2913_v60  ;;  %v2915_v63 = vpop.f32.mrb[227].mxu0  ;;  %v3154_v57 = vld [vmem:[%s4838_s30 + $0xb8] sm:$0xff] (%p4372_p9)   ;;  %v3162_v60 = vld [vmem:[%s4838_s30 + $0xc8] sm:$0xff] (%p4372_p9)   ;;  %3159 = vst [vmem:[%s5396_s14 + $0x168] sm:$0xff] (%p4372_p9), %v3158_v58  }
 0x617   : > { %3155 = vst [vmem:[%s5396_s14 + $0x160] sm:$0xff] (%p4372_p9), %v3154_v57   ;;  %3163 = vst [vmem:[%s5396_s14 + $0x170] sm:$0xff] (%p4372_p9), %v3162_v60   ;;  %v3170_v63 = vld [vmem:[%s4838_s30 + $0xd8] sm:$0xff] (%p4372_p9)  }
 0x618   : > { %3827 = vst.msk [vmem:[%s4838_s30 + $0x11c] sm:$0xf] %vm1432_vm1, %v3914_v48  ;;  %v3166_v48 = vld [vmem:[%s4838_s30 + $0xd0] sm:$0xff] (%p4372_p9)   ;;  %3171 = vst [vmem:[%s5396_s14 + $0x180] sm:$0xff] (%p4372_p9), %v3170_v63  }
 0x619   : > { %3167 = vst [vmem:[%s5396_s14 + $0x178] sm:$0xff] (%p4372_p9), %v3166_v48  }
 0x61b   : > { %v2918_v52 = vpop.f32.mrb[228].mxu0 }
 0x61c   : > { %v3915_v1 = vpack.c.bf16 %v2918_v52, %v2918_v52  ;;  %v2920_v46 = vpop.f32.mrb[229].mxu0  ;;  %v3174_v52 = vld [vmem:[%s4838_s30 + $0xe0] sm:$0xff] (%p4372_p9)  }
 0x61d   : > { %v2921_v47 = vpop.f32.mrb[230].mxu0  ;;  %3175 = vst [vmem:[%s5396_s14 + $0x188] sm:$0xff] (%p4372_p9), %v3174_v52   ;;  %v3182_v46 = vld [vmem:[%s4838_s30 + $0xf0] sm:$0xff] (%p4372_p9)  }
 0x61e   : > { %3828 = vst.msk [vmem:[%s4838_s30 + $0x120] sm:$0xf] %vm1432_vm1, %v3915_v1  ;;  %v3916_v40 = vpack.c.bf16 %v2921_v47, %v2921_v47  ;;  %v2923_v20 = vpop.f32.mrb[231].mxu0  ;;  %v3178_v1 = vld [vmem:[%s4838_s30 + $0xe8] sm:$0xff] (%p4372_p9)   ;;  %v3186_v47 = vld [vmem:[%s4838_s30 + $0xf8] sm:$0xff] (%p4372_p9)   ;;  %3183 = vst [vmem:[%s5396_s14 + $0x198] sm:$0xff] (%p4372_p9), %v3182_v46  }
 0x61f   : > { %3179 = vst [vmem:[%s5396_s14 + $0x190] sm:$0xff] (%p4372_p9), %v3178_v1   ;;  %3187 = vst [vmem:[%s5396_s14 + $0x1a0] sm:$0xff] (%p4372_p9), %v3186_v47   ;;  %v3194_v20 = vld [vmem:[%s4838_s30 + $0x108] sm:$0xff] (%p4372_p9)  }
 0x620   : > { %3829 = vst.msk [vmem:[%s4838_s30 + $0x124] sm:$0xf] %vm1432_vm1, %v3916_v40  ;;  %v3190_v40 = vld [vmem:[%s4838_s30 + $0x100] sm:$0xff] (%p4372_p9)   ;;  %3195 = vst [vmem:[%s5396_s14 + $0x1b0] sm:$0xff] (%p4372_p9), %v3194_v20  }
 0x621   : > { %3191 = vst [vmem:[%s5396_s14 + $0x1a8] sm:$0xff] (%p4372_p9), %v3190_v40  }
 0x623   : > { %v2926_v59 = vpop.f32.mrb[232].mxu0 }
 0x624   : > { %v3917_v4 = vpack.c.bf16 %v2926_v59, %v2926_v59  ;;  %v2928_v6 = vpop.f32.mrb[233].mxu0  ;;  %v3198_v59 = vld [vmem:[%s4838_s30 + $0x110] sm:$0xff] (%p4372_p9)  }
 0x625   : > { %v2929_v7 = vpop.f32.mrb[234].mxu0  ;;  %3199 = vst [vmem:[%s5396_s14 + $0x1b8] sm:$0xff] (%p4372_p9), %v3198_v59  }
 0x626   : > { %3830 = vst.msk [vmem:[%s4838_s30 + $0x128] sm:$0xf] %vm1432_vm1, %v3917_v4  ;;  %v3918_v2 = vpack.c.bf16 %v2929_v7, %v2929_v7  ;;  %v2931_v8 = vpop.f32.mrb[235].mxu0  ;;  %v3202_v4 = vld [vmem:[%s4838_s30 + $0x118] sm:$0xff] (%p4372_p9)  }
 0x627   : > { %3203 = vst [vmem:[%s5396_s14 + $0x1c0] sm:$0xff] (%p4372_p9), %v3202_v4   ;;  %v3206_v6 = vld [vmem:[%s4838_s30 + $0x120] sm:$0xff] (%p4372_p9)  }
 0x628   : > { %3831 = vst.msk [vmem:[%s4838_s30 + $0x12c] sm:$0xf] %vm1432_vm1, %v3918_v2  ;;  %3207 = vst [vmem:[%s5396_s14 + $0x1c8] sm:$0xff] (%p4372_p9), %v3206_v6  }
 0x62b   : > { %v2934_v3 = vpop.f32.mrb[236].mxu0 }
 0x62c   : > { %v3919_v9 = vpack.c.bf16 %v2934_v3, %v2934_v3  ;;  %v2936_v10 = vpop.f32.mrb[237].mxu0 }
 0x62d   : > { %v2937_v11 = vpop.f32.mrb[238].mxu0 }
 0x62e   : > { %3832 = vst.msk [vmem:[%s4838_s30 + $0x130] sm:$0xf] %vm1432_vm1, %v3919_v9  ;;  %v3920_v54 = vpack.c.bf16 %v2937_v11, %v2937_v11  ;;  %v2939_v55 = vpop.f32.mrb[239].mxu0 }
 0x62f   : > { %v3210_v7 = vld [vmem:[%s4838_s30 + $0x128] sm:$0xff] (%p4372_p9)  }
 0x630   : > { %3833 = vst.msk [vmem:[%s4838_s30 + $0x134] sm:$0xf] %vm1432_vm1, %v3920_v54  ;;  %3211 = vst [vmem:[%s5396_s14 + $0x1d0] sm:$0xff] (%p4372_p9), %v3210_v7  }
 0x633   : > { %v2942_v12 = vpop.f32.mrb[240].mxu0 }
 0x634   : > { %v3921_v13 = vpack.c.bf16 %v2942_v12, %v2942_v12  ;;  %v2944_v62 = vpop.f32.mrb[241].mxu0 }
 0x635   : > { %v2945_v15 = vpop.f32.mrb[242].mxu0 }
 0x636   : > { %3834 = vst.msk [vmem:[%s4838_s30 + $0x138] sm:$0xf] %vm1432_vm1, %v3921_v13  ;;  %v3922_v61 = vpack.c.bf16 %v2945_v15, %v2945_v15  ;;  %v2947_v16 = vpop.f32.mrb[243].mxu0 }
 0x637   : > { %v3214_v2 = vld [vmem:[%s4838_s30 + $0x130] sm:$0xff] (%p4372_p9)  }
 0x638   : > { %3835 = vst.msk [vmem:[%s4838_s30 + $0x13c] sm:$0xf] %vm1432_vm1, %v3922_v61  ;;  %3215 = vst [vmem:[%s5396_s14 + $0x1d8] sm:$0xff] (%p4372_p9), %v3214_v2  }
 0x63b   : > { %v2950_v17 = vpop.f32.mrb[244].mxu0 }
 0x63c   : > { %v3923_v18 = vpack.c.bf16 %v2950_v17, %v2950_v17  ;;  %v2952_v14 = vpop.f32.mrb[245].mxu0 }
 0x63d   : > { %v2953_v5 = vpop.f32.mrb[246].mxu0 }
 0x63e   : > { %3836 = vst.msk [vmem:[%s4838_s30 + $0x140] sm:$0xf] %vm1432_vm1, %v3923_v18  ;;  %v3924_v19 = vpack.c.bf16 %v2953_v5, %v2953_v5  ;;  %v2955_v21 = vpop.f32.mrb[247].mxu0 }
 0x63f   : > { %v3218_v8 = vld [vmem:[%s4838_s30 + $0x138] sm:$0xff] (%p4372_p9)  }
 0x640   : > { %3837 = vst.msk [vmem:[%s4838_s30 + $0x144] sm:$0xf] %vm1432_vm1, %v3924_v19  ;;  %3219 = vst [vmem:[%s5396_s14 + $0x1e0] sm:$0xff] (%p4372_p9), %v3218_v8  }
 0x642   : > { %3042 = sbr.rel (!%p4372_p9) target bundleno = 1617 (0x651), region = 56 }
 0x643   : > { %v2958_v24 = vpop.f32.mrb[248].mxu0 }
 0x644   : > { %v3925_v25 = vpack.c.bf16 %v2958_v24, %v2958_v24  ;;  %v2960_v26 = vpop.f32.mrb[249].mxu0 }
 0x645   : > { %v2961_v27 = vpop.f32.mrb[250].mxu0 }
 0x646   : > { %3838 = vst.msk [vmem:[%s4838_s30 + $0x148] sm:$0xf] %vm1432_vm1, %v3925_v25  ;;  %v3926_v28 = vpack.c.bf16 %v2961_v27, %v2961_v27  ;;  %v2963_v29 = vpop.f32.mrb[251].mxu0 }
 0x647   : > { %v3222_v3 = vld [vmem:[%s4838_s30 + $0x140] sm:$0xff] (%p4372_p9)  }
 0x648   : > { %3839 = vst.msk [vmem:[%s4838_s30 + $0x14c] sm:$0xf] %vm1432_vm1, %v3926_v28  ;;  %3223 = vst [vmem:[%s5396_s14 + $0x1e8] sm:$0xff] (%p4372_p9), %v3222_v3  }
 0x64f   : > { %v3226_v9 = vld [vmem:[%s4838_s30 + $0x148] sm:$0xff]  }
 0x650   : > { %3227 = vst [vmem:[%s5396_s14 + $0x1f0] sm:$0xff] %v3226_v9  }
 0x651 PF: > { %p18_p9 = scmp.ge.s32.totalorder %s4359_s7, 4   ;;  %s5506_s15 = smov %s4226_s16 }
 0x652   : > { %s5507_s16 = smov %s4230_s17  ;;  %s5508_s17 = smov %s4368_s10 }
 0x653   : > { %s5509_s18 = smov %s4359_s7  ;;  %20 = sbr.rel (!%p18_p9) target bundleno = 6 (0x6), region = 143 }
 0x65a   :  { %3430 = vsyncpa [#allocation3], 1 }
 0x65b   :  { %3432 = vsyncpa [#allocation3 + $0x1], 1 }
 0x65c   :  { %3433 = vsyncpa [#allocation5], 1 }
 0x65d   :  { %3435 = vsyncpa [#allocation5 + $0x1], 1 }
 0x65e   :  { %3436 = vsyncpa [#allocation8], 1 }

// kernel: id_loss_forward.4
= control target key start
LH: loop header
LB: loop body
LE: loop exit
PB: predicated region body
PF: predicated region fallthrough
CT: control target
= control target key end

     0   :  { %7 = vsyncpa [#allocation3], 0  ;;  %s18788_s0 = inlined_call_operand.vmem [shape: bf16[4,37632], index: 0, kind: input, shape index: {}]   ;;  %s18789_s1 = inlined_call_operand.hbm [shape: bf16[37632,512], index: 1, kind: input, shape index: {}]   ;;  %s18790_s2 = inlined_call_operand.vmem [shape: f32[4,512], index: 2, kind: output, shape index: {}]  }
   0x1   :  { %9 = vsyncpa [#allocation3 + $0x1], 0  ;;  %s16640_s9 = smov 0   ;;  %s16642_s10 = smov 0  }
   0x2   :  { %s16644_s11 = smov 0   ;;  %s16646_s12 = smov 0  }
   0x3   :  { %s16648_s13 = smov 0   ;;  %s16650_s14 = smov 0  }
   0x4   :  { %s16652_s15 = smov 0   ;;  %s16654_s16 = smov 0  }
   0x5 LB: > { %s12293_s17 = sadd.s32 4294967295, %s16617_s16   ;;  %s24_s18 = sadd.s32 1, %s16609_s14  ;;  %s16617_s16 = sphi %s16654_s16, %s15_s16   ;;  %s16613_s15 = sphi %s16652_s15, %s18800_s15   ;;  %s16609_s14 = sphi %s16650_s14, %s18799_s14   ;;  %s16605_s13 = sphi %s16648_s13, %s18798_s13   ;;  %s16601_s12 = sphi %s16646_s12, %s18797_s12   ;;  %s16597_s11 = sphi %s16644_s11, %s18796_s11   ;;  %s16593_s10 = sphi %s16642_s10, %s18795_s10   ;;  %s16589_s9 = sphi %s16640_s9, %s18794_s9  }
   0x6   : > { %p25_p0 = scmp.ge.s32.totalorder %s24_s18, 3  ;;  %s27_s19 = sadd.s32 1, %s16613_s15 }
   0x7   : > { %s62_s20 = sadd.s32 1, %s16597_s11  ;;  %p69_p1 = scmp.ne.s32.totalorder %s16597_s11, %s16593_s10 }
   0x8   : > { %s18802_s18 = smov (%p25_p0, %s24_s18), 0  ;;  %s18804_s19 = smov (!%p25_p0, %s27_s19), %s16613_s15 }
   0x9   : > { %s57_s21 = ssub.s32 %s16609_s14, %s18802_s18  ;;  %p70_p2 = scmp.eq.s32.totalorder %s16617_s16, 0 }
   0xa   : > { %p29_p3 = scmp.ge.s32.totalorder %s18804_s19, 2  ;;  %p75_p4 = scmp.ne.s32.totalorder %s16593_s10, %s16589_s9 }
   0xb   : > { %p16691_p5 = por %p70_p2, %p69_p1  ;;  %p76_p6 = scmp.eq.s32.totalorder %s12293_s17, 0 }
   0xc   : > { %s18806_s19 = smov (%p29_p3, %s18804_s19), 0  ;;  %p14075_p8 = scmp.lt.s32.totalorder %s16617_s16, 6 }
   0xd   : > { %p16697_p7 = por %p76_p6, %p75_p4  ;;  %s58_s24 = ssub.s32 %s16613_s15, %s18806_s19 }
   0xe   : > { %s59_s25 = sor.u32 %s58_s24, %s57_s21  ;;  %s134_s26 = sand.u32 1, %s16597_s11  }
   0xf   : > { %p60_p9 = scmp.eq.s32.totalorder %s59_s25, 0  ;;  %s14067_s27 = smul.u32 12544, %s134_s26 }
  0x10   : > { %s12297_s28 = sshll.u32 %s16613_s15, 1  ;;  %s13876_s30 = smul.u32 6272, %s16609_s14 }
  0x11   : > { %s16707_s29 = scalar_select %p60_p9, %s16597_s11, %s62_s20  }
  0x12   : > { %s138_s3 = scalar_lea.vmem [#allocation2], %s14067_s27  ;;  %p16712_p10 = pnand %p14075_p8, %p16691_p5 }
  0x13   : > { %s148_s4 = sshll.u32 %s138_s3, 4  ;;  %s145_s6 = sadd.s32 %s13876_s30, %s12297_s28  ;;  %s16716_s4 = int_to_ptr.vmem [resolvable:$true] %s148_s4 }
  0x14   : > { %s12299_s7 = sshll.u32 %s145_s6, 6  ;;  %s16723_s20 = scalar_lea.sflag [#allocation3], %s134_s26 }
  0x15   : > { %s16721_s17 = scalar_lea.hbm %s18789_s1, %s12299_s7  ;;  %p16523_p12 = pneg %p16712_p10 }
  0x16   : > { %s16521_s21 = scalar_lea.hbm %s16721_s17, 200704  ;;  %s16526_s25 = scalar_lea.hbm %s18789_s1, 1204224 }
  0x17   : > { %p16522_p11 = scmp.ne.s32.totalorder %s16721_s17, %s16521_s21  ;;  %p16527_p1 = scmp.lt.u32.totalorder %s16721_s17, %s18789_s1 }
  0x18   : > { %p16528_p2 = scmp.lt.u32.totalorder %s16526_s25, %s16521_s21  ;;  %p16530_p4 = scmp.lt.u32.totalorder %s16521_s21, %s16721_s17 }
  0x19   : > { %p16524_p13 = pnand %p16523_p12, %p16522_p11 }
  0x1a   : > { %p16529_p3 = por %p16528_p2, %p16527_p1 }
  0x1b   : > { %p16525_p0 = pneg %p16524_p13 }
  0x1c   : > { %p16531_p5 = por %p16530_p4, %p16529_p3 }
  0x1e   : > { %p16532_p6 = pnand %p16531_p5, %p16525_p0 }
  0x20   : > { %16535 = shalt.err (!%p16532_p6)
}
  0x21   : > { %s16536_s26 = scalar_lea.vmem %s16716_s4, 200704  ;;  %s16619_s30 = smov [#allocation2]  }
  0x22   : > { %p16537_p8 = scmp.ne.s32.totalorder %s16716_s4, %s16536_s26  ;;  %s16541_s3 = sshll.u32 %s16619_s30, 4  ;;  %s16542_s3 = int_to_ptr.vmem [resolvable:$false] %s16541_s3 }
  0x23   : > { %s16543_s6 = scalar_lea.vmem %s16542_s3, 401408  ;;  %p16544_p13 = scmp.lt.s32.totalorder %s16716_s4, %s16542_s3 }
  0x24   : > { %p16539_p9 = pnand %p16537_p8, %p16523_p12  ;;  %p16545_p1 = scmp.lt.s32.totalorder %s16543_s6, %s16536_s26 }
  0x26   : > { %p16540_p11 = pneg %p16539_p9  ;;  %p16546_p2 = por %p16545_p1, %p16544_p13 }
  0x28   : > { %p16547_p3 = pnand %p16546_p2, %p16540_p11 }
  0x2a   : > { %16550 = shalt.err (!%p16547_p3)
}
  0x2b   : > { %s16620_s7 = smov 256   ;;  %s16621_s8 = smov 128  }
  0x2c   : > { %s16622_s9 = smov 8   ;;  %p12300_p12 = scmp.ge.s32.totalorder %s16617_s16, 1 }
  0x2d   : > { %14074 = dma.hbm_to_vmem [thread:$0]  (!%p16712_p10), %s16721_s17, 200704, %s16716_s4, %s16723_s20, %s16620_s7, %s16621_s8, %s16622_s9  }
  0x2e   : > { %p156_p0 = scmp.lt.s32.totalorder %s16617_s16, 7 }
  0x30   : > { %p157_p4 = pnand %p12300_p12, %p156_p0 }
  0x31   : > { %s162_s21 = sand.u32 (!%p157_p4), 1, %s16593_s10  }
  0x32   : > { %160 = sbr.rel (%p157_p4) target bundleno = 1890 (0x762), region = 28  ;;  %s163_s24 = scalar_lea.sflag (!%p157_p4), [#allocation3], %s162_s21 }
  0x33   : > { %s14068_s22 = smul.u32 (!%p157_p4), 12544, %s162_s21 }
  0x35   : > { %s16754_s25 = scalar_lea.vmem (!%p157_p4), [#allocation2], %s14068_s22 }
  0x39   : > { %16584 = dma.done.wait (%p16697_p7), %s163_s24, 200704  }
  0x3a   : > { %16586 = vsyncadd (%p16697_p7), %s163_s24, 4294766592  ;;  %s192_s5 = smul.u32 98, %s16601_s12  ;;  %s12302_s4 = sshll.u32 %s16605_s13, 1 }
  0x3b   : > { %p201_p10 = scmp.lt.s32.totalorder %s12302_s4, 3  ;;  %p12304_p7 = scmp.ne.s32.totalorder %s16601_s12, 0 }
  0x3c   : > { %p193_p5 = scmp.lt.s32.totalorder %s192_s5, 293  ;;  %v16623_v0 = vmov (!%p12304_p7), 0.0  }
  0x3d   : > { %s18808_s4 = smov (!%p201_p10, %s12302_s4), 3  ;;  %209 = sbr.rel (%p12304_p7) target bundleno = 68 (0x44), region = 36 }
  0x3e   : > { %s18810_s5 = smov (!%p193_p5, %s192_s5), 293  ;;  %s12303_s17 = sshll.u32 %s18808_s4, 2 }
  0x3f   : > { %s12301_s20 = sshll.u32 %s18810_s5, 1  ;;  %s16765_s26 = scalar_lea.vmem %s18790_s2, %s12303_s17 }
  0x40   : > { %s16770_s23 = scalar_lea.vmem %s18788_s0, %s12301_s20  ;;  %210 = vst [vmem:[%s16765_s26] sm:$0xff] (!%p12304_p7), %v16623_v0 }
  0x44 PF: > { %v14145_v1 = vld [vmem:[%s16754_s25 + $0x4] ss:$8 sps:$4 sm:$0xff]   ;;  %v14149_v3 = vld [vmem:[%s16754_s25] ss:$8 sps:$4 sm:$0xff]   ;;  %v14151_v5 = vld [vmem:[%s16754_s25 + $0x14] ss:$8 sps:$4 sm:$0xff]   ;;  %v1834_v39 = vlaneseq }
  0x45   : > { %v14147_v2 = vld [vmem:[%s16754_s25 + $0x1804] ss:$8 sps:$4 sm:$0xff]   ;;  %10184 = vmatprep.subr.bf16.mxu1 %v14145_v1  ;;  %v14150_v4 = vld [vmem:[%s16754_s25 + $0x1800] ss:$8 sps:$4 sm:$0xff]   ;;  %v14153_v6 = vld [vmem:[%s16754_s25 + $0x1814] ss:$8 sps:$4 sm:$0xff]  }
  0x46   : > { %11168 = vmatprep.subr.bf16.mxu0 %v14147_v2  ;;  %10185 = vmatpush1.bf16.msra.mxu1 %v14149_v3  ;;  %v14155_v7 = vld [vmem:[%s16754_s25 + $0x10] ss:$8 sps:$4 sm:$0xff]   ;;  %v14157_v9 = vld [vmem:[%s16754_s25 + $0x24] ss:$8 sps:$4 sm:$0xff]   ;;  %v14161_v11 = vld [vmem:[%s16754_s25 + $0x20] ss:$8 sps:$4 sm:$0xff]  }
  0x47   : > { %11169 = vmatpush1.bf16.msra.mxu0 %v14150_v4  ;;  %10186 = vmatprep.subr.bf16.mxu1 %v14151_v5  ;;  %v14156_v8 = vld [vmem:[%s16754_s25 + $0x1810] ss:$8 sps:$4 sm:$0xff]   ;;  %v14159_v10 = vld [vmem:[%s16754_s25 + $0x1824] ss:$8 sps:$4 sm:$0xff]   ;;  %v14162_v12 = vld [vmem:[%s16754_s25 + $0x1820] ss:$8 sps:$4 sm:$0xff]  }
  0x48   : > { %11170 = vmatprep.subr.bf16.mxu0 %v14153_v6  ;;  %v14163_v13 = vld [vmem:[%s16754_s25 + $0x34] ss:$8 sps:$4 sm:$0xff]   ;;  %v14167_v15 = vld [vmem:[%s16754_s25 + $0x30] ss:$8 sps:$4 sm:$0xff]   ;;  %v14169_v17 = vld [vmem:[%s16754_s25 + $0x44] ss:$8 sps:$4 sm:$0xff]  }
  0x49   : > { %v14165_v14 = vld [vmem:[%s16754_s25 + $0x1834] ss:$8 sps:$4 sm:$0xff]   ;;  %v14168_v16 = vld [vmem:[%s16754_s25 + $0x1830] ss:$8 sps:$4 sm:$0xff]   ;;  %v14171_v18 = vld [vmem:[%s16754_s25 + $0x1844] ss:$8 sps:$4 sm:$0xff]  }
  0x4a   : > { %10187 = vmatpush1.bf16.msra.mxu1 %v14155_v7  ;;  %v14173_v19 = vld [vmem:[%s16754_s25 + $0x40] ss:$8 sps:$4 sm:$0xff]   ;;  %v14175_v21 = vld [vmem:[%s16754_s25 + $0x54] ss:$8 sps:$4 sm:$0xff]   ;;  %v14179_v23 = vld [vmem:[%s16754_s25 + $0x50] ss:$8 sps:$4 sm:$0xff]  }
  0x4b   : > { %11171 = vmatpush1.bf16.msra.mxu0 %v14156_v8  ;;  %10188 = vmatprep.subr.bf16.mxu1 %v14157_v9  ;;  %v14174_v20 = vld [vmem:[%s16754_s25 + $0x1840] ss:$8 sps:$4 sm:$0xff]   ;;  %v14177_v22 = vld [vmem:[%s16754_s25 + $0x1854] ss:$8 sps:$4 sm:$0xff]   ;;  %v14180_v24 = vld [vmem:[%s16754_s25 + $0x1850] ss:$8 sps:$4 sm:$0xff]  }
  0x4c   : > { %11172 = vmatprep.subr.bf16.mxu0 %v14159_v10  ;;  %v14181_v25 = vld [vmem:[%s16754_s25 + $0x64] ss:$8 sps:$4 sm:$0xff]   ;;  %v14185_v27 = vld [vmem:[%s16754_s25 + $0x60] ss:$8 sps:$4 sm:$0xff]   ;;  %v14187_v29 = vld [vmem:[%s16754_s25 + $0x74] ss:$8 sps:$4 sm:$0xff]  }
  0x4d   : > { %v14183_v26 = vld [vmem:[%s16754_s25 + $0x1864] ss:$8 sps:$4 sm:$0xff]   ;;  %v14186_v28 = vld [vmem:[%s16754_s25 + $0x1860] ss:$8 sps:$4 sm:$0xff]   ;;  %v14189_v30 = vld [vmem:[%s16754_s25 + $0x1874] ss:$8 sps:$4 sm:$0xff]  }
  0x4e   : > { %10189 = vmatpush1.bf16.msra.mxu1 %v14161_v11  ;;  %v14191_v31 = vld [vmem:[%s16754_s25 + $0x70] ss:$8 sps:$4 sm:$0xff]   ;;  %v14193_v33 = vld [vmem:[%s16754_s25 + $0x84] ss:$8 sps:$4 sm:$0xff]   ;;  %v14197_v35 = vld [vmem:[%s16754_s25 + $0x80] ss:$8 sps:$4 sm:$0xff]  }
  0x4f   : > { %11173 = vmatpush1.bf16.msra.mxu0 %v14162_v12  ;;  %10190 = vmatprep.subr.bf16.mxu1 %v14163_v13  ;;  %v14192_v32 = vld [vmem:[%s16754_s25 + $0x1870] ss:$8 sps:$4 sm:$0xff]   ;;  %v14195_v34 = vld [vmem:[%s16754_s25 + $0x1884] ss:$8 sps:$4 sm:$0xff]   ;;  %v14198_v36 = vld [vmem:[%s16754_s25 + $0x1880] ss:$8 sps:$4 sm:$0xff]  }
  0x50   : > { %11174 = vmatprep.subr.bf16.mxu0 %v14165_v14  ;;  %v16624_v37 = vmov 1983009808   ;;  %v14199_v40 = vld [vmem:[%s16754_s25 + $0x94] ss:$8 sps:$4 sm:$0xff]   ;;  %v14203_v42 = vld [vmem:[%s16754_s25 + $0x90] ss:$8 sps:$4 sm:$0xff]  }
  0x51   : > { %v1832_v38 = vunpack.c.l.s4 %v16624_v37  ;;  %v14201_v41 = vld [vmem:[%s16754_s25 + $0x1894] ss:$8 sps:$4 sm:$0xff]   ;;  %v1835_v44 = vshrl.u32 %v1834_v39, 7  ;;  %v14204_v45 = vld [vmem:[%s16754_s25 + $0x1890] ss:$8 sps:$4 sm:$0xff]   ;;  %v212_v53 = vld [vmem:[%s16770_s23] sm:$0xff] }
  0x52   : > { %10191 = vmatpush1.bf16.msra.mxu1 %v14167_v15  ;;  %v14205_v46 = vld [vmem:[%s16754_s25 + $0xa4] ss:$8 sps:$4 sm:$0xff]   ;;  %v14209_v48 = vld [vmem:[%s16754_s25 + $0xa0] ss:$8 sps:$4 sm:$0xff]   ;;  %v14211_v51 = vld [vmem:[%s16754_s25 + $0xb4] ss:$8 sps:$4 sm:$0xff]   ;;  %v1830_v11 = vcombine.high %v212_v53, %v212_v53 }
  0x53   : > { %11175 = vmatpush1.bf16.msra.mxu0 %v14168_v16  ;;  %10192 = vmatprep.subr.bf16.mxu1 %v14169_v17  ;;  %v1833_v43 = vunpack.c.0.s8 %v1832_v38  ;;  %v14207_v47 = vld [vmem:[%s16754_s25 + $0x18a4] ss:$8 sps:$4 sm:$0xff]   ;;  %v14210_v49 = vld [vmem:[%s16754_s25 + $0x18a0] ss:$8 sps:$4 sm:$0xff]   ;;  %v14213_v52 = vld [vmem:[%s16754_s25 + $0x18b4] ss:$8 sps:$4 sm:$0xff]  }
  0x54   : > { %11176 = vmatprep.subr.bf16.mxu0 %v14171_v18  ;;  %v14215_v54 = vld [vmem:[%s16754_s25 + $0xb0] ss:$8 sps:$4 sm:$0xff]   ;;  %v224_v57 = vld [vmem:[%s16770_s23 + $0x60] sm:$0xff]  ;;  %v14223_v1 = vld [vmem:[%s16754_s25 + $0xd4] ss:$8 sps:$4 sm:$0xff]  }
  0x55   : > { %v16818_v50 = vsub.s32 %v1833_v43, %v1835_v44  ;;  %v14216_v56 = vld [vmem:[%s16754_s25 + $0x18b0] ss:$8 sps:$4 sm:$0xff]   ;;  %v14217_v58 = vld [vmem:[%s16754_s25 + $0xc4] ss:$8 sps:$4 sm:$0xff]   ;;  %v14221_v63 = vld [vmem:[%s16754_s25 + $0xc0] ss:$8 sps:$4 sm:$0xff]   ;;  %v2034_v12 = vcombine.high %v224_v57, %v224_v57 }
  0x56   : > { %10193 = vmatpush1.bf16.msra.mxu1 %v14173_v19  ;;  %v14219_v59 = vld [vmem:[%s16754_s25 + $0x18c4] ss:$8 sps:$4 sm:$0xff]   ;;  %v14222_v0 = vld [vmem:[%s16754_s25 + $0x18c0] ss:$8 sps:$4 sm:$0xff]   ;;  %v14225_v2 = vld [vmem:[%s16754_s25 + $0x18d4] ss:$8 sps:$4 sm:$0xff]  }
  0x57   : > { %11177 = vmatpush1.bf16.msra.mxu0 %v14174_v20  ;;  %10194 = vmatprep.subr.bf16.mxu1 %v14175_v21  ;;  %v1837_v55 = vrot.slane %v212_v53, %v16818_v50  ;;  %v2041_v61 = vrot.slane %v224_v57, %v16818_v50  ;;  %v14227_v3 = vld [vmem:[%s16754_s25 + $0xd0] ss:$8 sps:$4 sm:$0xff]   ;;  %v14229_v5 = vld [vmem:[%s16754_s25 + $0xe4] ss:$8 sps:$4 sm:$0xff]   ;;  %v14233_v7 = vld [vmem:[%s16754_s25 + $0xe0] ss:$8 sps:$4 sm:$0xff]   ;;  %v16847_v17 = vrot.slane %v1830_v11, %v16818_v50 }
  0x58   : > { %11178 = vmatprep.subr.bf16.mxu0 %v14177_v22  ;;  %v14228_v4 = vld [vmem:[%s16754_s25 + $0x18d0] ss:$8 sps:$4 sm:$0xff]   ;;  %v14231_v6 = vld [vmem:[%s16754_s25 + $0x18e4] ss:$8 sps:$4 sm:$0xff]   ;;  %v14234_v8 = vld [vmem:[%s16754_s25 + $0x18e0] ss:$8 sps:$4 sm:$0xff]   ;;  %v16850_v18 = vrot.slane %v2034_v12, %v16818_v50 }
  0x59   : > { %v1845_v60 = vcombine.high %v1837_v55, %v1837_v55  ;;  %v2049_v62 = vcombine.high %v2041_v61, %v2041_v61  ;;  %v14235_v9 = vld [vmem:[%s16754_s25 + $0xf4] ss:$8 sps:$4 sm:$0xff]   ;;  %v14239_v13 = vld [vmem:[%s16754_s25 + $0xf0] ss:$8 sps:$4 sm:$0xff]   ;;  %v14244_v15 = vld [vmem:[%s16754_s25 + $0x104] ss:$8 sps:$4 sm:$0xff]  }
  0x5a   : > { %10195 = vmatpush1.bf16.msra.mxu1 %v14179_v23  ;;  %v14237_v10 = vld [vmem:[%s16754_s25 + $0x18f4] ss:$8 sps:$4 sm:$0xff]   ;;  %v14240_v14 = vld [vmem:[%s16754_s25 + $0x18f0] ss:$8 sps:$4 sm:$0xff]   ;;  %v14248_v16 = vld [vmem:[%s16754_s25 + $0x1904] ss:$8 sps:$4 sm:$0xff]   ;;  %v1846_v23 = vcombine.high %v16847_v17, %v16847_v17 }
  0x5b   : > { %11179 = vmatpush1.bf16.msra.mxu0 %v14180_v24  ;;  %10196 = vmatprep.subr.bf16.mxu1 %v14181_v25  ;;  %v14242_v19 = vld [vmem:[%s16754_s25 + $0x100] ss:$8 sps:$4 sm:$0xff]   ;;  %v14251_v21 = vld [vmem:[%s16754_s25 + $0x114] ss:$8 sps:$4 sm:$0xff]   ;;  %v2050_v24 = vcombine.high %v16850_v18, %v16850_v18  ;;  %v14249_v25 = vld [vmem:[%s16754_s25 + $0x110] ss:$8 sps:$4 sm:$0xff]  }
  0x5c   : > { %11180 = vmatprep.subr.bf16.mxu0 %v14183_v26  ;;  %10216 = vmatprep.mubr.bf16.mxu1 %v1845_v60  ;;  %v14246_v20 = vld [vmem:[%s16754_s25 + $0x1900] ss:$8 sps:$4 sm:$0xff]   ;;  %v14254_v22 = vld [vmem:[%s16754_s25 + $0x1914] ss:$8 sps:$4 sm:$0xff]   ;;  %v14252_v26 = vld [vmem:[%s16754_s25 + $0x1910] ss:$8 sps:$4 sm:$0xff]  }
  0x5d   : > { %11200 = vmatprep.mubr.bf16.mxu0 %v2049_v62  ;;  %v14267_v37 = vld [vmem:[%s16754_s25 + $0x140] ss:$8 sps:$4 sm:$0xff]   ;;  %v14275_v39 = vld [vmem:[%s16754_s25 + $0x154] ss:$8 sps:$4 sm:$0xff]   ;;  %v14281_v43 = vld [vmem:[%s16754_s25 + $0x164] ss:$8 sps:$4 sm:$0xff]  }
  0x5e   : > { %10197 = vmatpush1.bf16.msra.mxu1 %v14185_v27  ;;  %v14257_v27 = vld [vmem:[%s16754_s25 + $0x124] ss:$8 sps:$4 sm:$0xff]   ;;  %v14270_v38 = vld [vmem:[%s16754_s25 + $0x1940] ss:$8 sps:$4 sm:$0xff]   ;;  %v14302_v57 = vld [vmem:[%s16754_s25 + $0x1994] ss:$8 sps:$4 sm:$0xff]  }
  0x5f   : > { %11181 = vmatpush1.bf16.msra.mxu0 %v14186_v28  ;;  %10198 = vmatprep.subr.bf16.mxu1 %v14187_v29  ;;  %v14260_v28 = vld [vmem:[%s16754_s25 + $0x1924] ss:$8 sps:$4 sm:$0xff]   ;;  %v14255_v29 = vld [vmem:[%s16754_s25 + $0x120] ss:$8 sps:$4 sm:$0xff]   ;;  %v14324_v11 = vld [vmem:[%s16754_s25 + $0x19d0] ss:$8 sps:$4 sm:$0xff]  }
  0x60   : > { %11182 = vmatprep.subr.bf16.mxu0 %v14189_v30  ;;  %v14258_v30 = vld [vmem:[%s16754_s25 + $0x1920] ss:$8 sps:$4 sm:$0xff]   ;;  %v14284_v44 = vld [vmem:[%s16754_s25 + $0x1964] ss:$8 sps:$4 sm:$0xff]  }
  0x61   : > { %v14296_v53 = vld [vmem:[%s16754_s25 + $0x1984] ss:$8 sps:$4 sm:$0xff]   ;;  %v14303_v62 = vld [vmem:[%s16754_s25 + $0x1a0] ss:$8 sps:$4 sm:$0xff]  }
  0x62   : > { %10199 = vmatpush1.bf16.msra.mxu1 %v14191_v31  ;;  %v14263_v31 = vld [vmem:[%s16754_s25 + $0x134] ss:$8 sps:$4 sm:$0xff]   ;;  %v14305_v60 = vld [vmem:[%s16754_s25 + $0x1a4] ss:$8 sps:$4 sm:$0xff]  }
  0x63   : > { %11183 = vmatpush1.bf16.msra.mxu0 %v14192_v32  ;;  %10200 = vmatprep.subr.bf16.mxu1 %v14193_v33  ;;  %v14266_v32 = vld [vmem:[%s16754_s25 + $0x1934] ss:$8 sps:$4 sm:$0xff]   ;;  %v14261_v33 = vld [vmem:[%s16754_s25 + $0x130] ss:$8 sps:$4 sm:$0xff]   ;;  %v14329_v12 = vld [vmem:[%s16754_s25 + $0x1e4] ss:$8 sps:$4 sm:$0xff]  }
  0x64   : > { %11184 = vmatprep.subr.bf16.mxu0 %v14195_v34  ;;  %v14264_v34 = vld [vmem:[%s16754_s25 + $0x1930] ss:$8 sps:$4 sm:$0xff]  }
  0x66   : > { %10201 = vmatpush1.bf16.msra.mxu1 %v14197_v35  ;;  %v14269_v35 = vld [vmem:[%s16754_s25 + $0x144] ss:$8 sps:$4 sm:$0xff]  }
  0x67   : > { %11185 = vmatpush1.bf16.msra.mxu0 %v14198_v36  ;;  %10202 = vmatprep.subr.bf16.mxu1 %v14199_v40  ;;  %v14272_v36 = vld [vmem:[%s16754_s25 + $0x1944] ss:$8 sps:$4 sm:$0xff]   ;;  %v14278_v40 = vld [vmem:[%s16754_s25 + $0x1954] ss:$8 sps:$4 sm:$0xff]  }
  0x68   : > { %11186 = vmatprep.subr.bf16.mxu0 %v14201_v41  ;;  %v14273_v41 = vld [vmem:[%s16754_s25 + $0x150] ss:$8 sps:$4 sm:$0xff]  }
  0x6a   : > { %10203 = vmatpush1.bf16.msra.mxu1 %v14203_v42  ;;  %v14276_v42 = vld [vmem:[%s16754_s25 + $0x1950] ss:$8 sps:$4 sm:$0xff]  }
  0x6b   : > { %11187 = vmatpush1.bf16.msra.mxu0 %v14204_v45  ;;  %10204 = vmatprep.subr.bf16.mxu1 %v14205_v46  ;;  %v14279_v45 = vld [vmem:[%s16754_s25 + $0x160] ss:$8 sps:$4 sm:$0xff]  }
  0x6c   : > { %11188 = vmatprep.subr.bf16.mxu0 %v14207_v47  ;;  %v14282_v46 = vld [vmem:[%s16754_s25 + $0x1960] ss:$8 sps:$4 sm:$0xff]   ;;  %v14287_v47 = vld [vmem:[%s16754_s25 + $0x174] ss:$8 sps:$4 sm:$0xff]  }
  0x6e   : > { %10205 = vmatpush1.bf16.msra.mxu1 %v14209_v48  ;;  %v14290_v48 = vld [vmem:[%s16754_s25 + $0x1974] ss:$8 sps:$4 sm:$0xff]  }
  0x6f   : > { %11189 = vmatpush1.bf16.msra.mxu0 %v14210_v49  ;;  %10206 = vmatprep.subr.bf16.mxu1 %v14211_v51  ;;  %v14285_v49 = vld [vmem:[%s16754_s25 + $0x170] ss:$8 sps:$4 sm:$0xff]  }
  0x70   : > { %11190 = vmatprep.subr.bf16.mxu0 %v14213_v52  ;;  %v14288_v51 = vld [vmem:[%s16754_s25 + $0x1970] ss:$8 sps:$4 sm:$0xff]   ;;  %v14293_v52 = vld [vmem:[%s16754_s25 + $0x184] ss:$8 sps:$4 sm:$0xff]  }
  0x72   : > { %10207 = vmatpush1.bf16.msra.mxu1 %v14215_v54  ;;  %v14291_v54 = vld [vmem:[%s16754_s25 + $0x180] ss:$8 sps:$4 sm:$0xff]  }
  0x73   : > { %11191 = vmatpush1.bf16.msra.mxu0 %v14216_v56  ;;  %10208 = vmatprep.subr.bf16.mxu1 %v14217_v58  ;;  %v14299_v56 = vld [vmem:[%s16754_s25 + $0x194] ss:$8 sps:$4 sm:$0xff]   ;;  %v14297_v58 = vld [vmem:[%s16754_s25 + $0x190] ss:$8 sps:$4 sm:$0xff]  }
  0x74   : > { %11192 = vmatprep.subr.bf16.mxu0 %v14219_v59  ;;  %v14300_v59 = vld [vmem:[%s16754_s25 + $0x1990] ss:$8 sps:$4 sm:$0xff]  }
  0x76   : > { %10209 = vmatpush1.bf16.msra.mxu1 %v14221_v63  ;;  %v14306_v63 = vld [vmem:[%s16754_s25 + $0x19a0] ss:$8 sps:$4 sm:$0xff]  }
  0x77   : > { %11193 = vmatpush1.bf16.msra.mxu0 %v14222_v0  ;;  %10210 = vmatprep.subr.bf16.mxu1 %v14223_v1  ;;  %v14311_v0 = vld [vmem:[%s16754_s25 + $0x1b4] ss:$8 sps:$4 sm:$0xff]  }
  0x78   : > { %11194 = vmatprep.subr.bf16.mxu0 %v14225_v2  ;;  %v14314_v1 = vld [vmem:[%s16754_s25 + $0x19b4] ss:$8 sps:$4 sm:$0xff]   ;;  %v14309_v2 = vld [vmem:[%s16754_s25 + $0x1b0] ss:$8 sps:$4 sm:$0xff]  }
  0x7a   : > { %10211 = vmatpush1.bf16.msra.mxu1 %v14227_v3  ;;  %v14312_v3 = vld [vmem:[%s16754_s25 + $0x19b0] ss:$8 sps:$4 sm:$0xff]  }
  0x7b   : > { %11195 = vmatpush1.bf16.msra.mxu0 %v14228_v4  ;;  %10212 = vmatprep.subr.bf16.mxu1 %v14229_v5  ;;  %v14317_v4 = vld [vmem:[%s16754_s25 + $0x1c4] ss:$8 sps:$4 sm:$0xff]  }
  0x7c   : > { %11196 = vmatprep.subr.bf16.mxu0 %v14231_v6  ;;  %v14320_v5 = vld [vmem:[%s16754_s25 + $0x19c4] ss:$8 sps:$4 sm:$0xff]   ;;  %v14315_v6 = vld [vmem:[%s16754_s25 + $0x1c0] ss:$8 sps:$4 sm:$0xff]  }
  0x7e   : > { %10213 = vmatpush1.bf16.msra.mxu1 %v14233_v7  ;;  %v14318_v7 = vld [vmem:[%s16754_s25 + $0x19c0] ss:$8 sps:$4 sm:$0xff]  }
  0x7f   : > { %11197 = vmatpush1.bf16.msra.mxu0 %v14234_v8  ;;  %10214 = vmatprep.subr.bf16.mxu1 %v14235_v9  ;;  %v14323_v8 = vld [vmem:[%s16754_s25 + $0x1d4] ss:$8 sps:$4 sm:$0xff]  }
  0x80   : > { %11198 = vmatprep.subr.bf16.mxu0 %v14237_v10  ;;  %v14326_v9 = vld [vmem:[%s16754_s25 + $0x19d4] ss:$8 sps:$4 sm:$0xff]   ;;  %v14321_v10 = vld [vmem:[%s16754_s25 + $0x1d0] ss:$8 sps:$4 sm:$0xff]  }
  0x82   : > { %10215 = vmatpush1.bf16.msra.mxu1 %v14239_v13  ;;  %v14332_v13 = vld [vmem:[%s16754_s25 + $0x19e4] ss:$8 sps:$4 sm:$0xff]  }
  0x83   : > { %11199 = vmatpush1.bf16.msra.mxu0 %v14240_v14  ;;  %10225 = vmatprep.subr.bf16.mxu1 %v14244_v15  ;;  %v14327_v14 = vld [vmem:[%s16754_s25 + $0x1e0] ss:$8 sps:$4 sm:$0xff]  }
  0x84   : > { %11209 = vmatprep.subr.bf16.mxu0 %v14248_v16  ;;  %v14330_v15 = vld [vmem:[%s16754_s25 + $0x19e0] ss:$8 sps:$4 sm:$0xff]   ;;  %v14335_v16 = vld [vmem:[%s16754_s25 + $0x1f4] ss:$8 sps:$4 sm:$0xff]  }
  0x85   : > { %10217 = vmatmul.mubr.bf16.vlgmr.msra.gmra.mrb[0].mxu1 %v1837_v55  ;;  %v14294_v55 = vld [vmem:[%s16754_s25 + $0x1980] ss:$8 sps:$4 sm:$0xff]  }
  0x86   : > { %11201 = vmatmul.mubr.bf16.vlgmr.msra.gmra.mrb[0].mxu0 %v2041_v61  ;;  %10226 = vmatpush1.bf16.msra.mxu1 %v14242_v19  ;;  %v14308_v61 = vld [vmem:[%s16754_s25 + $0x19a4] ss:$8 sps:$4 sm:$0xff]   ;;  %v14338_v19 = vld [vmem:[%s16754_s25 + $0x19f4] ss:$8 sps:$4 sm:$0xff]  }
  0x87   : > { %11210 = vmatpush1.bf16.msra.mxu0 %v14246_v20  ;;  %10227 = vmatprep.subr.bf16.mxu1 %v14251_v21  ;;  %v14333_v20 = vld [vmem:[%s16754_s25 + $0x1f0] ss:$8 sps:$4 sm:$0xff]  }
  0x88   : > { %11211 = vmatprep.subr.bf16.mxu0 %v14254_v22  ;;  %10257 = vmatprep.mubr.bf16.mxu1 %v1846_v23  ;;  %v14336_v21 = vld [vmem:[%s16754_s25 + $0x19f0] ss:$8 sps:$4 sm:$0xff]   ;;  %v14341_v22 = vld [vmem:[%s16754_s25 + $0x204] ss:$8 sps:$4 sm:$0xff]  }
  0x89   : > { %11241 = vmatprep.mubr.bf16.mxu0 %v2050_v24  ;;  %v14344_v23 = vld [vmem:[%s16754_s25 + $0x1a04] ss:$8 sps:$4 sm:$0xff]   ;;  %v14339_v24 = vld [vmem:[%s16754_s25 + $0x200] ss:$8 sps:$4 sm:$0xff]  }
  0x8a   : > { %10228 = vmatpush1.bf16.msra.mxu1 %v14249_v25  ;;  %v14342_v25 = vld [vmem:[%s16754_s25 + $0x1a00] ss:$8 sps:$4 sm:$0xff]  }
  0x8b   : > { %11212 = vmatpush1.bf16.msra.mxu0 %v14252_v26  ;;  %10229 = vmatprep.subr.bf16.mxu1 %v14257_v27  ;;  %v14347_v26 = vld [vmem:[%s16754_s25 + $0x214] ss:$8 sps:$4 sm:$0xff]   ;;  %v16924_v27 = vld [vmem:[%s16770_s23 + $0x8] sm:$0xff] }
  0x8c   : > { %11213 = vmatprep.subr.bf16.mxu0 %v14260_v28  ;;  %v14350_v28 = vld [vmem:[%s16754_s25 + $0x1a14] ss:$8 sps:$4 sm:$0xff]  }
  0x8e   : > { %10230 = vmatpush1.bf16.msra.mxu1 %v14255_v29  ;;  %v16929_v29 = vrot.slane %v16924_v27, %v16818_v50 }
  0x8f   : > { %11214 = vmatpush1.bf16.msra.mxu0 %v14258_v30  ;;  %10231 = vmatprep.subr.bf16.mxu1 %v14263_v31  ;;  %v16932_v30 = vld [vmem:[%s16770_s23 + $0x68] sm:$0xff]  ;;  %v14345_v31 = vld [vmem:[%s16754_s25 + $0x210] ss:$8 sps:$4 sm:$0xff]  }
  0x90   : > { %11215 = vmatprep.subr.bf16.mxu0 %v14266_v32  ;;  %v14348_v32 = vld [vmem:[%s16754_s25 + $0x1a10] ss:$8 sps:$4 sm:$0xff]  }
  0x92   : > { %10232 = vmatpush1.bf16.msra.mxu1 %v14261_v33  ;;  %v1862_v33 = vcombine.high %v16929_v29, %v16929_v29 }
  0x93   : > { %11216 = vmatpush1.bf16.msra.mxu0 %v14264_v34  ;;  %10233 = vmatprep.subr.bf16.mxu1 %v14269_v35  ;;  %v16942_v34 = vrot.slane %v16932_v30, %v16818_v50  ;;  %v14353_v35 = vld [vmem:[%s16754_s25 + $0x224] ss:$8 sps:$4 sm:$0xff]  }
  0x94   : > { %11217 = vmatprep.subr.bf16.mxu0 %v14272_v36  ;;  %v14351_v36 = vld [vmem:[%s16754_s25 + $0x220] ss:$8 sps:$4 sm:$0xff]  }
  0x96   : > { %10234 = vmatpush1.bf16.msra.mxu1 %v14267_v37  ;;  %v14354_v37 = vld [vmem:[%s16754_s25 + $0x1a20] ss:$8 sps:$4 sm:$0xff]  }
  0x97   : > { %11218 = vmatpush1.bf16.msra.mxu0 %v14270_v38  ;;  %10235 = vmatprep.subr.bf16.mxu1 %v14275_v39  ;;  %v14359_v38 = vld [vmem:[%s16754_s25 + $0x234] ss:$8 sps:$4 sm:$0xff]  }
  0x98   : > { %11219 = vmatprep.subr.bf16.mxu0 %v14278_v40  ;;  %v14362_v39 = vld [vmem:[%s16754_s25 + $0x1a34] ss:$8 sps:$4 sm:$0xff]   ;;  %v14357_v40 = vld [vmem:[%s16754_s25 + $0x230] ss:$8 sps:$4 sm:$0xff]  }
  0x9a   : > { %10236 = vmatpush1.bf16.msra.mxu1 %v14273_v41  ;;  %v14360_v41 = vld [vmem:[%s16754_s25 + $0x1a30] ss:$8 sps:$4 sm:$0xff]  }
  0x9b   : > { %11220 = vmatpush1.bf16.msra.mxu0 %v14276_v42  ;;  %10237 = vmatprep.subr.bf16.mxu1 %v14281_v43  ;;  %v14365_v42 = vld [vmem:[%s16754_s25 + $0x244] ss:$8 sps:$4 sm:$0xff]  }
  0x9c   : > { %11221 = vmatprep.subr.bf16.mxu0 %v14284_v44  ;;  %v14368_v43 = vld [vmem:[%s16754_s25 + $0x1a44] ss:$8 sps:$4 sm:$0xff]   ;;  %v14363_v44 = vld [vmem:[%s16754_s25 + $0x240] ss:$8 sps:$4 sm:$0xff]  }
  0x9e   : > { %10238 = vmatpush1.bf16.msra.mxu1 %v14279_v45  ;;  %v14366_v45 = vld [vmem:[%s16754_s25 + $0x1a40] ss:$8 sps:$4 sm:$0xff]  }
  0x9f   : > { %11222 = vmatpush1.bf16.msra.mxu0 %v14282_v46  ;;  %10239 = vmatprep.subr.bf16.mxu1 %v14287_v47  ;;  %v14371_v46 = vld [vmem:[%s16754_s25 + $0x254] ss:$8 sps:$4 sm:$0xff]  }
  0xa0   : > { %11223 = vmatprep.subr.bf16.mxu0 %v14290_v48  ;;  %v14374_v47 = vld [vmem:[%s16754_s25 + $0x1a54] ss:$8 sps:$4 sm:$0xff]   ;;  %v14369_v48 = vld [vmem:[%s16754_s25 + $0x250] ss:$8 sps:$4 sm:$0xff]  }
  0xa2   : > { %10240 = vmatpush1.bf16.msra.mxu1 %v14285_v49  ;;  %v14372_v49 = vld [vmem:[%s16754_s25 + $0x1a50] ss:$8 sps:$4 sm:$0xff]  }
  0xa3   : > { %11224 = vmatpush1.bf16.msra.mxu0 %v14288_v51  ;;  %10241 = vmatprep.subr.bf16.mxu1 %v14293_v52  ;;  %v14377_v51 = vld [vmem:[%s16754_s25 + $0x264] ss:$8 sps:$4 sm:$0xff]  }
  0xa4   : > { %11225 = vmatprep.subr.bf16.mxu0 %v14296_v53  ;;  %v14380_v52 = vld [vmem:[%s16754_s25 + $0x1a64] ss:$8 sps:$4 sm:$0xff]   ;;  %v14375_v53 = vld [vmem:[%s16754_s25 + $0x260] ss:$8 sps:$4 sm:$0xff]  }
  0xa6   : > { %10242 = vmatpush1.bf16.msra.mxu1 %v14291_v54  ;;  %v14378_v54 = vld [vmem:[%s16754_s25 + $0x1a60] ss:$8 sps:$4 sm:$0xff]  }
  0xa7   : > { %11226 = vmatpush1.bf16.msra.mxu0 %v14294_v55  ;;  %10243 = vmatprep.subr.bf16.mxu1 %v14299_v56  ;;  %v14383_v55 = vld [vmem:[%s16754_s25 + $0x274] ss:$8 sps:$4 sm:$0xff]  }
  0xa8   : > { %11227 = vmatprep.subr.bf16.mxu0 %v14302_v57  ;;  %v14386_v56 = vld [vmem:[%s16754_s25 + $0x1a74] ss:$8 sps:$4 sm:$0xff]   ;;  %v14381_v57 = vld [vmem:[%s16754_s25 + $0x270] ss:$8 sps:$4 sm:$0xff]  }
  0xaa   : > { %10244 = vmatpush1.bf16.msra.mxu1 %v14297_v58  ;;  %v14384_v58 = vld [vmem:[%s16754_s25 + $0x1a70] ss:$8 sps:$4 sm:$0xff]  }
  0xab   : > { %11228 = vmatpush1.bf16.msra.mxu0 %v14300_v59  ;;  %10245 = vmatprep.subr.bf16.mxu1 %v14305_v60  ;;  %v14389_v59 = vld [vmem:[%s16754_s25 + $0x284] ss:$8 sps:$4 sm:$0xff]  }
  0xac   : > { %11229 = vmatprep.subr.bf16.mxu0 %v14308_v61  ;;  %v14392_v60 = vld [vmem:[%s16754_s25 + $0x1a84] ss:$8 sps:$4 sm:$0xff]   ;;  %v14387_v61 = vld [vmem:[%s16754_s25 + $0x280] ss:$8 sps:$4 sm:$0xff]  }
  0xae   : > { %10246 = vmatpush1.bf16.msra.mxu1 %v14303_v62  ;;  %v14390_v62 = vld [vmem:[%s16754_s25 + $0x1a80] ss:$8 sps:$4 sm:$0xff]  }
  0xaf   : > { %11230 = vmatpush1.bf16.msra.mxu0 %v14306_v63  ;;  %10247 = vmatprep.subr.bf16.mxu1 %v14311_v0  ;;  %v14395_v63 = vld [vmem:[%s16754_s25 + $0x294] ss:$8 sps:$4 sm:$0xff]  }
  0xb0   : > { %11231 = vmatprep.subr.bf16.mxu0 %v14314_v1  ;;  %v14398_v0 = vld [vmem:[%s16754_s25 + $0x1a94] ss:$8 sps:$4 sm:$0xff]   ;;  %v14393_v1 = vld [vmem:[%s16754_s25 + $0x290] ss:$8 sps:$4 sm:$0xff]  }
  0xb2   : > { %10248 = vmatpush1.bf16.msra.mxu1 %v14309_v2  ;;  %v14396_v2 = vld [vmem:[%s16754_s25 + $0x1a90] ss:$8 sps:$4 sm:$0xff]  }
  0xb3   : > { %11232 = vmatpush1.bf16.msra.mxu0 %v14312_v3  ;;  %10249 = vmatprep.subr.bf16.mxu1 %v14317_v4  ;;  %v14401_v3 = vld [vmem:[%s16754_s25 + $0x2a4] ss:$8 sps:$4 sm:$0xff]  }
  0xb4   : > { %11233 = vmatprep.subr.bf16.mxu0 %v14320_v5  ;;  %v14404_v4 = vld [vmem:[%s16754_s25 + $0x1aa4] ss:$8 sps:$4 sm:$0xff]   ;;  %v14399_v5 = vld [vmem:[%s16754_s25 + $0x2a0] ss:$8 sps:$4 sm:$0xff]  }
  0xb6   : > { %10250 = vmatpush1.bf16.msra.mxu1 %v14315_v6  ;;  %v14402_v6 = vld [vmem:[%s16754_s25 + $0x1aa0] ss:$8 sps:$4 sm:$0xff]  }
  0xb7   : > { %11234 = vmatpush1.bf16.msra.mxu0 %v14318_v7  ;;  %10251 = vmatprep.subr.bf16.mxu1 %v14323_v8  ;;  %v14407_v7 = vld [vmem:[%s16754_s25 + $0x2b4] ss:$8 sps:$4 sm:$0xff]  }
  0xb8   : > { %11235 = vmatprep.subr.bf16.mxu0 %v14326_v9  ;;  %v14410_v8 = vld [vmem:[%s16754_s25 + $0x1ab4] ss:$8 sps:$4 sm:$0xff]   ;;  %v14405_v9 = vld [vmem:[%s16754_s25 + $0x2b0] ss:$8 sps:$4 sm:$0xff]  }
  0xba   : > { %10252 = vmatpush1.bf16.msra.mxu1 %v14321_v10  ;;  %v14408_v10 = vld [vmem:[%s16754_s25 + $0x1ab0] ss:$8 sps:$4 sm:$0xff]  }
  0xbb   : > { %11236 = vmatpush1.bf16.msra.mxu0 %v14324_v11  ;;  %10253 = vmatprep.subr.bf16.mxu1 %v14329_v12  ;;  %v14413_v11 = vld [vmem:[%s16754_s25 + $0x2c4] ss:$8 sps:$4 sm:$0xff]  }
  0xbc   : > { %11237 = vmatprep.subr.bf16.mxu0 %v14332_v13  ;;  %v14416_v12 = vld [vmem:[%s16754_s25 + $0x1ac4] ss:$8 sps:$4 sm:$0xff]   ;;  %v14411_v13 = vld [vmem:[%s16754_s25 + $0x2c0] ss:$8 sps:$4 sm:$0xff]  }
  0xbe   : > { %10254 = vmatpush1.bf16.msra.mxu1 %v14327_v14  ;;  %v14414_v14 = vld [vmem:[%s16754_s25 + $0x1ac0] ss:$8 sps:$4 sm:$0xff]  }
  0xbf   : > { %11238 = vmatpush1.bf16.msra.mxu0 %v14330_v15  ;;  %10255 = vmatprep.subr.bf16.mxu1 %v14335_v16  ;;  %v14419_v15 = vld [vmem:[%s16754_s25 + $0x2d4] ss:$8 sps:$4 sm:$0xff]  }
  0xc0   : > { %11239 = vmatprep.subr.bf16.mxu0 %v14338_v19  ;;  %v14422_v16 = vld [vmem:[%s16754_s25 + $0x1ad4] ss:$8 sps:$4 sm:$0xff]   ;;  %v14417_v19 = vld [vmem:[%s16754_s25 + $0x2d0] ss:$8 sps:$4 sm:$0xff]  }
  0xc2   : > { %10256 = vmatpush1.bf16.msra.mxu1 %v14333_v20  ;;  %v14420_v20 = vld [vmem:[%s16754_s25 + $0x1ad0] ss:$8 sps:$4 sm:$0xff]  }
  0xc3   : > { %11240 = vmatpush1.bf16.msra.mxu0 %v14336_v21  ;;  %10266 = vmatprep.subr.bf16.mxu1 %v14341_v22  ;;  %v14425_v21 = vld [vmem:[%s16754_s25 + $0x2e4] ss:$8 sps:$4 sm:$0xff]  }
  0xc4   : > { %11250 = vmatprep.subr.bf16.mxu0 %v14344_v23  ;;  %v14428_v22 = vld [vmem:[%s16754_s25 + $0x1ae4] ss:$8 sps:$4 sm:$0xff]   ;;  %v14423_v23 = vld [vmem:[%s16754_s25 + $0x2e0] ss:$8 sps:$4 sm:$0xff]  }
  0xc5   : > { %10258 = vmatmul.mubr.bf16.vlgmr.msra.gmra.mrb[0].mxu1 %v16847_v17  ;;  %v14356_v17 = vld [vmem:[%s16754_s25 + $0x1a24] ss:$8 sps:$4 sm:$0xff]  }
  0xc6   : > { %11242 = vmatmul.mubr.bf16.vlgmr.msra.gmra.mrb[0].mxu0 %v16850_v18  ;;  %10267 = vmatpush1.bf16.msra.mxu1 %v14339_v24  ;;  %v2066_v18 = vcombine.high %v16942_v34, %v16942_v34  ;;  %v14426_v24 = vld [vmem:[%s16754_s25 + $0x1ae0] ss:$8 sps:$4 sm:$0xff]  }
  0xc7   : > { %11251 = vmatpush1.bf16.msra.mxu0 %v14342_v25  ;;  %10268 = vmatprep.subr.bf16.mxu1 %v14347_v26  ;;  %v14431_v25 = vld [vmem:[%s16754_s25 + $0x2f4] ss:$8 sps:$4 sm:$0xff]  }
  0xc8   : > { %11252 = vmatprep.subr.bf16.mxu0 %v14350_v28  ;;  %10298 = vmatprep.mubr.bf16.mxu1 %v1862_v33  ;;  %v14434_v26 = vld [vmem:[%s16754_s25 + $0x1af4] ss:$8 sps:$4 sm:$0xff]   ;;  %v1847_v28 = vcombine.high %v16924_v27, %v16924_v27  ;;  %v14432_v33 = vld [vmem:[%s16754_s25 + $0x1af0] ss:$8 sps:$4 sm:$0xff]  }
  0xc9   : > { %11282 = vmatprep.mubr.bf16.mxu0 %v2066_v18 }
  0xca   : > { %10269 = vmatpush1.bf16.msra.mxu1 %v14345_v31  ;;  %v2051_v31 = vcombine.high %v16932_v30, %v16932_v30  ;;  %v17009_v18 = vrot.slane %v1847_v28, %v16818_v50  ;;  %v14438_v30 = vld [vmem:[%s16754_s25 + $0x1b00] ss:$8 sps:$4 sm:$0xff]   ;;  %v14516_v28 = vld [vmem:[%s16754_s25 + $0x1bd0] ss:$8 sps:$4 sm:$0xff]  }
  0xcb   : > { %11253 = vmatpush1.bf16.msra.mxu0 %v14348_v32  ;;  %10270 = vmatprep.subr.bf16.mxu1 %v14353_v35  ;;  %v14429_v32 = vld [vmem:[%s16754_s25 + $0x2f0] ss:$8 sps:$4 sm:$0xff]   ;;  %v14437_v35 = vld [vmem:[%s16754_s25 + $0x304] ss:$8 sps:$4 sm:$0xff]  }
  0xcc   : > { %11254 = vmatprep.subr.bf16.mxu0 %v14356_v17  ;;  %v14440_v17 = vld [vmem:[%s16754_s25 + $0x1b04] ss:$8 sps:$4 sm:$0xff]   ;;  %v17012_v27 = vrot.slane %v2051_v31, %v16818_v50 }
  0xcd   : > { %v14521_v31 = vld [vmem:[%s16754_s25 + $0x3e4] ss:$8 sps:$4 sm:$0xff]  }
  0xce   : > { %10271 = vmatpush1.bf16.msra.mxu1 %v14351_v36  ;;  %v14435_v36 = vld [vmem:[%s16754_s25 + $0x300] ss:$8 sps:$4 sm:$0xff]  }
  0xcf   : > { %11255 = vmatpush1.bf16.msra.mxu0 %v14354_v37  ;;  %10272 = vmatprep.subr.bf16.mxu1 %v14359_v38  ;;  %v14443_v37 = vld [vmem:[%s16754_s25 + $0x314] ss:$8 sps:$4 sm:$0xff]  }
  0xd0   : > { %11256 = vmatprep.subr.bf16.mxu0 %v14362_v39  ;;  %v14446_v38 = vld [vmem:[%s16754_s25 + $0x1b14] ss:$8 sps:$4 sm:$0xff]   ;;  %v1863_v39 = vcombine.high %v17009_v18, %v17009_v18 }
  0xd2   : > { %10273 = vmatpush1.bf16.msra.mxu1 %v14357_v40  ;;  %v2067_v40 = vcombine.high %v17012_v27, %v17012_v27 }
  0xd3   : > { %11257 = vmatpush1.bf16.msra.mxu0 %v14360_v41  ;;  %10274 = vmatprep.subr.bf16.mxu1 %v14365_v42  ;;  %v14441_v41 = vld [vmem:[%s16754_s25 + $0x310] ss:$8 sps:$4 sm:$0xff]  }
  0xd4   : > { %11258 = vmatprep.subr.bf16.mxu0 %v14368_v43  ;;  %v14444_v42 = vld [vmem:[%s16754_s25 + $0x1b10] ss:$8 sps:$4 sm:$0xff]   ;;  %v14449_v43 = vld [vmem:[%s16754_s25 + $0x324] ss:$8 sps:$4 sm:$0xff]  }
  0xd6   : > { %10275 = vmatpush1.bf16.msra.mxu1 %v14363_v44  ;;  %v14452_v44 = vld [vmem:[%s16754_s25 + $0x1b24] ss:$8 sps:$4 sm:$0xff]  }
  0xd7   : > { %11259 = vmatpush1.bf16.msra.mxu0 %v14366_v45  ;;  %10276 = vmatprep.subr.bf16.mxu1 %v14371_v46  ;;  %v14447_v45 = vld [vmem:[%s16754_s25 + $0x320] ss:$8 sps:$4 sm:$0xff]   ;;  %v14458_v46 = vld [vmem:[%s16754_s25 + $0x1b34] ss:$8 sps:$4 sm:$0xff]  }
  0xd8   : > { %11260 = vmatprep.subr.bf16.mxu0 %v14374_v47  ;;  %v14453_v47 = vld [vmem:[%s16754_s25 + $0x330] ss:$8 sps:$4 sm:$0xff]  }
  0xda   : > { %10277 = vmatpush1.bf16.msra.mxu1 %v14369_v48  ;;  %v14456_v48 = vld [vmem:[%s16754_s25 + $0x1b30] ss:$8 sps:$4 sm:$0xff]  }
  0xdb   : > { %11261 = vmatpush1.bf16.msra.mxu0 %v14372_v49  ;;  %10278 = vmatprep.subr.bf16.mxu1 %v14377_v51  ;;  %v14461_v49 = vld [vmem:[%s16754_s25 + $0x344] ss:$8 sps:$4 sm:$0xff]  }
  0xdc   : > { %11262 = vmatprep.subr.bf16.mxu0 %v14380_v52  ;;  %v14464_v51 = vld [vmem:[%s16754_s25 + $0x1b44] ss:$8 sps:$4 sm:$0xff]   ;;  %v14459_v52 = vld [vmem:[%s16754_s25 + $0x340] ss:$8 sps:$4 sm:$0xff]  }
  0xde   : > { %10279 = vmatpush1.bf16.msra.mxu1 %v14375_v53  ;;  %v14462_v53 = vld [vmem:[%s16754_s25 + $0x1b40] ss:$8 sps:$4 sm:$0xff]  }
  0xdf   : > { %11263 = vmatpush1.bf16.msra.mxu0 %v14378_v54  ;;  %10280 = vmatprep.subr.bf16.mxu1 %v14383_v55  ;;  %v14467_v54 = vld [vmem:[%s16754_s25 + $0x354] ss:$8 sps:$4 sm:$0xff]  }
  0xe0   : > { %11264 = vmatprep.subr.bf16.mxu0 %v14386_v56  ;;  %v14470_v55 = vld [vmem:[%s16754_s25 + $0x1b54] ss:$8 sps:$4 sm:$0xff]   ;;  %v14465_v56 = vld [vmem:[%s16754_s25 + $0x350] ss:$8 sps:$4 sm:$0xff]  }
  0xe2   : > { %10281 = vmatpush1.bf16.msra.mxu1 %v14381_v57  ;;  %v14468_v57 = vld [vmem:[%s16754_s25 + $0x1b50] ss:$8 sps:$4 sm:$0xff]  }
  0xe3   : > { %11265 = vmatpush1.bf16.msra.mxu0 %v14384_v58  ;;  %10282 = vmatprep.subr.bf16.mxu1 %v14389_v59  ;;  %v14473_v58 = vld [vmem:[%s16754_s25 + $0x364] ss:$8 sps:$4 sm:$0xff]  }
  0xe4   : > { %11266 = vmatprep.subr.bf16.mxu0 %v14392_v60  ;;  %v14476_v59 = vld [vmem:[%s16754_s25 + $0x1b64] ss:$8 sps:$4 sm:$0xff]   ;;  %v14471_v60 = vld [vmem:[%s16754_s25 + $0x360] ss:$8 sps:$4 sm:$0xff]  }
  0xe6   : > { %10283 = vmatpush1.bf16.msra.mxu1 %v14387_v61  ;;  %v14474_v61 = vld [vmem:[%s16754_s25 + $0x1b60] ss:$8 sps:$4 sm:$0xff]  }
  0xe7   : > { %11267 = vmatpush1.bf16.msra.mxu0 %v14390_v62  ;;  %10284 = vmatprep.subr.bf16.mxu1 %v14395_v63  ;;  %v14479_v62 = vld [vmem:[%s16754_s25 + $0x374] ss:$8 sps:$4 sm:$0xff]  }
  0xe8   : > { %11268 = vmatprep.subr.bf16.mxu0 %v14398_v0  ;;  %v14482_v63 = vld [vmem:[%s16754_s25 + $0x1b74] ss:$8 sps:$4 sm:$0xff]   ;;  %v14477_v0 = vld [vmem:[%s16754_s25 + $0x370] ss:$8 sps:$4 sm:$0xff]  }
  0xea   : > { %10285 = vmatpush1.bf16.msra.mxu1 %v14393_v1  ;;  %v14480_v1 = vld [vmem:[%s16754_s25 + $0x1b70] ss:$8 sps:$4 sm:$0xff]  }
  0xeb   : > { %11269 = vmatpush1.bf16.msra.mxu0 %v14396_v2  ;;  %10286 = vmatprep.subr.bf16.mxu1 %v14401_v3  ;;  %v14485_v2 = vld [vmem:[%s16754_s25 + $0x384] ss:$8 sps:$4 sm:$0xff]  }
  0xec   : > { %11270 = vmatprep.subr.bf16.mxu0 %v14404_v4  ;;  %v14488_v3 = vld [vmem:[%s16754_s25 + $0x1b84] ss:$8 sps:$4 sm:$0xff]   ;;  %v14483_v4 = vld [vmem:[%s16754_s25 + $0x380] ss:$8 sps:$4 sm:$0xff]  }
  0xee   : > { %10287 = vmatpush1.bf16.msra.mxu1 %v14399_v5  ;;  %v14486_v5 = vld [vmem:[%s16754_s25 + $0x1b80] ss:$8 sps:$4 sm:$0xff]  }
  0xef   : > { %11271 = vmatpush1.bf16.msra.mxu0 %v14402_v6  ;;  %10288 = vmatprep.subr.bf16.mxu1 %v14407_v7  ;;  %v14491_v6 = vld [vmem:[%s16754_s25 + $0x394] ss:$8 sps:$4 sm:$0xff]  }
  0xf0   : > { %11272 = vmatprep.subr.bf16.mxu0 %v14410_v8  ;;  %v14494_v7 = vld [vmem:[%s16754_s25 + $0x1b94] ss:$8 sps:$4 sm:$0xff]   ;;  %v14489_v8 = vld [vmem:[%s16754_s25 + $0x390] ss:$8 sps:$4 sm:$0xff]  }
  0xf2   : > { %10289 = vmatpush1.bf16.msra.mxu1 %v14405_v9  ;;  %v14492_v9 = vld [vmem:[%s16754_s25 + $0x1b90] ss:$8 sps:$4 sm:$0xff]  }
  0xf3   : > { %11273 = vmatpush1.bf16.msra.mxu0 %v14408_v10  ;;  %10290 = vmatprep.subr.bf16.mxu1 %v14413_v11  ;;  %v14497_v10 = vld [vmem:[%s16754_s25 + $0x3a4] ss:$8 sps:$4 sm:$0xff]  }
  0xf4   : > { %11274 = vmatprep.subr.bf16.mxu0 %v14416_v12  ;;  %v14500_v11 = vld [vmem:[%s16754_s25 + $0x1ba4] ss:$8 sps:$4 sm:$0xff]   ;;  %v14495_v12 = vld [vmem:[%s16754_s25 + $0x3a0] ss:$8 sps:$4 sm:$0xff]  }
  0xf6   : > { %10291 = vmatpush1.bf16.msra.mxu1 %v14411_v13  ;;  %v14498_v13 = vld [vmem:[%s16754_s25 + $0x1ba0] ss:$8 sps:$4 sm:$0xff]  }
  0xf7   : > { %11275 = vmatpush1.bf16.msra.mxu0 %v14414_v14  ;;  %10292 = vmatprep.subr.bf16.mxu1 %v14419_v15  ;;  %v14503_v14 = vld [vmem:[%s16754_s25 + $0x3b4] ss:$8 sps:$4 sm:$0xff]  }
  0xf8   : > { %11276 = vmatprep.subr.bf16.mxu0 %v14422_v16  ;;  %v14506_v15 = vld [vmem:[%s16754_s25 + $0x1bb4] ss:$8 sps:$4 sm:$0xff]   ;;  %v14501_v16 = vld [vmem:[%s16754_s25 + $0x3b0] ss:$8 sps:$4 sm:$0xff]  }
  0xfa   : > { %10293 = vmatpush1.bf16.msra.mxu1 %v14417_v19  ;;  %v14504_v19 = vld [vmem:[%s16754_s25 + $0x1bb0] ss:$8 sps:$4 sm:$0xff]  }
  0xfb   : > { %11277 = vmatpush1.bf16.msra.mxu0 %v14420_v20  ;;  %10294 = vmatprep.subr.bf16.mxu1 %v14425_v21  ;;  %v14509_v20 = vld [vmem:[%s16754_s25 + $0x3c4] ss:$8 sps:$4 sm:$0xff]  }
  0xfc   : > { %11278 = vmatprep.subr.bf16.mxu0 %v14428_v22  ;;  %v14512_v21 = vld [vmem:[%s16754_s25 + $0x1bc4] ss:$8 sps:$4 sm:$0xff]   ;;  %v14507_v22 = vld [vmem:[%s16754_s25 + $0x3c0] ss:$8 sps:$4 sm:$0xff]  }
  0xfe   : > { %10295 = vmatpush1.bf16.msra.mxu1 %v14423_v23  ;;  %v14510_v23 = vld [vmem:[%s16754_s25 + $0x1bc0] ss:$8 sps:$4 sm:$0xff]  }
  0xff   : > { %11279 = vmatpush1.bf16.msra.mxu0 %v14426_v24  ;;  %10296 = vmatprep.subr.bf16.mxu1 %v14431_v25  ;;  %v14515_v24 = vld [vmem:[%s16754_s25 + $0x3d4] ss:$8 sps:$4 sm:$0xff]  }
 0x100   : > { %11280 = vmatprep.subr.bf16.mxu0 %v14434_v26  ;;  %v14518_v25 = vld [vmem:[%s16754_s25 + $0x1bd4] ss:$8 sps:$4 sm:$0xff]   ;;  %v14513_v26 = vld [vmem:[%s16754_s25 + $0x3d0] ss:$8 sps:$4 sm:$0xff]  }
 0x102   : > { %10297 = vmatpush1.bf16.msra.mxu1 %v14429_v32  ;;  %v14524_v32 = vld [vmem:[%s16754_s25 + $0x1be4] ss:$8 sps:$4 sm:$0xff]  }
 0x103   : > { %11281 = vmatpush1.bf16.msra.mxu0 %v14432_v33  ;;  %10307 = vmatprep.subr.bf16.mxu1 %v14437_v35  ;;  %v14519_v33 = vld [vmem:[%s16754_s25 + $0x3e0] ss:$8 sps:$4 sm:$0xff]  }
 0x104   : > { %11291 = vmatprep.subr.bf16.mxu0 %v14440_v17  ;;  %v14522_v35 = vld [vmem:[%s16754_s25 + $0x1be0] ss:$8 sps:$4 sm:$0xff]   ;;  %v14527_v17 = vld [vmem:[%s16754_s25 + $0x3f4] ss:$8 sps:$4 sm:$0xff]  }
 0x105   : > { %10299 = vmatmul.mubr.bf16.vlgmr.msra.gmra.mrb[0].mxu1 %v16929_v29  ;;  %v14450_v29 = vld [vmem:[%s16754_s25 + $0x1b20] ss:$8 sps:$4 sm:$0xff]  }
 0x106   : > { %11283 = vmatmul.mubr.bf16.vlgmr.msra.gmra.mrb[0].mxu0 %v16942_v34  ;;  %10308 = vmatpush1.bf16.msra.mxu1 %v14435_v36  ;;  %v14455_v34 = vld [vmem:[%s16754_s25 + $0x334] ss:$8 sps:$4 sm:$0xff]  }
 0x107   : > { %11292 = vmatpush1.bf16.msra.mxu0 %v14438_v30  ;;  %10309 = vmatprep.subr.bf16.mxu1 %v14443_v37  ;;  %v14530_v36 = vld [vmem:[%s16754_s25 + $0x1bf4] ss:$8 sps:$4 sm:$0xff]  }
 0x108   : > { %11293 = vmatprep.subr.bf16.mxu0 %v14446_v38  ;;  %10339 = vmatprep.mubr.bf16.mxu1 %v1863_v39  ;;  %v17081_v30 = vld [vmem:[%s16770_s23 + $0x10] sm:$0xff] }
 0x109   : > { %11323 = vmatprep.mubr.bf16.mxu0 %v2067_v40  ;;  %v17084_v37 = vld [vmem:[%s16770_s23 + $0x70] sm:$0xff]  ;;  %v14534_v40 = vld [vmem:[%s16754_s25 + $0x404] ss:$8 sps:$4 sm:$0xff]  }
 0x10a   : > { %10310 = vmatpush1.bf16.msra.mxu1 %v14441_v41  ;;  %v14525_v38 = vld [vmem:[%s16754_s25 + $0x3f0] ss:$8 sps:$4 sm:$0xff]   ;;  %v14538_v41 = vld [vmem:[%s16754_s25 + $0x1c04] ss:$8 sps:$4 sm:$0xff]  }
 0x10b   : > { %11294 = vmatpush1.bf16.msra.mxu0 %v14444_v42  ;;  %10311 = vmatprep.subr.bf16.mxu1 %v14449_v43  ;;  %v14528_v39 = vld [vmem:[%s16754_s25 + $0x1bf0] ss:$8 sps:$4 sm:$0xff]   ;;  %v17092_v42 = vrot.slane %v17081_v30, %v16818_v50  ;;  %v17096_v43 = vrot.slane %v17084_v37, %v16818_v50 }
 0x10c   : > { %11295 = vmatprep.subr.bf16.mxu0 %v14452_v44  ;;  %v14532_v44 = vld [vmem:[%s16754_s25 + $0x400] ss:$8 sps:$4 sm:$0xff]  }
 0x10e   : > { %10312 = vmatpush1.bf16.msra.mxu1 %v14447_v45  ;;  %v14536_v45 = vld [vmem:[%s16754_s25 + $0x1c00] ss:$8 sps:$4 sm:$0xff]  }
 0x10f   : > { %11296 = vmatpush1.bf16.msra.mxu0 %v14450_v29  ;;  %10313 = vmatprep.subr.bf16.mxu1 %v14455_v34  ;;  %v14541_v29 = vld [vmem:[%s16754_s25 + $0x414] ss:$8 sps:$4 sm:$0xff]  }
 0x110   : > { %11297 = vmatprep.subr.bf16.mxu0 %v14458_v46  ;;  %v14544_v34 = vld [vmem:[%s16754_s25 + $0x1c14] ss:$8 sps:$4 sm:$0xff]   ;;  %v1879_v46 = vcombine.high %v17092_v42, %v17092_v42 }
 0x112   : > { %10314 = vmatpush1.bf16.msra.mxu1 %v14453_v47  ;;  %v2083_v47 = vcombine.high %v17096_v43, %v17096_v43 }
 0x113   : > { %11298 = vmatpush1.bf16.msra.mxu0 %v14456_v48  ;;  %10315 = vmatprep.subr.bf16.mxu1 %v14461_v49  ;;  %v14539_v48 = vld [vmem:[%s16754_s25 + $0x410] ss:$8 sps:$4 sm:$0xff]  }
 0x114   : > { %11299 = vmatprep.subr.bf16.mxu0 %v14464_v51  ;;  %v14542_v49 = vld [vmem:[%s16754_s25 + $0x1c10] ss:$8 sps:$4 sm:$0xff]   ;;  %v14547_v51 = vld [vmem:[%s16754_s25 + $0x424] ss:$8 sps:$4 sm:$0xff]  }
 0x116   : > { %10316 = vmatpush1.bf16.msra.mxu1 %v14459_v52  ;;  %v14550_v52 = vld [vmem:[%s16754_s25 + $0x1c24] ss:$8 sps:$4 sm:$0xff]  }
 0x117   : > { %11300 = vmatpush1.bf16.msra.mxu0 %v14462_v53  ;;  %10317 = vmatprep.subr.bf16.mxu1 %v14467_v54  ;;  %v14553_v53 = vld [vmem:[%s16754_s25 + $0x434] ss:$8 sps:$4 sm:$0xff]  }
 0x118   : > { %11301 = vmatprep.subr.bf16.mxu0 %v14470_v55  ;;  %v14556_v54 = vld [vmem:[%s16754_s25 + $0x1c34] ss:$8 sps:$4 sm:$0xff]   ;;  %v14551_v55 = vld [vmem:[%s16754_s25 + $0x430] ss:$8 sps:$4 sm:$0xff]  }
 0x11a   : > { %10318 = vmatpush1.bf16.msra.mxu1 %v14465_v56  ;;  %v14554_v56 = vld [vmem:[%s16754_s25 + $0x1c30] ss:$8 sps:$4 sm:$0xff]  }
 0x11b   : > { %11302 = vmatpush1.bf16.msra.mxu0 %v14468_v57  ;;  %10319 = vmatprep.subr.bf16.mxu1 %v14473_v58  ;;  %v14559_v57 = vld [vmem:[%s16754_s25 + $0x444] ss:$8 sps:$4 sm:$0xff]  }
 0x11c   : > { %11303 = vmatprep.subr.bf16.mxu0 %v14476_v59  ;;  %v14562_v58 = vld [vmem:[%s16754_s25 + $0x1c44] ss:$8 sps:$4 sm:$0xff]   ;;  %v14557_v59 = vld [vmem:[%s16754_s25 + $0x440] ss:$8 sps:$4 sm:$0xff]  }
 0x11e   : > { %10320 = vmatpush1.bf16.msra.mxu1 %v14471_v60  ;;  %v14560_v60 = vld [vmem:[%s16754_s25 + $0x1c40] ss:$8 sps:$4 sm:$0xff]  }
 0x11f   : > { %11304 = vmatpush1.bf16.msra.mxu0 %v14474_v61  ;;  %10321 = vmatprep.subr.bf16.mxu1 %v14479_v62  ;;  %v14565_v61 = vld [vmem:[%s16754_s25 + $0x454] ss:$8 sps:$4 sm:$0xff]  }
 0x120   : > { %11305 = vmatprep.subr.bf16.mxu0 %v14482_v63  ;;  %v14568_v62 = vld [vmem:[%s16754_s25 + $0x1c54] ss:$8 sps:$4 sm:$0xff]   ;;  %v14563_v63 = vld [vmem:[%s16754_s25 + $0x450] ss:$8 sps:$4 sm:$0xff]  }
 0x122   : > { %10322 = vmatpush1.bf16.msra.mxu1 %v14477_v0  ;;  %v14566_v0 = vld [vmem:[%s16754_s25 + $0x1c50] ss:$8 sps:$4 sm:$0xff]  }
 0x123   : > { %11306 = vmatpush1.bf16.msra.mxu0 %v14480_v1  ;;  %10323 = vmatprep.subr.bf16.mxu1 %v14485_v2  ;;  %v14571_v1 = vld [vmem:[%s16754_s25 + $0x464] ss:$8 sps:$4 sm:$0xff]  }
 0x124   : > { %11307 = vmatprep.subr.bf16.mxu0 %v14488_v3  ;;  %v14574_v2 = vld [vmem:[%s16754_s25 + $0x1c64] ss:$8 sps:$4 sm:$0xff]   ;;  %v14569_v3 = vld [vmem:[%s16754_s25 + $0x460] ss:$8 sps:$4 sm:$0xff]  }
 0x126   : > { %10324 = vmatpush1.bf16.msra.mxu1 %v14483_v4  ;;  %v14572_v4 = vld [vmem:[%s16754_s25 + $0x1c60] ss:$8 sps:$4 sm:$0xff]  }
 0x127   : > { %11308 = vmatpush1.bf16.msra.mxu0 %v14486_v5  ;;  %10325 = vmatprep.subr.bf16.mxu1 %v14491_v6  ;;  %v14577_v5 = vld [vmem:[%s16754_s25 + $0x474] ss:$8 sps:$4 sm:$0xff]  }
 0x128   : > { %11309 = vmatprep.subr.bf16.mxu0 %v14494_v7  ;;  %v14580_v6 = vld [vmem:[%s16754_s25 + $0x1c74] ss:$8 sps:$4 sm:$0xff]   ;;  %v14575_v7 = vld [vmem:[%s16754_s25 + $0x470] ss:$8 sps:$4 sm:$0xff]  }
 0x12a   : > { %10326 = vmatpush1.bf16.msra.mxu1 %v14489_v8  ;;  %v14578_v8 = vld [vmem:[%s16754_s25 + $0x1c70] ss:$8 sps:$4 sm:$0xff]  }
 0x12b   : > { %11310 = vmatpush1.bf16.msra.mxu0 %v14492_v9  ;;  %10327 = vmatprep.subr.bf16.mxu1 %v14497_v10  ;;  %v14583_v9 = vld [vmem:[%s16754_s25 + $0x484] ss:$8 sps:$4 sm:$0xff]  }
 0x12c   : > { %11311 = vmatprep.subr.bf16.mxu0 %v14500_v11  ;;  %v14586_v10 = vld [vmem:[%s16754_s25 + $0x1c84] ss:$8 sps:$4 sm:$0xff]   ;;  %v14581_v11 = vld [vmem:[%s16754_s25 + $0x480] ss:$8 sps:$4 sm:$0xff]  }
 0x12e   : > { %10328 = vmatpush1.bf16.msra.mxu1 %v14495_v12  ;;  %v14584_v12 = vld [vmem:[%s16754_s25 + $0x1c80] ss:$8 sps:$4 sm:$0xff]  }
 0x12f   : > { %11312 = vmatpush1.bf16.msra.mxu0 %v14498_v13  ;;  %10329 = vmatprep.subr.bf16.mxu1 %v14503_v14  ;;  %v14589_v13 = vld [vmem:[%s16754_s25 + $0x494] ss:$8 sps:$4 sm:$0xff]  }
 0x130   : > { %11313 = vmatprep.subr.bf16.mxu0 %v14506_v15  ;;  %v14592_v14 = vld [vmem:[%s16754_s25 + $0x1c94] ss:$8 sps:$4 sm:$0xff]   ;;  %v14587_v15 = vld [vmem:[%s16754_s25 + $0x490] ss:$8 sps:$4 sm:$0xff]  }
 0x132   : > { %10330 = vmatpush1.bf16.msra.mxu1 %v14501_v16  ;;  %v14590_v16 = vld [vmem:[%s16754_s25 + $0x1c90] ss:$8 sps:$4 sm:$0xff]  }
 0x133   : > { %11314 = vmatpush1.bf16.msra.mxu0 %v14504_v19  ;;  %10331 = vmatprep.subr.bf16.mxu1 %v14509_v20  ;;  %v14595_v19 = vld [vmem:[%s16754_s25 + $0x4a4] ss:$8 sps:$4 sm:$0xff]  }
 0x134   : > { %11315 = vmatprep.subr.bf16.mxu0 %v14512_v21  ;;  %v14598_v20 = vld [vmem:[%s16754_s25 + $0x1ca4] ss:$8 sps:$4 sm:$0xff]   ;;  %v14593_v21 = vld [vmem:[%s16754_s25 + $0x4a0] ss:$8 sps:$4 sm:$0xff]  }
 0x136   : > { %10332 = vmatpush1.bf16.msra.mxu1 %v14507_v22  ;;  %v14596_v22 = vld [vmem:[%s16754_s25 + $0x1ca0] ss:$8 sps:$4 sm:$0xff]  }
 0x137   : > { %11316 = vmatpush1.bf16.msra.mxu0 %v14510_v23  ;;  %10333 = vmatprep.subr.bf16.mxu1 %v14515_v24  ;;  %v14601_v23 = vld [vmem:[%s16754_s25 + $0x4b4] ss:$8 sps:$4 sm:$0xff]  }
 0x138   : > { %11317 = vmatprep.subr.bf16.mxu0 %v14518_v25  ;;  %v14604_v24 = vld [vmem:[%s16754_s25 + $0x1cb4] ss:$8 sps:$4 sm:$0xff]   ;;  %v14599_v25 = vld [vmem:[%s16754_s25 + $0x4b0] ss:$8 sps:$4 sm:$0xff]  }
 0x13a   : > { %10334 = vmatpush1.bf16.msra.mxu1 %v14513_v26  ;;  %v14602_v26 = vld [vmem:[%s16754_s25 + $0x1cb0] ss:$8 sps:$4 sm:$0xff]  }
 0x13b   : > { %11318 = vmatpush1.bf16.msra.mxu0 %v14516_v28  ;;  %10335 = vmatprep.subr.bf16.mxu1 %v14521_v31  ;;  %v14607_v28 = vld [vmem:[%s16754_s25 + $0x4c4] ss:$8 sps:$4 sm:$0xff]  }
 0x13c   : > { %11319 = vmatprep.subr.bf16.mxu0 %v14524_v32  ;;  %v14610_v31 = vld [vmem:[%s16754_s25 + $0x1cc4] ss:$8 sps:$4 sm:$0xff]   ;;  %v14605_v32 = vld [vmem:[%s16754_s25 + $0x4c0] ss:$8 sps:$4 sm:$0xff]  }
 0x13e   : > { %10336 = vmatpush1.bf16.msra.mxu1 %v14519_v33  ;;  %v14608_v33 = vld [vmem:[%s16754_s25 + $0x1cc0] ss:$8 sps:$4 sm:$0xff]  }
 0x13f   : > { %11320 = vmatpush1.bf16.msra.mxu0 %v14522_v35  ;;  %10337 = vmatprep.subr.bf16.mxu1 %v14527_v17  ;;  %v14613_v35 = vld [vmem:[%s16754_s25 + $0x4d4] ss:$8 sps:$4 sm:$0xff]  }
 0x140   : > { %11321 = vmatprep.subr.bf16.mxu0 %v14530_v36  ;;  %v14616_v17 = vld [vmem:[%s16754_s25 + $0x1cd4] ss:$8 sps:$4 sm:$0xff]   ;;  %v14611_v36 = vld [vmem:[%s16754_s25 + $0x4d0] ss:$8 sps:$4 sm:$0xff]  }
 0x142   : > { %10338 = vmatpush1.bf16.msra.mxu1 %v14525_v38  ;;  %v14614_v38 = vld [vmem:[%s16754_s25 + $0x1cd0] ss:$8 sps:$4 sm:$0xff]  }
 0x143   : > { %11322 = vmatpush1.bf16.msra.mxu0 %v14528_v39  ;;  %10348 = vmatprep.subr.bf16.mxu1 %v14534_v40  ;;  %v14619_v39 = vld [vmem:[%s16754_s25 + $0x4e4] ss:$8 sps:$4 sm:$0xff]  }
 0x144   : > { %11332 = vmatprep.subr.bf16.mxu0 %v14538_v41  ;;  %v14622_v40 = vld [vmem:[%s16754_s25 + $0x1ce4] ss:$8 sps:$4 sm:$0xff]   ;;  %v14617_v41 = vld [vmem:[%s16754_s25 + $0x4e0] ss:$8 sps:$4 sm:$0xff]  }
 0x145   : > { %10340 = vmatmul.mubr.bf16.vlgmr.msra.gmra.mrb[0].mxu1 %v17009_v18  ;;  %v14545_v18 = vld [vmem:[%s16754_s25 + $0x420] ss:$8 sps:$4 sm:$0xff]  }
 0x146   : > { %11324 = vmatmul.mubr.bf16.vlgmr.msra.gmra.mrb[0].mxu0 %v17012_v27  ;;  %10349 = vmatpush1.bf16.msra.mxu1 %v14532_v44  ;;  %v14548_v27 = vld [vmem:[%s16754_s25 + $0x1c20] ss:$8 sps:$4 sm:$0xff]  }
 0x147   : > { %11333 = vmatpush1.bf16.msra.mxu0 %v14536_v45  ;;  %10350 = vmatprep.subr.bf16.mxu1 %v14541_v29  ;;  %v14620_v44 = vld [vmem:[%s16754_s25 + $0x1ce0] ss:$8 sps:$4 sm:$0xff]   ;;  %v14625_v45 = vld [vmem:[%s16754_s25 + $0x4f4] ss:$8 sps:$4 sm:$0xff]  }
 0x148   : > { %11334 = vmatprep.subr.bf16.mxu0 %v14544_v34  ;;  %10380 = vmatprep.mubr.bf16.mxu1 %v1879_v46  ;;  %v14628_v29 = vld [vmem:[%s16754_s25 + $0x1cf4] ss:$8 sps:$4 sm:$0xff]   ;;  %v1864_v34 = vcombine.high %v17081_v30, %v17081_v30  ;;  %v2068_v46 = vcombine.high %v17084_v37, %v17084_v37  ;;  %v14629_v30 = vld [vmem:[%s16754_s25 + $0x500] ss:$8 sps:$4 sm:$0xff]  }
 0x149   : > { %11364 = vmatprep.mubr.bf16.mxu0 %v2083_v47  ;;  %v14623_v47 = vld [vmem:[%s16754_s25 + $0x4f0] ss:$8 sps:$4 sm:$0xff]   ;;  %v14632_v37 = vld [vmem:[%s16754_s25 + $0x1d00] ss:$8 sps:$4 sm:$0xff]  }
 0x14a   : > { %10351 = vmatpush1.bf16.msra.mxu1 %v14539_v48  ;;  %v14626_v48 = vld [vmem:[%s16754_s25 + $0x1cf0] ss:$8 sps:$4 sm:$0xff]  }
 0x14b   : > { %11335 = vmatpush1.bf16.msra.mxu0 %v14542_v49  ;;  %10352 = vmatprep.subr.bf16.mxu1 %v14547_v51  ;;  %v14631_v49 = vld [vmem:[%s16754_s25 + $0x504] ss:$8 sps:$4 sm:$0xff]  }
 0x14c   : > { %11336 = vmatprep.subr.bf16.mxu0 %v14550_v52  ;;  %v14634_v51 = vld [vmem:[%s16754_s25 + $0x1d04] ss:$8 sps:$4 sm:$0xff]   ;;  %v17173_v52 = vrot.slane %v1864_v34, %v16818_v50  ;;  %v14710_v34 = vld [vmem:[%s16754_s25 + $0x1dd0] ss:$8 sps:$4 sm:$0xff]  }
 0x14e   : > { %10353 = vmatpush1.bf16.msra.mxu1 %v14545_v18  ;;  %v17176_v18 = vrot.slane %v2068_v46, %v16818_v50  ;;  %v14715_v46 = vld [vmem:[%s16754_s25 + $0x5e4] ss:$8 sps:$4 sm:$0xff]  }
 0x14f   : > { %11337 = vmatpush1.bf16.msra.mxu0 %v14548_v27  ;;  %10354 = vmatprep.subr.bf16.mxu1 %v14553_v53  ;;  %v14637_v27 = vld [vmem:[%s16754_s25 + $0x514] ss:$8 sps:$4 sm:$0xff]  }
 0x150   : > { %11338 = vmatprep.subr.bf16.mxu0 %v14556_v54  ;;  %v14640_v53 = vld [vmem:[%s16754_s25 + $0x1d14] ss:$8 sps:$4 sm:$0xff]   ;;  %v1880_v54 = vcombine.high %v17173_v52, %v17173_v52 }
 0x152   : > { %10355 = vmatpush1.bf16.msra.mxu1 %v14551_v55  ;;  %v2084_v55 = vcombine.high %v17176_v18, %v17176_v18 }
 0x153   : > { %11339 = vmatpush1.bf16.msra.mxu0 %v14554_v56  ;;  %10356 = vmatprep.subr.bf16.mxu1 %v14559_v57  ;;  %v14635_v56 = vld [vmem:[%s16754_s25 + $0x510] ss:$8 sps:$4 sm:$0xff]  }
 0x154   : > { %11340 = vmatprep.subr.bf16.mxu0 %v14562_v58  ;;  %v14638_v57 = vld [vmem:[%s16754_s25 + $0x1d10] ss:$8 sps:$4 sm:$0xff]   ;;  %v14643_v58 = vld [vmem:[%s16754_s25 + $0x524] ss:$8 sps:$4 sm:$0xff]  }
 0x156   : > { %10357 = vmatpush1.bf16.msra.mxu1 %v14557_v59  ;;  %v14646_v59 = vld [vmem:[%s16754_s25 + $0x1d24] ss:$8 sps:$4 sm:$0xff]  }
 0x157   : > { %11341 = vmatpush1.bf16.msra.mxu0 %v14560_v60  ;;  %10358 = vmatprep.subr.bf16.mxu1 %v14565_v61  ;;  %v14649_v60 = vld [vmem:[%s16754_s25 + $0x534] ss:$8 sps:$4 sm:$0xff]  }
 0x158   : > { %11342 = vmatprep.subr.bf16.mxu0 %v14568_v62  ;;  %v14652_v61 = vld [vmem:[%s16754_s25 + $0x1d34] ss:$8 sps:$4 sm:$0xff]   ;;  %v14647_v62 = vld [vmem:[%s16754_s25 + $0x530] ss:$8 sps:$4 sm:$0xff]  }
 0x15a   : > { %10359 = vmatpush1.bf16.msra.mxu1 %v14563_v63  ;;  %v14650_v63 = vld [vmem:[%s16754_s25 + $0x1d30] ss:$8 sps:$4 sm:$0xff]  }
 0x15b   : > { %11343 = vmatpush1.bf16.msra.mxu0 %v14566_v0  ;;  %10360 = vmatprep.subr.bf16.mxu1 %v14571_v1  ;;  %v14655_v0 = vld [vmem:[%s16754_s25 + $0x544] ss:$8 sps:$4 sm:$0xff]  }
 0x15c   : > { %11344 = vmatprep.subr.bf16.mxu0 %v14574_v2  ;;  %v14658_v1 = vld [vmem:[%s16754_s25 + $0x1d44] ss:$8 sps:$4 sm:$0xff]   ;;  %v14653_v2 = vld [vmem:[%s16754_s25 + $0x540] ss:$8 sps:$4 sm:$0xff]  }
 0x15e   : > { %10361 = vmatpush1.bf16.msra.mxu1 %v14569_v3  ;;  %v14656_v3 = vld [vmem:[%s16754_s25 + $0x1d40] ss:$8 sps:$4 sm:$0xff]  }
 0x15f   : > { %11345 = vmatpush1.bf16.msra.mxu0 %v14572_v4  ;;  %10362 = vmatprep.subr.bf16.mxu1 %v14577_v5  ;;  %v14661_v4 = vld [vmem:[%s16754_s25 + $0x554] ss:$8 sps:$4 sm:$0xff]  }
 0x160   : > { %11346 = vmatprep.subr.bf16.mxu0 %v14580_v6  ;;  %v14664_v5 = vld [vmem:[%s16754_s25 + $0x1d54] ss:$8 sps:$4 sm:$0xff]   ;;  %v14659_v6 = vld [vmem:[%s16754_s25 + $0x550] ss:$8 sps:$4 sm:$0xff]  }
 0x162   : > { %10363 = vmatpush1.bf16.msra.mxu1 %v14575_v7  ;;  %v14662_v7 = vld [vmem:[%s16754_s25 + $0x1d50] ss:$8 sps:$4 sm:$0xff]  }
 0x163   : > { %11347 = vmatpush1.bf16.msra.mxu0 %v14578_v8  ;;  %10364 = vmatprep.subr.bf16.mxu1 %v14583_v9  ;;  %v14667_v8 = vld [vmem:[%s16754_s25 + $0x564] ss:$8 sps:$4 sm:$0xff]  }
 0x164   : > { %11348 = vmatprep.subr.bf16.mxu0 %v14586_v10  ;;  %v14670_v9 = vld [vmem:[%s16754_s25 + $0x1d64] ss:$8 sps:$4 sm:$0xff]   ;;  %v14665_v10 = vld [vmem:[%s16754_s25 + $0x560] ss:$8 sps:$4 sm:$0xff]  }
 0x166   : > { %10365 = vmatpush1.bf16.msra.mxu1 %v14581_v11  ;;  %v14668_v11 = vld [vmem:[%s16754_s25 + $0x1d60] ss:$8 sps:$4 sm:$0xff]  }
 0x167   : > { %11349 = vmatpush1.bf16.msra.mxu0 %v14584_v12  ;;  %10366 = vmatprep.subr.bf16.mxu1 %v14589_v13  ;;  %v14673_v12 = vld [vmem:[%s16754_s25 + $0x574] ss:$8 sps:$4 sm:$0xff]  }
 0x168   : > { %11350 = vmatprep.subr.bf16.mxu0 %v14592_v14  ;;  %v14676_v13 = vld [vmem:[%s16754_s25 + $0x1d74] ss:$8 sps:$4 sm:$0xff]   ;;  %v14671_v14 = vld [vmem:[%s16754_s25 + $0x570] ss:$8 sps:$4 sm:$0xff]  }
 0x16a   : > { %10367 = vmatpush1.bf16.msra.mxu1 %v14587_v15  ;;  %v14674_v15 = vld [vmem:[%s16754_s25 + $0x1d70] ss:$8 sps:$4 sm:$0xff]  }
 0x16b   : > { %11351 = vmatpush1.bf16.msra.mxu0 %v14590_v16  ;;  %10368 = vmatprep.subr.bf16.mxu1 %v14595_v19  ;;  %v14679_v16 = vld [vmem:[%s16754_s25 + $0x584] ss:$8 sps:$4 sm:$0xff]  }
 0x16c   : > { %11352 = vmatprep.subr.bf16.mxu0 %v14598_v20  ;;  %v14682_v19 = vld [vmem:[%s16754_s25 + $0x1d84] ss:$8 sps:$4 sm:$0xff]   ;;  %v14677_v20 = vld [vmem:[%s16754_s25 + $0x580] ss:$8 sps:$4 sm:$0xff]  }
 0x16e   : > { %10369 = vmatpush1.bf16.msra.mxu1 %v14593_v21  ;;  %v14680_v21 = vld [vmem:[%s16754_s25 + $0x1d80] ss:$8 sps:$4 sm:$0xff]  }
 0x16f   : > { %11353 = vmatpush1.bf16.msra.mxu0 %v14596_v22  ;;  %10370 = vmatprep.subr.bf16.mxu1 %v14601_v23  ;;  %v14685_v22 = vld [vmem:[%s16754_s25 + $0x594] ss:$8 sps:$4 sm:$0xff]  }
 0x170   : > { %11354 = vmatprep.subr.bf16.mxu0 %v14604_v24  ;;  %v14688_v23 = vld [vmem:[%s16754_s25 + $0x1d94] ss:$8 sps:$4 sm:$0xff]   ;;  %v14683_v24 = vld [vmem:[%s16754_s25 + $0x590] ss:$8 sps:$4 sm:$0xff]  }
 0x172   : > { %10371 = vmatpush1.bf16.msra.mxu1 %v14599_v25  ;;  %v14686_v25 = vld [vmem:[%s16754_s25 + $0x1d90] ss:$8 sps:$4 sm:$0xff]  }
 0x173   : > { %11355 = vmatpush1.bf16.msra.mxu0 %v14602_v26  ;;  %10372 = vmatprep.subr.bf16.mxu1 %v14607_v28  ;;  %v14691_v26 = vld [vmem:[%s16754_s25 + $0x5a4] ss:$8 sps:$4 sm:$0xff]  }
 0x174   : > { %11356 = vmatprep.subr.bf16.mxu0 %v14610_v31  ;;  %v14694_v28 = vld [vmem:[%s16754_s25 + $0x1da4] ss:$8 sps:$4 sm:$0xff]   ;;  %v14689_v31 = vld [vmem:[%s16754_s25 + $0x5a0] ss:$8 sps:$4 sm:$0xff]  }
 0x176   : > { %10373 = vmatpush1.bf16.msra.mxu1 %v14605_v32  ;;  %v14692_v32 = vld [vmem:[%s16754_s25 + $0x1da0] ss:$8 sps:$4 sm:$0xff]  }
 0x177   : > { %11357 = vmatpush1.bf16.msra.mxu0 %v14608_v33  ;;  %10374 = vmatprep.subr.bf16.mxu1 %v14613_v35  ;;  %v14697_v33 = vld [vmem:[%s16754_s25 + $0x5b4] ss:$8 sps:$4 sm:$0xff]  }
 0x178   : > { %11358 = vmatprep.subr.bf16.mxu0 %v14616_v17  ;;  %v14700_v35 = vld [vmem:[%s16754_s25 + $0x1db4] ss:$8 sps:$4 sm:$0xff]   ;;  %v14695_v17 = vld [vmem:[%s16754_s25 + $0x5b0] ss:$8 sps:$4 sm:$0xff]  }
 0x17a   : > { %10375 = vmatpush1.bf16.msra.mxu1 %v14611_v36  ;;  %v14698_v36 = vld [vmem:[%s16754_s25 + $0x1db0] ss:$8 sps:$4 sm:$0xff]  }
 0x17b   : > { %11359 = vmatpush1.bf16.msra.mxu0 %v14614_v38  ;;  %10376 = vmatprep.subr.bf16.mxu1 %v14619_v39  ;;  %v14703_v38 = vld [vmem:[%s16754_s25 + $0x5c4] ss:$8 sps:$4 sm:$0xff]  }
 0x17c   : > { %11360 = vmatprep.subr.bf16.mxu0 %v14622_v40  ;;  %v14706_v39 = vld [vmem:[%s16754_s25 + $0x1dc4] ss:$8 sps:$4 sm:$0xff]   ;;  %v14701_v40 = vld [vmem:[%s16754_s25 + $0x5c0] ss:$8 sps:$4 sm:$0xff]  }
 0x17e   : > { %10377 = vmatpush1.bf16.msra.mxu1 %v14617_v41  ;;  %v14704_v41 = vld [vmem:[%s16754_s25 + $0x1dc0] ss:$8 sps:$4 sm:$0xff]  }
 0x17f   : > { %11361 = vmatpush1.bf16.msra.mxu0 %v14620_v44  ;;  %10378 = vmatprep.subr.bf16.mxu1 %v14625_v45  ;;  %v14709_v44 = vld [vmem:[%s16754_s25 + $0x5d4] ss:$8 sps:$4 sm:$0xff]  }
 0x180   : > { %11362 = vmatprep.subr.bf16.mxu0 %v14628_v29  ;;  %v14712_v45 = vld [vmem:[%s16754_s25 + $0x1dd4] ss:$8 sps:$4 sm:$0xff]   ;;  %v14707_v29 = vld [vmem:[%s16754_s25 + $0x5d0] ss:$8 sps:$4 sm:$0xff]  }
 0x182   : > { %10379 = vmatpush1.bf16.msra.mxu1 %v14623_v47  ;;  %v14718_v47 = vld [vmem:[%s16754_s25 + $0x1de4] ss:$8 sps:$4 sm:$0xff]  }
 0x183   : > { %11363 = vmatpush1.bf16.msra.mxu0 %v14626_v48  ;;  %10389 = vmatprep.subr.bf16.mxu1 %v14631_v49  ;;  %v14713_v48 = vld [vmem:[%s16754_s25 + $0x5e0] ss:$8 sps:$4 sm:$0xff]  }
 0x184   : > { %11373 = vmatprep.subr.bf16.mxu0 %v14634_v51  ;;  %v14716_v49 = vld [vmem:[%s16754_s25 + $0x1de0] ss:$8 sps:$4 sm:$0xff]   ;;  %v14721_v51 = vld [vmem:[%s16754_s25 + $0x5f4] ss:$8 sps:$4 sm:$0xff]  }
 0x185   : > { %10381 = vmatmul.mubr.bf16.vlgmr.msra.gmra.mrb[0].mxu1 %v17092_v42  ;;  %v14641_v42 = vld [vmem:[%s16754_s25 + $0x520] ss:$8 sps:$4 sm:$0xff]  }
 0x186   : > { %11365 = vmatmul.mubr.bf16.vlgmr.msra.gmra.mrb[0].mxu0 %v17096_v43  ;;  %10390 = vmatpush1.bf16.msra.mxu1 %v14629_v30  ;;  %v14644_v43 = vld [vmem:[%s16754_s25 + $0x1d20] ss:$8 sps:$4 sm:$0xff]   ;;  %v14724_v30 = vld [vmem:[%s16754_s25 + $0x1df4] ss:$8 sps:$4 sm:$0xff]  }
 0x187   : > { %11374 = vmatpush1.bf16.msra.mxu0 %v14632_v37  ;;  %10391 = vmatprep.subr.bf16.mxu1 %v14637_v27  ;;  %v17245_v37 = vld [vmem:[%s16770_s23 + $0x18] sm:$0xff] }
 0x188   : > { %11375 = vmatprep.subr.bf16.mxu0 %v14640_v53  ;;  %10421 = vmatprep.mubr.bf16.mxu1 %v1880_v54  ;;  %v17248_v27 = vld [vmem:[%s16770_s23 + $0x78] sm:$0xff] }
 0x189   : > { %11405 = vmatprep.mubr.bf16.mxu0 %v2084_v55  ;;  %v14719_v53 = vld [vmem:[%s16754_s25 + $0x5f0] ss:$8 sps:$4 sm:$0xff]   ;;  %v14728_v55 = vld [vmem:[%s16754_s25 + $0x604] ss:$8 sps:$4 sm:$0xff]  }
 0x18a   : > { %10392 = vmatpush1.bf16.msra.mxu1 %v14635_v56  ;;  %v14722_v54 = vld [vmem:[%s16754_s25 + $0x1df0] ss:$8 sps:$4 sm:$0xff]   ;;  %v14732_v56 = vld [vmem:[%s16754_s25 + $0x1e04] ss:$8 sps:$4 sm:$0xff]  }
 0x18b   : > { %11376 = vmatpush1.bf16.msra.mxu0 %v14638_v57  ;;  %10393 = vmatprep.subr.bf16.mxu1 %v14643_v58  ;;  %v17256_v57 = vrot.slane %v17245_v37, %v16818_v50  ;;  %v17260_v58 = vrot.slane %v17248_v27, %v16818_v50 }
 0x18c   : > { %11377 = vmatprep.subr.bf16.mxu0 %v14646_v59  ;;  %v14726_v59 = vld [vmem:[%s16754_s25 + $0x600] ss:$8 sps:$4 sm:$0xff]  }
 0x18e   : > { %10394 = vmatpush1.bf16.msra.mxu1 %v14641_v42  ;;  %v14730_v42 = vld [vmem:[%s16754_s25 + $0x1e00] ss:$8 sps:$4 sm:$0xff]  }
 0x18f   : > { %11378 = vmatpush1.bf16.msra.mxu0 %v14644_v43  ;;  %10395 = vmatprep.subr.bf16.mxu1 %v14649_v60  ;;  %v14735_v43 = vld [vmem:[%s16754_s25 + $0x614] ss:$8 sps:$4 sm:$0xff]  }
 0x190   : > { %11379 = vmatprep.subr.bf16.mxu0 %v14652_v61  ;;  %v14738_v60 = vld [vmem:[%s16754_s25 + $0x1e14] ss:$8 sps:$4 sm:$0xff]   ;;  %v1896_v61 = vcombine.high %v17256_v57, %v17256_v57 }
 0x192   : > { %10396 = vmatpush1.bf16.msra.mxu1 %v14647_v62  ;;  %v2100_v62 = vcombine.high %v17260_v58, %v17260_v58 }
 0x193   : > { %11380 = vmatpush1.bf16.msra.mxu0 %v14650_v63  ;;  %10397 = vmatprep.subr.bf16.mxu1 %v14655_v0  ;;  %v14733_v63 = vld [vmem:[%s16754_s25 + $0x610] ss:$8 sps:$4 sm:$0xff]  }
 0x194   : > { %11381 = vmatprep.subr.bf16.mxu0 %v14658_v1  ;;  %v14736_v0 = vld [vmem:[%s16754_s25 + $0x1e10] ss:$8 sps:$4 sm:$0xff]   ;;  %v14741_v1 = vld [vmem:[%s16754_s25 + $0x624] ss:$8 sps:$4 sm:$0xff]  }
 0x196   : > { %10398 = vmatpush1.bf16.msra.mxu1 %v14653_v2  ;;  %v14744_v2 = vld [vmem:[%s16754_s25 + $0x1e24] ss:$8 sps:$4 sm:$0xff]  }
 0x197   : > { %11382 = vmatpush1.bf16.msra.mxu0 %v14656_v3  ;;  %10399 = vmatprep.subr.bf16.mxu1 %v14661_v4  ;;  %v14747_v3 = vld [vmem:[%s16754_s25 + $0x634] ss:$8 sps:$4 sm:$0xff]  }
 0x198   : > { %11383 = vmatprep.subr.bf16.mxu0 %v14664_v5  ;;  %v14750_v4 = vld [vmem:[%s16754_s25 + $0x1e34] ss:$8 sps:$4 sm:$0xff]   ;;  %v14745_v5 = vld [vmem:[%s16754_s25 + $0x630] ss:$8 sps:$4 sm:$0xff]  }
 0x19a   : > { %10400 = vmatpush1.bf16.msra.mxu1 %v14659_v6  ;;  %v14748_v6 = vld [vmem:[%s16754_s25 + $0x1e30] ss:$8 sps:$4 sm:$0xff]  }
 0x19b   : > { %11384 = vmatpush1.bf16.msra.mxu0 %v14662_v7  ;;  %10401 = vmatprep.subr.bf16.mxu1 %v14667_v8  ;;  %v14753_v7 = vld [vmem:[%s16754_s25 + $0x644] ss:$8 sps:$4 sm:$0xff]  }
 0x19c   : > { %11385 = vmatprep.subr.bf16.mxu0 %v14670_v9  ;;  %v14756_v8 = vld [vmem:[%s16754_s25 + $0x1e44] ss:$8 sps:$4 sm:$0xff]   ;;  %v14751_v9 = vld [vmem:[%s16754_s25 + $0x640] ss:$8 sps:$4 sm:$0xff]  }
 0x19e   : > { %10402 = vmatpush1.bf16.msra.mxu1 %v14665_v10  ;;  %v14754_v10 = vld [vmem:[%s16754_s25 + $0x1e40] ss:$8 sps:$4 sm:$0xff]  }
 0x19f   : > { %11386 = vmatpush1.bf16.msra.mxu0 %v14668_v11  ;;  %10403 = vmatprep.subr.bf16.mxu1 %v14673_v12  ;;  %v14759_v11 = vld [vmem:[%s16754_s25 + $0x654] ss:$8 sps:$4 sm:$0xff]  }
 0x1a0   : > { %11387 = vmatprep.subr.bf16.mxu0 %v14676_v13  ;;  %v14762_v12 = vld [vmem:[%s16754_s25 + $0x1e54] ss:$8 sps:$4 sm:$0xff]   ;;  %v14757_v13 = vld [vmem:[%s16754_s25 + $0x650] ss:$8 sps:$4 sm:$0xff]  }
 0x1a2   : > { %10404 = vmatpush1.bf16.msra.mxu1 %v14671_v14  ;;  %v14760_v14 = vld [vmem:[%s16754_s25 + $0x1e50] ss:$8 sps:$4 sm:$0xff]  }
 0x1a3   : > { %11388 = vmatpush1.bf16.msra.mxu0 %v14674_v15  ;;  %10405 = vmatprep.subr.bf16.mxu1 %v14679_v16  ;;  %v14765_v15 = vld [vmem:[%s16754_s25 + $0x664] ss:$8 sps:$4 sm:$0xff]  }
 0x1a4   : > { %11389 = vmatprep.subr.bf16.mxu0 %v14682_v19  ;;  %v14768_v16 = vld [vmem:[%s16754_s25 + $0x1e64] ss:$8 sps:$4 sm:$0xff]   ;;  %v14763_v19 = vld [vmem:[%s16754_s25 + $0x660] ss:$8 sps:$4 sm:$0xff]  }
 0x1a6   : > { %10406 = vmatpush1.bf16.msra.mxu1 %v14677_v20  ;;  %v14766_v20 = vld [vmem:[%s16754_s25 + $0x1e60] ss:$8 sps:$4 sm:$0xff]  }
 0x1a7   : > { %11390 = vmatpush1.bf16.msra.mxu0 %v14680_v21  ;;  %10407 = vmatprep.subr.bf16.mxu1 %v14685_v22  ;;  %v14771_v21 = vld [vmem:[%s16754_s25 + $0x674] ss:$8 sps:$4 sm:$0xff]  }
 0x1a8   : > { %11391 = vmatprep.subr.bf16.mxu0 %v14688_v23  ;;  %v14774_v22 = vld [vmem:[%s16754_s25 + $0x1e74] ss:$8 sps:$4 sm:$0xff]   ;;  %v14769_v23 = vld [vmem:[%s16754_s25 + $0x670] ss:$8 sps:$4 sm:$0xff]  }
 0x1aa   : > { %10408 = vmatpush1.bf16.msra.mxu1 %v14683_v24  ;;  %v14772_v24 = vld [vmem:[%s16754_s25 + $0x1e70] ss:$8 sps:$4 sm:$0xff]  }
 0x1ab   : > { %11392 = vmatpush1.bf16.msra.mxu0 %v14686_v25  ;;  %10409 = vmatprep.subr.bf16.mxu1 %v14691_v26  ;;  %v14777_v25 = vld [vmem:[%s16754_s25 + $0x684] ss:$8 sps:$4 sm:$0xff]  }
 0x1ac   : > { %11393 = vmatprep.subr.bf16.mxu0 %v14694_v28  ;;  %v14780_v26 = vld [vmem:[%s16754_s25 + $0x1e84] ss:$8 sps:$4 sm:$0xff]   ;;  %v14775_v28 = vld [vmem:[%s16754_s25 + $0x680] ss:$8 sps:$4 sm:$0xff]  }
 0x1ae   : > { %10410 = vmatpush1.bf16.msra.mxu1 %v14689_v31  ;;  %v14778_v31 = vld [vmem:[%s16754_s25 + $0x1e80] ss:$8 sps:$4 sm:$0xff]  }
 0x1af   : > { %11394 = vmatpush1.bf16.msra.mxu0 %v14692_v32  ;;  %10411 = vmatprep.subr.bf16.mxu1 %v14697_v33  ;;  %v14783_v32 = vld [vmem:[%s16754_s25 + $0x694] ss:$8 sps:$4 sm:$0xff]  }
 0x1b0   : > { %11395 = vmatprep.subr.bf16.mxu0 %v14700_v35  ;;  %v14786_v33 = vld [vmem:[%s16754_s25 + $0x1e94] ss:$8 sps:$4 sm:$0xff]   ;;  %v14781_v35 = vld [vmem:[%s16754_s25 + $0x690] ss:$8 sps:$4 sm:$0xff]  }
 0x1b2   : > { %10412 = vmatpush1.bf16.msra.mxu1 %v14695_v17  ;;  %v14784_v17 = vld [vmem:[%s16754_s25 + $0x1e90] ss:$8 sps:$4 sm:$0xff]  }
 0x1b3   : > { %11396 = vmatpush1.bf16.msra.mxu0 %v14698_v36  ;;  %10413 = vmatprep.subr.bf16.mxu1 %v14703_v38  ;;  %v14789_v36 = vld [vmem:[%s16754_s25 + $0x6a4] ss:$8 sps:$4 sm:$0xff]  }
 0x1b4   : > { %11397 = vmatprep.subr.bf16.mxu0 %v14706_v39  ;;  %v14792_v38 = vld [vmem:[%s16754_s25 + $0x1ea4] ss:$8 sps:$4 sm:$0xff]   ;;  %v14787_v39 = vld [vmem:[%s16754_s25 + $0x6a0] ss:$8 sps:$4 sm:$0xff]  }
 0x1b6   : > { %10414 = vmatpush1.bf16.msra.mxu1 %v14701_v40  ;;  %v14790_v40 = vld [vmem:[%s16754_s25 + $0x1ea0] ss:$8 sps:$4 sm:$0xff]  }
 0x1b7   : > { %11398 = vmatpush1.bf16.msra.mxu0 %v14704_v41  ;;  %10415 = vmatprep.subr.bf16.mxu1 %v14709_v44  ;;  %v14795_v41 = vld [vmem:[%s16754_s25 + $0x6b4] ss:$8 sps:$4 sm:$0xff]  }
 0x1b8   : > { %11399 = vmatprep.subr.bf16.mxu0 %v14712_v45  ;;  %v14798_v44 = vld [vmem:[%s16754_s25 + $0x1eb4] ss:$8 sps:$4 sm:$0xff]   ;;  %v14793_v45 = vld [vmem:[%s16754_s25 + $0x6b0] ss:$8 sps:$4 sm:$0xff]  }
 0x1ba   : > { %10416 = vmatpush1.bf16.msra.mxu1 %v14707_v29  ;;  %v14796_v29 = vld [vmem:[%s16754_s25 + $0x1eb0] ss:$8 sps:$4 sm:$0xff]  }
 0x1bb   : > { %11400 = vmatpush1.bf16.msra.mxu0 %v14710_v34  ;;  %10417 = vmatprep.subr.bf16.mxu1 %v14715_v46  ;;  %v14801_v34 = vld [vmem:[%s16754_s25 + $0x6c4] ss:$8 sps:$4 sm:$0xff]  }
 0x1bc   : > { %11401 = vmatprep.subr.bf16.mxu0 %v14718_v47  ;;  %v14804_v46 = vld [vmem:[%s16754_s25 + $0x1ec4] ss:$8 sps:$4 sm:$0xff]   ;;  %v14799_v47 = vld [vmem:[%s16754_s25 + $0x6c0] ss:$8 sps:$4 sm:$0xff]  }
 0x1be   : > { %10418 = vmatpush1.bf16.msra.mxu1 %v14713_v48  ;;  %v14802_v48 = vld [vmem:[%s16754_s25 + $0x1ec0] ss:$8 sps:$4 sm:$0xff]  }
 0x1bf   : > { %11402 = vmatpush1.bf16.msra.mxu0 %v14716_v49  ;;  %10419 = vmatprep.subr.bf16.mxu1 %v14721_v51  ;;  %v14807_v49 = vld [vmem:[%s16754_s25 + $0x6d4] ss:$8 sps:$4 sm:$0xff]  }
 0x1c0   : > { %11403 = vmatprep.subr.bf16.mxu0 %v14724_v30  ;;  %v14810_v51 = vld [vmem:[%s16754_s25 + $0x1ed4] ss:$8 sps:$4 sm:$0xff]   ;;  %v14805_v30 = vld [vmem:[%s16754_s25 + $0x6d0] ss:$8 sps:$4 sm:$0xff]  }
 0x1c2   : > { %10420 = vmatpush1.bf16.msra.mxu1 %v14719_v53  ;;  %v14808_v53 = vld [vmem:[%s16754_s25 + $0x1ed0] ss:$8 sps:$4 sm:$0xff]  }
 0x1c3   : > { %11404 = vmatpush1.bf16.msra.mxu0 %v14722_v54  ;;  %10430 = vmatprep.subr.bf16.mxu1 %v14728_v55  ;;  %v14813_v54 = vld [vmem:[%s16754_s25 + $0x6e4] ss:$8 sps:$4 sm:$0xff]  }
 0x1c4   : > { %11414 = vmatprep.subr.bf16.mxu0 %v14732_v56  ;;  %v14816_v55 = vld [vmem:[%s16754_s25 + $0x1ee4] ss:$8 sps:$4 sm:$0xff]   ;;  %v14811_v56 = vld [vmem:[%s16754_s25 + $0x6e0] ss:$8 sps:$4 sm:$0xff]  }
 0x1c5   : > { %10422 = vmatmul.mubr.bf16.vlgmr.msra.gmra.mrb[0].mxu1 %v17173_v52  ;;  %v14739_v52 = vld [vmem:[%s16754_s25 + $0x620] ss:$8 sps:$4 sm:$0xff]  }
 0x1c6   : > { %11406 = vmatmul.mubr.bf16.vlgmr.msra.gmra.mrb[0].mxu0 %v17176_v18  ;;  %10431 = vmatpush1.bf16.msra.mxu1 %v14726_v59  ;;  %v14742_v18 = vld [vmem:[%s16754_s25 + $0x1e20] ss:$8 sps:$4 sm:$0xff]  }
 0x1c7   : > { %11415 = vmatpush1.bf16.msra.mxu0 %v14730_v42  ;;  %10432 = vmatprep.subr.bf16.mxu1 %v14735_v43  ;;  %v14814_v59 = vld [vmem:[%s16754_s25 + $0x1ee0] ss:$8 sps:$4 sm:$0xff]   ;;  %v14819_v42 = vld [vmem:[%s16754_s25 + $0x6f4] ss:$8 sps:$4 sm:$0xff]  }
 0x1c8   : > { %11416 = vmatprep.subr.bf16.mxu0 %v14738_v60  ;;  %10462 = vmatprep.mubr.bf16.mxu1 %v1896_v61  ;;  %v14822_v43 = vld [vmem:[%s16754_s25 + $0x1ef4] ss:$8 sps:$4 sm:$0xff]   ;;  %v1881_v60 = vcombine.high %v17245_v37, %v17245_v37  ;;  %v2085_v61 = vcombine.high %v17248_v27, %v17248_v27  ;;  %v14823_v37 = vld [vmem:[%s16754_s25 + $0x700] ss:$8 sps:$4 sm:$0xff]  }
 0x1c9   : > { %11446 = vmatprep.mubr.bf16.mxu0 %v2100_v62  ;;  %v14817_v62 = vld [vmem:[%s16754_s25 + $0x6f0] ss:$8 sps:$4 sm:$0xff]   ;;  %v14826_v27 = vld [vmem:[%s16754_s25 + $0x1f00] ss:$8 sps:$4 sm:$0xff]  }
 0x1ca   : > { %10433 = vmatpush1.bf16.msra.mxu1 %v14733_v63  ;;  %v14820_v63 = vld [vmem:[%s16754_s25 + $0x1ef0] ss:$8 sps:$4 sm:$0xff]  }
 0x1cb   : > { %11417 = vmatpush1.bf16.msra.mxu0 %v14736_v0  ;;  %10434 = vmatprep.subr.bf16.mxu1 %v14741_v1  ;;  %v14825_v0 = vld [vmem:[%s16754_s25 + $0x704] ss:$8 sps:$4 sm:$0xff]  }
 0x1cc   : > { %11418 = vmatprep.subr.bf16.mxu0 %v14744_v2  ;;  %v14828_v1 = vld [vmem:[%s16754_s25 + $0x1f04] ss:$8 sps:$4 sm:$0xff]   ;;  %v17337_v2 = vrot.slane %v1881_v60, %v16818_v50  ;;  %v14904_v60 = vld [vmem:[%s16754_s25 + $0x1fd0] ss:$8 sps:$4 sm:$0xff]  }
 0x1ce   : > { %10435 = vmatpush1.bf16.msra.mxu1 %v14739_v52  ;;  %v17340_v52 = vrot.slane %v2085_v61, %v16818_v50  ;;  %v14909_v61 = vld [vmem:[%s16754_s25 + $0x7e4] ss:$8 sps:$4 sm:$0xff]  }
 0x1cf   : > { %11419 = vmatpush1.bf16.msra.mxu0 %v14742_v18  ;;  %10436 = vmatprep.subr.bf16.mxu1 %v14747_v3  ;;  %v14831_v18 = vld [vmem:[%s16754_s25 + $0x714] ss:$8 sps:$4 sm:$0xff]  }
 0x1d0   : > { %11420 = vmatprep.subr.bf16.mxu0 %v14750_v4  ;;  %v14834_v3 = vld [vmem:[%s16754_s25 + $0x1f14] ss:$8 sps:$4 sm:$0xff]   ;;  %v1897_v4 = vcombine.high %v17337_v2, %v17337_v2 }
 0x1d2   : > { %10437 = vmatpush1.bf16.msra.mxu1 %v14745_v5  ;;  %v2101_v5 = vcombine.high %v17340_v52, %v17340_v52 }
 0x1d3   : > { %11421 = vmatpush1.bf16.msra.mxu0 %v14748_v6  ;;  %10438 = vmatprep.subr.bf16.mxu1 %v14753_v7  ;;  %v14829_v6 = vld [vmem:[%s16754_s25 + $0x710] ss:$8 sps:$4 sm:$0xff]  }
 0x1d4   : > { %11422 = vmatprep.subr.bf16.mxu0 %v14756_v8  ;;  %v14832_v7 = vld [vmem:[%s16754_s25 + $0x1f10] ss:$8 sps:$4 sm:$0xff]   ;;  %v14837_v8 = vld [vmem:[%s16754_s25 + $0x724] ss:$8 sps:$4 sm:$0xff]  }
 0x1d6   : > { %10439 = vmatpush1.bf16.msra.mxu1 %v14751_v9  ;;  %v14840_v9 = vld [vmem:[%s16754_s25 + $0x1f24] ss:$8 sps:$4 sm:$0xff]  }
 0x1d7   : > { %11423 = vmatpush1.bf16.msra.mxu0 %v14754_v10  ;;  %10440 = vmatprep.subr.bf16.mxu1 %v14759_v11  ;;  %v14843_v10 = vld [vmem:[%s16754_s25 + $0x734] ss:$8 sps:$4 sm:$0xff]  }
 0x1d8   : > { %11424 = vmatprep.subr.bf16.mxu0 %v14762_v12  ;;  %v14846_v11 = vld [vmem:[%s16754_s25 + $0x1f34] ss:$8 sps:$4 sm:$0xff]   ;;  %v14841_v12 = vld [vmem:[%s16754_s25 + $0x730] ss:$8 sps:$4 sm:$0xff]  }
 0x1da   : > { %10441 = vmatpush1.bf16.msra.mxu1 %v14757_v13  ;;  %v14844_v13 = vld [vmem:[%s16754_s25 + $0x1f30] ss:$8 sps:$4 sm:$0xff]  }
 0x1db   : > { %11425 = vmatpush1.bf16.msra.mxu0 %v14760_v14  ;;  %10442 = vmatprep.subr.bf16.mxu1 %v14765_v15  ;;  %v14849_v14 = vld [vmem:[%s16754_s25 + $0x744] ss:$8 sps:$4 sm:$0xff]  }
 0x1dc   : > { %11426 = vmatprep.subr.bf16.mxu0 %v14768_v16  ;;  %v14852_v15 = vld [vmem:[%s16754_s25 + $0x1f44] ss:$8 sps:$4 sm:$0xff]   ;;  %v14847_v16 = vld [vmem:[%s16754_s25 + $0x740] ss:$8 sps:$4 sm:$0xff]  }
 0x1de   : > { %10443 = vmatpush1.bf16.msra.mxu1 %v14763_v19  ;;  %v14850_v19 = vld [vmem:[%s16754_s25 + $0x1f40] ss:$8 sps:$4 sm:$0xff]  }
 0x1df   : > { %11427 = vmatpush1.bf16.msra.mxu0 %v14766_v20  ;;  %10444 = vmatprep.subr.bf16.mxu1 %v14771_v21  ;;  %v14855_v20 = vld [vmem:[%s16754_s25 + $0x754] ss:$8 sps:$4 sm:$0xff]  }
 0x1e0   : > { %11428 = vmatprep.subr.bf16.mxu0 %v14774_v22  ;;  %v14858_v21 = vld [vmem:[%s16754_s25 + $0x1f54] ss:$8 sps:$4 sm:$0xff]   ;;  %v14853_v22 = vld [vmem:[%s16754_s25 + $0x750] ss:$8 sps:$4 sm:$0xff]  }
 0x1e2   : > { %10445 = vmatpush1.bf16.msra.mxu1 %v14769_v23  ;;  %v14856_v23 = vld [vmem:[%s16754_s25 + $0x1f50] ss:$8 sps:$4 sm:$0xff]  }
 0x1e3   : > { %11429 = vmatpush1.bf16.msra.mxu0 %v14772_v24  ;;  %10446 = vmatprep.subr.bf16.mxu1 %v14777_v25  ;;  %v14861_v24 = vld [vmem:[%s16754_s25 + $0x764] ss:$8 sps:$4 sm:$0xff]  }
 0x1e4   : > { %11430 = vmatprep.subr.bf16.mxu0 %v14780_v26  ;;  %v14864_v25 = vld [vmem:[%s16754_s25 + $0x1f64] ss:$8 sps:$4 sm:$0xff]   ;;  %v14859_v26 = vld [vmem:[%s16754_s25 + $0x760] ss:$8 sps:$4 sm:$0xff]  }
 0x1e6   : > { %10447 = vmatpush1.bf16.msra.mxu1 %v14775_v28  ;;  %v14862_v28 = vld [vmem:[%s16754_s25 + $0x1f60] ss:$8 sps:$4 sm:$0xff]  }
 0x1e7   : > { %11431 = vmatpush1.bf16.msra.mxu0 %v14778_v31  ;;  %10448 = vmatprep.subr.bf16.mxu1 %v14783_v32  ;;  %v14867_v31 = vld [vmem:[%s16754_s25 + $0x774] ss:$8 sps:$4 sm:$0xff]  }
 0x1e8   : > { %11432 = vmatprep.subr.bf16.mxu0 %v14786_v33  ;;  %v14870_v32 = vld [vmem:[%s16754_s25 + $0x1f74] ss:$8 sps:$4 sm:$0xff]   ;;  %v14865_v33 = vld [vmem:[%s16754_s25 + $0x770] ss:$8 sps:$4 sm:$0xff]  }
 0x1ea   : > { %10449 = vmatpush1.bf16.msra.mxu1 %v14781_v35  ;;  %v14868_v35 = vld [vmem:[%s16754_s25 + $0x1f70] ss:$8 sps:$4 sm:$0xff]  }
 0x1eb   : > { %11433 = vmatpush1.bf16.msra.mxu0 %v14784_v17  ;;  %10450 = vmatprep.subr.bf16.mxu1 %v14789_v36  ;;  %v14873_v17 = vld [vmem:[%s16754_s25 + $0x784] ss:$8 sps:$4 sm:$0xff]  }
 0x1ec   : > { %11434 = vmatprep.subr.bf16.mxu0 %v14792_v38  ;;  %v14876_v36 = vld [vmem:[%s16754_s25 + $0x1f84] ss:$8 sps:$4 sm:$0xff]   ;;  %v14871_v38 = vld [vmem:[%s16754_s25 + $0x780] ss:$8 sps:$4 sm:$0xff]  }
 0x1ee   : > { %10451 = vmatpush1.bf16.msra.mxu1 %v14787_v39  ;;  %v14874_v39 = vld [vmem:[%s16754_s25 + $0x1f80] ss:$8 sps:$4 sm:$0xff]  }
 0x1ef   : > { %11435 = vmatpush1.bf16.msra.mxu0 %v14790_v40  ;;  %10452 = vmatprep.subr.bf16.mxu1 %v14795_v41  ;;  %v14879_v40 = vld [vmem:[%s16754_s25 + $0x794] ss:$8 sps:$4 sm:$0xff]  }
 0x1f0   : > { %11436 = vmatprep.subr.bf16.mxu0 %v14798_v44  ;;  %v14882_v41 = vld [vmem:[%s16754_s25 + $0x1f94] ss:$8 sps:$4 sm:$0xff]   ;;  %v14877_v44 = vld [vmem:[%s16754_s25 + $0x790] ss:$8 sps:$4 sm:$0xff]  }
 0x1f2   : > { %10453 = vmatpush1.bf16.msra.mxu1 %v14793_v45  ;;  %v14880_v45 = vld [vmem:[%s16754_s25 + $0x1f90] ss:$8 sps:$4 sm:$0xff]  }
 0x1f3   : > { %11437 = vmatpush1.bf16.msra.mxu0 %v14796_v29  ;;  %10454 = vmatprep.subr.bf16.mxu1 %v14801_v34  ;;  %v14885_v29 = vld [vmem:[%s16754_s25 + $0x7a4] ss:$8 sps:$4 sm:$0xff]  }
 0x1f4   : > { %11438 = vmatprep.subr.bf16.mxu0 %v14804_v46  ;;  %v14888_v34 = vld [vmem:[%s16754_s25 + $0x1fa4] ss:$8 sps:$4 sm:$0xff]   ;;  %v14883_v46 = vld [vmem:[%s16754_s25 + $0x7a0] ss:$8 sps:$4 sm:$0xff]  }
 0x1f6   : > { %10455 = vmatpush1.bf16.msra.mxu1 %v14799_v47  ;;  %v14886_v47 = vld [vmem:[%s16754_s25 + $0x1fa0] ss:$8 sps:$4 sm:$0xff]  }
 0x1f7   : > { %11439 = vmatpush1.bf16.msra.mxu0 %v14802_v48  ;;  %10456 = vmatprep.subr.bf16.mxu1 %v14807_v49  ;;  %v14891_v48 = vld [vmem:[%s16754_s25 + $0x7b4] ss:$8 sps:$4 sm:$0xff]  }
 0x1f8   : > { %11440 = vmatprep.subr.bf16.mxu0 %v14810_v51  ;;  %v14894_v49 = vld [vmem:[%s16754_s25 + $0x1fb4] ss:$8 sps:$4 sm:$0xff]   ;;  %v14889_v51 = vld [vmem:[%s16754_s25 + $0x7b0] ss:$8 sps:$4 sm:$0xff]  }
 0x1fa   : > { %10457 = vmatpush1.bf16.msra.mxu1 %v14805_v30  ;;  %v14892_v30 = vld [vmem:[%s16754_s25 + $0x1fb0] ss:$8 sps:$4 sm:$0xff]  }
 0x1fb   : > { %11441 = vmatpush1.bf16.msra.mxu0 %v14808_v53  ;;  %10458 = vmatprep.subr.bf16.mxu1 %v14813_v54  ;;  %v14897_v53 = vld [vmem:[%s16754_s25 + $0x7c4] ss:$8 sps:$4 sm:$0xff]  }
 0x1fc   : > { %11442 = vmatprep.subr.bf16.mxu0 %v14816_v55  ;;  %v14900_v54 = vld [vmem:[%s16754_s25 + $0x1fc4] ss:$8 sps:$4 sm:$0xff]   ;;  %v14895_v55 = vld [vmem:[%s16754_s25 + $0x7c0] ss:$8 sps:$4 sm:$0xff]  }
 0x1fe   : > { %10459 = vmatpush1.bf16.msra.mxu1 %v14811_v56  ;;  %v14898_v56 = vld [vmem:[%s16754_s25 + $0x1fc0] ss:$8 sps:$4 sm:$0xff]  }
 0x1ff   : > { %11443 = vmatpush1.bf16.msra.mxu0 %v14814_v59  ;;  %10460 = vmatprep.subr.bf16.mxu1 %v14819_v42  ;;  %v14903_v59 = vld [vmem:[%s16754_s25 + $0x7d4] ss:$8 sps:$4 sm:$0xff]  }
 0x200   : > { %11444 = vmatprep.subr.bf16.mxu0 %v14822_v43  ;;  %v14906_v42 = vld [vmem:[%s16754_s25 + $0x1fd4] ss:$8 sps:$4 sm:$0xff]   ;;  %v14901_v43 = vld [vmem:[%s16754_s25 + $0x7d0] ss:$8 sps:$4 sm:$0xff]  }
 0x202   : > { %10461 = vmatpush1.bf16.msra.mxu1 %v14817_v62  ;;  %v14912_v62 = vld [vmem:[%s16754_s25 + $0x1fe4] ss:$8 sps:$4 sm:$0xff]  }
 0x203   : > { %11445 = vmatpush1.bf16.msra.mxu0 %v14820_v63  ;;  %10471 = vmatprep.subr.bf16.mxu1 %v14825_v0  ;;  %v14907_v63 = vld [vmem:[%s16754_s25 + $0x7e0] ss:$8 sps:$4 sm:$0xff]  }
 0x204   : > { %11455 = vmatprep.subr.bf16.mxu0 %v14828_v1  ;;  %v14910_v0 = vld [vmem:[%s16754_s25 + $0x1fe0] ss:$8 sps:$4 sm:$0xff]   ;;  %v14915_v1 = vld [vmem:[%s16754_s25 + $0x7f4] ss:$8 sps:$4 sm:$0xff]  }
 0x205   : > { %10463 = vmatmul.mubr.bf16.vlgmr.msra.gmra.mrb[0].mxu1 %v17256_v57  ;;  %v14835_v57 = vld [vmem:[%s16754_s25 + $0x720] ss:$8 sps:$4 sm:$0xff]  }
 0x206   : > { %11447 = vmatmul.mubr.bf16.vlgmr.msra.gmra.mrb[0].mxu0 %v17260_v58  ;;  %10472 = vmatpush1.bf16.msra.mxu1 %v14823_v37  ;;  %v14838_v58 = vld [vmem:[%s16754_s25 + $0x1f20] ss:$8 sps:$4 sm:$0xff]   ;;  %v14918_v37 = vld [vmem:[%s16754_s25 + $0x1ff4] ss:$8 sps:$4 sm:$0xff]  }
 0x207   : > { %11456 = vmatpush1.bf16.msra.mxu0 %v14826_v27  ;;  %10473 = vmatprep.subr.bf16.mxu1 %v14831_v18  ;;  %v17409_v27 = vld [vmem:[%s16770_s23 + $0x20] sm:$0xff] }
 0x208   : > { %11457 = vmatprep.subr.bf16.mxu0 %v14834_v3  ;;  %10503 = vmatprep.mubr.bf16.mxu1 %v1897_v4  ;;  %v17412_v18 = vld [vmem:[%s16770_s23 + $0x80] sm:$0xff]  ;;  %v14913_v3 = vld [vmem:[%s16754_s25 + $0x7f0] ss:$8 sps:$4 sm:$0xff]  }
 0x209   : > { %11487 = vmatprep.mubr.bf16.mxu0 %v2101_v5  ;;  %v14916_v4 = vld [vmem:[%s16754_s25 + $0x1ff0] ss:$8 sps:$4 sm:$0xff]   ;;  %v14922_v5 = vld [vmem:[%s16754_s25 + $0x804] ss:$8 sps:$4 sm:$0xff]  }
 0x20a   : > { %10474 = vmatpush1.bf16.msra.mxu1 %v14829_v6  ;;  %v14926_v6 = vld [vmem:[%s16754_s25 + $0x2004] ss:$8 sps:$4 sm:$0xff]  }
 0x20b   : > { %11458 = vmatpush1.bf16.msra.mxu0 %v14832_v7  ;;  %10475 = vmatprep.subr.bf16.mxu1 %v14837_v8  ;;  %v17420_v7 = vrot.slane %v17409_v27, %v16818_v50  ;;  %v17424_v8 = vrot.slane %v17412_v18, %v16818_v50 }
 0x20c   : > { %11459 = vmatprep.subr.bf16.mxu0 %v14840_v9  ;;  %v14920_v9 = vld [vmem:[%s16754_s25 + $0x800] ss:$8 sps:$4 sm:$0xff]  }
 0x20e   : > { %10476 = vmatpush1.bf16.msra.mxu1 %v14835_v57  ;;  %v14924_v57 = vld [vmem:[%s16754_s25 + $0x2000] ss:$8 sps:$4 sm:$0xff]  }
 0x20f   : > { %11460 = vmatpush1.bf16.msra.mxu0 %v14838_v58  ;;  %10477 = vmatprep.subr.bf16.mxu1 %v14843_v10  ;;  %v14929_v58 = vld [vmem:[%s16754_s25 + $0x814] ss:$8 sps:$4 sm:$0xff]  }
 0x210   : > { %11461 = vmatprep.subr.bf16.mxu0 %v14846_v11  ;;  %v14932_v10 = vld [vmem:[%s16754_s25 + $0x2014] ss:$8 sps:$4 sm:$0xff]   ;;  %v1913_v11 = vcombine.high %v17420_v7, %v17420_v7 }
 0x212   : > { %10478 = vmatpush1.bf16.msra.mxu1 %v14841_v12  ;;  %v2117_v12 = vcombine.high %v17424_v8, %v17424_v8 }
 0x213   : > { %11462 = vmatpush1.bf16.msra.mxu0 %v14844_v13  ;;  %10479 = vmatprep.subr.bf16.mxu1 %v14849_v14  ;;  %v14927_v13 = vld [vmem:[%s16754_s25 + $0x810] ss:$8 sps:$4 sm:$0xff]  }
 0x214   : > { %11463 = vmatprep.subr.bf16.mxu0 %v14852_v15  ;;  %v14930_v14 = vld [vmem:[%s16754_s25 + $0x2010] ss:$8 sps:$4 sm:$0xff]   ;;  %v14935_v15 = vld [vmem:[%s16754_s25 + $0x824] ss:$8 sps:$4 sm:$0xff]  }
 0x216   : > { %10480 = vmatpush1.bf16.msra.mxu1 %v14847_v16  ;;  %v14938_v16 = vld [vmem:[%s16754_s25 + $0x2024] ss:$8 sps:$4 sm:$0xff]  }
 0x217   : > { %11464 = vmatpush1.bf16.msra.mxu0 %v14850_v19  ;;  %10481 = vmatprep.subr.bf16.mxu1 %v14855_v20  ;;  %v14941_v19 = vld [vmem:[%s16754_s25 + $0x834] ss:$8 sps:$4 sm:$0xff]  }
 0x218   : > { %11465 = vmatprep.subr.bf16.mxu0 %v14858_v21  ;;  %v14944_v20 = vld [vmem:[%s16754_s25 + $0x2034] ss:$8 sps:$4 sm:$0xff]   ;;  %v14939_v21 = vld [vmem:[%s16754_s25 + $0x830] ss:$8 sps:$4 sm:$0xff]  }
 0x21a   : > { %10482 = vmatpush1.bf16.msra.mxu1 %v14853_v22  ;;  %v14942_v22 = vld [vmem:[%s16754_s25 + $0x2030] ss:$8 sps:$4 sm:$0xff]  }
 0x21b   : > { %11466 = vmatpush1.bf16.msra.mxu0 %v14856_v23  ;;  %10483 = vmatprep.subr.bf16.mxu1 %v14861_v24  ;;  %v14947_v23 = vld [vmem:[%s16754_s25 + $0x844] ss:$8 sps:$4 sm:$0xff]  }
 0x21c   : > { %11467 = vmatprep.subr.bf16.mxu0 %v14864_v25  ;;  %v14950_v24 = vld [vmem:[%s16754_s25 + $0x2044] ss:$8 sps:$4 sm:$0xff]   ;;  %v14945_v25 = vld [vmem:[%s16754_s25 + $0x840] ss:$8 sps:$4 sm:$0xff]  }
 0x21e   : > { %10484 = vmatpush1.bf16.msra.mxu1 %v14859_v26  ;;  %v14948_v26 = vld [vmem:[%s16754_s25 + $0x2040] ss:$8 sps:$4 sm:$0xff]  }
 0x21f   : > { %11468 = vmatpush1.bf16.msra.mxu0 %v14862_v28  ;;  %10485 = vmatprep.subr.bf16.mxu1 %v14867_v31  ;;  %v14953_v28 = vld [vmem:[%s16754_s25 + $0x854] ss:$8 sps:$4 sm:$0xff]  }
 0x220   : > { %11469 = vmatprep.subr.bf16.mxu0 %v14870_v32  ;;  %v14956_v31 = vld [vmem:[%s16754_s25 + $0x2054] ss:$8 sps:$4 sm:$0xff]   ;;  %v14951_v32 = vld [vmem:[%s16754_s25 + $0x850] ss:$8 sps:$4 sm:$0xff]  }
 0x222   : > { %10486 = vmatpush1.bf16.msra.mxu1 %v14865_v33  ;;  %v14954_v33 = vld [vmem:[%s16754_s25 + $0x2050] ss:$8 sps:$4 sm:$0xff]  }
 0x223   : > { %11470 = vmatpush1.bf16.msra.mxu0 %v14868_v35  ;;  %10487 = vmatprep.subr.bf16.mxu1 %v14873_v17  ;;  %v14959_v35 = vld [vmem:[%s16754_s25 + $0x864] ss:$8 sps:$4 sm:$0xff]  }
 0x224   : > { %11471 = vmatprep.subr.bf16.mxu0 %v14876_v36  ;;  %v14962_v17 = vld [vmem:[%s16754_s25 + $0x2064] ss:$8 sps:$4 sm:$0xff]   ;;  %v14957_v36 = vld [vmem:[%s16754_s25 + $0x860] ss:$8 sps:$4 sm:$0xff]  }
 0x226   : > { %10488 = vmatpush1.bf16.msra.mxu1 %v14871_v38  ;;  %v14960_v38 = vld [vmem:[%s16754_s25 + $0x2060] ss:$8 sps:$4 sm:$0xff]  }
 0x227   : > { %11472 = vmatpush1.bf16.msra.mxu0 %v14874_v39  ;;  %10489 = vmatprep.subr.bf16.mxu1 %v14879_v40  ;;  %v14965_v39 = vld [vmem:[%s16754_s25 + $0x874] ss:$8 sps:$4 sm:$0xff]  }
 0x228   : > { %11473 = vmatprep.subr.bf16.mxu0 %v14882_v41  ;;  %v14968_v40 = vld [vmem:[%s16754_s25 + $0x2074] ss:$8 sps:$4 sm:$0xff]   ;;  %v14963_v41 = vld [vmem:[%s16754_s25 + $0x870] ss:$8 sps:$4 sm:$0xff]  }
 0x22a   : > { %10490 = vmatpush1.bf16.msra.mxu1 %v14877_v44  ;;  %v14966_v44 = vld [vmem:[%s16754_s25 + $0x2070] ss:$8 sps:$4 sm:$0xff]  }
 0x22b   : > { %11474 = vmatpush1.bf16.msra.mxu0 %v14880_v45  ;;  %10491 = vmatprep.subr.bf16.mxu1 %v14885_v29  ;;  %v14971_v45 = vld [vmem:[%s16754_s25 + $0x884] ss:$8 sps:$4 sm:$0xff]  }
 0x22c   : > { %11475 = vmatprep.subr.bf16.mxu0 %v14888_v34  ;;  %v14974_v29 = vld [vmem:[%s16754_s25 + $0x2084] ss:$8 sps:$4 sm:$0xff]   ;;  %v14969_v34 = vld [vmem:[%s16754_s25 + $0x880] ss:$8 sps:$4 sm:$0xff]  }
 0x22e   : > { %10492 = vmatpush1.bf16.msra.mxu1 %v14883_v46  ;;  %v14972_v46 = vld [vmem:[%s16754_s25 + $0x2080] ss:$8 sps:$4 sm:$0xff]  }
 0x22f   : > { %11476 = vmatpush1.bf16.msra.mxu0 %v14886_v47  ;;  %10493 = vmatprep.subr.bf16.mxu1 %v14891_v48  ;;  %v14977_v47 = vld [vmem:[%s16754_s25 + $0x894] ss:$8 sps:$4 sm:$0xff]  }
 0x230   : > { %11477 = vmatprep.subr.bf16.mxu0 %v14894_v49  ;;  %v14980_v48 = vld [vmem:[%s16754_s25 + $0x2094] ss:$8 sps:$4 sm:$0xff]   ;;  %v14975_v49 = vld [vmem:[%s16754_s25 + $0x890] ss:$8 sps:$4 sm:$0xff]  }
 0x232   : > { %10494 = vmatpush1.bf16.msra.mxu1 %v14889_v51  ;;  %v14978_v51 = vld [vmem:[%s16754_s25 + $0x2090] ss:$8 sps:$4 sm:$0xff]  }
 0x233   : > { %11478 = vmatpush1.bf16.msra.mxu0 %v14892_v30  ;;  %10495 = vmatprep.subr.bf16.mxu1 %v14897_v53  ;;  %v14983_v30 = vld [vmem:[%s16754_s25 + $0x8a4] ss:$8 sps:$4 sm:$0xff]  }
 0x234   : > { %11479 = vmatprep.subr.bf16.mxu0 %v14900_v54  ;;  %v14986_v53 = vld [vmem:[%s16754_s25 + $0x20a4] ss:$8 sps:$4 sm:$0xff]   ;;  %v14981_v54 = vld [vmem:[%s16754_s25 + $0x8a0] ss:$8 sps:$4 sm:$0xff]  }
 0x236   : > { %10496 = vmatpush1.bf16.msra.mxu1 %v14895_v55  ;;  %v14984_v55 = vld [vmem:[%s16754_s25 + $0x20a0] ss:$8 sps:$4 sm:$0xff]  }
 0x237   : > { %11480 = vmatpush1.bf16.msra.mxu0 %v14898_v56  ;;  %10497 = vmatprep.subr.bf16.mxu1 %v14903_v59  ;;  %v14989_v56 = vld [vmem:[%s16754_s25 + $0x8b4] ss:$8 sps:$4 sm:$0xff]  }
 0x238   : > { %11481 = vmatprep.subr.bf16.mxu0 %v14906_v42  ;;  %v14992_v59 = vld [vmem:[%s16754_s25 + $0x20b4] ss:$8 sps:$4 sm:$0xff]   ;;  %v14987_v42 = vld [vmem:[%s16754_s25 + $0x8b0] ss:$8 sps:$4 sm:$0xff]  }
 0x23a   : > { %10498 = vmatpush1.bf16.msra.mxu1 %v14901_v43  ;;  %v14990_v43 = vld [vmem:[%s16754_s25 + $0x20b0] ss:$8 sps:$4 sm:$0xff]  }
 0x23b   : > { %11482 = vmatpush1.bf16.msra.mxu0 %v14904_v60  ;;  %10499 = vmatprep.subr.bf16.mxu1 %v14909_v61  ;;  %v14995_v60 = vld [vmem:[%s16754_s25 + $0x8c4] ss:$8 sps:$4 sm:$0xff]  }
 0x23c   : > { %11483 = vmatprep.subr.bf16.mxu0 %v14912_v62  ;;  %v14998_v61 = vld [vmem:[%s16754_s25 + $0x20c4] ss:$8 sps:$4 sm:$0xff]   ;;  %v14993_v62 = vld [vmem:[%s16754_s25 + $0x8c0] ss:$8 sps:$4 sm:$0xff]  }
 0x23e   : > { %10500 = vmatpush1.bf16.msra.mxu1 %v14907_v63  ;;  %v14996_v63 = vld [vmem:[%s16754_s25 + $0x20c0] ss:$8 sps:$4 sm:$0xff]  }
 0x23f   : > { %11484 = vmatpush1.bf16.msra.mxu0 %v14910_v0  ;;  %10501 = vmatprep.subr.bf16.mxu1 %v14915_v1  ;;  %v15001_v0 = vld [vmem:[%s16754_s25 + $0x8d4] ss:$8 sps:$4 sm:$0xff]  }
 0x240   : > { %11485 = vmatprep.subr.bf16.mxu0 %v14918_v37  ;;  %v15004_v1 = vld [vmem:[%s16754_s25 + $0x20d4] ss:$8 sps:$4 sm:$0xff]   ;;  %v14999_v37 = vld [vmem:[%s16754_s25 + $0x8d0] ss:$8 sps:$4 sm:$0xff]  }
 0x242   : > { %10502 = vmatpush1.bf16.msra.mxu1 %v14913_v3  ;;  %v15002_v3 = vld [vmem:[%s16754_s25 + $0x20d0] ss:$8 sps:$4 sm:$0xff]  }
 0x243   : > { %11486 = vmatpush1.bf16.msra.mxu0 %v14916_v4  ;;  %10512 = vmatprep.subr.bf16.mxu1 %v14922_v5  ;;  %v15007_v4 = vld [vmem:[%s16754_s25 + $0x8e4] ss:$8 sps:$4 sm:$0xff]  }
 0x244   : > { %11496 = vmatprep.subr.bf16.mxu0 %v14926_v6  ;;  %v15010_v5 = vld [vmem:[%s16754_s25 + $0x20e4] ss:$8 sps:$4 sm:$0xff]   ;;  %v15005_v6 = vld [vmem:[%s16754_s25 + $0x8e0] ss:$8 sps:$4 sm:$0xff]  }
 0x245   : > { %10504 = vmatmul.mubr.bf16.vlgmr.msra.gmra.mrb[0].mxu1 %v17337_v2  ;;  %v14933_v2 = vld [vmem:[%s16754_s25 + $0x820] ss:$8 sps:$4 sm:$0xff]  }
 0x246   : > { %11488 = vmatmul.mubr.bf16.vlgmr.msra.gmra.mrb[0].mxu0 %v17340_v52  ;;  %10513 = vmatpush1.bf16.msra.mxu1 %v14920_v9  ;;  %v14936_v52 = vld [vmem:[%s16754_s25 + $0x2020] ss:$8 sps:$4 sm:$0xff]  }
 0x247   : > { %11497 = vmatpush1.bf16.msra.mxu0 %v14924_v57  ;;  %10514 = vmatprep.subr.bf16.mxu1 %v14929_v58  ;;  %v15008_v9 = vld [vmem:[%s16754_s25 + $0x20e0] ss:$8 sps:$4 sm:$0xff]   ;;  %v15013_v57 = vld [vmem:[%s16754_s25 + $0x8f4] ss:$8 sps:$4 sm:$0xff]  }
 0x248   : > { %11498 = vmatprep.subr.bf16.mxu0 %v14932_v10  ;;  %10544 = vmatprep.mubr.bf16.mxu1 %v1913_v11  ;;  %v15016_v58 = vld [vmem:[%s16754_s25 + $0x20f4] ss:$8 sps:$4 sm:$0xff]   ;;  %v1898_v10 = vcombine.high %v17409_v27, %v17409_v27  ;;  %v2102_v11 = vcombine.high %v17412_v18, %v17412_v18  ;;  %v15017_v27 = vld [vmem:[%s16754_s25 + $0x900] ss:$8 sps:$4 sm:$0xff]  }
 0x249   : > { %11528 = vmatprep.mubr.bf16.mxu0 %v2117_v12  ;;  %v15011_v12 = vld [vmem:[%s16754_s25 + $0x8f0] ss:$8 sps:$4 sm:$0xff]   ;;  %v15020_v18 = vld [vmem:[%s16754_s25 + $0x2100] ss:$8 sps:$4 sm:$0xff]  }
 0x24a   : > { %10515 = vmatpush1.bf16.msra.mxu1 %v14927_v13  ;;  %v15014_v13 = vld [vmem:[%s16754_s25 + $0x20f0] ss:$8 sps:$4 sm:$0xff]  }
 0x24b   : > { %11499 = vmatpush1.bf16.msra.mxu0 %v14930_v14  ;;  %10516 = vmatprep.subr.bf16.mxu1 %v14935_v15  ;;  %v15019_v14 = vld [vmem:[%s16754_s25 + $0x904] ss:$8 sps:$4 sm:$0xff]  }
 0x24c   : > { %11500 = vmatprep.subr.bf16.mxu0 %v14938_v16  ;;  %v15022_v15 = vld [vmem:[%s16754_s25 + $0x2104] ss:$8 sps:$4 sm:$0xff]   ;;  %v17501_v16 = vrot.slane %v1898_v10, %v16818_v50  ;;  %v15098_v10 = vld [vmem:[%s16754_s25 + $0x21d0] ss:$8 sps:$4 sm:$0xff]  }
 0x24e   : > { %10517 = vmatpush1.bf16.msra.mxu1 %v14933_v2  ;;  %v17504_v2 = vrot.slane %v2102_v11, %v16818_v50  ;;  %v15103_v11 = vld [vmem:[%s16754_s25 + $0x9e4] ss:$8 sps:$4 sm:$0xff]  }
 0x24f   : > { %11501 = vmatpush1.bf16.msra.mxu0 %v14936_v52  ;;  %10518 = vmatprep.subr.bf16.mxu1 %v14941_v19  ;;  %v15025_v52 = vld [vmem:[%s16754_s25 + $0x914] ss:$8 sps:$4 sm:$0xff]  }
 0x250   : > { %11502 = vmatprep.subr.bf16.mxu0 %v14944_v20  ;;  %v15028_v19 = vld [vmem:[%s16754_s25 + $0x2114] ss:$8 sps:$4 sm:$0xff]   ;;  %v1914_v20 = vcombine.high %v17501_v16, %v17501_v16 }
 0x252   : > { %10519 = vmatpush1.bf16.msra.mxu1 %v14939_v21  ;;  %v2118_v21 = vcombine.high %v17504_v2, %v17504_v2 }
 0x253   : > { %11503 = vmatpush1.bf16.msra.mxu0 %v14942_v22  ;;  %10520 = vmatprep.subr.bf16.mxu1 %v14947_v23  ;;  %v15023_v22 = vld [vmem:[%s16754_s25 + $0x910] ss:$8 sps:$4 sm:$0xff]  }
 0x254   : > { %11504 = vmatprep.subr.bf16.mxu0 %v14950_v24  ;;  %v15026_v23 = vld [vmem:[%s16754_s25 + $0x2110] ss:$8 sps:$4 sm:$0xff]   ;;  %v15031_v24 = vld [vmem:[%s16754_s25 + $0x924] ss:$8 sps:$4 sm:$0xff]  }
 0x256   : > { %10521 = vmatpush1.bf16.msra.mxu1 %v14945_v25  ;;  %v15034_v25 = vld [vmem:[%s16754_s25 + $0x2124] ss:$8 sps:$4 sm:$0xff]  }
 0x257   : > { %11505 = vmatpush1.bf16.msra.mxu0 %v14948_v26  ;;  %10522 = vmatprep.subr.bf16.mxu1 %v14953_v28  ;;  %v15037_v26 = vld [vmem:[%s16754_s25 + $0x934] ss:$8 sps:$4 sm:$0xff]  }
 0x258   : > { %11506 = vmatprep.subr.bf16.mxu0 %v14956_v31  ;;  %v15040_v28 = vld [vmem:[%s16754_s25 + $0x2134] ss:$8 sps:$4 sm:$0xff]   ;;  %v15035_v31 = vld [vmem:[%s16754_s25 + $0x930] ss:$8 sps:$4 sm:$0xff]  }
 0x25a   : > { %10523 = vmatpush1.bf16.msra.mxu1 %v14951_v32  ;;  %v15038_v32 = vld [vmem:[%s16754_s25 + $0x2130] ss:$8 sps:$4 sm:$0xff]  }
 0x25b   : > { %11507 = vmatpush1.bf16.msra.mxu0 %v14954_v33  ;;  %10524 = vmatprep.subr.bf16.mxu1 %v14959_v35  ;;  %v15043_v33 = vld [vmem:[%s16754_s25 + $0x944] ss:$8 sps:$4 sm:$0xff]  }
 0x25c   : > { %11508 = vmatprep.subr.bf16.mxu0 %v14962_v17  ;;  %v15046_v35 = vld [vmem:[%s16754_s25 + $0x2144] ss:$8 sps:$4 sm:$0xff]   ;;  %v15041_v17 = vld [vmem:[%s16754_s25 + $0x940] ss:$8 sps:$4 sm:$0xff]  }
 0x25e   : > { %10525 = vmatpush1.bf16.msra.mxu1 %v14957_v36  ;;  %v15044_v36 = vld [vmem:[%s16754_s25 + $0x2140] ss:$8 sps:$4 sm:$0xff]  }
 0x25f   : > { %11509 = vmatpush1.bf16.msra.mxu0 %v14960_v38  ;;  %10526 = vmatprep.subr.bf16.mxu1 %v14965_v39  ;;  %v15049_v38 = vld [vmem:[%s16754_s25 + $0x954] ss:$8 sps:$4 sm:$0xff]  }
 0x260   : > { %11510 = vmatprep.subr.bf16.mxu0 %v14968_v40  ;;  %v15052_v39 = vld [vmem:[%s16754_s25 + $0x2154] ss:$8 sps:$4 sm:$0xff]   ;;  %v15047_v40 = vld [vmem:[%s16754_s25 + $0x950] ss:$8 sps:$4 sm:$0xff]  }
 0x262   : > { %10527 = vmatpush1.bf16.msra.mxu1 %v14963_v41  ;;  %v15050_v41 = vld [vmem:[%s16754_s25 + $0x2150] ss:$8 sps:$4 sm:$0xff]  }
 0x263   : > { %11511 = vmatpush1.bf16.msra.mxu0 %v14966_v44  ;;  %10528 = vmatprep.subr.bf16.mxu1 %v14971_v45  ;;  %v15055_v44 = vld [vmem:[%s16754_s25 + $0x964] ss:$8 sps:$4 sm:$0xff]  }
 0x264   : > { %11512 = vmatprep.subr.bf16.mxu0 %v14974_v29  ;;  %v15058_v45 = vld [vmem:[%s16754_s25 + $0x2164] ss:$8 sps:$4 sm:$0xff]   ;;  %v15053_v29 = vld [vmem:[%s16754_s25 + $0x960] ss:$8 sps:$4 sm:$0xff]  }
 0x266   : > { %10529 = vmatpush1.bf16.msra.mxu1 %v14969_v34  ;;  %v15056_v34 = vld [vmem:[%s16754_s25 + $0x2160] ss:$8 sps:$4 sm:$0xff]  }
 0x267   : > { %11513 = vmatpush1.bf16.msra.mxu0 %v14972_v46  ;;  %10530 = vmatprep.subr.bf16.mxu1 %v14977_v47  ;;  %v15061_v46 = vld [vmem:[%s16754_s25 + $0x974] ss:$8 sps:$4 sm:$0xff]  }
 0x268   : > { %11514 = vmatprep.subr.bf16.mxu0 %v14980_v48  ;;  %v15064_v47 = vld [vmem:[%s16754_s25 + $0x2174] ss:$8 sps:$4 sm:$0xff]   ;;  %v15059_v48 = vld [vmem:[%s16754_s25 + $0x970] ss:$8 sps:$4 sm:$0xff]  }
 0x26a   : > { %10531 = vmatpush1.bf16.msra.mxu1 %v14975_v49  ;;  %v15062_v49 = vld [vmem:[%s16754_s25 + $0x2170] ss:$8 sps:$4 sm:$0xff]  }
 0x26b   : > { %11515 = vmatpush1.bf16.msra.mxu0 %v14978_v51  ;;  %10532 = vmatprep.subr.bf16.mxu1 %v14983_v30  ;;  %v15067_v51 = vld [vmem:[%s16754_s25 + $0x984] ss:$8 sps:$4 sm:$0xff]  }
 0x26c   : > { %11516 = vmatprep.subr.bf16.mxu0 %v14986_v53  ;;  %v15070_v30 = vld [vmem:[%s16754_s25 + $0x2184] ss:$8 sps:$4 sm:$0xff]   ;;  %v15065_v53 = vld [vmem:[%s16754_s25 + $0x980] ss:$8 sps:$4 sm:$0xff]  }
 0x26e   : > { %10533 = vmatpush1.bf16.msra.mxu1 %v14981_v54  ;;  %v15068_v54 = vld [vmem:[%s16754_s25 + $0x2180] ss:$8 sps:$4 sm:$0xff]  }
 0x26f   : > { %11517 = vmatpush1.bf16.msra.mxu0 %v14984_v55  ;;  %10534 = vmatprep.subr.bf16.mxu1 %v14989_v56  ;;  %v15073_v55 = vld [vmem:[%s16754_s25 + $0x994] ss:$8 sps:$4 sm:$0xff]  }
 0x270   : > { %11518 = vmatprep.subr.bf16.mxu0 %v14992_v59  ;;  %v15076_v56 = vld [vmem:[%s16754_s25 + $0x2194] ss:$8 sps:$4 sm:$0xff]   ;;  %v15071_v59 = vld [vmem:[%s16754_s25 + $0x990] ss:$8 sps:$4 sm:$0xff]  }
 0x272   : > { %10535 = vmatpush1.bf16.msra.mxu1 %v14987_v42  ;;  %v15074_v42 = vld [vmem:[%s16754_s25 + $0x2190] ss:$8 sps:$4 sm:$0xff]  }
 0x273   : > { %11519 = vmatpush1.bf16.msra.mxu0 %v14990_v43  ;;  %10536 = vmatprep.subr.bf16.mxu1 %v14995_v60  ;;  %v15079_v43 = vld [vmem:[%s16754_s25 + $0x9a4] ss:$8 sps:$4 sm:$0xff]  }
 0x274   : > { %11520 = vmatprep.subr.bf16.mxu0 %v14998_v61  ;;  %v15082_v60 = vld [vmem:[%s16754_s25 + $0x21a4] ss:$8 sps:$4 sm:$0xff]   ;;  %v15077_v61 = vld [vmem:[%s16754_s25 + $0x9a0] ss:$8 sps:$4 sm:$0xff]  }
 0x276   : > { %10537 = vmatpush1.bf16.msra.mxu1 %v14993_v62  ;;  %v15080_v62 = vld [vmem:[%s16754_s25 + $0x21a0] ss:$8 sps:$4 sm:$0xff]  }
 0x277   : > { %11521 = vmatpush1.bf16.msra.mxu0 %v14996_v63  ;;  %10538 = vmatprep.subr.bf16.mxu1 %v15001_v0  ;;  %v15085_v63 = vld [vmem:[%s16754_s25 + $0x9b4] ss:$8 sps:$4 sm:$0xff]  }
 0x278   : > { %11522 = vmatprep.subr.bf16.mxu0 %v15004_v1  ;;  %v15088_v0 = vld [vmem:[%s16754_s25 + $0x21b4] ss:$8 sps:$4 sm:$0xff]   ;;  %v15083_v1 = vld [vmem:[%s16754_s25 + $0x9b0] ss:$8 sps:$4 sm:$0xff]  }
 0x27a   : > { %10539 = vmatpush1.bf16.msra.mxu1 %v14999_v37  ;;  %v15086_v37 = vld [vmem:[%s16754_s25 + $0x21b0] ss:$8 sps:$4 sm:$0xff]  }
 0x27b   : > { %11523 = vmatpush1.bf16.msra.mxu0 %v15002_v3  ;;  %10540 = vmatprep.subr.bf16.mxu1 %v15007_v4  ;;  %v15091_v3 = vld [vmem:[%s16754_s25 + $0x9c4] ss:$8 sps:$4 sm:$0xff]  }
 0x27c   : > { %11524 = vmatprep.subr.bf16.mxu0 %v15010_v5  ;;  %v15094_v4 = vld [vmem:[%s16754_s25 + $0x21c4] ss:$8 sps:$4 sm:$0xff]   ;;  %v15089_v5 = vld [vmem:[%s16754_s25 + $0x9c0] ss:$8 sps:$4 sm:$0xff]  }
 0x27e   : > { %10541 = vmatpush1.bf16.msra.mxu1 %v15005_v6  ;;  %v15092_v6 = vld [vmem:[%s16754_s25 + $0x21c0] ss:$8 sps:$4 sm:$0xff]  }
 0x27f   : > { %11525 = vmatpush1.bf16.msra.mxu0 %v15008_v9  ;;  %10542 = vmatprep.subr.bf16.mxu1 %v15013_v57  ;;  %v15097_v9 = vld [vmem:[%s16754_s25 + $0x9d4] ss:$8 sps:$4 sm:$0xff]  }
 0x280   : > { %11526 = vmatprep.subr.bf16.mxu0 %v15016_v58  ;;  %v15100_v57 = vld [vmem:[%s16754_s25 + $0x21d4] ss:$8 sps:$4 sm:$0xff]   ;;  %v15095_v58 = vld [vmem:[%s16754_s25 + $0x9d0] ss:$8 sps:$4 sm:$0xff]  }
 0x282   : > { %10543 = vmatpush1.bf16.msra.mxu1 %v15011_v12  ;;  %v15106_v12 = vld [vmem:[%s16754_s25 + $0x21e4] ss:$8 sps:$4 sm:$0xff]  }
 0x283   : > { %11527 = vmatpush1.bf16.msra.mxu0 %v15014_v13  ;;  %10553 = vmatprep.subr.bf16.mxu1 %v15019_v14  ;;  %v15101_v13 = vld [vmem:[%s16754_s25 + $0x9e0] ss:$8 sps:$4 sm:$0xff]  }
 0x284   : > { %11537 = vmatprep.subr.bf16.mxu0 %v15022_v15  ;;  %v15104_v14 = vld [vmem:[%s16754_s25 + $0x21e0] ss:$8 sps:$4 sm:$0xff]   ;;  %v15109_v15 = vld [vmem:[%s16754_s25 + $0x9f4] ss:$8 sps:$4 sm:$0xff]  }
 0x285   : > { %10545 = vmatmul.mubr.bf16.vlgmr.msra.gmra.mrb[0].mxu1 %v17420_v7  ;;  %v15029_v7 = vld [vmem:[%s16754_s25 + $0x920] ss:$8 sps:$4 sm:$0xff]  }
 0x286   : > { %11529 = vmatmul.mubr.bf16.vlgmr.msra.gmra.mrb[0].mxu0 %v17424_v8  ;;  %10554 = vmatpush1.bf16.msra.mxu1 %v15017_v27  ;;  %v15032_v8 = vld [vmem:[%s16754_s25 + $0x2120] ss:$8 sps:$4 sm:$0xff]   ;;  %v15112_v27 = vld [vmem:[%s16754_s25 + $0x21f4] ss:$8 sps:$4 sm:$0xff]  }
 0x287   : > { %11538 = vmatpush1.bf16.msra.mxu0 %v15020_v18  ;;  %10555 = vmatprep.subr.bf16.mxu1 %v15025_v52  ;;  %v17573_v18 = vld [vmem:[%s16770_s23 + $0x28] sm:$0xff] }
 0x288   : > { %11539 = vmatprep.subr.bf16.mxu0 %v15028_v19  ;;  %10585 = vmatprep.mubr.bf16.mxu1 %v1914_v20  ;;  %v17576_v52 = vld [vmem:[%s16770_s23 + $0x88] sm:$0xff]  ;;  %v15107_v19 = vld [vmem:[%s16754_s25 + $0x9f0] ss:$8 sps:$4 sm:$0xff]  }
 0x289   : > { %11569 = vmatprep.mubr.bf16.mxu0 %v2118_v21  ;;  %v15110_v20 = vld [vmem:[%s16754_s25 + $0x21f0] ss:$8 sps:$4 sm:$0xff]   ;;  %v15116_v21 = vld [vmem:[%s16754_s25 + $0xa04] ss:$8 sps:$4 sm:$0xff]  }
 0x28a   : > { %10556 = vmatpush1.bf16.msra.mxu1 %v15023_v22  ;;  %v15120_v22 = vld [vmem:[%s16754_s25 + $0x2204] ss:$8 sps:$4 sm:$0xff]  }
 0x28b   : > { %11540 = vmatpush1.bf16.msra.mxu0 %v15026_v23  ;;  %10557 = vmatprep.subr.bf16.mxu1 %v15031_v24  ;;  %v17584_v23 = vrot.slane %v17573_v18, %v16818_v50  ;;  %v17588_v24 = vrot.slane %v17576_v52, %v16818_v50 }
 0x28c   : > { %11541 = vmatprep.subr.bf16.mxu0 %v15034_v25  ;;  %v15114_v25 = vld [vmem:[%s16754_s25 + $0xa00] ss:$8 sps:$4 sm:$0xff]  }
 0x28e   : > { %10558 = vmatpush1.bf16.msra.mxu1 %v15029_v7  ;;  %v15118_v7 = vld [vmem:[%s16754_s25 + $0x2200] ss:$8 sps:$4 sm:$0xff]  }
 0x28f   : > { %11542 = vmatpush1.bf16.msra.mxu0 %v15032_v8  ;;  %10559 = vmatprep.subr.bf16.mxu1 %v15037_v26  ;;  %v15123_v8 = vld [vmem:[%s16754_s25 + $0xa14] ss:$8 sps:$4 sm:$0xff]  }
 0x290   : > { %11543 = vmatprep.subr.bf16.mxu0 %v15040_v28  ;;  %v15126_v26 = vld [vmem:[%s16754_s25 + $0x2214] ss:$8 sps:$4 sm:$0xff]   ;;  %v1930_v28 = vcombine.high %v17584_v23, %v17584_v23 }
 0x292   : > { %10560 = vmatpush1.bf16.msra.mxu1 %v15035_v31  ;;  %v2134_v31 = vcombine.high %v17588_v24, %v17588_v24 }
 0x293   : > { %11544 = vmatpush1.bf16.msra.mxu0 %v15038_v32  ;;  %10561 = vmatprep.subr.bf16.mxu1 %v15043_v33  ;;  %v15121_v32 = vld [vmem:[%s16754_s25 + $0xa10] ss:$8 sps:$4 sm:$0xff]  }
 0x294   : > { %11545 = vmatprep.subr.bf16.mxu0 %v15046_v35  ;;  %v15124_v33 = vld [vmem:[%s16754_s25 + $0x2210] ss:$8 sps:$4 sm:$0xff]   ;;  %v15129_v35 = vld [vmem:[%s16754_s25 + $0xa24] ss:$8 sps:$4 sm:$0xff]  }
 0x296   : > { %10562 = vmatpush1.bf16.msra.mxu1 %v15041_v17  ;;  %v15132_v17 = vld [vmem:[%s16754_s25 + $0x2224] ss:$8 sps:$4 sm:$0xff]  }
 0x297   : > { %11546 = vmatpush1.bf16.msra.mxu0 %v15044_v36  ;;  %10563 = vmatprep.subr.bf16.mxu1 %v15049_v38  ;;  %v15135_v36 = vld [vmem:[%s16754_s25 + $0xa34] ss:$8 sps:$4 sm:$0xff]  }
 0x298   : > { %11547 = vmatprep.subr.bf16.mxu0 %v15052_v39  ;;  %v15138_v38 = vld [vmem:[%s16754_s25 + $0x2234] ss:$8 sps:$4 sm:$0xff]   ;;  %v15133_v39 = vld [vmem:[%s16754_s25 + $0xa30] ss:$8 sps:$4 sm:$0xff]  }
 0x29a   : > { %10564 = vmatpush1.bf16.msra.mxu1 %v15047_v40  ;;  %v15136_v40 = vld [vmem:[%s16754_s25 + $0x2230] ss:$8 sps:$4 sm:$0xff]  }
 0x29b   : > { %11548 = vmatpush1.bf16.msra.mxu0 %v15050_v41  ;;  %10565 = vmatprep.subr.bf16.mxu1 %v15055_v44  ;;  %v15141_v41 = vld [vmem:[%s16754_s25 + $0xa44] ss:$8 sps:$4 sm:$0xff]  }
 0x29c   : > { %11549 = vmatprep.subr.bf16.mxu0 %v15058_v45  ;;  %v15144_v44 = vld [vmem:[%s16754_s25 + $0x2244] ss:$8 sps:$4 sm:$0xff]   ;;  %v15139_v45 = vld [vmem:[%s16754_s25 + $0xa40] ss:$8 sps:$4 sm:$0xff]  }
 0x29e   : > { %10566 = vmatpush1.bf16.msra.mxu1 %v15053_v29  ;;  %v15142_v29 = vld [vmem:[%s16754_s25 + $0x2240] ss:$8 sps:$4 sm:$0xff]  }
 0x29f   : > { %11550 = vmatpush1.bf16.msra.mxu0 %v15056_v34  ;;  %10567 = vmatprep.subr.bf16.mxu1 %v15061_v46  ;;  %v15147_v34 = vld [vmem:[%s16754_s25 + $0xa54] ss:$8 sps:$4 sm:$0xff]  }
 0x2a0   : > { %11551 = vmatprep.subr.bf16.mxu0 %v15064_v47  ;;  %v15150_v46 = vld [vmem:[%s16754_s25 + $0x2254] ss:$8 sps:$4 sm:$0xff]   ;;  %v15145_v47 = vld [vmem:[%s16754_s25 + $0xa50] ss:$8 sps:$4 sm:$0xff]  }
 0x2a2   : > { %10568 = vmatpush1.bf16.msra.mxu1 %v15059_v48  ;;  %v15148_v48 = vld [vmem:[%s16754_s25 + $0x2250] ss:$8 sps:$4 sm:$0xff]  }
 0x2a3   : > { %11552 = vmatpush1.bf16.msra.mxu0 %v15062_v49  ;;  %10569 = vmatprep.subr.bf16.mxu1 %v15067_v51  ;;  %v15153_v49 = vld [vmem:[%s16754_s25 + $0xa64] ss:$8 sps:$4 sm:$0xff]  }
 0x2a4   : > { %11553 = vmatprep.subr.bf16.mxu0 %v15070_v30  ;;  %v15156_v51 = vld [vmem:[%s16754_s25 + $0x2264] ss:$8 sps:$4 sm:$0xff]   ;;  %v15151_v30 = vld [vmem:[%s16754_s25 + $0xa60] ss:$8 sps:$4 sm:$0xff]  }
 0x2a6   : > { %10570 = vmatpush1.bf16.msra.mxu1 %v15065_v53  ;;  %v15154_v53 = vld [vmem:[%s16754_s25 + $0x2260] ss:$8 sps:$4 sm:$0xff]  }
 0x2a7   : > { %11554 = vmatpush1.bf16.msra.mxu0 %v15068_v54  ;;  %10571 = vmatprep.subr.bf16.mxu1 %v15073_v55  ;;  %v15159_v54 = vld [vmem:[%s16754_s25 + $0xa74] ss:$8 sps:$4 sm:$0xff]  }
 0x2a8   : > { %11555 = vmatprep.subr.bf16.mxu0 %v15076_v56  ;;  %v15162_v55 = vld [vmem:[%s16754_s25 + $0x2274] ss:$8 sps:$4 sm:$0xff]   ;;  %v15157_v56 = vld [vmem:[%s16754_s25 + $0xa70] ss:$8 sps:$4 sm:$0xff]  }
 0x2aa   : > { %10572 = vmatpush1.bf16.msra.mxu1 %v15071_v59  ;;  %v15160_v59 = vld [vmem:[%s16754_s25 + $0x2270] ss:$8 sps:$4 sm:$0xff]  }
 0x2ab   : > { %11556 = vmatpush1.bf16.msra.mxu0 %v15074_v42  ;;  %10573 = vmatprep.subr.bf16.mxu1 %v15079_v43  ;;  %v15165_v42 = vld [vmem:[%s16754_s25 + $0xa84] ss:$8 sps:$4 sm:$0xff]  }
 0x2ac   : > { %11557 = vmatprep.subr.bf16.mxu0 %v15082_v60  ;;  %v15168_v43 = vld [vmem:[%s16754_s25 + $0x2284] ss:$8 sps:$4 sm:$0xff]   ;;  %v15163_v60 = vld [vmem:[%s16754_s25 + $0xa80] ss:$8 sps:$4 sm:$0xff]  }
 0x2ae   : > { %10574 = vmatpush1.bf16.msra.mxu1 %v15077_v61  ;;  %v15166_v61 = vld [vmem:[%s16754_s25 + $0x2280] ss:$8 sps:$4 sm:$0xff]  }
 0x2af   : > { %11558 = vmatpush1.bf16.msra.mxu0 %v15080_v62  ;;  %10575 = vmatprep.subr.bf16.mxu1 %v15085_v63  ;;  %v15171_v62 = vld [vmem:[%s16754_s25 + $0xa94] ss:$8 sps:$4 sm:$0xff]  }
 0x2b0   : > { %11559 = vmatprep.subr.bf16.mxu0 %v15088_v0  ;;  %v15174_v63 = vld [vmem:[%s16754_s25 + $0x2294] ss:$8 sps:$4 sm:$0xff]   ;;  %v15169_v0 = vld [vmem:[%s16754_s25 + $0xa90] ss:$8 sps:$4 sm:$0xff]  }
 0x2b2   : > { %10576 = vmatpush1.bf16.msra.mxu1 %v15083_v1  ;;  %v15172_v1 = vld [vmem:[%s16754_s25 + $0x2290] ss:$8 sps:$4 sm:$0xff]  }
 0x2b3   : > { %11560 = vmatpush1.bf16.msra.mxu0 %v15086_v37  ;;  %10577 = vmatprep.subr.bf16.mxu1 %v15091_v3  ;;  %v15177_v37 = vld [vmem:[%s16754_s25 + $0xaa4] ss:$8 sps:$4 sm:$0xff]  }
 0x2b4   : > { %11561 = vmatprep.subr.bf16.mxu0 %v15094_v4  ;;  %v15180_v3 = vld [vmem:[%s16754_s25 + $0x22a4] ss:$8 sps:$4 sm:$0xff]   ;;  %v15175_v4 = vld [vmem:[%s16754_s25 + $0xaa0] ss:$8 sps:$4 sm:$0xff]  }
 0x2b6   : > { %10578 = vmatpush1.bf16.msra.mxu1 %v15089_v5  ;;  %v15178_v5 = vld [vmem:[%s16754_s25 + $0x22a0] ss:$8 sps:$4 sm:$0xff]  }
 0x2b7   : > { %11562 = vmatpush1.bf16.msra.mxu0 %v15092_v6  ;;  %10579 = vmatprep.subr.bf16.mxu1 %v15097_v9  ;;  %v15183_v6 = vld [vmem:[%s16754_s25 + $0xab4] ss:$8 sps:$4 sm:$0xff]  }
 0x2b8   : > { %11563 = vmatprep.subr.bf16.mxu0 %v15100_v57  ;;  %v15186_v9 = vld [vmem:[%s16754_s25 + $0x22b4] ss:$8 sps:$4 sm:$0xff]   ;;  %v15181_v57 = vld [vmem:[%s16754_s25 + $0xab0] ss:$8 sps:$4 sm:$0xff]  }
 0x2ba   : > { %10580 = vmatpush1.bf16.msra.mxu1 %v15095_v58  ;;  %v15184_v58 = vld [vmem:[%s16754_s25 + $0x22b0] ss:$8 sps:$4 sm:$0xff]  }
 0x2bb   : > { %11564 = vmatpush1.bf16.msra.mxu0 %v15098_v10  ;;  %10581 = vmatprep.subr.bf16.mxu1 %v15103_v11  ;;  %v15189_v10 = vld [vmem:[%s16754_s25 + $0xac4] ss:$8 sps:$4 sm:$0xff]  }
 0x2bc   : > { %11565 = vmatprep.subr.bf16.mxu0 %v15106_v12  ;;  %v15192_v11 = vld [vmem:[%s16754_s25 + $0x22c4] ss:$8 sps:$4 sm:$0xff]   ;;  %v15187_v12 = vld [vmem:[%s16754_s25 + $0xac0] ss:$8 sps:$4 sm:$0xff]  }
 0x2be   : > { %10582 = vmatpush1.bf16.msra.mxu1 %v15101_v13  ;;  %v15190_v13 = vld [vmem:[%s16754_s25 + $0x22c0] ss:$8 sps:$4 sm:$0xff]  }
 0x2bf   : > { %11566 = vmatpush1.bf16.msra.mxu0 %v15104_v14  ;;  %10583 = vmatprep.subr.bf16.mxu1 %v15109_v15  ;;  %v15195_v14 = vld [vmem:[%s16754_s25 + $0xad4] ss:$8 sps:$4 sm:$0xff]  }
 0x2c0   : > { %11567 = vmatprep.subr.bf16.mxu0 %v15112_v27  ;;  %v15198_v15 = vld [vmem:[%s16754_s25 + $0x22d4] ss:$8 sps:$4 sm:$0xff]   ;;  %v15193_v27 = vld [vmem:[%s16754_s25 + $0xad0] ss:$8 sps:$4 sm:$0xff]  }
 0x2c2   : > { %10584 = vmatpush1.bf16.msra.mxu1 %v15107_v19  ;;  %v15196_v19 = vld [vmem:[%s16754_s25 + $0x22d0] ss:$8 sps:$4 sm:$0xff]  }
 0x2c3   : > { %11568 = vmatpush1.bf16.msra.mxu0 %v15110_v20  ;;  %10594 = vmatprep.subr.bf16.mxu1 %v15116_v21  ;;  %v15201_v20 = vld [vmem:[%s16754_s25 + $0xae4] ss:$8 sps:$4 sm:$0xff]  }
 0x2c4   : > { %11578 = vmatprep.subr.bf16.mxu0 %v15120_v22  ;;  %v15204_v21 = vld [vmem:[%s16754_s25 + $0x22e4] ss:$8 sps:$4 sm:$0xff]   ;;  %v15199_v22 = vld [vmem:[%s16754_s25 + $0xae0] ss:$8 sps:$4 sm:$0xff]  }
 0x2c5   : > { %10586 = vmatmul.mubr.bf16.vlgmr.msra.gmra.mrb[0].mxu1 %v17501_v16  ;;  %v15127_v16 = vld [vmem:[%s16754_s25 + $0xa20] ss:$8 sps:$4 sm:$0xff]  }
 0x2c6   : > { %11570 = vmatmul.mubr.bf16.vlgmr.msra.gmra.mrb[0].mxu0 %v17504_v2  ;;  %10595 = vmatpush1.bf16.msra.mxu1 %v15114_v25  ;;  %v15130_v2 = vld [vmem:[%s16754_s25 + $0x2220] ss:$8 sps:$4 sm:$0xff]  }
 0x2c7   : > { %11579 = vmatpush1.bf16.msra.mxu0 %v15118_v7  ;;  %10596 = vmatprep.subr.bf16.mxu1 %v15123_v8  ;;  %v15202_v25 = vld [vmem:[%s16754_s25 + $0x22e0] ss:$8 sps:$4 sm:$0xff]   ;;  %v15207_v7 = vld [vmem:[%s16754_s25 + $0xaf4] ss:$8 sps:$4 sm:$0xff]  }
 0x2c8   : > { %11580 = vmatprep.subr.bf16.mxu0 %v15126_v26  ;;  %10626 = vmatprep.mubr.bf16.mxu1 %v1930_v28  ;;  %v15210_v8 = vld [vmem:[%s16754_s25 + $0x22f4] ss:$8 sps:$4 sm:$0xff]   ;;  %v1915_v26 = vcombine.high %v17573_v18, %v17573_v18  ;;  %v2119_v28 = vcombine.high %v17576_v52, %v17576_v52  ;;  %v15211_v18 = vld [vmem:[%s16754_s25 + $0xb00] ss:$8 sps:$4 sm:$0xff]  }
 0x2c9   : > { %11610 = vmatprep.mubr.bf16.mxu0 %v2134_v31  ;;  %v15205_v31 = vld [vmem:[%s16754_s25 + $0xaf0] ss:$8 sps:$4 sm:$0xff]   ;;  %v15214_v52 = vld [vmem:[%s16754_s25 + $0x2300] ss:$8 sps:$4 sm:$0xff]  }
 0x2ca   : > { %10597 = vmatpush1.bf16.msra.mxu1 %v15121_v32  ;;  %v15208_v32 = vld [vmem:[%s16754_s25 + $0x22f0] ss:$8 sps:$4 sm:$0xff]  }
 0x2cb   : > { %11581 = vmatpush1.bf16.msra.mxu0 %v15124_v33  ;;  %10598 = vmatprep.subr.bf16.mxu1 %v15129_v35  ;;  %v15213_v33 = vld [vmem:[%s16754_s25 + $0xb04] ss:$8 sps:$4 sm:$0xff]  }
 0x2cc   : > { %11582 = vmatprep.subr.bf16.mxu0 %v15132_v17  ;;  %v15216_v35 = vld [vmem:[%s16754_s25 + $0x2304] ss:$8 sps:$4 sm:$0xff]   ;;  %v17665_v17 = vrot.slane %v1915_v26, %v16818_v50  ;;  %v15292_v26 = vld [vmem:[%s16754_s25 + $0x23d0] ss:$8 sps:$4 sm:$0xff]  }
 0x2ce   : > { %10599 = vmatpush1.bf16.msra.mxu1 %v15127_v16  ;;  %v17668_v16 = vrot.slane %v2119_v28, %v16818_v50  ;;  %v15297_v28 = vld [vmem:[%s16754_s25 + $0xbe4] ss:$8 sps:$4 sm:$0xff]  }
 0x2cf   : > { %11583 = vmatpush1.bf16.msra.mxu0 %v15130_v2  ;;  %10600 = vmatprep.subr.bf16.mxu1 %v15135_v36  ;;  %v15219_v2 = vld [vmem:[%s16754_s25 + $0xb14] ss:$8 sps:$4 sm:$0xff]  }
 0x2d0   : > { %11584 = vmatprep.subr.bf16.mxu0 %v15138_v38  ;;  %v15222_v36 = vld [vmem:[%s16754_s25 + $0x2314] ss:$8 sps:$4 sm:$0xff]   ;;  %v1931_v38 = vcombine.high %v17665_v17, %v17665_v17 }
 0x2d2   : > { %10601 = vmatpush1.bf16.msra.mxu1 %v15133_v39  ;;  %v2135_v39 = vcombine.high %v17668_v16, %v17668_v16 }
 0x2d3   : > { %11585 = vmatpush1.bf16.msra.mxu0 %v15136_v40  ;;  %10602 = vmatprep.subr.bf16.mxu1 %v15141_v41  ;;  %v15217_v40 = vld [vmem:[%s16754_s25 + $0xb10] ss:$8 sps:$4 sm:$0xff]  }
 0x2d4   : > { %11586 = vmatprep.subr.bf16.mxu0 %v15144_v44  ;;  %v15220_v41 = vld [vmem:[%s16754_s25 + $0x2310] ss:$8 sps:$4 sm:$0xff]   ;;  %v15225_v44 = vld [vmem:[%s16754_s25 + $0xb24] ss:$8 sps:$4 sm:$0xff]  }
 0x2d6   : > { %10603 = vmatpush1.bf16.msra.mxu1 %v15139_v45  ;;  %v15228_v45 = vld [vmem:[%s16754_s25 + $0x2324] ss:$8 sps:$4 sm:$0xff]  }
 0x2d7   : > { %11587 = vmatpush1.bf16.msra.mxu0 %v15142_v29  ;;  %10604 = vmatprep.subr.bf16.mxu1 %v15147_v34  ;;  %v15231_v29 = vld [vmem:[%s16754_s25 + $0xb34] ss:$8 sps:$4 sm:$0xff]  }
 0x2d8   : > { %11588 = vmatprep.subr.bf16.mxu0 %v15150_v46  ;;  %v15234_v34 = vld [vmem:[%s16754_s25 + $0x2334] ss:$8 sps:$4 sm:$0xff]   ;;  %v15229_v46 = vld [vmem:[%s16754_s25 + $0xb30] ss:$8 sps:$4 sm:$0xff]  }
 0x2da   : > { %10605 = vmatpush1.bf16.msra.mxu1 %v15145_v47  ;;  %v15232_v47 = vld [vmem:[%s16754_s25 + $0x2330] ss:$8 sps:$4 sm:$0xff]  }
 0x2db   : > { %11589 = vmatpush1.bf16.msra.mxu0 %v15148_v48  ;;  %10606 = vmatprep.subr.bf16.mxu1 %v15153_v49  ;;  %v15237_v48 = vld [vmem:[%s16754_s25 + $0xb44] ss:$8 sps:$4 sm:$0xff]  }
 0x2dc   : > { %11590 = vmatprep.subr.bf16.mxu0 %v15156_v51  ;;  %v15240_v49 = vld [vmem:[%s16754_s25 + $0x2344] ss:$8 sps:$4 sm:$0xff]   ;;  %v15235_v51 = vld [vmem:[%s16754_s25 + $0xb40] ss:$8 sps:$4 sm:$0xff]  }
 0x2de   : > { %10607 = vmatpush1.bf16.msra.mxu1 %v15151_v30  ;;  %v15238_v30 = vld [vmem:[%s16754_s25 + $0x2340] ss:$8 sps:$4 sm:$0xff]  }
 0x2df   : > { %11591 = vmatpush1.bf16.msra.mxu0 %v15154_v53  ;;  %10608 = vmatprep.subr.bf16.mxu1 %v15159_v54  ;;  %v15243_v53 = vld [vmem:[%s16754_s25 + $0xb54] ss:$8 sps:$4 sm:$0xff]  }
 0x2e0   : > { %11592 = vmatprep.subr.bf16.mxu0 %v15162_v55  ;;  %v15246_v54 = vld [vmem:[%s16754_s25 + $0x2354] ss:$8 sps:$4 sm:$0xff]   ;;  %v15241_v55 = vld [vmem:[%s16754_s25 + $0xb50] ss:$8 sps:$4 sm:$0xff]  }
 0x2e2   : > { %10609 = vmatpush1.bf16.msra.mxu1 %v15157_v56  ;;  %v15244_v56 = vld [vmem:[%s16754_s25 + $0x2350] ss:$8 sps:$4 sm:$0xff]  }
 0x2e3   : > { %11593 = vmatpush1.bf16.msra.mxu0 %v15160_v59  ;;  %10610 = vmatprep.subr.bf16.mxu1 %v15165_v42  ;;  %v15249_v59 = vld [vmem:[%s16754_s25 + $0xb64] ss:$8 sps:$4 sm:$0xff]  }
 0x2e4   : > { %11594 = vmatprep.subr.bf16.mxu0 %v15168_v43  ;;  %v15252_v42 = vld [vmem:[%s16754_s25 + $0x2364] ss:$8 sps:$4 sm:$0xff]   ;;  %v15247_v43 = vld [vmem:[%s16754_s25 + $0xb60] ss:$8 sps:$4 sm:$0xff]  }
 0x2e6   : > { %10611 = vmatpush1.bf16.msra.mxu1 %v15163_v60  ;;  %v15250_v60 = vld [vmem:[%s16754_s25 + $0x2360] ss:$8 sps:$4 sm:$0xff]  }
 0x2e7   : > { %11595 = vmatpush1.bf16.msra.mxu0 %v15166_v61  ;;  %10612 = vmatprep.subr.bf16.mxu1 %v15171_v62  ;;  %v15255_v61 = vld [vmem:[%s16754_s25 + $0xb74] ss:$8 sps:$4 sm:$0xff]  }
 0x2e8   : > { %11596 = vmatprep.subr.bf16.mxu0 %v15174_v63  ;;  %v15258_v62 = vld [vmem:[%s16754_s25 + $0x2374] ss:$8 sps:$4 sm:$0xff]   ;;  %v15253_v63 = vld [vmem:[%s16754_s25 + $0xb70] ss:$8 sps:$4 sm:$0xff]  }
 0x2ea   : > { %10613 = vmatpush1.bf16.msra.mxu1 %v15169_v0  ;;  %v15256_v0 = vld [vmem:[%s16754_s25 + $0x2370] ss:$8 sps:$4 sm:$0xff]  }
 0x2eb   : > { %11597 = vmatpush1.bf16.msra.mxu0 %v15172_v1  ;;  %10614 = vmatprep.subr.bf16.mxu1 %v15177_v37  ;;  %v15261_v1 = vld [vmem:[%s16754_s25 + $0xb84] ss:$8 sps:$4 sm:$0xff]  }
 0x2ec   : > { %11598 = vmatprep.subr.bf16.mxu0 %v15180_v3  ;;  %v15264_v37 = vld [vmem:[%s16754_s25 + $0x2384] ss:$8 sps:$4 sm:$0xff]   ;;  %v15259_v3 = vld [vmem:[%s16754_s25 + $0xb80] ss:$8 sps:$4 sm:$0xff]  }
 0x2ee   : > { %10615 = vmatpush1.bf16.msra.mxu1 %v15175_v4  ;;  %v15262_v4 = vld [vmem:[%s16754_s25 + $0x2380] ss:$8 sps:$4 sm:$0xff]  }
 0x2ef   : > { %11599 = vmatpush1.bf16.msra.mxu0 %v15178_v5  ;;  %10616 = vmatprep.subr.bf16.mxu1 %v15183_v6  ;;  %v15267_v5 = vld [vmem:[%s16754_s25 + $0xb94] ss:$8 sps:$4 sm:$0xff]  }
 0x2f0   : > { %11600 = vmatprep.subr.bf16.mxu0 %v15186_v9  ;;  %v15270_v6 = vld [vmem:[%s16754_s25 + $0x2394] ss:$8 sps:$4 sm:$0xff]   ;;  %v15265_v9 = vld [vmem:[%s16754_s25 + $0xb90] ss:$8 sps:$4 sm:$0xff]  }
 0x2f2   : > { %10617 = vmatpush1.bf16.msra.mxu1 %v15181_v57  ;;  %v15268_v57 = vld [vmem:[%s16754_s25 + $0x2390] ss:$8 sps:$4 sm:$0xff]  }
 0x2f3   : > { %11601 = vmatpush1.bf16.msra.mxu0 %v15184_v58  ;;  %10618 = vmatprep.subr.bf16.mxu1 %v15189_v10  ;;  %v15273_v58 = vld [vmem:[%s16754_s25 + $0xba4] ss:$8 sps:$4 sm:$0xff]  }
 0x2f4   : > { %11602 = vmatprep.subr.bf16.mxu0 %v15192_v11  ;;  %v15276_v10 = vld [vmem:[%s16754_s25 + $0x23a4] ss:$8 sps:$4 sm:$0xff]   ;;  %v15271_v11 = vld [vmem:[%s16754_s25 + $0xba0] ss:$8 sps:$4 sm:$0xff]  }
 0x2f6   : > { %10619 = vmatpush1.bf16.msra.mxu1 %v15187_v12  ;;  %v15274_v12 = vld [vmem:[%s16754_s25 + $0x23a0] ss:$8 sps:$4 sm:$0xff]  }
 0x2f7   : > { %11603 = vmatpush1.bf16.msra.mxu0 %v15190_v13  ;;  %10620 = vmatprep.subr.bf16.mxu1 %v15195_v14  ;;  %v15279_v13 = vld [vmem:[%s16754_s25 + $0xbb4] ss:$8 sps:$4 sm:$0xff]  }
 0x2f8   : > { %11604 = vmatprep.subr.bf16.mxu0 %v15198_v15  ;;  %v15282_v14 = vld [vmem:[%s16754_s25 + $0x23b4] ss:$8 sps:$4 sm:$0xff]   ;;  %v15277_v15 = vld [vmem:[%s16754_s25 + $0xbb0] ss:$8 sps:$4 sm:$0xff]  }
 0x2fa   : > { %10621 = vmatpush1.bf16.msra.mxu1 %v15193_v27  ;;  %v15280_v27 = vld [vmem:[%s16754_s25 + $0x23b0] ss:$8 sps:$4 sm:$0xff]  }
 0x2fb   : > { %11605 = vmatpush1.bf16.msra.mxu0 %v15196_v19  ;;  %10622 = vmatprep.subr.bf16.mxu1 %v15201_v20  ;;  %v15285_v19 = vld [vmem:[%s16754_s25 + $0xbc4] ss:$8 sps:$4 sm:$0xff]  }
 0x2fc   : > { %11606 = vmatprep.subr.bf16.mxu0 %v15204_v21  ;;  %v15288_v20 = vld [vmem:[%s16754_s25 + $0x23c4] ss:$8 sps:$4 sm:$0xff]   ;;  %v15283_v21 = vld [vmem:[%s16754_s25 + $0xbc0] ss:$8 sps:$4 sm:$0xff]  }
 0x2fe   : > { %10623 = vmatpush1.bf16.msra.mxu1 %v15199_v22  ;;  %v15286_v22 = vld [vmem:[%s16754_s25 + $0x23c0] ss:$8 sps:$4 sm:$0xff]  }
 0x2ff   : > { %11607 = vmatpush1.bf16.msra.mxu0 %v15202_v25  ;;  %10624 = vmatprep.subr.bf16.mxu1 %v15207_v7  ;;  %v15291_v25 = vld [vmem:[%s16754_s25 + $0xbd4] ss:$8 sps:$4 sm:$0xff]  }
 0x300   : > { %11608 = vmatprep.subr.bf16.mxu0 %v15210_v8  ;;  %v15294_v7 = vld [vmem:[%s16754_s25 + $0x23d4] ss:$8 sps:$4 sm:$0xff]   ;;  %v15289_v8 = vld [vmem:[%s16754_s25 + $0xbd0] ss:$8 sps:$4 sm:$0xff]  }
 0x302   : > { %10625 = vmatpush1.bf16.msra.mxu1 %v15205_v31  ;;  %v15300_v31 = vld [vmem:[%s16754_s25 + $0x23e4] ss:$8 sps:$4 sm:$0xff]  }
 0x303   : > { %11609 = vmatpush1.bf16.msra.mxu0 %v15208_v32  ;;  %10635 = vmatprep.subr.bf16.mxu1 %v15213_v33  ;;  %v15295_v32 = vld [vmem:[%s16754_s25 + $0xbe0] ss:$8 sps:$4 sm:$0xff]  }
 0x304   : > { %11619 = vmatprep.subr.bf16.mxu0 %v15216_v35  ;;  %v15298_v33 = vld [vmem:[%s16754_s25 + $0x23e0] ss:$8 sps:$4 sm:$0xff]   ;;  %v15303_v35 = vld [vmem:[%s16754_s25 + $0xbf4] ss:$8 sps:$4 sm:$0xff]  }
 0x305   : > { %10627 = vmatmul.mubr.bf16.vlgmr.msra.gmra.mrb[0].mxu1 %v17584_v23  ;;  %v15223_v23 = vld [vmem:[%s16754_s25 + $0xb20] ss:$8 sps:$4 sm:$0xff]  }
 0x306   : > { %11611 = vmatmul.mubr.bf16.vlgmr.msra.gmra.mrb[0].mxu0 %v17588_v24  ;;  %10636 = vmatpush1.bf16.msra.mxu1 %v15211_v18  ;;  %v15226_v24 = vld [vmem:[%s16754_s25 + $0x2320] ss:$8 sps:$4 sm:$0xff]   ;;  %v15306_v18 = vld [vmem:[%s16754_s25 + $0x23f4] ss:$8 sps:$4 sm:$0xff]  }
 0x307   : > { %11620 = vmatpush1.bf16.msra.mxu0 %v15214_v52  ;;  %10637 = vmatprep.subr.bf16.mxu1 %v15219_v2  ;;  %v17737_v52 = vld [vmem:[%s16770_s23 + $0x30] sm:$0xff] }
 0x308   : > { %11621 = vmatprep.subr.bf16.mxu0 %v15222_v36  ;;  %10667 = vmatprep.mubr.bf16.mxu1 %v1931_v38  ;;  %v17740_v2 = vld [vmem:[%s16770_s23 + $0x90] sm:$0xff] }
 0x309   : > { %11651 = vmatprep.mubr.bf16.mxu0 %v2135_v39  ;;  %v15301_v36 = vld [vmem:[%s16754_s25 + $0xbf0] ss:$8 sps:$4 sm:$0xff]   ;;  %v15310_v39 = vld [vmem:[%s16754_s25 + $0xc04] ss:$8 sps:$4 sm:$0xff]  }
 0x30a   : > { %10638 = vmatpush1.bf16.msra.mxu1 %v15217_v40  ;;  %v15304_v38 = vld [vmem:[%s16754_s25 + $0x23f0] ss:$8 sps:$4 sm:$0xff]   ;;  %v15314_v40 = vld [vmem:[%s16754_s25 + $0x2404] ss:$8 sps:$4 sm:$0xff]  }
 0x30b   : > { %11622 = vmatpush1.bf16.msra.mxu0 %v15220_v41  ;;  %10639 = vmatprep.subr.bf16.mxu1 %v15225_v44  ;;  %v17748_v41 = vrot.slane %v17737_v52, %v16818_v50  ;;  %v17752_v44 = vrot.slane %v17740_v2, %v16818_v50 }
 0x30c   : > { %11623 = vmatprep.subr.bf16.mxu0 %v15228_v45  ;;  %v15308_v45 = vld [vmem:[%s16754_s25 + $0xc00] ss:$8 sps:$4 sm:$0xff]  }
 0x30e   : > { %10640 = vmatpush1.bf16.msra.mxu1 %v15223_v23  ;;  %v15312_v23 = vld [vmem:[%s16754_s25 + $0x2400] ss:$8 sps:$4 sm:$0xff]  }
 0x30f   : > { %11624 = vmatpush1.bf16.msra.mxu0 %v15226_v24  ;;  %10641 = vmatprep.subr.bf16.mxu1 %v15231_v29  ;;  %v15317_v24 = vld [vmem:[%s16754_s25 + $0xc14] ss:$8 sps:$4 sm:$0xff]  }
 0x310   : > { %11625 = vmatprep.subr.bf16.mxu0 %v15234_v34  ;;  %v15320_v29 = vld [vmem:[%s16754_s25 + $0x2414] ss:$8 sps:$4 sm:$0xff]   ;;  %v1947_v34 = vcombine.high %v17748_v41, %v17748_v41 }
 0x312   : > { %10642 = vmatpush1.bf16.msra.mxu1 %v15229_v46  ;;  %v2151_v46 = vcombine.high %v17752_v44, %v17752_v44 }
 0x313   : > { %11626 = vmatpush1.bf16.msra.mxu0 %v15232_v47  ;;  %10643 = vmatprep.subr.bf16.mxu1 %v15237_v48  ;;  %v15315_v47 = vld [vmem:[%s16754_s25 + $0xc10] ss:$8 sps:$4 sm:$0xff]  }
 0x314   : > { %11627 = vmatprep.subr.bf16.mxu0 %v15240_v49  ;;  %v15318_v48 = vld [vmem:[%s16754_s25 + $0x2410] ss:$8 sps:$4 sm:$0xff]   ;;  %v15323_v49 = vld [vmem:[%s16754_s25 + $0xc24] ss:$8 sps:$4 sm:$0xff]  }
 0x316   : > { %10644 = vmatpush1.bf16.msra.mxu1 %v15235_v51  ;;  %v15326_v51 = vld [vmem:[%s16754_s25 + $0x2424] ss:$8 sps:$4 sm:$0xff]  }
 0x317   : > { %11628 = vmatpush1.bf16.msra.mxu0 %v15238_v30  ;;  %10645 = vmatprep.subr.bf16.mxu1 %v15243_v53  ;;  %v15329_v30 = vld [vmem:[%s16754_s25 + $0xc34] ss:$8 sps:$4 sm:$0xff]  }
 0x318   : > { %11629 = vmatprep.subr.bf16.mxu0 %v15246_v54  ;;  %v15332_v53 = vld [vmem:[%s16754_s25 + $0x2434] ss:$8 sps:$4 sm:$0xff]   ;;  %v15327_v54 = vld [vmem:[%s16754_s25 + $0xc30] ss:$8 sps:$4 sm:$0xff]  }
 0x31a   : > { %10646 = vmatpush1.bf16.msra.mxu1 %v15241_v55  ;;  %v15330_v55 = vld [vmem:[%s16754_s25 + $0x2430] ss:$8 sps:$4 sm:$0xff]  }
 0x31b   : > { %11630 = vmatpush1.bf16.msra.mxu0 %v15244_v56  ;;  %10647 = vmatprep.subr.bf16.mxu1 %v15249_v59  ;;  %v15335_v56 = vld [vmem:[%s16754_s25 + $0xc44] ss:$8 sps:$4 sm:$0xff]  }
 0x31c   : > { %11631 = vmatprep.subr.bf16.mxu0 %v15252_v42  ;;  %v15338_v59 = vld [vmem:[%s16754_s25 + $0x2444] ss:$8 sps:$4 sm:$0xff]   ;;  %v15333_v42 = vld [vmem:[%s16754_s25 + $0xc40] ss:$8 sps:$4 sm:$0xff]  }
 0x31e   : > { %10648 = vmatpush1.bf16.msra.mxu1 %v15247_v43  ;;  %v15336_v43 = vld [vmem:[%s16754_s25 + $0x2440] ss:$8 sps:$4 sm:$0xff]  }
 0x31f   : > { %11632 = vmatpush1.bf16.msra.mxu0 %v15250_v60  ;;  %10649 = vmatprep.subr.bf16.mxu1 %v15255_v61  ;;  %v15341_v60 = vld [vmem:[%s16754_s25 + $0xc54] ss:$8 sps:$4 sm:$0xff]  }
 0x320   : > { %11633 = vmatprep.subr.bf16.mxu0 %v15258_v62  ;;  %v15344_v61 = vld [vmem:[%s16754_s25 + $0x2454] ss:$8 sps:$4 sm:$0xff]   ;;  %v15339_v62 = vld [vmem:[%s16754_s25 + $0xc50] ss:$8 sps:$4 sm:$0xff]  }
 0x322   : > { %10650 = vmatpush1.bf16.msra.mxu1 %v15253_v63  ;;  %v15342_v63 = vld [vmem:[%s16754_s25 + $0x2450] ss:$8 sps:$4 sm:$0xff]  }
 0x323   : > { %11634 = vmatpush1.bf16.msra.mxu0 %v15256_v0  ;;  %10651 = vmatprep.subr.bf16.mxu1 %v15261_v1  ;;  %v15347_v0 = vld [vmem:[%s16754_s25 + $0xc64] ss:$8 sps:$4 sm:$0xff]  }
 0x324   : > { %11635 = vmatprep.subr.bf16.mxu0 %v15264_v37  ;;  %v15350_v1 = vld [vmem:[%s16754_s25 + $0x2464] ss:$8 sps:$4 sm:$0xff]   ;;  %v15345_v37 = vld [vmem:[%s16754_s25 + $0xc60] ss:$8 sps:$4 sm:$0xff]  }
 0x326   : > { %10652 = vmatpush1.bf16.msra.mxu1 %v15259_v3  ;;  %v15348_v3 = vld [vmem:[%s16754_s25 + $0x2460] ss:$8 sps:$4 sm:$0xff]  }
 0x327   : > { %11636 = vmatpush1.bf16.msra.mxu0 %v15262_v4  ;;  %10653 = vmatprep.subr.bf16.mxu1 %v15267_v5  ;;  %v15353_v4 = vld [vmem:[%s16754_s25 + $0xc74] ss:$8 sps:$4 sm:$0xff]  }
 0x328   : > { %11637 = vmatprep.subr.bf16.mxu0 %v15270_v6  ;;  %v15356_v5 = vld [vmem:[%s16754_s25 + $0x2474] ss:$8 sps:$4 sm:$0xff]   ;;  %v15351_v6 = vld [vmem:[%s16754_s25 + $0xc70] ss:$8 sps:$4 sm:$0xff]  }
 0x32a   : > { %10654 = vmatpush1.bf16.msra.mxu1 %v15265_v9  ;;  %v15354_v9 = vld [vmem:[%s16754_s25 + $0x2470] ss:$8 sps:$4 sm:$0xff]  }
 0x32b   : > { %11638 = vmatpush1.bf16.msra.mxu0 %v15268_v57  ;;  %10655 = vmatprep.subr.bf16.mxu1 %v15273_v58  ;;  %v15359_v57 = vld [vmem:[%s16754_s25 + $0xc84] ss:$8 sps:$4 sm:$0xff]  }
 0x32c   : > { %11639 = vmatprep.subr.bf16.mxu0 %v15276_v10  ;;  %v15362_v58 = vld [vmem:[%s16754_s25 + $0x2484] ss:$8 sps:$4 sm:$0xff]   ;;  %v15357_v10 = vld [vmem:[%s16754_s25 + $0xc80] ss:$8 sps:$4 sm:$0xff]  }
 0x32e   : > { %10656 = vmatpush1.bf16.msra.mxu1 %v15271_v11  ;;  %v15360_v11 = vld [vmem:[%s16754_s25 + $0x2480] ss:$8 sps:$4 sm:$0xff]  }
 0x32f   : > { %11640 = vmatpush1.bf16.msra.mxu0 %v15274_v12  ;;  %10657 = vmatprep.subr.bf16.mxu1 %v15279_v13  ;;  %v15365_v12 = vld [vmem:[%s16754_s25 + $0xc94] ss:$8 sps:$4 sm:$0xff]  }
 0x330   : > { %11641 = vmatprep.subr.bf16.mxu0 %v15282_v14  ;;  %v15368_v13 = vld [vmem:[%s16754_s25 + $0x2494] ss:$8 sps:$4 sm:$0xff]   ;;  %v15363_v14 = vld [vmem:[%s16754_s25 + $0xc90] ss:$8 sps:$4 sm:$0xff]  }
 0x332   : > { %10658 = vmatpush1.bf16.msra.mxu1 %v15277_v15  ;;  %v15366_v15 = vld [vmem:[%s16754_s25 + $0x2490] ss:$8 sps:$4 sm:$0xff]  }
 0x333   : > { %11642 = vmatpush1.bf16.msra.mxu0 %v15280_v27  ;;  %10659 = vmatprep.subr.bf16.mxu1 %v15285_v19  ;;  %v15371_v27 = vld [vmem:[%s16754_s25 + $0xca4] ss:$8 sps:$4 sm:$0xff]  }
 0x334   : > { %11643 = vmatprep.subr.bf16.mxu0 %v15288_v20  ;;  %v15374_v19 = vld [vmem:[%s16754_s25 + $0x24a4] ss:$8 sps:$4 sm:$0xff]   ;;  %v15369_v20 = vld [vmem:[%s16754_s25 + $0xca0] ss:$8 sps:$4 sm:$0xff]  }
 0x336   : > { %10660 = vmatpush1.bf16.msra.mxu1 %v15283_v21  ;;  %v15372_v21 = vld [vmem:[%s16754_s25 + $0x24a0] ss:$8 sps:$4 sm:$0xff]  }
 0x337   : > { %11644 = vmatpush1.bf16.msra.mxu0 %v15286_v22  ;;  %10661 = vmatprep.subr.bf16.mxu1 %v15291_v25  ;;  %v15377_v22 = vld [vmem:[%s16754_s25 + $0xcb4] ss:$8 sps:$4 sm:$0xff]  }
 0x338   : > { %11645 = vmatprep.subr.bf16.mxu0 %v15294_v7  ;;  %v15380_v25 = vld [vmem:[%s16754_s25 + $0x24b4] ss:$8 sps:$4 sm:$0xff]   ;;  %v15375_v7 = vld [vmem:[%s16754_s25 + $0xcb0] ss:$8 sps:$4 sm:$0xff]  }
 0x33a   : > { %10662 = vmatpush1.bf16.msra.mxu1 %v15289_v8  ;;  %v15378_v8 = vld [vmem:[%s16754_s25 + $0x24b0] ss:$8 sps:$4 sm:$0xff]  }
 0x33b   : > { %11646 = vmatpush1.bf16.msra.mxu0 %v15292_v26  ;;  %10663 = vmatprep.subr.bf16.mxu1 %v15297_v28  ;;  %v15383_v26 = vld [vmem:[%s16754_s25 + $0xcc4] ss:$8 sps:$4 sm:$0xff]  }
 0x33c   : > { %11647 = vmatprep.subr.bf16.mxu0 %v15300_v31  ;;  %v15386_v28 = vld [vmem:[%s16754_s25 + $0x24c4] ss:$8 sps:$4 sm:$0xff]   ;;  %v15381_v31 = vld [vmem:[%s16754_s25 + $0xcc0] ss:$8 sps:$4 sm:$0xff]  }
 0x33e   : > { %10664 = vmatpush1.bf16.msra.mxu1 %v15295_v32  ;;  %v15384_v32 = vld [vmem:[%s16754_s25 + $0x24c0] ss:$8 sps:$4 sm:$0xff]  }
 0x33f   : > { %11648 = vmatpush1.bf16.msra.mxu0 %v15298_v33  ;;  %10665 = vmatprep.subr.bf16.mxu1 %v15303_v35  ;;  %v15389_v33 = vld [vmem:[%s16754_s25 + $0xcd4] ss:$8 sps:$4 sm:$0xff]  }
 0x340   : > { %11649 = vmatprep.subr.bf16.mxu0 %v15306_v18  ;;  %v15392_v35 = vld [vmem:[%s16754_s25 + $0x24d4] ss:$8 sps:$4 sm:$0xff]   ;;  %v15387_v18 = vld [vmem:[%s16754_s25 + $0xcd0] ss:$8 sps:$4 sm:$0xff]  }
 0x342   : > { %10666 = vmatpush1.bf16.msra.mxu1 %v15301_v36  ;;  %v15390_v36 = vld [vmem:[%s16754_s25 + $0x24d0] ss:$8 sps:$4 sm:$0xff]  }
 0x343   : > { %11650 = vmatpush1.bf16.msra.mxu0 %v15304_v38  ;;  %10676 = vmatprep.subr.bf16.mxu1 %v15310_v39  ;;  %v15395_v38 = vld [vmem:[%s16754_s25 + $0xce4] ss:$8 sps:$4 sm:$0xff]  }
 0x344   : > { %11660 = vmatprep.subr.bf16.mxu0 %v15314_v40  ;;  %v15398_v39 = vld [vmem:[%s16754_s25 + $0x24e4] ss:$8 sps:$4 sm:$0xff]   ;;  %v15393_v40 = vld [vmem:[%s16754_s25 + $0xce0] ss:$8 sps:$4 sm:$0xff]  }
 0x345   : > { %10668 = vmatmul.mubr.bf16.vlgmr.msra.gmra.mrb[0].mxu1 %v17665_v17  ;;  %v15321_v17 = vld [vmem:[%s16754_s25 + $0xc20] ss:$8 sps:$4 sm:$0xff]  }
 0x346   : > { %11652 = vmatmul.mubr.bf16.vlgmr.msra.gmra.mrb[0].mxu0 %v17668_v16  ;;  %10677 = vmatpush1.bf16.msra.mxu1 %v15308_v45  ;;  %v15324_v16 = vld [vmem:[%s16754_s25 + $0x2420] ss:$8 sps:$4 sm:$0xff]  }
 0x347   : > { %11661 = vmatpush1.bf16.msra.mxu0 %v15312_v23  ;;  %10678 = vmatprep.subr.bf16.mxu1 %v15317_v24  ;;  %v15396_v45 = vld [vmem:[%s16754_s25 + $0x24e0] ss:$8 sps:$4 sm:$0xff]   ;;  %v15401_v23 = vld [vmem:[%s16754_s25 + $0xcf4] ss:$8 sps:$4 sm:$0xff]  }
 0x348   : > { %11662 = vmatprep.subr.bf16.mxu0 %v15320_v29  ;;  %10708 = vmatprep.mubr.bf16.mxu1 %v1947_v34  ;;  %v15404_v24 = vld [vmem:[%s16754_s25 + $0x24f4] ss:$8 sps:$4 sm:$0xff]   ;;  %v1932_v29 = vcombine.high %v17737_v52, %v17737_v52  ;;  %v2136_v34 = vcombine.high %v17740_v2, %v17740_v2  ;;  %v15405_v52 = vld [vmem:[%s16754_s25 + $0xd00] ss:$8 sps:$4 sm:$0xff]  }
 0x349   : > { %11692 = vmatprep.mubr.bf16.mxu0 %v2151_v46  ;;  %v15399_v46 = vld [vmem:[%s16754_s25 + $0xcf0] ss:$8 sps:$4 sm:$0xff]   ;;  %v15408_v2 = vld [vmem:[%s16754_s25 + $0x2500] ss:$8 sps:$4 sm:$0xff]  }
 0x34a   : > { %10679 = vmatpush1.bf16.msra.mxu1 %v15315_v47  ;;  %v15402_v47 = vld [vmem:[%s16754_s25 + $0x24f0] ss:$8 sps:$4 sm:$0xff]  }
 0x34b   : > { %11663 = vmatpush1.bf16.msra.mxu0 %v15318_v48  ;;  %10680 = vmatprep.subr.bf16.mxu1 %v15323_v49  ;;  %v15407_v48 = vld [vmem:[%s16754_s25 + $0xd04] ss:$8 sps:$4 sm:$0xff]  }
 0x34c   : > { %11664 = vmatprep.subr.bf16.mxu0 %v15326_v51  ;;  %v15410_v49 = vld [vmem:[%s16754_s25 + $0x2504] ss:$8 sps:$4 sm:$0xff]   ;;  %v17829_v51 = vrot.slane %v1932_v29, %v16818_v50  ;;  %v15486_v29 = vld [vmem:[%s16754_s25 + $0x25d0] ss:$8 sps:$4 sm:$0xff]  }
 0x34e   : > { %10681 = vmatpush1.bf16.msra.mxu1 %v15321_v17  ;;  %v17832_v17 = vrot.slane %v2136_v34, %v16818_v50  ;;  %v15491_v34 = vld [vmem:[%s16754_s25 + $0xde4] ss:$8 sps:$4 sm:$0xff]  }
 0x34f   : > { %11665 = vmatpush1.bf16.msra.mxu0 %v15324_v16  ;;  %10682 = vmatprep.subr.bf16.mxu1 %v15329_v30  ;;  %v15413_v16 = vld [vmem:[%s16754_s25 + $0xd14] ss:$8 sps:$4 sm:$0xff]  }
 0x350   : > { %11666 = vmatprep.subr.bf16.mxu0 %v15332_v53  ;;  %v15416_v30 = vld [vmem:[%s16754_s25 + $0x2514] ss:$8 sps:$4 sm:$0xff]   ;;  %v1948_v53 = vcombine.high %v17829_v51, %v17829_v51 }
 0x352   : > { %10683 = vmatpush1.bf16.msra.mxu1 %v15327_v54  ;;  %v2152_v54 = vcombine.high %v17832_v17, %v17832_v17 }
 0x353   : > { %11667 = vmatpush1.bf16.msra.mxu0 %v15330_v55  ;;  %10684 = vmatprep.subr.bf16.mxu1 %v15335_v56  ;;  %v15411_v55 = vld [vmem:[%s16754_s25 + $0xd10] ss:$8 sps:$4 sm:$0xff]  }
 0x354   : > { %11668 = vmatprep.subr.bf16.mxu0 %v15338_v59  ;;  %v15414_v56 = vld [vmem:[%s16754_s25 + $0x2510] ss:$8 sps:$4 sm:$0xff]   ;;  %v15419_v59 = vld [vmem:[%s16754_s25 + $0xd24] ss:$8 sps:$4 sm:$0xff]  }
 0x356   : > { %10685 = vmatpush1.bf16.msra.mxu1 %v15333_v42  ;;  %v15422_v42 = vld [vmem:[%s16754_s25 + $0x2524] ss:$8 sps:$4 sm:$0xff]  }
 0x357   : > { %11669 = vmatpush1.bf16.msra.mxu0 %v15336_v43  ;;  %10686 = vmatprep.subr.bf16.mxu1 %v15341_v60  ;;  %v15425_v43 = vld [vmem:[%s16754_s25 + $0xd34] ss:$8 sps:$4 sm:$0xff]  }
 0x358   : > { %11670 = vmatprep.subr.bf16.mxu0 %v15344_v61  ;;  %v15428_v60 = vld [vmem:[%s16754_s25 + $0x2534] ss:$8 sps:$4 sm:$0xff]   ;;  %v15423_v61 = vld [vmem:[%s16754_s25 + $0xd30] ss:$8 sps:$4 sm:$0xff]  }
 0x35a   : > { %10687 = vmatpush1.bf16.msra.mxu1 %v15339_v62  ;;  %v15426_v62 = vld [vmem:[%s16754_s25 + $0x2530] ss:$8 sps:$4 sm:$0xff]  }
 0x35b   : > { %11671 = vmatpush1.bf16.msra.mxu0 %v15342_v63  ;;  %10688 = vmatprep.subr.bf16.mxu1 %v15347_v0  ;;  %v15431_v63 = vld [vmem:[%s16754_s25 + $0xd44] ss:$8 sps:$4 sm:$0xff]  }
 0x35c   : > { %11672 = vmatprep.subr.bf16.mxu0 %v15350_v1  ;;  %v15434_v0 = vld [vmem:[%s16754_s25 + $0x2544] ss:$8 sps:$4 sm:$0xff]   ;;  %v15429_v1 = vld [vmem:[%s16754_s25 + $0xd40] ss:$8 sps:$4 sm:$0xff]  }
 0x35e   : > { %10689 = vmatpush1.bf16.msra.mxu1 %v15345_v37  ;;  %v15432_v37 = vld [vmem:[%s16754_s25 + $0x2540] ss:$8 sps:$4 sm:$0xff]  }
 0x35f   : > { %11673 = vmatpush1.bf16.msra.mxu0 %v15348_v3  ;;  %10690 = vmatprep.subr.bf16.mxu1 %v15353_v4  ;;  %v15437_v3 = vld [vmem:[%s16754_s25 + $0xd54] ss:$8 sps:$4 sm:$0xff]  }
 0x360   : > { %11674 = vmatprep.subr.bf16.mxu0 %v15356_v5  ;;  %v15440_v4 = vld [vmem:[%s16754_s25 + $0x2554] ss:$8 sps:$4 sm:$0xff]   ;;  %v15435_v5 = vld [vmem:[%s16754_s25 + $0xd50] ss:$8 sps:$4 sm:$0xff]  }
 0x362   : > { %10691 = vmatpush1.bf16.msra.mxu1 %v15351_v6  ;;  %v15438_v6 = vld [vmem:[%s16754_s25 + $0x2550] ss:$8 sps:$4 sm:$0xff]  }
 0x363   : > { %11675 = vmatpush1.bf16.msra.mxu0 %v15354_v9  ;;  %10692 = vmatprep.subr.bf16.mxu1 %v15359_v57  ;;  %v15443_v9 = vld [vmem:[%s16754_s25 + $0xd64] ss:$8 sps:$4 sm:$0xff]  }
 0x364   : > { %11676 = vmatprep.subr.bf16.mxu0 %v15362_v58  ;;  %v15446_v57 = vld [vmem:[%s16754_s25 + $0x2564] ss:$8 sps:$4 sm:$0xff]   ;;  %v15441_v58 = vld [vmem:[%s16754_s25 + $0xd60] ss:$8 sps:$4 sm:$0xff]  }
 0x366   : > { %10693 = vmatpush1.bf16.msra.mxu1 %v15357_v10  ;;  %v15444_v10 = vld [vmem:[%s16754_s25 + $0x2560] ss:$8 sps:$4 sm:$0xff]  }
 0x367   : > { %11677 = vmatpush1.bf16.msra.mxu0 %v15360_v11  ;;  %10694 = vmatprep.subr.bf16.mxu1 %v15365_v12  ;;  %v15449_v11 = vld [vmem:[%s16754_s25 + $0xd74] ss:$8 sps:$4 sm:$0xff]  }
 0x368   : > { %11678 = vmatprep.subr.bf16.mxu0 %v15368_v13  ;;  %v15452_v12 = vld [vmem:[%s16754_s25 + $0x2574] ss:$8 sps:$4 sm:$0xff]   ;;  %v15447_v13 = vld [vmem:[%s16754_s25 + $0xd70] ss:$8 sps:$4 sm:$0xff]  }
 0x36a   : > { %10695 = vmatpush1.bf16.msra.mxu1 %v15363_v14  ;;  %v15450_v14 = vld [vmem:[%s16754_s25 + $0x2570] ss:$8 sps:$4 sm:$0xff]  }
 0x36b   : > { %11679 = vmatpush1.bf16.msra.mxu0 %v15366_v15  ;;  %10696 = vmatprep.subr.bf16.mxu1 %v15371_v27  ;;  %v15455_v15 = vld [vmem:[%s16754_s25 + $0xd84] ss:$8 sps:$4 sm:$0xff]  }
 0x36c   : > { %11680 = vmatprep.subr.bf16.mxu0 %v15374_v19  ;;  %v15458_v27 = vld [vmem:[%s16754_s25 + $0x2584] ss:$8 sps:$4 sm:$0xff]   ;;  %v15453_v19 = vld [vmem:[%s16754_s25 + $0xd80] ss:$8 sps:$4 sm:$0xff]  }
 0x36e   : > { %10697 = vmatpush1.bf16.msra.mxu1 %v15369_v20  ;;  %v15456_v20 = vld [vmem:[%s16754_s25 + $0x2580] ss:$8 sps:$4 sm:$0xff]  }
 0x36f   : > { %11681 = vmatpush1.bf16.msra.mxu0 %v15372_v21  ;;  %10698 = vmatprep.subr.bf16.mxu1 %v15377_v22  ;;  %v15461_v21 = vld [vmem:[%s16754_s25 + $0xd94] ss:$8 sps:$4 sm:$0xff]  }
 0x370   : > { %11682 = vmatprep.subr.bf16.mxu0 %v15380_v25  ;;  %v15464_v22 = vld [vmem:[%s16754_s25 + $0x2594] ss:$8 sps:$4 sm:$0xff]   ;;  %v15459_v25 = vld [vmem:[%s16754_s25 + $0xd90] ss:$8 sps:$4 sm:$0xff]  }
 0x372   : > { %10699 = vmatpush1.bf16.msra.mxu1 %v15375_v7  ;;  %v15462_v7 = vld [vmem:[%s16754_s25 + $0x2590] ss:$8 sps:$4 sm:$0xff]  }
 0x373   : > { %11683 = vmatpush1.bf16.msra.mxu0 %v15378_v8  ;;  %10700 = vmatprep.subr.bf16.mxu1 %v15383_v26  ;;  %v15467_v8 = vld [vmem:[%s16754_s25 + $0xda4] ss:$8 sps:$4 sm:$0xff]  }
 0x374   : > { %11684 = vmatprep.subr.bf16.mxu0 %v15386_v28  ;;  %v15470_v26 = vld [vmem:[%s16754_s25 + $0x25a4] ss:$8 sps:$4 sm:$0xff]   ;;  %v15465_v28 = vld [vmem:[%s16754_s25 + $0xda0] ss:$8 sps:$4 sm:$0xff]  }
 0x376   : > { %10701 = vmatpush1.bf16.msra.mxu1 %v15381_v31  ;;  %v15468_v31 = vld [vmem:[%s16754_s25 + $0x25a0] ss:$8 sps:$4 sm:$0xff]  }
 0x377   : > { %11685 = vmatpush1.bf16.msra.mxu0 %v15384_v32  ;;  %10702 = vmatprep.subr.bf16.mxu1 %v15389_v33  ;;  %v15473_v32 = vld [vmem:[%s16754_s25 + $0xdb4] ss:$8 sps:$4 sm:$0xff]  }
 0x378   : > { %11686 = vmatprep.subr.bf16.mxu0 %v15392_v35  ;;  %v15476_v33 = vld [vmem:[%s16754_s25 + $0x25b4] ss:$8 sps:$4 sm:$0xff]   ;;  %v15471_v35 = vld [vmem:[%s16754_s25 + $0xdb0] ss:$8 sps:$4 sm:$0xff]  }
 0x37a   : > { %10703 = vmatpush1.bf16.msra.mxu1 %v15387_v18  ;;  %v15474_v18 = vld [vmem:[%s16754_s25 + $0x25b0] ss:$8 sps:$4 sm:$0xff]  }
 0x37b   : > { %11687 = vmatpush1.bf16.msra.mxu0 %v15390_v36  ;;  %10704 = vmatprep.subr.bf16.mxu1 %v15395_v38  ;;  %v15479_v36 = vld [vmem:[%s16754_s25 + $0xdc4] ss:$8 sps:$4 sm:$0xff]  }
 0x37c   : > { %11688 = vmatprep.subr.bf16.mxu0 %v15398_v39  ;;  %v15482_v38 = vld [vmem:[%s16754_s25 + $0x25c4] ss:$8 sps:$4 sm:$0xff]   ;;  %v15477_v39 = vld [vmem:[%s16754_s25 + $0xdc0] ss:$8 sps:$4 sm:$0xff]  }
 0x37e   : > { %10705 = vmatpush1.bf16.msra.mxu1 %v15393_v40  ;;  %v15480_v40 = vld [vmem:[%s16754_s25 + $0x25c0] ss:$8 sps:$4 sm:$0xff]  }
 0x37f   : > { %11689 = vmatpush1.bf16.msra.mxu0 %v15396_v45  ;;  %10706 = vmatprep.subr.bf16.mxu1 %v15401_v23  ;;  %v15485_v45 = vld [vmem:[%s16754_s25 + $0xdd4] ss:$8 sps:$4 sm:$0xff]  }
 0x380   : > { %11690 = vmatprep.subr.bf16.mxu0 %v15404_v24  ;;  %v15488_v23 = vld [vmem:[%s16754_s25 + $0x25d4] ss:$8 sps:$4 sm:$0xff]   ;;  %v15483_v24 = vld [vmem:[%s16754_s25 + $0xdd0] ss:$8 sps:$4 sm:$0xff]  }
 0x382   : > { %10707 = vmatpush1.bf16.msra.mxu1 %v15399_v46  ;;  %v15494_v46 = vld [vmem:[%s16754_s25 + $0x25e4] ss:$8 sps:$4 sm:$0xff]  }
 0x383   : > { %11691 = vmatpush1.bf16.msra.mxu0 %v15402_v47  ;;  %10717 = vmatprep.subr.bf16.mxu1 %v15407_v48  ;;  %v15489_v47 = vld [vmem:[%s16754_s25 + $0xde0] ss:$8 sps:$4 sm:$0xff]  }
 0x384   : > { %11701 = vmatprep.subr.bf16.mxu0 %v15410_v49  ;;  %v15492_v48 = vld [vmem:[%s16754_s25 + $0x25e0] ss:$8 sps:$4 sm:$0xff]   ;;  %v15497_v49 = vld [vmem:[%s16754_s25 + $0xdf4] ss:$8 sps:$4 sm:$0xff]  }
 0x385   : > { %10709 = vmatmul.mubr.bf16.vlgmr.msra.gmra.mrb[0].mxu1 %v17748_v41  ;;  %v15417_v41 = vld [vmem:[%s16754_s25 + $0xd20] ss:$8 sps:$4 sm:$0xff]  }
 0x386   : > { %11693 = vmatmul.mubr.bf16.vlgmr.msra.gmra.mrb[0].mxu0 %v17752_v44  ;;  %10718 = vmatpush1.bf16.msra.mxu1 %v15405_v52  ;;  %v15420_v44 = vld [vmem:[%s16754_s25 + $0x2520] ss:$8 sps:$4 sm:$0xff]   ;;  %v15500_v52 = vld [vmem:[%s16754_s25 + $0x25f4] ss:$8 sps:$4 sm:$0xff]  }
 0x387   : > { %11702 = vmatpush1.bf16.msra.mxu0 %v15408_v2  ;;  %10719 = vmatprep.subr.bf16.mxu1 %v15413_v16  ;;  %v17901_v2 = vld [vmem:[%s16770_s23 + $0x38] sm:$0xff] }
 0x388   : > { %11703 = vmatprep.subr.bf16.mxu0 %v15416_v30  ;;  %10749 = vmatprep.mubr.bf16.mxu1 %v1948_v53  ;;  %v17904_v16 = vld [vmem:[%s16770_s23 + $0x98] sm:$0xff] }
 0x389   : > { %11733 = vmatprep.mubr.bf16.mxu0 %v2152_v54  ;;  %v15495_v30 = vld [vmem:[%s16754_s25 + $0xdf0] ss:$8 sps:$4 sm:$0xff]   ;;  %v15504_v54 = vld [vmem:[%s16754_s25 + $0xe04] ss:$8 sps:$4 sm:$0xff]  }
 0x38a   : > { %10720 = vmatpush1.bf16.msra.mxu1 %v15411_v55  ;;  %v15498_v53 = vld [vmem:[%s16754_s25 + $0x25f0] ss:$8 sps:$4 sm:$0xff]   ;;  %v15508_v55 = vld [vmem:[%s16754_s25 + $0x2604] ss:$8 sps:$4 sm:$0xff]  }
 0x38b   : > { %11704 = vmatpush1.bf16.msra.mxu0 %v15414_v56  ;;  %10721 = vmatprep.subr.bf16.mxu1 %v15419_v59  ;;  %v17912_v56 = vrot.slane %v17901_v2, %v16818_v50  ;;  %v17916_v59 = vrot.slane %v17904_v16, %v16818_v50 }
 0x38c   : > { %11705 = vmatprep.subr.bf16.mxu0 %v15422_v42  ;;  %v15502_v42 = vld [vmem:[%s16754_s25 + $0xe00] ss:$8 sps:$4 sm:$0xff]  }
 0x38e   : > { %10722 = vmatpush1.bf16.msra.mxu1 %v15417_v41  ;;  %v15506_v41 = vld [vmem:[%s16754_s25 + $0x2600] ss:$8 sps:$4 sm:$0xff]  }
 0x38f   : > { %11706 = vmatpush1.bf16.msra.mxu0 %v15420_v44  ;;  %10723 = vmatprep.subr.bf16.mxu1 %v15425_v43  ;;  %v15511_v44 = vld [vmem:[%s16754_s25 + $0xe14] ss:$8 sps:$4 sm:$0xff]  }
 0x390   : > { %11707 = vmatprep.subr.bf16.mxu0 %v15428_v60  ;;  %v15514_v43 = vld [vmem:[%s16754_s25 + $0x2614] ss:$8 sps:$4 sm:$0xff]   ;;  %v1964_v60 = vcombine.high %v17912_v56, %v17912_v56 }
 0x392   : > { %10724 = vmatpush1.bf16.msra.mxu1 %v15423_v61  ;;  %v2168_v61 = vcombine.high %v17916_v59, %v17916_v59 }
 0x393   : > { %11708 = vmatpush1.bf16.msra.mxu0 %v15426_v62  ;;  %10725 = vmatprep.subr.bf16.mxu1 %v15431_v63  ;;  %v15509_v62 = vld [vmem:[%s16754_s25 + $0xe10] ss:$8 sps:$4 sm:$0xff]  }
 0x394   : > { %11709 = vmatprep.subr.bf16.mxu0 %v15434_v0  ;;  %v15512_v63 = vld [vmem:[%s16754_s25 + $0x2610] ss:$8 sps:$4 sm:$0xff]   ;;  %v15517_v0 = vld [vmem:[%s16754_s25 + $0xe24] ss:$8 sps:$4 sm:$0xff]  }
 0x396   : > { %10726 = vmatpush1.bf16.msra.mxu1 %v15429_v1  ;;  %v15520_v1 = vld [vmem:[%s16754_s25 + $0x2624] ss:$8 sps:$4 sm:$0xff]  }
 0x397   : > { %11710 = vmatpush1.bf16.msra.mxu0 %v15432_v37  ;;  %10727 = vmatprep.subr.bf16.mxu1 %v15437_v3  ;;  %v15523_v37 = vld [vmem:[%s16754_s25 + $0xe34] ss:$8 sps:$4 sm:$0xff]  }
 0x398   : > { %11711 = vmatprep.subr.bf16.mxu0 %v15440_v4  ;;  %v15526_v3 = vld [vmem:[%s16754_s25 + $0x2634] ss:$8 sps:$4 sm:$0xff]   ;;  %v15521_v4 = vld [vmem:[%s16754_s25 + $0xe30] ss:$8 sps:$4 sm:$0xff]  }
 0x39a   : > { %10728 = vmatpush1.bf16.msra.mxu1 %v15435_v5  ;;  %v15524_v5 = vld [vmem:[%s16754_s25 + $0x2630] ss:$8 sps:$4 sm:$0xff]  }
 0x39b   : > { %11712 = vmatpush1.bf16.msra.mxu0 %v15438_v6  ;;  %10729 = vmatprep.subr.bf16.mxu1 %v15443_v9  ;;  %v15529_v6 = vld [vmem:[%s16754_s25 + $0xe44] ss:$8 sps:$4 sm:$0xff]  }
 0x39c   : > { %11713 = vmatprep.subr.bf16.mxu0 %v15446_v57  ;;  %v15532_v9 = vld [vmem:[%s16754_s25 + $0x2644] ss:$8 sps:$4 sm:$0xff]   ;;  %v15527_v57 = vld [vmem:[%s16754_s25 + $0xe40] ss:$8 sps:$4 sm:$0xff]  }
 0x39e   : > { %10730 = vmatpush1.bf16.msra.mxu1 %v15441_v58  ;;  %v15530_v58 = vld [vmem:[%s16754_s25 + $0x2640] ss:$8 sps:$4 sm:$0xff]  }
 0x39f   : > { %11714 = vmatpush1.bf16.msra.mxu0 %v15444_v10  ;;  %10731 = vmatprep.subr.bf16.mxu1 %v15449_v11  ;;  %v15535_v10 = vld [vmem:[%s16754_s25 + $0xe54] ss:$8 sps:$4 sm:$0xff]  }
 0x3a0   : > { %11715 = vmatprep.subr.bf16.mxu0 %v15452_v12  ;;  %v15538_v11 = vld [vmem:[%s16754_s25 + $0x2654] ss:$8 sps:$4 sm:$0xff]   ;;  %v15533_v12 = vld [vmem:[%s16754_s25 + $0xe50] ss:$8 sps:$4 sm:$0xff]  }
 0x3a2   : > { %10732 = vmatpush1.bf16.msra.mxu1 %v15447_v13  ;;  %v15536_v13 = vld [vmem:[%s16754_s25 + $0x2650] ss:$8 sps:$4 sm:$0xff]  }
 0x3a3   : > { %11716 = vmatpush1.bf16.msra.mxu0 %v15450_v14  ;;  %10733 = vmatprep.subr.bf16.mxu1 %v15455_v15  ;;  %v15541_v14 = vld [vmem:[%s16754_s25 + $0xe64] ss:$8 sps:$4 sm:$0xff]  }
 0x3a4   : > { %11717 = vmatprep.subr.bf16.mxu0 %v15458_v27  ;;  %v15544_v15 = vld [vmem:[%s16754_s25 + $0x2664] ss:$8 sps:$4 sm:$0xff]   ;;  %v15539_v27 = vld [vmem:[%s16754_s25 + $0xe60] ss:$8 sps:$4 sm:$0xff]  }
 0x3a6   : > { %10734 = vmatpush1.bf16.msra.mxu1 %v15453_v19  ;;  %v15542_v19 = vld [vmem:[%s16754_s25 + $0x2660] ss:$8 sps:$4 sm:$0xff]  }
 0x3a7   : > { %11718 = vmatpush1.bf16.msra.mxu0 %v15456_v20  ;;  %10735 = vmatprep.subr.bf16.mxu1 %v15461_v21  ;;  %v15547_v20 = vld [vmem:[%s16754_s25 + $0xe74] ss:$8 sps:$4 sm:$0xff]  }
 0x3a8   : > { %11719 = vmatprep.subr.bf16.mxu0 %v15464_v22  ;;  %v15550_v21 = vld [vmem:[%s16754_s25 + $0x2674] ss:$8 sps:$4 sm:$0xff]   ;;  %v15545_v22 = vld [vmem:[%s16754_s25 + $0xe70] ss:$8 sps:$4 sm:$0xff]  }
 0x3aa   : > { %10736 = vmatpush1.bf16.msra.mxu1 %v15459_v25  ;;  %v15548_v25 = vld [vmem:[%s16754_s25 + $0x2670] ss:$8 sps:$4 sm:$0xff]  }
 0x3ab   : > { %11720 = vmatpush1.bf16.msra.mxu0 %v15462_v7  ;;  %10737 = vmatprep.subr.bf16.mxu1 %v15467_v8  ;;  %v15553_v7 = vld [vmem:[%s16754_s25 + $0xe84] ss:$8 sps:$4 sm:$0xff]  }
 0x3ac   : > { %11721 = vmatprep.subr.bf16.mxu0 %v15470_v26  ;;  %v15556_v8 = vld [vmem:[%s16754_s25 + $0x2684] ss:$8 sps:$4 sm:$0xff]   ;;  %v15551_v26 = vld [vmem:[%s16754_s25 + $0xe80] ss:$8 sps:$4 sm:$0xff]  }
 0x3ae   : > { %10738 = vmatpush1.bf16.msra.mxu1 %v15465_v28  ;;  %v15554_v28 = vld [vmem:[%s16754_s25 + $0x2680] ss:$8 sps:$4 sm:$0xff]  }
 0x3af   : > { %11722 = vmatpush1.bf16.msra.mxu0 %v15468_v31  ;;  %10739 = vmatprep.subr.bf16.mxu1 %v15473_v32  ;;  %v15559_v31 = vld [vmem:[%s16754_s25 + $0xe94] ss:$8 sps:$4 sm:$0xff]  }
 0x3b0   : > { %11723 = vmatprep.subr.bf16.mxu0 %v15476_v33  ;;  %v15562_v32 = vld [vmem:[%s16754_s25 + $0x2694] ss:$8 sps:$4 sm:$0xff]   ;;  %v15557_v33 = vld [vmem:[%s16754_s25 + $0xe90] ss:$8 sps:$4 sm:$0xff]  }
 0x3b2   : > { %10740 = vmatpush1.bf16.msra.mxu1 %v15471_v35  ;;  %v15560_v35 = vld [vmem:[%s16754_s25 + $0x2690] ss:$8 sps:$4 sm:$0xff]  }
 0x3b3   : > { %11724 = vmatpush1.bf16.msra.mxu0 %v15474_v18  ;;  %10741 = vmatprep.subr.bf16.mxu1 %v15479_v36  ;;  %v15565_v18 = vld [vmem:[%s16754_s25 + $0xea4] ss:$8 sps:$4 sm:$0xff]  }
 0x3b4   : > { %11725 = vmatprep.subr.bf16.mxu0 %v15482_v38  ;;  %v15568_v36 = vld [vmem:[%s16754_s25 + $0x26a4] ss:$8 sps:$4 sm:$0xff]   ;;  %v15563_v38 = vld [vmem:[%s16754_s25 + $0xea0] ss:$8 sps:$4 sm:$0xff]  }
 0x3b6   : > { %10742 = vmatpush1.bf16.msra.mxu1 %v15477_v39  ;;  %v15566_v39 = vld [vmem:[%s16754_s25 + $0x26a0] ss:$8 sps:$4 sm:$0xff]  }
 0x3b7   : > { %11726 = vmatpush1.bf16.msra.mxu0 %v15480_v40  ;;  %10743 = vmatprep.subr.bf16.mxu1 %v15485_v45  ;;  %v15571_v40 = vld [vmem:[%s16754_s25 + $0xeb4] ss:$8 sps:$4 sm:$0xff]  }
 0x3b8   : > { %11727 = vmatprep.subr.bf16.mxu0 %v15488_v23  ;;  %v15574_v45 = vld [vmem:[%s16754_s25 + $0x26b4] ss:$8 sps:$4 sm:$0xff]   ;;  %v15569_v23 = vld [vmem:[%s16754_s25 + $0xeb0] ss:$8 sps:$4 sm:$0xff]  }
 0x3ba   : > { %10744 = vmatpush1.bf16.msra.mxu1 %v15483_v24  ;;  %v15572_v24 = vld [vmem:[%s16754_s25 + $0x26b0] ss:$8 sps:$4 sm:$0xff]  }
 0x3bb   : > { %11728 = vmatpush1.bf16.msra.mxu0 %v15486_v29  ;;  %10745 = vmatprep.subr.bf16.mxu1 %v15491_v34  ;;  %v15577_v29 = vld [vmem:[%s16754_s25 + $0xec4] ss:$8 sps:$4 sm:$0xff]  }
 0x3bc   : > { %11729 = vmatprep.subr.bf16.mxu0 %v15494_v46  ;;  %v15580_v34 = vld [vmem:[%s16754_s25 + $0x26c4] ss:$8 sps:$4 sm:$0xff]   ;;  %v15575_v46 = vld [vmem:[%s16754_s25 + $0xec0] ss:$8 sps:$4 sm:$0xff]  }
 0x3be   : > { %10746 = vmatpush1.bf16.msra.mxu1 %v15489_v47  ;;  %v15578_v47 = vld [vmem:[%s16754_s25 + $0x26c0] ss:$8 sps:$4 sm:$0xff]  }
 0x3bf   : > { %11730 = vmatpush1.bf16.msra.mxu0 %v15492_v48  ;;  %10747 = vmatprep.subr.bf16.mxu1 %v15497_v49  ;;  %v15583_v48 = vld [vmem:[%s16754_s25 + $0xed4] ss:$8 sps:$4 sm:$0xff]  }
 0x3c0   : > { %11731 = vmatprep.subr.bf16.mxu0 %v15500_v52  ;;  %v15586_v49 = vld [vmem:[%s16754_s25 + $0x26d4] ss:$8 sps:$4 sm:$0xff]   ;;  %v15581_v52 = vld [vmem:[%s16754_s25 + $0xed0] ss:$8 sps:$4 sm:$0xff]  }
 0x3c2   : > { %10748 = vmatpush1.bf16.msra.mxu1 %v15495_v30  ;;  %v15584_v30 = vld [vmem:[%s16754_s25 + $0x26d0] ss:$8 sps:$4 sm:$0xff]  }
 0x3c3   : > { %11732 = vmatpush1.bf16.msra.mxu0 %v15498_v53  ;;  %10758 = vmatprep.subr.bf16.mxu1 %v15504_v54  ;;  %v15589_v53 = vld [vmem:[%s16754_s25 + $0xee4] ss:$8 sps:$4 sm:$0xff]  }
 0x3c4   : > { %11742 = vmatprep.subr.bf16.mxu0 %v15508_v55  ;;  %v15592_v54 = vld [vmem:[%s16754_s25 + $0x26e4] ss:$8 sps:$4 sm:$0xff]   ;;  %v15587_v55 = vld [vmem:[%s16754_s25 + $0xee0] ss:$8 sps:$4 sm:$0xff]  }
 0x3c5   : > { %10750 = vmatmul.mubr.bf16.vlgmr.msra.gmra.mrb[0].mxu1 %v17829_v51  ;;  %v15515_v51 = vld [vmem:[%s16754_s25 + $0xe20] ss:$8 sps:$4 sm:$0xff]  }
 0x3c6   : > { %11734 = vmatmul.mubr.bf16.vlgmr.msra.gmra.mrb[0].mxu0 %v17832_v17  ;;  %10759 = vmatpush1.bf16.msra.mxu1 %v15502_v42  ;;  %v15518_v17 = vld [vmem:[%s16754_s25 + $0x2620] ss:$8 sps:$4 sm:$0xff]  }
 0x3c7   : > { %11743 = vmatpush1.bf16.msra.mxu0 %v15506_v41  ;;  %10760 = vmatprep.subr.bf16.mxu1 %v15511_v44  ;;  %v15590_v42 = vld [vmem:[%s16754_s25 + $0x26e0] ss:$8 sps:$4 sm:$0xff]   ;;  %v15595_v41 = vld [vmem:[%s16754_s25 + $0xef4] ss:$8 sps:$4 sm:$0xff]  }
 0x3c8   : > { %11744 = vmatprep.subr.bf16.mxu0 %v15514_v43  ;;  %10790 = vmatprep.mubr.bf16.mxu1 %v1964_v60  ;;  %v15598_v44 = vld [vmem:[%s16754_s25 + $0x26f4] ss:$8 sps:$4 sm:$0xff]   ;;  %v1949_v43 = vcombine.high %v17901_v2, %v17901_v2  ;;  %v2153_v60 = vcombine.high %v17904_v16, %v17904_v16  ;;  %v15599_v2 = vld [vmem:[%s16754_s25 + $0xf00] ss:$8 sps:$4 sm:$0xff]  }
 0x3c9   : > { %11774 = vmatprep.mubr.bf16.mxu0 %v2168_v61  ;;  %v15593_v61 = vld [vmem:[%s16754_s25 + $0xef0] ss:$8 sps:$4 sm:$0xff]   ;;  %v15602_v16 = vld [vmem:[%s16754_s25 + $0x2700] ss:$8 sps:$4 sm:$0xff]  }
 0x3ca   : > { %10761 = vmatpush1.bf16.msra.mxu1 %v15509_v62  ;;  %v15596_v62 = vld [vmem:[%s16754_s25 + $0x26f0] ss:$8 sps:$4 sm:$0xff]  }
 0x3cb   : > { %11745 = vmatpush1.bf16.msra.mxu0 %v15512_v63  ;;  %10762 = vmatprep.subr.bf16.mxu1 %v15517_v0  ;;  %v15601_v63 = vld [vmem:[%s16754_s25 + $0xf04] ss:$8 sps:$4 sm:$0xff]  }
 0x3cc   : > { %11746 = vmatprep.subr.bf16.mxu0 %v15520_v1  ;;  %v15604_v0 = vld [vmem:[%s16754_s25 + $0x2704] ss:$8 sps:$4 sm:$0xff]   ;;  %v17993_v1 = vrot.slane %v1949_v43, %v16818_v50  ;;  %v15680_v43 = vld [vmem:[%s16754_s25 + $0x27d0] ss:$8 sps:$4 sm:$0xff]  }
 0x3ce   : > { %10763 = vmatpush1.bf16.msra.mxu1 %v15515_v51  ;;  %v17996_v51 = vrot.slane %v2153_v60, %v16818_v50  ;;  %v15685_v60 = vld [vmem:[%s16754_s25 + $0xfe4] ss:$8 sps:$4 sm:$0xff]  }
 0x3cf   : > { %11747 = vmatpush1.bf16.msra.mxu0 %v15518_v17  ;;  %10764 = vmatprep.subr.bf16.mxu1 %v15523_v37  ;;  %v15607_v17 = vld [vmem:[%s16754_s25 + $0xf14] ss:$8 sps:$4 sm:$0xff]  }
 0x3d0   : > { %11748 = vmatprep.subr.bf16.mxu0 %v15526_v3  ;;  %v15610_v37 = vld [vmem:[%s16754_s25 + $0x2714] ss:$8 sps:$4 sm:$0xff]   ;;  %v1965_v3 = vcombine.high %v17993_v1, %v17993_v1 }
 0x3d2   : > { %10765 = vmatpush1.bf16.msra.mxu1 %v15521_v4  ;;  %v2169_v4 = vcombine.high %v17996_v51, %v17996_v51 }
 0x3d3   : > { %11749 = vmatpush1.bf16.msra.mxu0 %v15524_v5  ;;  %10766 = vmatprep.subr.bf16.mxu1 %v15529_v6  ;;  %v15605_v5 = vld [vmem:[%s16754_s25 + $0xf10] ss:$8 sps:$4 sm:$0xff]  }
 0x3d4   : > { %11750 = vmatprep.subr.bf16.mxu0 %v15532_v9  ;;  %v15608_v6 = vld [vmem:[%s16754_s25 + $0x2710] ss:$8 sps:$4 sm:$0xff]   ;;  %v15613_v9 = vld [vmem:[%s16754_s25 + $0xf24] ss:$8 sps:$4 sm:$0xff]  }
 0x3d6   : > { %10767 = vmatpush1.bf16.msra.mxu1 %v15527_v57  ;;  %v15616_v57 = vld [vmem:[%s16754_s25 + $0x2724] ss:$8 sps:$4 sm:$0xff]  }
 0x3d7   : > { %11751 = vmatpush1.bf16.msra.mxu0 %v15530_v58  ;;  %10768 = vmatprep.subr.bf16.mxu1 %v15535_v10  ;;  %v15619_v58 = vld [vmem:[%s16754_s25 + $0xf34] ss:$8 sps:$4 sm:$0xff]  }
 0x3d8   : > { %11752 = vmatprep.subr.bf16.mxu0 %v15538_v11  ;;  %v15622_v10 = vld [vmem:[%s16754_s25 + $0x2734] ss:$8 sps:$4 sm:$0xff]   ;;  %v15617_v11 = vld [vmem:[%s16754_s25 + $0xf30] ss:$8 sps:$4 sm:$0xff]  }
 0x3da   : > { %10769 = vmatpush1.bf16.msra.mxu1 %v15533_v12  ;;  %v15620_v12 = vld [vmem:[%s16754_s25 + $0x2730] ss:$8 sps:$4 sm:$0xff]  }
 0x3db   : > { %11753 = vmatpush1.bf16.msra.mxu0 %v15536_v13  ;;  %10770 = vmatprep.subr.bf16.mxu1 %v15541_v14  ;;  %v15625_v13 = vld [vmem:[%s16754_s25 + $0xf44] ss:$8 sps:$4 sm:$0xff]  }
 0x3dc   : > { %11754 = vmatprep.subr.bf16.mxu0 %v15544_v15  ;;  %v15628_v14 = vld [vmem:[%s16754_s25 + $0x2744] ss:$8 sps:$4 sm:$0xff]   ;;  %v15623_v15 = vld [vmem:[%s16754_s25 + $0xf40] ss:$8 sps:$4 sm:$0xff]  }
 0x3de   : > { %10771 = vmatpush1.bf16.msra.mxu1 %v15539_v27  ;;  %v15626_v27 = vld [vmem:[%s16754_s25 + $0x2740] ss:$8 sps:$4 sm:$0xff]  }
 0x3df   : > { %11755 = vmatpush1.bf16.msra.mxu0 %v15542_v19  ;;  %10772 = vmatprep.subr.bf16.mxu1 %v15547_v20  ;;  %v15631_v19 = vld [vmem:[%s16754_s25 + $0xf54] ss:$8 sps:$4 sm:$0xff]  }
 0x3e0   : > { %11756 = vmatprep.subr.bf16.mxu0 %v15550_v21  ;;  %v15634_v20 = vld [vmem:[%s16754_s25 + $0x2754] ss:$8 sps:$4 sm:$0xff]   ;;  %v15629_v21 = vld [vmem:[%s16754_s25 + $0xf50] ss:$8 sps:$4 sm:$0xff]  }
 0x3e2   : > { %10773 = vmatpush1.bf16.msra.mxu1 %v15545_v22  ;;  %v15632_v22 = vld [vmem:[%s16754_s25 + $0x2750] ss:$8 sps:$4 sm:$0xff]  }
 0x3e3   : > { %11757 = vmatpush1.bf16.msra.mxu0 %v15548_v25  ;;  %10774 = vmatprep.subr.bf16.mxu1 %v15553_v7  ;;  %v15637_v25 = vld [vmem:[%s16754_s25 + $0xf64] ss:$8 sps:$4 sm:$0xff]  }
 0x3e4   : > { %11758 = vmatprep.subr.bf16.mxu0 %v15556_v8  ;;  %v15640_v7 = vld [vmem:[%s16754_s25 + $0x2764] ss:$8 sps:$4 sm:$0xff]   ;;  %v15635_v8 = vld [vmem:[%s16754_s25 + $0xf60] ss:$8 sps:$4 sm:$0xff]  }
 0x3e6   : > { %10775 = vmatpush1.bf16.msra.mxu1 %v15551_v26  ;;  %v15638_v26 = vld [vmem:[%s16754_s25 + $0x2760] ss:$8 sps:$4 sm:$0xff]  }
 0x3e7   : > { %11759 = vmatpush1.bf16.msra.mxu0 %v15554_v28  ;;  %10776 = vmatprep.subr.bf16.mxu1 %v15559_v31  ;;  %v15643_v28 = vld [vmem:[%s16754_s25 + $0xf74] ss:$8 sps:$4 sm:$0xff]  }
 0x3e8   : > { %11760 = vmatprep.subr.bf16.mxu0 %v15562_v32  ;;  %v15646_v31 = vld [vmem:[%s16754_s25 + $0x2774] ss:$8 sps:$4 sm:$0xff]   ;;  %v15641_v32 = vld [vmem:[%s16754_s25 + $0xf70] ss:$8 sps:$4 sm:$0xff]  }
 0x3ea   : > { %10777 = vmatpush1.bf16.msra.mxu1 %v15557_v33  ;;  %v15644_v33 = vld [vmem:[%s16754_s25 + $0x2770] ss:$8 sps:$4 sm:$0xff]  }
 0x3eb   : > { %11761 = vmatpush1.bf16.msra.mxu0 %v15560_v35  ;;  %10778 = vmatprep.subr.bf16.mxu1 %v15565_v18  ;;  %v15649_v35 = vld [vmem:[%s16754_s25 + $0xf84] ss:$8 sps:$4 sm:$0xff]  }
 0x3ec   : > { %11762 = vmatprep.subr.bf16.mxu0 %v15568_v36  ;;  %v15652_v18 = vld [vmem:[%s16754_s25 + $0x2784] ss:$8 sps:$4 sm:$0xff]   ;;  %v15647_v36 = vld [vmem:[%s16754_s25 + $0xf80] ss:$8 sps:$4 sm:$0xff]  }
 0x3ee   : > { %10779 = vmatpush1.bf16.msra.mxu1 %v15563_v38  ;;  %v15650_v38 = vld [vmem:[%s16754_s25 + $0x2780] ss:$8 sps:$4 sm:$0xff]  }
 0x3ef   : > { %11763 = vmatpush1.bf16.msra.mxu0 %v15566_v39  ;;  %10780 = vmatprep.subr.bf16.mxu1 %v15571_v40  ;;  %v15655_v39 = vld [vmem:[%s16754_s25 + $0xf94] ss:$8 sps:$4 sm:$0xff]  }
 0x3f0   : > { %11764 = vmatprep.subr.bf16.mxu0 %v15574_v45  ;;  %v15658_v40 = vld [vmem:[%s16754_s25 + $0x2794] ss:$8 sps:$4 sm:$0xff]   ;;  %v15653_v45 = vld [vmem:[%s16754_s25 + $0xf90] ss:$8 sps:$4 sm:$0xff]  }
 0x3f2   : > { %10781 = vmatpush1.bf16.msra.mxu1 %v15569_v23  ;;  %v15656_v23 = vld [vmem:[%s16754_s25 + $0x2790] ss:$8 sps:$4 sm:$0xff]  }
 0x3f3   : > { %11765 = vmatpush1.bf16.msra.mxu0 %v15572_v24  ;;  %10782 = vmatprep.subr.bf16.mxu1 %v15577_v29  ;;  %v15661_v24 = vld [vmem:[%s16754_s25 + $0xfa4] ss:$8 sps:$4 sm:$0xff]  }
 0x3f4   : > { %11766 = vmatprep.subr.bf16.mxu0 %v15580_v34  ;;  %v15664_v29 = vld [vmem:[%s16754_s25 + $0x27a4] ss:$8 sps:$4 sm:$0xff]   ;;  %v15659_v34 = vld [vmem:[%s16754_s25 + $0xfa0] ss:$8 sps:$4 sm:$0xff]  }
 0x3f6   : > { %10783 = vmatpush1.bf16.msra.mxu1 %v15575_v46  ;;  %v15662_v46 = vld [vmem:[%s16754_s25 + $0x27a0] ss:$8 sps:$4 sm:$0xff]  }
 0x3f7   : > { %11767 = vmatpush1.bf16.msra.mxu0 %v15578_v47  ;;  %10784 = vmatprep.subr.bf16.mxu1 %v15583_v48  ;;  %v15667_v47 = vld [vmem:[%s16754_s25 + $0xfb4] ss:$8 sps:$4 sm:$0xff]  }
 0x3f8   : > { %11768 = vmatprep.subr.bf16.mxu0 %v15586_v49  ;;  %v15670_v48 = vld [vmem:[%s16754_s25 + $0x27b4] ss:$8 sps:$4 sm:$0xff]   ;;  %v15665_v49 = vld [vmem:[%s16754_s25 + $0xfb0] ss:$8 sps:$4 sm:$0xff]  }
 0x3fa   : > { %10785 = vmatpush1.bf16.msra.mxu1 %v15581_v52  ;;  %v15668_v52 = vld [vmem:[%s16754_s25 + $0x27b0] ss:$8 sps:$4 sm:$0xff]  }
 0x3fb   : > { %11769 = vmatpush1.bf16.msra.mxu0 %v15584_v30  ;;  %10786 = vmatprep.subr.bf16.mxu1 %v15589_v53  ;;  %v15673_v30 = vld [vmem:[%s16754_s25 + $0xfc4] ss:$8 sps:$4 sm:$0xff]  }
 0x3fc   : > { %11770 = vmatprep.subr.bf16.mxu0 %v15592_v54  ;;  %v15676_v53 = vld [vmem:[%s16754_s25 + $0x27c4] ss:$8 sps:$4 sm:$0xff]   ;;  %v15671_v54 = vld [vmem:[%s16754_s25 + $0xfc0] ss:$8 sps:$4 sm:$0xff]  }
 0x3fe   : > { %10787 = vmatpush1.bf16.msra.mxu1 %v15587_v55  ;;  %v15674_v55 = vld [vmem:[%s16754_s25 + $0x27c0] ss:$8 sps:$4 sm:$0xff]  }
 0x3ff   : > { %11771 = vmatpush1.bf16.msra.mxu0 %v15590_v42  ;;  %10788 = vmatprep.subr.bf16.mxu1 %v15595_v41  ;;  %v15679_v42 = vld [vmem:[%s16754_s25 + $0xfd4] ss:$8 sps:$4 sm:$0xff]  }
 0x400   : > { %11772 = vmatprep.subr.bf16.mxu0 %v15598_v44  ;;  %v15682_v41 = vld [vmem:[%s16754_s25 + $0x27d4] ss:$8 sps:$4 sm:$0xff]   ;;  %v15677_v44 = vld [vmem:[%s16754_s25 + $0xfd0] ss:$8 sps:$4 sm:$0xff]  }
 0x402   : > { %10789 = vmatpush1.bf16.msra.mxu1 %v15593_v61  ;;  %v15688_v61 = vld [vmem:[%s16754_s25 + $0x27e4] ss:$8 sps:$4 sm:$0xff]  }
 0x403   : > { %11773 = vmatpush1.bf16.msra.mxu0 %v15596_v62  ;;  %10799 = vmatprep.subr.bf16.mxu1 %v15601_v63  ;;  %v15683_v62 = vld [vmem:[%s16754_s25 + $0xfe0] ss:$8 sps:$4 sm:$0xff]  }
 0x404   : > { %11783 = vmatprep.subr.bf16.mxu0 %v15604_v0  ;;  %v15686_v63 = vld [vmem:[%s16754_s25 + $0x27e0] ss:$8 sps:$4 sm:$0xff]   ;;  %v15691_v0 = vld [vmem:[%s16754_s25 + $0xff4] ss:$8 sps:$4 sm:$0xff]  }
 0x405   : > { %10791 = vmatmul.mubr.bf16.vlgmr.msra.gmra.mrb[0].mxu1 %v17912_v56  ;;  %v15611_v56 = vld [vmem:[%s16754_s25 + $0xf20] ss:$8 sps:$4 sm:$0xff]  }
 0x406   : > { %11775 = vmatmul.mubr.bf16.vlgmr.msra.gmra.mrb[0].mxu0 %v17916_v59  ;;  %10800 = vmatpush1.bf16.msra.mxu1 %v15599_v2  ;;  %v15614_v59 = vld [vmem:[%s16754_s25 + $0x2720] ss:$8 sps:$4 sm:$0xff]   ;;  %v15694_v2 = vld [vmem:[%s16754_s25 + $0x27f4] ss:$8 sps:$4 sm:$0xff]  }
 0x407   : > { %11784 = vmatpush1.bf16.msra.mxu0 %v15602_v16  ;;  %10801 = vmatprep.subr.bf16.mxu1 %v15607_v17  ;;  %v18065_v16 = vld [vmem:[%s16770_s23 + $0x40] sm:$0xff] }
 0x408   : > { %11785 = vmatprep.subr.bf16.mxu0 %v15610_v37  ;;  %10831 = vmatprep.mubr.bf16.mxu1 %v1965_v3  ;;  %v18068_v17 = vld [vmem:[%s16770_s23 + $0xa0] sm:$0xff]  ;;  %v15689_v37 = vld [vmem:[%s16754_s25 + $0xff0] ss:$8 sps:$4 sm:$0xff]  }
 0x409   : > { %11815 = vmatprep.mubr.bf16.mxu0 %v2169_v4  ;;  %v15692_v3 = vld [vmem:[%s16754_s25 + $0x27f0] ss:$8 sps:$4 sm:$0xff]   ;;  %v15698_v4 = vld [vmem:[%s16754_s25 + $0x1004] ss:$8 sps:$4 sm:$0xff]  }
 0x40a   : > { %10802 = vmatpush1.bf16.msra.mxu1 %v15605_v5  ;;  %v15702_v5 = vld [vmem:[%s16754_s25 + $0x2804] ss:$8 sps:$4 sm:$0xff]  }
 0x40b   : > { %11786 = vmatpush1.bf16.msra.mxu0 %v15608_v6  ;;  %10803 = vmatprep.subr.bf16.mxu1 %v15613_v9  ;;  %v18076_v6 = vrot.slane %v18065_v16, %v16818_v50  ;;  %v18080_v9 = vrot.slane %v18068_v17, %v16818_v50 }
 0x40c   : > { %11787 = vmatprep.subr.bf16.mxu0 %v15616_v57  ;;  %v15696_v57 = vld [vmem:[%s16754_s25 + $0x1000] ss:$8 sps:$4 sm:$0xff]  }
 0x40e   : > { %10804 = vmatpush1.bf16.msra.mxu1 %v15611_v56  ;;  %v15700_v56 = vld [vmem:[%s16754_s25 + $0x2800] ss:$8 sps:$4 sm:$0xff]  }
 0x40f   : > { %11788 = vmatpush1.bf16.msra.mxu0 %v15614_v59  ;;  %10805 = vmatprep.subr.bf16.mxu1 %v15619_v58  ;;  %v15705_v59 = vld [vmem:[%s16754_s25 + $0x1014] ss:$8 sps:$4 sm:$0xff]  }
 0x410   : > { %11789 = vmatprep.subr.bf16.mxu0 %v15622_v10  ;;  %v15708_v58 = vld [vmem:[%s16754_s25 + $0x2814] ss:$8 sps:$4 sm:$0xff]   ;;  %v1981_v10 = vcombine.high %v18076_v6, %v18076_v6 }
 0x412   : > { %10806 = vmatpush1.bf16.msra.mxu1 %v15617_v11  ;;  %v2185_v11 = vcombine.high %v18080_v9, %v18080_v9 }
 0x413   : > { %11790 = vmatpush1.bf16.msra.mxu0 %v15620_v12  ;;  %10807 = vmatprep.subr.bf16.mxu1 %v15625_v13  ;;  %v15703_v12 = vld [vmem:[%s16754_s25 + $0x1010] ss:$8 sps:$4 sm:$0xff]  }
 0x414   : > { %11791 = vmatprep.subr.bf16.mxu0 %v15628_v14  ;;  %v15706_v13 = vld [vmem:[%s16754_s25 + $0x2810] ss:$8 sps:$4 sm:$0xff]   ;;  %v15711_v14 = vld [vmem:[%s16754_s25 + $0x1024] ss:$8 sps:$4 sm:$0xff]  }
 0x416   : > { %10808 = vmatpush1.bf16.msra.mxu1 %v15623_v15  ;;  %v15714_v15 = vld [vmem:[%s16754_s25 + $0x2824] ss:$8 sps:$4 sm:$0xff]  }
 0x417   : > { %11792 = vmatpush1.bf16.msra.mxu0 %v15626_v27  ;;  %10809 = vmatprep.subr.bf16.mxu1 %v15631_v19  ;;  %v15717_v27 = vld [vmem:[%s16754_s25 + $0x1034] ss:$8 sps:$4 sm:$0xff]  }
 0x418   : > { %11793 = vmatprep.subr.bf16.mxu0 %v15634_v20  ;;  %v15720_v19 = vld [vmem:[%s16754_s25 + $0x2834] ss:$8 sps:$4 sm:$0xff]   ;;  %v15715_v20 = vld [vmem:[%s16754_s25 + $0x1030] ss:$8 sps:$4 sm:$0xff]  }
 0x41a   : > { %10810 = vmatpush1.bf16.msra.mxu1 %v15629_v21  ;;  %v15718_v21 = vld [vmem:[%s16754_s25 + $0x2830] ss:$8 sps:$4 sm:$0xff]  }
 0x41b   : > { %11794 = vmatpush1.bf16.msra.mxu0 %v15632_v22  ;;  %10811 = vmatprep.subr.bf16.mxu1 %v15637_v25  ;;  %v15723_v22 = vld [vmem:[%s16754_s25 + $0x1044] ss:$8 sps:$4 sm:$0xff]  }
 0x41c   : > { %11795 = vmatprep.subr.bf16.mxu0 %v15640_v7  ;;  %v15726_v25 = vld [vmem:[%s16754_s25 + $0x2844] ss:$8 sps:$4 sm:$0xff]   ;;  %v15721_v7 = vld [vmem:[%s16754_s25 + $0x1040] ss:$8 sps:$4 sm:$0xff]  }
 0x41e   : > { %10812 = vmatpush1.bf16.msra.mxu1 %v15635_v8  ;;  %v15724_v8 = vld [vmem:[%s16754_s25 + $0x2840] ss:$8 sps:$4 sm:$0xff]  }
 0x41f   : > { %11796 = vmatpush1.bf16.msra.mxu0 %v15638_v26  ;;  %10813 = vmatprep.subr.bf16.mxu1 %v15643_v28  ;;  %v15729_v26 = vld [vmem:[%s16754_s25 + $0x1054] ss:$8 sps:$4 sm:$0xff]  }
 0x420   : > { %11797 = vmatprep.subr.bf16.mxu0 %v15646_v31  ;;  %v15732_v28 = vld [vmem:[%s16754_s25 + $0x2854] ss:$8 sps:$4 sm:$0xff]   ;;  %v15727_v31 = vld [vmem:[%s16754_s25 + $0x1050] ss:$8 sps:$4 sm:$0xff]  }
 0x422   : > { %10814 = vmatpush1.bf16.msra.mxu1 %v15641_v32  ;;  %v15730_v32 = vld [vmem:[%s16754_s25 + $0x2850] ss:$8 sps:$4 sm:$0xff]  }
 0x423   : > { %11798 = vmatpush1.bf16.msra.mxu0 %v15644_v33  ;;  %10815 = vmatprep.subr.bf16.mxu1 %v15649_v35  ;;  %v15735_v33 = vld [vmem:[%s16754_s25 + $0x1064] ss:$8 sps:$4 sm:$0xff]  }
 0x424   : > { %11799 = vmatprep.subr.bf16.mxu0 %v15652_v18  ;;  %v15738_v35 = vld [vmem:[%s16754_s25 + $0x2864] ss:$8 sps:$4 sm:$0xff]   ;;  %v15733_v18 = vld [vmem:[%s16754_s25 + $0x1060] ss:$8 sps:$4 sm:$0xff]  }
 0x426   : > { %10816 = vmatpush1.bf16.msra.mxu1 %v15647_v36  ;;  %v15736_v36 = vld [vmem:[%s16754_s25 + $0x2860] ss:$8 sps:$4 sm:$0xff]  }
 0x427   : > { %11800 = vmatpush1.bf16.msra.mxu0 %v15650_v38  ;;  %10817 = vmatprep.subr.bf16.mxu1 %v15655_v39  ;;  %v15741_v38 = vld [vmem:[%s16754_s25 + $0x1074] ss:$8 sps:$4 sm:$0xff]  }
 0x428   : > { %11801 = vmatprep.subr.bf16.mxu0 %v15658_v40  ;;  %v15744_v39 = vld [vmem:[%s16754_s25 + $0x2874] ss:$8 sps:$4 sm:$0xff]   ;;  %v15739_v40 = vld [vmem:[%s16754_s25 + $0x1070] ss:$8 sps:$4 sm:$0xff]  }
 0x42a   : > { %10818 = vmatpush1.bf16.msra.mxu1 %v15653_v45  ;;  %v15742_v45 = vld [vmem:[%s16754_s25 + $0x2870] ss:$8 sps:$4 sm:$0xff]  }
 0x42b   : > { %11802 = vmatpush1.bf16.msra.mxu0 %v15656_v23  ;;  %10819 = vmatprep.subr.bf16.mxu1 %v15661_v24  ;;  %v15747_v23 = vld [vmem:[%s16754_s25 + $0x1084] ss:$8 sps:$4 sm:$0xff]  }
 0x42c   : > { %11803 = vmatprep.subr.bf16.mxu0 %v15664_v29  ;;  %v15750_v24 = vld [vmem:[%s16754_s25 + $0x2884] ss:$8 sps:$4 sm:$0xff]   ;;  %v15745_v29 = vld [vmem:[%s16754_s25 + $0x1080] ss:$8 sps:$4 sm:$0xff]  }
 0x42e   : > { %10820 = vmatpush1.bf16.msra.mxu1 %v15659_v34  ;;  %v15748_v34 = vld [vmem:[%s16754_s25 + $0x2880] ss:$8 sps:$4 sm:$0xff]  }
 0x42f   : > { %11804 = vmatpush1.bf16.msra.mxu0 %v15662_v46  ;;  %10821 = vmatprep.subr.bf16.mxu1 %v15667_v47  ;;  %v15753_v46 = vld [vmem:[%s16754_s25 + $0x1094] ss:$8 sps:$4 sm:$0xff]  }
 0x430   : > { %11805 = vmatprep.subr.bf16.mxu0 %v15670_v48  ;;  %v15756_v47 = vld [vmem:[%s16754_s25 + $0x2894] ss:$8 sps:$4 sm:$0xff]   ;;  %v15751_v48 = vld [vmem:[%s16754_s25 + $0x1090] ss:$8 sps:$4 sm:$0xff]  }
 0x432   : > { %10822 = vmatpush1.bf16.msra.mxu1 %v15665_v49  ;;  %v15754_v49 = vld [vmem:[%s16754_s25 + $0x2890] ss:$8 sps:$4 sm:$0xff]  }
 0x433   : > { %11806 = vmatpush1.bf16.msra.mxu0 %v15668_v52  ;;  %10823 = vmatprep.subr.bf16.mxu1 %v15673_v30  ;;  %v15759_v52 = vld [vmem:[%s16754_s25 + $0x10a4] ss:$8 sps:$4 sm:$0xff]  }
 0x434   : > { %11807 = vmatprep.subr.bf16.mxu0 %v15676_v53  ;;  %v15762_v30 = vld [vmem:[%s16754_s25 + $0x28a4] ss:$8 sps:$4 sm:$0xff]   ;;  %v15757_v53 = vld [vmem:[%s16754_s25 + $0x10a0] ss:$8 sps:$4 sm:$0xff]  }
 0x436   : > { %10824 = vmatpush1.bf16.msra.mxu1 %v15671_v54  ;;  %v15760_v54 = vld [vmem:[%s16754_s25 + $0x28a0] ss:$8 sps:$4 sm:$0xff]  }
 0x437   : > { %11808 = vmatpush1.bf16.msra.mxu0 %v15674_v55  ;;  %10825 = vmatprep.subr.bf16.mxu1 %v15679_v42  ;;  %v15765_v55 = vld [vmem:[%s16754_s25 + $0x10b4] ss:$8 sps:$4 sm:$0xff]  }
 0x438   : > { %11809 = vmatprep.subr.bf16.mxu0 %v15682_v41  ;;  %v15768_v42 = vld [vmem:[%s16754_s25 + $0x28b4] ss:$8 sps:$4 sm:$0xff]   ;;  %v15763_v41 = vld [vmem:[%s16754_s25 + $0x10b0] ss:$8 sps:$4 sm:$0xff]  }
 0x43a   : > { %10826 = vmatpush1.bf16.msra.mxu1 %v15677_v44  ;;  %v15766_v44 = vld [vmem:[%s16754_s25 + $0x28b0] ss:$8 sps:$4 sm:$0xff]  }
 0x43b   : > { %11810 = vmatpush1.bf16.msra.mxu0 %v15680_v43  ;;  %10827 = vmatprep.subr.bf16.mxu1 %v15685_v60  ;;  %v15771_v43 = vld [vmem:[%s16754_s25 + $0x10c4] ss:$8 sps:$4 sm:$0xff]  }
 0x43c   : > { %11811 = vmatprep.subr.bf16.mxu0 %v15688_v61  ;;  %v15774_v60 = vld [vmem:[%s16754_s25 + $0x28c4] ss:$8 sps:$4 sm:$0xff]   ;;  %v15769_v61 = vld [vmem:[%s16754_s25 + $0x10c0] ss:$8 sps:$4 sm:$0xff]  }
 0x43e   : > { %10828 = vmatpush1.bf16.msra.mxu1 %v15683_v62  ;;  %v15772_v62 = vld [vmem:[%s16754_s25 + $0x28c0] ss:$8 sps:$4 sm:$0xff]  }
 0x43f   : > { %11812 = vmatpush1.bf16.msra.mxu0 %v15686_v63  ;;  %10829 = vmatprep.subr.bf16.mxu1 %v15691_v0  ;;  %v15777_v63 = vld [vmem:[%s16754_s25 + $0x10d4] ss:$8 sps:$4 sm:$0xff]  }
 0x440   : > { %11813 = vmatprep.subr.bf16.mxu0 %v15694_v2  ;;  %v15780_v0 = vld [vmem:[%s16754_s25 + $0x28d4] ss:$8 sps:$4 sm:$0xff]   ;;  %v15775_v2 = vld [vmem:[%s16754_s25 + $0x10d0] ss:$8 sps:$4 sm:$0xff]  }
 0x442   : > { %10830 = vmatpush1.bf16.msra.mxu1 %v15689_v37  ;;  %v15778_v37 = vld [vmem:[%s16754_s25 + $0x28d0] ss:$8 sps:$4 sm:$0xff]  }
 0x443   : > { %11814 = vmatpush1.bf16.msra.mxu0 %v15692_v3  ;;  %10840 = vmatprep.subr.bf16.mxu1 %v15698_v4  ;;  %v15783_v3 = vld [vmem:[%s16754_s25 + $0x10e4] ss:$8 sps:$4 sm:$0xff]  }
 0x444   : > { %11824 = vmatprep.subr.bf16.mxu0 %v15702_v5  ;;  %v15786_v4 = vld [vmem:[%s16754_s25 + $0x28e4] ss:$8 sps:$4 sm:$0xff]   ;;  %v15781_v5 = vld [vmem:[%s16754_s25 + $0x10e0] ss:$8 sps:$4 sm:$0xff]  }
 0x445   : > { %10832 = vmatmul.mubr.bf16.vlgmr.msra.gmra.mrb[0].mxu1 %v17993_v1  ;;  %v15709_v1 = vld [vmem:[%s16754_s25 + $0x1020] ss:$8 sps:$4 sm:$0xff]  }
 0x446   : > { %11816 = vmatmul.mubr.bf16.vlgmr.msra.gmra.mrb[0].mxu0 %v17996_v51  ;;  %10841 = vmatpush1.bf16.msra.mxu1 %v15696_v57  ;;  %v15712_v51 = vld [vmem:[%s16754_s25 + $0x2820] ss:$8 sps:$4 sm:$0xff]  }
 0x447   : > { %11825 = vmatpush1.bf16.msra.mxu0 %v15700_v56  ;;  %10842 = vmatprep.subr.bf16.mxu1 %v15705_v59  ;;  %v15784_v57 = vld [vmem:[%s16754_s25 + $0x28e0] ss:$8 sps:$4 sm:$0xff]   ;;  %v15789_v56 = vld [vmem:[%s16754_s25 + $0x10f4] ss:$8 sps:$4 sm:$0xff]  }
 0x448   : > { %11826 = vmatprep.subr.bf16.mxu0 %v15708_v58  ;;  %10872 = vmatprep.mubr.bf16.mxu1 %v1981_v10  ;;  %v15792_v59 = vld [vmem:[%s16754_s25 + $0x28f4] ss:$8 sps:$4 sm:$0xff]   ;;  %v1966_v58 = vcombine.high %v18065_v16, %v18065_v16  ;;  %v2170_v10 = vcombine.high %v18068_v17, %v18068_v17  ;;  %v15793_v16 = vld [vmem:[%s16754_s25 + $0x1100] ss:$8 sps:$4 sm:$0xff]  }
 0x449   : > { %11856 = vmatprep.mubr.bf16.mxu0 %v2185_v11  ;;  %v15787_v11 = vld [vmem:[%s16754_s25 + $0x10f0] ss:$8 sps:$4 sm:$0xff]   ;;  %v15796_v17 = vld [vmem:[%s16754_s25 + $0x2900] ss:$8 sps:$4 sm:$0xff]  }
 0x44a   : > { %10843 = vmatpush1.bf16.msra.mxu1 %v15703_v12  ;;  %v15790_v12 = vld [vmem:[%s16754_s25 + $0x28f0] ss:$8 sps:$4 sm:$0xff]  }
 0x44b   : > { %11827 = vmatpush1.bf16.msra.mxu0 %v15706_v13  ;;  %10844 = vmatprep.subr.bf16.mxu1 %v15711_v14  ;;  %v15795_v13 = vld [vmem:[%s16754_s25 + $0x1104] ss:$8 sps:$4 sm:$0xff]  }
 0x44c   : > { %11828 = vmatprep.subr.bf16.mxu0 %v15714_v15  ;;  %v15798_v14 = vld [vmem:[%s16754_s25 + $0x2904] ss:$8 sps:$4 sm:$0xff]   ;;  %v18157_v15 = vrot.slane %v1966_v58, %v16818_v50  ;;  %v15874_v58 = vld [vmem:[%s16754_s25 + $0x29d0] ss:$8 sps:$4 sm:$0xff]  }
 0x44e   : > { %10845 = vmatpush1.bf16.msra.mxu1 %v15709_v1  ;;  %v18160_v1 = vrot.slane %v2170_v10, %v16818_v50  ;;  %v15879_v10 = vld [vmem:[%s16754_s25 + $0x11e4] ss:$8 sps:$4 sm:$0xff]  }
 0x44f   : > { %11829 = vmatpush1.bf16.msra.mxu0 %v15712_v51  ;;  %10846 = vmatprep.subr.bf16.mxu1 %v15717_v27  ;;  %v15801_v51 = vld [vmem:[%s16754_s25 + $0x1114] ss:$8 sps:$4 sm:$0xff]  }
 0x450   : > { %11830 = vmatprep.subr.bf16.mxu0 %v15720_v19  ;;  %v15804_v27 = vld [vmem:[%s16754_s25 + $0x2914] ss:$8 sps:$4 sm:$0xff]   ;;  %v1982_v19 = vcombine.high %v18157_v15, %v18157_v15 }
 0x452   : > { %10847 = vmatpush1.bf16.msra.mxu1 %v15715_v20  ;;  %v2186_v20 = vcombine.high %v18160_v1, %v18160_v1 }
 0x453   : > { %11831 = vmatpush1.bf16.msra.mxu0 %v15718_v21  ;;  %10848 = vmatprep.subr.bf16.mxu1 %v15723_v22  ;;  %v15799_v21 = vld [vmem:[%s16754_s25 + $0x1110] ss:$8 sps:$4 sm:$0xff]  }
 0x454   : > { %11832 = vmatprep.subr.bf16.mxu0 %v15726_v25  ;;  %v15802_v22 = vld [vmem:[%s16754_s25 + $0x2910] ss:$8 sps:$4 sm:$0xff]   ;;  %v15807_v25 = vld [vmem:[%s16754_s25 + $0x1124] ss:$8 sps:$4 sm:$0xff]  }
 0x456   : > { %10849 = vmatpush1.bf16.msra.mxu1 %v15721_v7  ;;  %v15810_v7 = vld [vmem:[%s16754_s25 + $0x2924] ss:$8 sps:$4 sm:$0xff]  }
 0x457   : > { %11833 = vmatpush1.bf16.msra.mxu0 %v15724_v8  ;;  %10850 = vmatprep.subr.bf16.mxu1 %v15729_v26  ;;  %v15813_v8 = vld [vmem:[%s16754_s25 + $0x1134] ss:$8 sps:$4 sm:$0xff]  }
 0x458   : > { %11834 = vmatprep.subr.bf16.mxu0 %v15732_v28  ;;  %v15816_v26 = vld [vmem:[%s16754_s25 + $0x2934] ss:$8 sps:$4 sm:$0xff]   ;;  %v15811_v28 = vld [vmem:[%s16754_s25 + $0x1130] ss:$8 sps:$4 sm:$0xff]  }
 0x45a   : > { %10851 = vmatpush1.bf16.msra.mxu1 %v15727_v31  ;;  %v15814_v31 = vld [vmem:[%s16754_s25 + $0x2930] ss:$8 sps:$4 sm:$0xff]  }
 0x45b   : > { %11835 = vmatpush1.bf16.msra.mxu0 %v15730_v32  ;;  %10852 = vmatprep.subr.bf16.mxu1 %v15735_v33  ;;  %v15819_v32 = vld [vmem:[%s16754_s25 + $0x1144] ss:$8 sps:$4 sm:$0xff]  }
 0x45c   : > { %11836 = vmatprep.subr.bf16.mxu0 %v15738_v35  ;;  %v15822_v33 = vld [vmem:[%s16754_s25 + $0x2944] ss:$8 sps:$4 sm:$0xff]   ;;  %v15817_v35 = vld [vmem:[%s16754_s25 + $0x1140] ss:$8 sps:$4 sm:$0xff]  }
 0x45e   : > { %10853 = vmatpush1.bf16.msra.mxu1 %v15733_v18  ;;  %v15820_v18 = vld [vmem:[%s16754_s25 + $0x2940] ss:$8 sps:$4 sm:$0xff]  }
 0x45f   : > { %11837 = vmatpush1.bf16.msra.mxu0 %v15736_v36  ;;  %10854 = vmatprep.subr.bf16.mxu1 %v15741_v38  ;;  %v15825_v36 = vld [vmem:[%s16754_s25 + $0x1154] ss:$8 sps:$4 sm:$0xff]  }
 0x460   : > { %11838 = vmatprep.subr.bf16.mxu0 %v15744_v39  ;;  %v15828_v38 = vld [vmem:[%s16754_s25 + $0x2954] ss:$8 sps:$4 sm:$0xff]   ;;  %v15823_v39 = vld [vmem:[%s16754_s25 + $0x1150] ss:$8 sps:$4 sm:$0xff]  }
 0x462   : > { %10855 = vmatpush1.bf16.msra.mxu1 %v15739_v40  ;;  %v15826_v40 = vld [vmem:[%s16754_s25 + $0x2950] ss:$8 sps:$4 sm:$0xff]  }
 0x463   : > { %11839 = vmatpush1.bf16.msra.mxu0 %v15742_v45  ;;  %10856 = vmatprep.subr.bf16.mxu1 %v15747_v23  ;;  %v15831_v45 = vld [vmem:[%s16754_s25 + $0x1164] ss:$8 sps:$4 sm:$0xff]  }
 0x464   : > { %11840 = vmatprep.subr.bf16.mxu0 %v15750_v24  ;;  %v15834_v23 = vld [vmem:[%s16754_s25 + $0x2964] ss:$8 sps:$4 sm:$0xff]   ;;  %v15829_v24 = vld [vmem:[%s16754_s25 + $0x1160] ss:$8 sps:$4 sm:$0xff]  }
 0x466   : > { %10857 = vmatpush1.bf16.msra.mxu1 %v15745_v29  ;;  %v15832_v29 = vld [vmem:[%s16754_s25 + $0x2960] ss:$8 sps:$4 sm:$0xff]  }
 0x467   : > { %11841 = vmatpush1.bf16.msra.mxu0 %v15748_v34  ;;  %10858 = vmatprep.subr.bf16.mxu1 %v15753_v46  ;;  %v15837_v34 = vld [vmem:[%s16754_s25 + $0x1174] ss:$8 sps:$4 sm:$0xff]  }
 0x468   : > { %11842 = vmatprep.subr.bf16.mxu0 %v15756_v47  ;;  %v15840_v46 = vld [vmem:[%s16754_s25 + $0x2974] ss:$8 sps:$4 sm:$0xff]   ;;  %v15835_v47 = vld [vmem:[%s16754_s25 + $0x1170] ss:$8 sps:$4 sm:$0xff]  }
 0x46a   : > { %10859 = vmatpush1.bf16.msra.mxu1 %v15751_v48  ;;  %v15838_v48 = vld [vmem:[%s16754_s25 + $0x2970] ss:$8 sps:$4 sm:$0xff]  }
 0x46b   : > { %11843 = vmatpush1.bf16.msra.mxu0 %v15754_v49  ;;  %10860 = vmatprep.subr.bf16.mxu1 %v15759_v52  ;;  %v15843_v49 = vld [vmem:[%s16754_s25 + $0x1184] ss:$8 sps:$4 sm:$0xff]  }
 0x46c   : > { %11844 = vmatprep.subr.bf16.mxu0 %v15762_v30  ;;  %v15846_v52 = vld [vmem:[%s16754_s25 + $0x2984] ss:$8 sps:$4 sm:$0xff]   ;;  %v15841_v30 = vld [vmem:[%s16754_s25 + $0x1180] ss:$8 sps:$4 sm:$0xff]  }
 0x46e   : > { %10861 = vmatpush1.bf16.msra.mxu1 %v15757_v53  ;;  %v15844_v53 = vld [vmem:[%s16754_s25 + $0x2980] ss:$8 sps:$4 sm:$0xff]  }
 0x46f   : > { %11845 = vmatpush1.bf16.msra.mxu0 %v15760_v54  ;;  %10862 = vmatprep.subr.bf16.mxu1 %v15765_v55  ;;  %v15849_v54 = vld [vmem:[%s16754_s25 + $0x1194] ss:$8 sps:$4 sm:$0xff]  }
 0x470   : > { %11846 = vmatprep.subr.bf16.mxu0 %v15768_v42  ;;  %v15852_v55 = vld [vmem:[%s16754_s25 + $0x2994] ss:$8 sps:$4 sm:$0xff]   ;;  %v15847_v42 = vld [vmem:[%s16754_s25 + $0x1190] ss:$8 sps:$4 sm:$0xff]  }
 0x472   : > { %10863 = vmatpush1.bf16.msra.mxu1 %v15763_v41  ;;  %v15850_v41 = vld [vmem:[%s16754_s25 + $0x2990] ss:$8 sps:$4 sm:$0xff]  }
 0x473   : > { %11847 = vmatpush1.bf16.msra.mxu0 %v15766_v44  ;;  %10864 = vmatprep.subr.bf16.mxu1 %v15771_v43  ;;  %v15855_v44 = vld [vmem:[%s16754_s25 + $0x11a4] ss:$8 sps:$4 sm:$0xff]  }
 0x474   : > { %11848 = vmatprep.subr.bf16.mxu0 %v15774_v60  ;;  %v15858_v43 = vld [vmem:[%s16754_s25 + $0x29a4] ss:$8 sps:$4 sm:$0xff]   ;;  %v15853_v60 = vld [vmem:[%s16754_s25 + $0x11a0] ss:$8 sps:$4 sm:$0xff]  }
 0x476   : > { %10865 = vmatpush1.bf16.msra.mxu1 %v15769_v61  ;;  %v15856_v61 = vld [vmem:[%s16754_s25 + $0x29a0] ss:$8 sps:$4 sm:$0xff]  }
 0x477   : > { %11849 = vmatpush1.bf16.msra.mxu0 %v15772_v62  ;;  %10866 = vmatprep.subr.bf16.mxu1 %v15777_v63  ;;  %v15861_v62 = vld [vmem:[%s16754_s25 + $0x11b4] ss:$8 sps:$4 sm:$0xff]  }
 0x478   : > { %11850 = vmatprep.subr.bf16.mxu0 %v15780_v0  ;;  %v15864_v63 = vld [vmem:[%s16754_s25 + $0x29b4] ss:$8 sps:$4 sm:$0xff]   ;;  %v15859_v0 = vld [vmem:[%s16754_s25 + $0x11b0] ss:$8 sps:$4 sm:$0xff]  }
 0x47a   : > { %10867 = vmatpush1.bf16.msra.mxu1 %v15775_v2  ;;  %v15862_v2 = vld [vmem:[%s16754_s25 + $0x29b0] ss:$8 sps:$4 sm:$0xff]  }
 0x47b   : > { %11851 = vmatpush1.bf16.msra.mxu0 %v15778_v37  ;;  %10868 = vmatprep.subr.bf16.mxu1 %v15783_v3  ;;  %v15867_v37 = vld [vmem:[%s16754_s25 + $0x11c4] ss:$8 sps:$4 sm:$0xff]  }
 0x47c   : > { %11852 = vmatprep.subr.bf16.mxu0 %v15786_v4  ;;  %v15870_v3 = vld [vmem:[%s16754_s25 + $0x29c4] ss:$8 sps:$4 sm:$0xff]   ;;  %v15865_v4 = vld [vmem:[%s16754_s25 + $0x11c0] ss:$8 sps:$4 sm:$0xff]  }
 0x47e   : > { %10869 = vmatpush1.bf16.msra.mxu1 %v15781_v5  ;;  %v15868_v5 = vld [vmem:[%s16754_s25 + $0x29c0] ss:$8 sps:$4 sm:$0xff]  }
 0x47f   : > { %11853 = vmatpush1.bf16.msra.mxu0 %v15784_v57  ;;  %10870 = vmatprep.subr.bf16.mxu1 %v15789_v56  ;;  %v15873_v57 = vld [vmem:[%s16754_s25 + $0x11d4] ss:$8 sps:$4 sm:$0xff]  }
 0x480   : > { %11854 = vmatprep.subr.bf16.mxu0 %v15792_v59  ;;  %v15876_v56 = vld [vmem:[%s16754_s25 + $0x29d4] ss:$8 sps:$4 sm:$0xff]   ;;  %v15871_v59 = vld [vmem:[%s16754_s25 + $0x11d0] ss:$8 sps:$4 sm:$0xff]  }
 0x482   : > { %10871 = vmatpush1.bf16.msra.mxu1 %v15787_v11  ;;  %v15882_v11 = vld [vmem:[%s16754_s25 + $0x29e4] ss:$8 sps:$4 sm:$0xff]  }
 0x483   : > { %11855 = vmatpush1.bf16.msra.mxu0 %v15790_v12  ;;  %10881 = vmatprep.subr.bf16.mxu1 %v15795_v13  ;;  %v15877_v12 = vld [vmem:[%s16754_s25 + $0x11e0] ss:$8 sps:$4 sm:$0xff]  }
 0x484   : > { %11865 = vmatprep.subr.bf16.mxu0 %v15798_v14  ;;  %v15880_v13 = vld [vmem:[%s16754_s25 + $0x29e0] ss:$8 sps:$4 sm:$0xff]   ;;  %v15885_v14 = vld [vmem:[%s16754_s25 + $0x11f4] ss:$8 sps:$4 sm:$0xff]  }
 0x485   : > { %10873 = vmatmul.mubr.bf16.vlgmr.msra.gmra.mrb[0].mxu1 %v18076_v6  ;;  %v15805_v6 = vld [vmem:[%s16754_s25 + $0x1120] ss:$8 sps:$4 sm:$0xff]  }
 0x486   : > { %11857 = vmatmul.mubr.bf16.vlgmr.msra.gmra.mrb[0].mxu0 %v18080_v9  ;;  %10882 = vmatpush1.bf16.msra.mxu1 %v15793_v16  ;;  %v15808_v9 = vld [vmem:[%s16754_s25 + $0x2920] ss:$8 sps:$4 sm:$0xff]   ;;  %v15888_v16 = vld [vmem:[%s16754_s25 + $0x29f4] ss:$8 sps:$4 sm:$0xff]  }
 0x487   : > { %11866 = vmatpush1.bf16.msra.mxu0 %v15796_v17  ;;  %10883 = vmatprep.subr.bf16.mxu1 %v15801_v51  ;;  %v18229_v17 = vld [vmem:[%s16770_s23 + $0x48] sm:$0xff] }
 0x488   : > { %11867 = vmatprep.subr.bf16.mxu0 %v15804_v27  ;;  %10913 = vmatprep.mubr.bf16.mxu1 %v1982_v19  ;;  %v18232_v51 = vld [vmem:[%s16770_s23 + $0xa8] sm:$0xff]  ;;  %v15883_v27 = vld [vmem:[%s16754_s25 + $0x11f0] ss:$8 sps:$4 sm:$0xff]  }
 0x489   : > { %11897 = vmatprep.mubr.bf16.mxu0 %v2186_v20  ;;  %v15886_v19 = vld [vmem:[%s16754_s25 + $0x29f0] ss:$8 sps:$4 sm:$0xff]   ;;  %v15892_v20 = vld [vmem:[%s16754_s25 + $0x1204] ss:$8 sps:$4 sm:$0xff]  }
 0x48a   : > { %10884 = vmatpush1.bf16.msra.mxu1 %v15799_v21  ;;  %v15896_v21 = vld [vmem:[%s16754_s25 + $0x2a04] ss:$8 sps:$4 sm:$0xff]  }
 0x48b   : > { %11868 = vmatpush1.bf16.msra.mxu0 %v15802_v22  ;;  %10885 = vmatprep.subr.bf16.mxu1 %v15807_v25  ;;  %v18240_v22 = vrot.slane %v18229_v17, %v16818_v50  ;;  %v18244_v25 = vrot.slane %v18232_v51, %v16818_v50 }
 0x48c   : > { %11869 = vmatprep.subr.bf16.mxu0 %v15810_v7  ;;  %v15890_v7 = vld [vmem:[%s16754_s25 + $0x1200] ss:$8 sps:$4 sm:$0xff]  }
 0x48e   : > { %10886 = vmatpush1.bf16.msra.mxu1 %v15805_v6  ;;  %v15894_v6 = vld [vmem:[%s16754_s25 + $0x2a00] ss:$8 sps:$4 sm:$0xff]  }
 0x48f   : > { %11870 = vmatpush1.bf16.msra.mxu0 %v15808_v9  ;;  %10887 = vmatprep.subr.bf16.mxu1 %v15813_v8  ;;  %v15899_v9 = vld [vmem:[%s16754_s25 + $0x1214] ss:$8 sps:$4 sm:$0xff]  }
 0x490   : > { %11871 = vmatprep.subr.bf16.mxu0 %v15816_v26  ;;  %v15902_v8 = vld [vmem:[%s16754_s25 + $0x2a14] ss:$8 sps:$4 sm:$0xff]   ;;  %v1998_v26 = vcombine.high %v18240_v22, %v18240_v22 }
 0x492   : > { %10888 = vmatpush1.bf16.msra.mxu1 %v15811_v28  ;;  %v2202_v28 = vcombine.high %v18244_v25, %v18244_v25 }
 0x493   : > { %11872 = vmatpush1.bf16.msra.mxu0 %v15814_v31  ;;  %10889 = vmatprep.subr.bf16.mxu1 %v15819_v32  ;;  %v15897_v31 = vld [vmem:[%s16754_s25 + $0x1210] ss:$8 sps:$4 sm:$0xff]  }
 0x494   : > { %11873 = vmatprep.subr.bf16.mxu0 %v15822_v33  ;;  %v15900_v32 = vld [vmem:[%s16754_s25 + $0x2a10] ss:$8 sps:$4 sm:$0xff]   ;;  %v15905_v33 = vld [vmem:[%s16754_s25 + $0x1224] ss:$8 sps:$4 sm:$0xff]  }
 0x496   : > { %10890 = vmatpush1.bf16.msra.mxu1 %v15817_v35  ;;  %v15908_v35 = vld [vmem:[%s16754_s25 + $0x2a24] ss:$8 sps:$4 sm:$0xff]  }
 0x497   : > { %11874 = vmatpush1.bf16.msra.mxu0 %v15820_v18  ;;  %10891 = vmatprep.subr.bf16.mxu1 %v15825_v36  ;;  %v15911_v18 = vld [vmem:[%s16754_s25 + $0x1234] ss:$8 sps:$4 sm:$0xff]  }
 0x498   : > { %11875 = vmatprep.subr.bf16.mxu0 %v15828_v38  ;;  %v15914_v36 = vld [vmem:[%s16754_s25 + $0x2a34] ss:$8 sps:$4 sm:$0xff]   ;;  %v15909_v38 = vld [vmem:[%s16754_s25 + $0x1230] ss:$8 sps:$4 sm:$0xff]  }
 0x49a   : > { %10892 = vmatpush1.bf16.msra.mxu1 %v15823_v39  ;;  %v15912_v39 = vld [vmem:[%s16754_s25 + $0x2a30] ss:$8 sps:$4 sm:$0xff]  }
 0x49b   : > { %11876 = vmatpush1.bf16.msra.mxu0 %v15826_v40  ;;  %10893 = vmatprep.subr.bf16.mxu1 %v15831_v45  ;;  %v15917_v40 = vld [vmem:[%s16754_s25 + $0x1244] ss:$8 sps:$4 sm:$0xff]  }
 0x49c   : > { %11877 = vmatprep.subr.bf16.mxu0 %v15834_v23  ;;  %v15920_v45 = vld [vmem:[%s16754_s25 + $0x2a44] ss:$8 sps:$4 sm:$0xff]   ;;  %v15915_v23 = vld [vmem:[%s16754_s25 + $0x1240] ss:$8 sps:$4 sm:$0xff]  }
 0x49e   : > { %10894 = vmatpush1.bf16.msra.mxu1 %v15829_v24  ;;  %v15918_v24 = vld [vmem:[%s16754_s25 + $0x2a40] ss:$8 sps:$4 sm:$0xff]  }
 0x49f   : > { %11878 = vmatpush1.bf16.msra.mxu0 %v15832_v29  ;;  %10895 = vmatprep.subr.bf16.mxu1 %v15837_v34  ;;  %v15923_v29 = vld [vmem:[%s16754_s25 + $0x1254] ss:$8 sps:$4 sm:$0xff]  }
 0x4a0   : > { %11879 = vmatprep.subr.bf16.mxu0 %v15840_v46  ;;  %v15926_v34 = vld [vmem:[%s16754_s25 + $0x2a54] ss:$8 sps:$4 sm:$0xff]   ;;  %v15921_v46 = vld [vmem:[%s16754_s25 + $0x1250] ss:$8 sps:$4 sm:$0xff]  }
 0x4a2   : > { %10896 = vmatpush1.bf16.msra.mxu1 %v15835_v47  ;;  %v15924_v47 = vld [vmem:[%s16754_s25 + $0x2a50] ss:$8 sps:$4 sm:$0xff]  }
 0x4a3   : > { %11880 = vmatpush1.bf16.msra.mxu0 %v15838_v48  ;;  %10897 = vmatprep.subr.bf16.mxu1 %v15843_v49  ;;  %v15929_v48 = vld [vmem:[%s16754_s25 + $0x1264] ss:$8 sps:$4 sm:$0xff]  }
 0x4a4   : > { %11881 = vmatprep.subr.bf16.mxu0 %v15846_v52  ;;  %v15932_v49 = vld [vmem:[%s16754_s25 + $0x2a64] ss:$8 sps:$4 sm:$0xff]   ;;  %v15927_v52 = vld [vmem:[%s16754_s25 + $0x1260] ss:$8 sps:$4 sm:$0xff]  }
 0x4a6   : > { %10898 = vmatpush1.bf16.msra.mxu1 %v15841_v30  ;;  %v15930_v30 = vld [vmem:[%s16754_s25 + $0x2a60] ss:$8 sps:$4 sm:$0xff]  }
 0x4a7   : > { %11882 = vmatpush1.bf16.msra.mxu0 %v15844_v53  ;;  %10899 = vmatprep.subr.bf16.mxu1 %v15849_v54  ;;  %v15935_v53 = vld [vmem:[%s16754_s25 + $0x1274] ss:$8 sps:$4 sm:$0xff]  }
 0x4a8   : > { %11883 = vmatprep.subr.bf16.mxu0 %v15852_v55  ;;  %v15938_v54 = vld [vmem:[%s16754_s25 + $0x2a74] ss:$8 sps:$4 sm:$0xff]   ;;  %v15933_v55 = vld [vmem:[%s16754_s25 + $0x1270] ss:$8 sps:$4 sm:$0xff]  }
 0x4aa   : > { %10900 = vmatpush1.bf16.msra.mxu1 %v15847_v42  ;;  %v15936_v42 = vld [vmem:[%s16754_s25 + $0x2a70] ss:$8 sps:$4 sm:$0xff]  }
 0x4ab   : > { %11884 = vmatpush1.bf16.msra.mxu0 %v15850_v41  ;;  %10901 = vmatprep.subr.bf16.mxu1 %v15855_v44  ;;  %v15941_v41 = vld [vmem:[%s16754_s25 + $0x1284] ss:$8 sps:$4 sm:$0xff]  }
 0x4ac   : > { %11885 = vmatprep.subr.bf16.mxu0 %v15858_v43  ;;  %v15944_v44 = vld [vmem:[%s16754_s25 + $0x2a84] ss:$8 sps:$4 sm:$0xff]   ;;  %v15939_v43 = vld [vmem:[%s16754_s25 + $0x1280] ss:$8 sps:$4 sm:$0xff]  }
 0x4ae   : > { %10902 = vmatpush1.bf16.msra.mxu1 %v15853_v60  ;;  %v15942_v60 = vld [vmem:[%s16754_s25 + $0x2a80] ss:$8 sps:$4 sm:$0xff]  }
 0x4af   : > { %11886 = vmatpush1.bf16.msra.mxu0 %v15856_v61  ;;  %10903 = vmatprep.subr.bf16.mxu1 %v15861_v62  ;;  %v15947_v61 = vld [vmem:[%s16754_s25 + $0x1294] ss:$8 sps:$4 sm:$0xff]  }
 0x4b0   : > { %11887 = vmatprep.subr.bf16.mxu0 %v15864_v63  ;;  %v15950_v62 = vld [vmem:[%s16754_s25 + $0x2a94] ss:$8 sps:$4 sm:$0xff]   ;;  %v15945_v63 = vld [vmem:[%s16754_s25 + $0x1290] ss:$8 sps:$4 sm:$0xff]  }
 0x4b2   : > { %10904 = vmatpush1.bf16.msra.mxu1 %v15859_v0  ;;  %v15948_v0 = vld [vmem:[%s16754_s25 + $0x2a90] ss:$8 sps:$4 sm:$0xff]  }
 0x4b3   : > { %11888 = vmatpush1.bf16.msra.mxu0 %v15862_v2  ;;  %10905 = vmatprep.subr.bf16.mxu1 %v15867_v37  ;;  %v15953_v2 = vld [vmem:[%s16754_s25 + $0x12a4] ss:$8 sps:$4 sm:$0xff]  }
 0x4b4   : > { %11889 = vmatprep.subr.bf16.mxu0 %v15870_v3  ;;  %v15956_v37 = vld [vmem:[%s16754_s25 + $0x2aa4] ss:$8 sps:$4 sm:$0xff]   ;;  %v15951_v3 = vld [vmem:[%s16754_s25 + $0x12a0] ss:$8 sps:$4 sm:$0xff]  }
 0x4b6   : > { %10906 = vmatpush1.bf16.msra.mxu1 %v15865_v4  ;;  %v15954_v4 = vld [vmem:[%s16754_s25 + $0x2aa0] ss:$8 sps:$4 sm:$0xff]  }
 0x4b7   : > { %11890 = vmatpush1.bf16.msra.mxu0 %v15868_v5  ;;  %10907 = vmatprep.subr.bf16.mxu1 %v15873_v57  ;;  %v15959_v5 = vld [vmem:[%s16754_s25 + $0x12b4] ss:$8 sps:$4 sm:$0xff]  }
 0x4b8   : > { %11891 = vmatprep.subr.bf16.mxu0 %v15876_v56  ;;  %v15962_v57 = vld [vmem:[%s16754_s25 + $0x2ab4] ss:$8 sps:$4 sm:$0xff]   ;;  %v15957_v56 = vld [vmem:[%s16754_s25 + $0x12b0] ss:$8 sps:$4 sm:$0xff]  }
 0x4ba   : > { %10908 = vmatpush1.bf16.msra.mxu1 %v15871_v59  ;;  %v15960_v59 = vld [vmem:[%s16754_s25 + $0x2ab0] ss:$8 sps:$4 sm:$0xff]  }
 0x4bb   : > { %11892 = vmatpush1.bf16.msra.mxu0 %v15874_v58  ;;  %10909 = vmatprep.subr.bf16.mxu1 %v15879_v10  ;;  %v15965_v58 = vld [vmem:[%s16754_s25 + $0x12c4] ss:$8 sps:$4 sm:$0xff]  }
 0x4bc   : > { %11893 = vmatprep.subr.bf16.mxu0 %v15882_v11  ;;  %v15968_v10 = vld [vmem:[%s16754_s25 + $0x2ac4] ss:$8 sps:$4 sm:$0xff]   ;;  %v15963_v11 = vld [vmem:[%s16754_s25 + $0x12c0] ss:$8 sps:$4 sm:$0xff]  }
 0x4be   : > { %10910 = vmatpush1.bf16.msra.mxu1 %v15877_v12  ;;  %v15966_v12 = vld [vmem:[%s16754_s25 + $0x2ac0] ss:$8 sps:$4 sm:$0xff]  }
 0x4bf   : > { %11894 = vmatpush1.bf16.msra.mxu0 %v15880_v13  ;;  %10911 = vmatprep.subr.bf16.mxu1 %v15885_v14  ;;  %v15971_v13 = vld [vmem:[%s16754_s25 + $0x12d4] ss:$8 sps:$4 sm:$0xff]  }
 0x4c0   : > { %11895 = vmatprep.subr.bf16.mxu0 %v15888_v16  ;;  %v15974_v14 = vld [vmem:[%s16754_s25 + $0x2ad4] ss:$8 sps:$4 sm:$0xff]   ;;  %v15969_v16 = vld [vmem:[%s16754_s25 + $0x12d0] ss:$8 sps:$4 sm:$0xff]  }
 0x4c2   : > { %10912 = vmatpush1.bf16.msra.mxu1 %v15883_v27  ;;  %v15972_v27 = vld [vmem:[%s16754_s25 + $0x2ad0] ss:$8 sps:$4 sm:$0xff]  }
 0x4c3   : > { %11896 = vmatpush1.bf16.msra.mxu0 %v15886_v19  ;;  %10922 = vmatprep.subr.bf16.mxu1 %v15892_v20  ;;  %v15977_v19 = vld [vmem:[%s16754_s25 + $0x12e4] ss:$8 sps:$4 sm:$0xff]  }
 0x4c4   : > { %11906 = vmatprep.subr.bf16.mxu0 %v15896_v21  ;;  %v15980_v20 = vld [vmem:[%s16754_s25 + $0x2ae4] ss:$8 sps:$4 sm:$0xff]   ;;  %v15975_v21 = vld [vmem:[%s16754_s25 + $0x12e0] ss:$8 sps:$4 sm:$0xff]  }
 0x4c5   : > { %10914 = vmatmul.mubr.bf16.vlgmr.msra.gmra.mrb[0].mxu1 %v18157_v15  ;;  %v15903_v15 = vld [vmem:[%s16754_s25 + $0x1220] ss:$8 sps:$4 sm:$0xff]  }
 0x4c6   : > { %11898 = vmatmul.mubr.bf16.vlgmr.msra.gmra.mrb[0].mxu0 %v18160_v1  ;;  %10923 = vmatpush1.bf16.msra.mxu1 %v15890_v7  ;;  %v15906_v1 = vld [vmem:[%s16754_s25 + $0x2a20] ss:$8 sps:$4 sm:$0xff]  }
 0x4c7   : > { %11907 = vmatpush1.bf16.msra.mxu0 %v15894_v6  ;;  %10924 = vmatprep.subr.bf16.mxu1 %v15899_v9  ;;  %v15978_v7 = vld [vmem:[%s16754_s25 + $0x2ae0] ss:$8 sps:$4 sm:$0xff]   ;;  %v15983_v6 = vld [vmem:[%s16754_s25 + $0x12f4] ss:$8 sps:$4 sm:$0xff]  }
 0x4c8   : > { %11908 = vmatprep.subr.bf16.mxu0 %v15902_v8  ;;  %10954 = vmatprep.mubr.bf16.mxu1 %v1998_v26  ;;  %v15986_v9 = vld [vmem:[%s16754_s25 + $0x2af4] ss:$8 sps:$4 sm:$0xff]   ;;  %v1983_v8 = vcombine.high %v18229_v17, %v18229_v17  ;;  %v2187_v26 = vcombine.high %v18232_v51, %v18232_v51  ;;  %v15987_v17 = vld [vmem:[%s16754_s25 + $0x1300] ss:$8 sps:$4 sm:$0xff]  }
 0x4c9   : > { %11938 = vmatprep.mubr.bf16.mxu0 %v2202_v28  ;;  %v15981_v28 = vld [vmem:[%s16754_s25 + $0x12f0] ss:$8 sps:$4 sm:$0xff]   ;;  %v15990_v51 = vld [vmem:[%s16754_s25 + $0x2b00] ss:$8 sps:$4 sm:$0xff]  }
 0x4ca   : > { %10925 = vmatpush1.bf16.msra.mxu1 %v15897_v31  ;;  %v15984_v31 = vld [vmem:[%s16754_s25 + $0x2af0] ss:$8 sps:$4 sm:$0xff]  }
 0x4cb   : > { %11909 = vmatpush1.bf16.msra.mxu0 %v15900_v32  ;;  %10926 = vmatprep.subr.bf16.mxu1 %v15905_v33  ;;  %v15989_v32 = vld [vmem:[%s16754_s25 + $0x1304] ss:$8 sps:$4 sm:$0xff]  }
 0x4cc   : > { %11910 = vmatprep.subr.bf16.mxu0 %v15908_v35  ;;  %v15992_v33 = vld [vmem:[%s16754_s25 + $0x2b04] ss:$8 sps:$4 sm:$0xff]   ;;  %v18321_v35 = vrot.slane %v1983_v8, %v16818_v50  ;;  %v16068_v8 = vld [vmem:[%s16754_s25 + $0x2bd0] ss:$8 sps:$4 sm:$0xff]  }
 0x4ce   : > { %10927 = vmatpush1.bf16.msra.mxu1 %v15903_v15  ;;  %v18324_v15 = vrot.slane %v2187_v26, %v16818_v50  ;;  %v16073_v26 = vld [vmem:[%s16754_s25 + $0x13e4] ss:$8 sps:$4 sm:$0xff]  }
 0x4cf   : > { %11911 = vmatpush1.bf16.msra.mxu0 %v15906_v1  ;;  %10928 = vmatprep.subr.bf16.mxu1 %v15911_v18  ;;  %v15995_v1 = vld [vmem:[%s16754_s25 + $0x1314] ss:$8 sps:$4 sm:$0xff]  }
 0x4d0   : > { %11912 = vmatprep.subr.bf16.mxu0 %v15914_v36  ;;  %v15998_v18 = vld [vmem:[%s16754_s25 + $0x2b14] ss:$8 sps:$4 sm:$0xff]   ;;  %v1999_v36 = vcombine.high %v18321_v35, %v18321_v35 }
 0x4d2   : > { %10929 = vmatpush1.bf16.msra.mxu1 %v15909_v38  ;;  %v2203_v38 = vcombine.high %v18324_v15, %v18324_v15 }
 0x4d3   : > { %11913 = vmatpush1.bf16.msra.mxu0 %v15912_v39  ;;  %10930 = vmatprep.subr.bf16.mxu1 %v15917_v40  ;;  %v15993_v39 = vld [vmem:[%s16754_s25 + $0x1310] ss:$8 sps:$4 sm:$0xff]  }
 0x4d4   : > { %11914 = vmatprep.subr.bf16.mxu0 %v15920_v45  ;;  %v15996_v40 = vld [vmem:[%s16754_s25 + $0x2b10] ss:$8 sps:$4 sm:$0xff]   ;;  %v16001_v45 = vld [vmem:[%s16754_s25 + $0x1324] ss:$8 sps:$4 sm:$0xff]  }
 0x4d6   : > { %10931 = vmatpush1.bf16.msra.mxu1 %v15915_v23  ;;  %v16004_v23 = vld [vmem:[%s16754_s25 + $0x2b24] ss:$8 sps:$4 sm:$0xff]  }
 0x4d7   : > { %11915 = vmatpush1.bf16.msra.mxu0 %v15918_v24  ;;  %10932 = vmatprep.subr.bf16.mxu1 %v15923_v29  ;;  %v16007_v24 = vld [vmem:[%s16754_s25 + $0x1334] ss:$8 sps:$4 sm:$0xff]  }
 0x4d8   : > { %11916 = vmatprep.subr.bf16.mxu0 %v15926_v34  ;;  %v16010_v29 = vld [vmem:[%s16754_s25 + $0x2b34] ss:$8 sps:$4 sm:$0xff]   ;;  %v16005_v34 = vld [vmem:[%s16754_s25 + $0x1330] ss:$8 sps:$4 sm:$0xff]  }
 0x4da   : > { %10933 = vmatpush1.bf16.msra.mxu1 %v15921_v46  ;;  %v16008_v46 = vld [vmem:[%s16754_s25 + $0x2b30] ss:$8 sps:$4 sm:$0xff]  }
 0x4db   : > { %11917 = vmatpush1.bf16.msra.mxu0 %v15924_v47  ;;  %10934 = vmatprep.subr.bf16.mxu1 %v15929_v48  ;;  %v16013_v47 = vld [vmem:[%s16754_s25 + $0x1344] ss:$8 sps:$4 sm:$0xff]  }
 0x4dc   : > { %11918 = vmatprep.subr.bf16.mxu0 %v15932_v49  ;;  %v16016_v48 = vld [vmem:[%s16754_s25 + $0x2b44] ss:$8 sps:$4 sm:$0xff]   ;;  %v16011_v49 = vld [vmem:[%s16754_s25 + $0x1340] ss:$8 sps:$4 sm:$0xff]  }
 0x4de   : > { %10935 = vmatpush1.bf16.msra.mxu1 %v15927_v52  ;;  %v16014_v52 = vld [vmem:[%s16754_s25 + $0x2b40] ss:$8 sps:$4 sm:$0xff]  }
 0x4df   : > { %11919 = vmatpush1.bf16.msra.mxu0 %v15930_v30  ;;  %10936 = vmatprep.subr.bf16.mxu1 %v15935_v53  ;;  %v16019_v30 = vld [vmem:[%s16754_s25 + $0x1354] ss:$8 sps:$4 sm:$0xff]  }
 0x4e0   : > { %11920 = vmatprep.subr.bf16.mxu0 %v15938_v54  ;;  %v16022_v53 = vld [vmem:[%s16754_s25 + $0x2b54] ss:$8 sps:$4 sm:$0xff]   ;;  %v16017_v54 = vld [vmem:[%s16754_s25 + $0x1350] ss:$8 sps:$4 sm:$0xff]  }
 0x4e2   : > { %10937 = vmatpush1.bf16.msra.mxu1 %v15933_v55  ;;  %v16020_v55 = vld [vmem:[%s16754_s25 + $0x2b50] ss:$8 sps:$4 sm:$0xff]  }
 0x4e3   : > { %11921 = vmatpush1.bf16.msra.mxu0 %v15936_v42  ;;  %10938 = vmatprep.subr.bf16.mxu1 %v15941_v41  ;;  %v16025_v42 = vld [vmem:[%s16754_s25 + $0x1364] ss:$8 sps:$4 sm:$0xff]  }
 0x4e4   : > { %11922 = vmatprep.subr.bf16.mxu0 %v15944_v44  ;;  %v16028_v41 = vld [vmem:[%s16754_s25 + $0x2b64] ss:$8 sps:$4 sm:$0xff]   ;;  %v16023_v44 = vld [vmem:[%s16754_s25 + $0x1360] ss:$8 sps:$4 sm:$0xff]  }
 0x4e6   : > { %10939 = vmatpush1.bf16.msra.mxu1 %v15939_v43  ;;  %v16026_v43 = vld [vmem:[%s16754_s25 + $0x2b60] ss:$8 sps:$4 sm:$0xff]  }
 0x4e7   : > { %11923 = vmatpush1.bf16.msra.mxu0 %v15942_v60  ;;  %10940 = vmatprep.subr.bf16.mxu1 %v15947_v61  ;;  %v16031_v60 = vld [vmem:[%s16754_s25 + $0x1374] ss:$8 sps:$4 sm:$0xff]  }
 0x4e8   : > { %11924 = vmatprep.subr.bf16.mxu0 %v15950_v62  ;;  %v16034_v61 = vld [vmem:[%s16754_s25 + $0x2b74] ss:$8 sps:$4 sm:$0xff]   ;;  %v16029_v62 = vld [vmem:[%s16754_s25 + $0x1370] ss:$8 sps:$4 sm:$0xff]  }
 0x4ea   : > { %10941 = vmatpush1.bf16.msra.mxu1 %v15945_v63  ;;  %v16032_v63 = vld [vmem:[%s16754_s25 + $0x2b70] ss:$8 sps:$4 sm:$0xff]  }
 0x4eb   : > { %11925 = vmatpush1.bf16.msra.mxu0 %v15948_v0  ;;  %10942 = vmatprep.subr.bf16.mxu1 %v15953_v2  ;;  %v16037_v0 = vld [vmem:[%s16754_s25 + $0x1384] ss:$8 sps:$4 sm:$0xff]  }
 0x4ec   : > { %11926 = vmatprep.subr.bf16.mxu0 %v15956_v37  ;;  %v16040_v2 = vld [vmem:[%s16754_s25 + $0x2b84] ss:$8 sps:$4 sm:$0xff]   ;;  %v16035_v37 = vld [vmem:[%s16754_s25 + $0x1380] ss:$8 sps:$4 sm:$0xff]  }
 0x4ee   : > { %10943 = vmatpush1.bf16.msra.mxu1 %v15951_v3  ;;  %v16038_v3 = vld [vmem:[%s16754_s25 + $0x2b80] ss:$8 sps:$4 sm:$0xff]  }
 0x4ef   : > { %11927 = vmatpush1.bf16.msra.mxu0 %v15954_v4  ;;  %10944 = vmatprep.subr.bf16.mxu1 %v15959_v5  ;;  %v16043_v4 = vld [vmem:[%s16754_s25 + $0x1394] ss:$8 sps:$4 sm:$0xff]  }
 0x4f0   : > { %11928 = vmatprep.subr.bf16.mxu0 %v15962_v57  ;;  %v16046_v5 = vld [vmem:[%s16754_s25 + $0x2b94] ss:$8 sps:$4 sm:$0xff]   ;;  %v16041_v57 = vld [vmem:[%s16754_s25 + $0x1390] ss:$8 sps:$4 sm:$0xff]  }
 0x4f2   : > { %10945 = vmatpush1.bf16.msra.mxu1 %v15957_v56  ;;  %v16044_v56 = vld [vmem:[%s16754_s25 + $0x2b90] ss:$8 sps:$4 sm:$0xff]  }
 0x4f3   : > { %11929 = vmatpush1.bf16.msra.mxu0 %v15960_v59  ;;  %10946 = vmatprep.subr.bf16.mxu1 %v15965_v58  ;;  %v16049_v59 = vld [vmem:[%s16754_s25 + $0x13a4] ss:$8 sps:$4 sm:$0xff]  }
 0x4f4   : > { %11930 = vmatprep.subr.bf16.mxu0 %v15968_v10  ;;  %v16052_v58 = vld [vmem:[%s16754_s25 + $0x2ba4] ss:$8 sps:$4 sm:$0xff]   ;;  %v16047_v10 = vld [vmem:[%s16754_s25 + $0x13a0] ss:$8 sps:$4 sm:$0xff]  }
 0x4f6   : > { %10947 = vmatpush1.bf16.msra.mxu1 %v15963_v11  ;;  %v16050_v11 = vld [vmem:[%s16754_s25 + $0x2ba0] ss:$8 sps:$4 sm:$0xff]  }
 0x4f7   : > { %11931 = vmatpush1.bf16.msra.mxu0 %v15966_v12  ;;  %10948 = vmatprep.subr.bf16.mxu1 %v15971_v13  ;;  %v16055_v12 = vld [vmem:[%s16754_s25 + $0x13b4] ss:$8 sps:$4 sm:$0xff]  }
 0x4f8   : > { %11932 = vmatprep.subr.bf16.mxu0 %v15974_v14  ;;  %v16058_v13 = vld [vmem:[%s16754_s25 + $0x2bb4] ss:$8 sps:$4 sm:$0xff]   ;;  %v16053_v14 = vld [vmem:[%s16754_s25 + $0x13b0] ss:$8 sps:$4 sm:$0xff]  }
 0x4fa   : > { %10949 = vmatpush1.bf16.msra.mxu1 %v15969_v16  ;;  %v16056_v16 = vld [vmem:[%s16754_s25 + $0x2bb0] ss:$8 sps:$4 sm:$0xff]  }
 0x4fb   : > { %11933 = vmatpush1.bf16.msra.mxu0 %v15972_v27  ;;  %10950 = vmatprep.subr.bf16.mxu1 %v15977_v19  ;;  %v16061_v27 = vld [vmem:[%s16754_s25 + $0x13c4] ss:$8 sps:$4 sm:$0xff]  }
 0x4fc   : > { %11934 = vmatprep.subr.bf16.mxu0 %v15980_v20  ;;  %v16064_v19 = vld [vmem:[%s16754_s25 + $0x2bc4] ss:$8 sps:$4 sm:$0xff]   ;;  %v16059_v20 = vld [vmem:[%s16754_s25 + $0x13c0] ss:$8 sps:$4 sm:$0xff]  }
 0x4fe   : > { %10951 = vmatpush1.bf16.msra.mxu1 %v15975_v21  ;;  %v16062_v21 = vld [vmem:[%s16754_s25 + $0x2bc0] ss:$8 sps:$4 sm:$0xff]  }
 0x4ff   : > { %11935 = vmatpush1.bf16.msra.mxu0 %v15978_v7  ;;  %10952 = vmatprep.subr.bf16.mxu1 %v15983_v6  ;;  %v16067_v7 = vld [vmem:[%s16754_s25 + $0x13d4] ss:$8 sps:$4 sm:$0xff]  }
 0x500   : > { %11936 = vmatprep.subr.bf16.mxu0 %v15986_v9  ;;  %v16070_v6 = vld [vmem:[%s16754_s25 + $0x2bd4] ss:$8 sps:$4 sm:$0xff]   ;;  %v16065_v9 = vld [vmem:[%s16754_s25 + $0x13d0] ss:$8 sps:$4 sm:$0xff]  }
 0x502   : > { %10953 = vmatpush1.bf16.msra.mxu1 %v15981_v28  ;;  %v16076_v28 = vld [vmem:[%s16754_s25 + $0x2be4] ss:$8 sps:$4 sm:$0xff]  }
 0x503   : > { %11937 = vmatpush1.bf16.msra.mxu0 %v15984_v31  ;;  %10963 = vmatprep.subr.bf16.mxu1 %v15989_v32  ;;  %v16071_v31 = vld [vmem:[%s16754_s25 + $0x13e0] ss:$8 sps:$4 sm:$0xff]  }
 0x504   : > { %11947 = vmatprep.subr.bf16.mxu0 %v15992_v33  ;;  %v16074_v32 = vld [vmem:[%s16754_s25 + $0x2be0] ss:$8 sps:$4 sm:$0xff]   ;;  %v16079_v33 = vld [vmem:[%s16754_s25 + $0x13f4] ss:$8 sps:$4 sm:$0xff]  }
 0x505   : > { %10955 = vmatmul.mubr.bf16.vlgmr.msra.gmra.mrb[0].mxu1 %v18240_v22  ;;  %v15999_v22 = vld [vmem:[%s16754_s25 + $0x1320] ss:$8 sps:$4 sm:$0xff]  }
 0x506   : > { %11939 = vmatmul.mubr.bf16.vlgmr.msra.gmra.mrb[0].mxu0 %v18244_v25  ;;  %10964 = vmatpush1.bf16.msra.mxu1 %v15987_v17  ;;  %v16002_v25 = vld [vmem:[%s16754_s25 + $0x2b20] ss:$8 sps:$4 sm:$0xff]   ;;  %v16082_v17 = vld [vmem:[%s16754_s25 + $0x2bf4] ss:$8 sps:$4 sm:$0xff]  }
 0x507   : > { %11948 = vmatpush1.bf16.msra.mxu0 %v15990_v51  ;;  %10965 = vmatprep.subr.bf16.mxu1 %v15995_v1  ;;  %v18393_v51 = vld [vmem:[%s16770_s23 + $0x50] sm:$0xff] }
 0x508   : > { %11949 = vmatprep.subr.bf16.mxu0 %v15998_v18  ;;  %10995 = vmatprep.mubr.bf16.mxu1 %v1999_v36  ;;  %v18396_v1 = vld [vmem:[%s16770_s23 + $0xb0] sm:$0xff] }
 0x509   : > { %11979 = vmatprep.mubr.bf16.mxu0 %v2203_v38  ;;  %v16077_v18 = vld [vmem:[%s16754_s25 + $0x13f0] ss:$8 sps:$4 sm:$0xff]   ;;  %v16086_v38 = vld [vmem:[%s16754_s25 + $0x1404] ss:$8 sps:$4 sm:$0xff]  }
 0x50a   : > { %10966 = vmatpush1.bf16.msra.mxu1 %v15993_v39  ;;  %v16080_v36 = vld [vmem:[%s16754_s25 + $0x2bf0] ss:$8 sps:$4 sm:$0xff]   ;;  %v16090_v39 = vld [vmem:[%s16754_s25 + $0x2c04] ss:$8 sps:$4 sm:$0xff]  }
 0x50b   : > { %11950 = vmatpush1.bf16.msra.mxu0 %v15996_v40  ;;  %10967 = vmatprep.subr.bf16.mxu1 %v16001_v45  ;;  %v18404_v40 = vrot.slane %v18393_v51, %v16818_v50  ;;  %v18408_v45 = vrot.slane %v18396_v1, %v16818_v50 }
 0x50c   : > { %11951 = vmatprep.subr.bf16.mxu0 %v16004_v23  ;;  %v16084_v23 = vld [vmem:[%s16754_s25 + $0x1400] ss:$8 sps:$4 sm:$0xff]  }
 0x50e   : > { %10968 = vmatpush1.bf16.msra.mxu1 %v15999_v22  ;;  %v16088_v22 = vld [vmem:[%s16754_s25 + $0x2c00] ss:$8 sps:$4 sm:$0xff]  }
 0x50f   : > { %11952 = vmatpush1.bf16.msra.mxu0 %v16002_v25  ;;  %10969 = vmatprep.subr.bf16.mxu1 %v16007_v24  ;;  %v16093_v25 = vld [vmem:[%s16754_s25 + $0x1414] ss:$8 sps:$4 sm:$0xff]  }
 0x510   : > { %11953 = vmatprep.subr.bf16.mxu0 %v16010_v29  ;;  %v16096_v24 = vld [vmem:[%s16754_s25 + $0x2c14] ss:$8 sps:$4 sm:$0xff]   ;;  %v2015_v29 = vcombine.high %v18404_v40, %v18404_v40 }
 0x512   : > { %10970 = vmatpush1.bf16.msra.mxu1 %v16005_v34  ;;  %v2219_v34 = vcombine.high %v18408_v45, %v18408_v45 }
 0x513   : > { %11954 = vmatpush1.bf16.msra.mxu0 %v16008_v46  ;;  %10971 = vmatprep.subr.bf16.mxu1 %v16013_v47  ;;  %v16091_v46 = vld [vmem:[%s16754_s25 + $0x1410] ss:$8 sps:$4 sm:$0xff]  }
 0x514   : > { %11955 = vmatprep.subr.bf16.mxu0 %v16016_v48  ;;  %v16094_v47 = vld [vmem:[%s16754_s25 + $0x2c10] ss:$8 sps:$4 sm:$0xff]   ;;  %v16099_v48 = vld [vmem:[%s16754_s25 + $0x1424] ss:$8 sps:$4 sm:$0xff]  }
 0x516   : > { %10972 = vmatpush1.bf16.msra.mxu1 %v16011_v49  ;;  %v16102_v49 = vld [vmem:[%s16754_s25 + $0x2c24] ss:$8 sps:$4 sm:$0xff]  }
 0x517   : > { %11956 = vmatpush1.bf16.msra.mxu0 %v16014_v52  ;;  %10973 = vmatprep.subr.bf16.mxu1 %v16019_v30  ;;  %v16105_v52 = vld [vmem:[%s16754_s25 + $0x1434] ss:$8 sps:$4 sm:$0xff]  }
 0x518   : > { %11957 = vmatprep.subr.bf16.mxu0 %v16022_v53  ;;  %v16108_v30 = vld [vmem:[%s16754_s25 + $0x2c34] ss:$8 sps:$4 sm:$0xff]   ;;  %v16103_v53 = vld [vmem:[%s16754_s25 + $0x1430] ss:$8 sps:$4 sm:$0xff]  }
 0x51a   : > { %10974 = vmatpush1.bf16.msra.mxu1 %v16017_v54  ;;  %v16106_v54 = vld [vmem:[%s16754_s25 + $0x2c30] ss:$8 sps:$4 sm:$0xff]  }
 0x51b   : > { %11958 = vmatpush1.bf16.msra.mxu0 %v16020_v55  ;;  %10975 = vmatprep.subr.bf16.mxu1 %v16025_v42  ;;  %v16111_v55 = vld [vmem:[%s16754_s25 + $0x1444] ss:$8 sps:$4 sm:$0xff]  }
 0x51c   : > { %11959 = vmatprep.subr.bf16.mxu0 %v16028_v41  ;;  %v16114_v42 = vld [vmem:[%s16754_s25 + $0x2c44] ss:$8 sps:$4 sm:$0xff]   ;;  %v16109_v41 = vld [vmem:[%s16754_s25 + $0x1440] ss:$8 sps:$4 sm:$0xff]  }
 0x51e   : > { %10976 = vmatpush1.bf16.msra.mxu1 %v16023_v44  ;;  %v16112_v44 = vld [vmem:[%s16754_s25 + $0x2c40] ss:$8 sps:$4 sm:$0xff]  }
 0x51f   : > { %11960 = vmatpush1.bf16.msra.mxu0 %v16026_v43  ;;  %10977 = vmatprep.subr.bf16.mxu1 %v16031_v60  ;;  %v16117_v43 = vld [vmem:[%s16754_s25 + $0x1454] ss:$8 sps:$4 sm:$0xff]  }
 0x520   : > { %11961 = vmatprep.subr.bf16.mxu0 %v16034_v61  ;;  %v16120_v60 = vld [vmem:[%s16754_s25 + $0x2c54] ss:$8 sps:$4 sm:$0xff]   ;;  %v16115_v61 = vld [vmem:[%s16754_s25 + $0x1450] ss:$8 sps:$4 sm:$0xff]  }
 0x522   : > { %10978 = vmatpush1.bf16.msra.mxu1 %v16029_v62  ;;  %v16118_v62 = vld [vmem:[%s16754_s25 + $0x2c50] ss:$8 sps:$4 sm:$0xff]  }
 0x523   : > { %11962 = vmatpush1.bf16.msra.mxu0 %v16032_v63  ;;  %10979 = vmatprep.subr.bf16.mxu1 %v16037_v0  ;;  %v16123_v63 = vld [vmem:[%s16754_s25 + $0x1464] ss:$8 sps:$4 sm:$0xff]  }
 0x524   : > { %11963 = vmatprep.subr.bf16.mxu0 %v16040_v2  ;;  %v16126_v0 = vld [vmem:[%s16754_s25 + $0x2c64] ss:$8 sps:$4 sm:$0xff]   ;;  %v16121_v2 = vld [vmem:[%s16754_s25 + $0x1460] ss:$8 sps:$4 sm:$0xff]  }
 0x526   : > { %10980 = vmatpush1.bf16.msra.mxu1 %v16035_v37  ;;  %v16124_v37 = vld [vmem:[%s16754_s25 + $0x2c60] ss:$8 sps:$4 sm:$0xff]  }
 0x527   : > { %11964 = vmatpush1.bf16.msra.mxu0 %v16038_v3  ;;  %10981 = vmatprep.subr.bf16.mxu1 %v16043_v4  ;;  %v16129_v3 = vld [vmem:[%s16754_s25 + $0x1474] ss:$8 sps:$4 sm:$0xff]  }
 0x528   : > { %11965 = vmatprep.subr.bf16.mxu0 %v16046_v5  ;;  %v16132_v4 = vld [vmem:[%s16754_s25 + $0x2c74] ss:$8 sps:$4 sm:$0xff]   ;;  %v16127_v5 = vld [vmem:[%s16754_s25 + $0x1470] ss:$8 sps:$4 sm:$0xff]  }
 0x52a   : > { %10982 = vmatpush1.bf16.msra.mxu1 %v16041_v57  ;;  %v16130_v57 = vld [vmem:[%s16754_s25 + $0x2c70] ss:$8 sps:$4 sm:$0xff]  }
 0x52b   : > { %11966 = vmatpush1.bf16.msra.mxu0 %v16044_v56  ;;  %10983 = vmatprep.subr.bf16.mxu1 %v16049_v59  ;;  %v16135_v56 = vld [vmem:[%s16754_s25 + $0x1484] ss:$8 sps:$4 sm:$0xff]  }
 0x52c   : > { %11967 = vmatprep.subr.bf16.mxu0 %v16052_v58  ;;  %v16138_v59 = vld [vmem:[%s16754_s25 + $0x2c84] ss:$8 sps:$4 sm:$0xff]   ;;  %v16133_v58 = vld [vmem:[%s16754_s25 + $0x1480] ss:$8 sps:$4 sm:$0xff]  }
 0x52e   : > { %10984 = vmatpush1.bf16.msra.mxu1 %v16047_v10  ;;  %v16136_v10 = vld [vmem:[%s16754_s25 + $0x2c80] ss:$8 sps:$4 sm:$0xff]  }
 0x52f   : > { %11968 = vmatpush1.bf16.msra.mxu0 %v16050_v11  ;;  %10985 = vmatprep.subr.bf16.mxu1 %v16055_v12  ;;  %v16141_v11 = vld [vmem:[%s16754_s25 + $0x1494] ss:$8 sps:$4 sm:$0xff]  }
 0x530   : > { %11969 = vmatprep.subr.bf16.mxu0 %v16058_v13  ;;  %v16144_v12 = vld [vmem:[%s16754_s25 + $0x2c94] ss:$8 sps:$4 sm:$0xff]   ;;  %v16139_v13 = vld [vmem:[%s16754_s25 + $0x1490] ss:$8 sps:$4 sm:$0xff]  }
 0x532   : > { %10986 = vmatpush1.bf16.msra.mxu1 %v16053_v14  ;;  %v16142_v14 = vld [vmem:[%s16754_s25 + $0x2c90] ss:$8 sps:$4 sm:$0xff]  }
 0x533   : > { %11970 = vmatpush1.bf16.msra.mxu0 %v16056_v16  ;;  %10987 = vmatprep.subr.bf16.mxu1 %v16061_v27  ;;  %v16147_v16 = vld [vmem:[%s16754_s25 + $0x14a4] ss:$8 sps:$4 sm:$0xff]  }
 0x534   : > { %11971 = vmatprep.subr.bf16.mxu0 %v16064_v19  ;;  %v16150_v27 = vld [vmem:[%s16754_s25 + $0x2ca4] ss:$8 sps:$4 sm:$0xff]   ;;  %v16145_v19 = vld [vmem:[%s16754_s25 + $0x14a0] ss:$8 sps:$4 sm:$0xff]  }
 0x536   : > { %10988 = vmatpush1.bf16.msra.mxu1 %v16059_v20  ;;  %v16148_v20 = vld [vmem:[%s16754_s25 + $0x2ca0] ss:$8 sps:$4 sm:$0xff]  }
 0x537   : > { %11972 = vmatpush1.bf16.msra.mxu0 %v16062_v21  ;;  %10989 = vmatprep.subr.bf16.mxu1 %v16067_v7  ;;  %v16153_v21 = vld [vmem:[%s16754_s25 + $0x14b4] ss:$8 sps:$4 sm:$0xff]  }
 0x538   : > { %11973 = vmatprep.subr.bf16.mxu0 %v16070_v6  ;;  %v16156_v7 = vld [vmem:[%s16754_s25 + $0x2cb4] ss:$8 sps:$4 sm:$0xff]   ;;  %v16151_v6 = vld [vmem:[%s16754_s25 + $0x14b0] ss:$8 sps:$4 sm:$0xff]  }
 0x53a   : > { %10990 = vmatpush1.bf16.msra.mxu1 %v16065_v9  ;;  %v16154_v9 = vld [vmem:[%s16754_s25 + $0x2cb0] ss:$8 sps:$4 sm:$0xff]  }
 0x53b   : > { %11974 = vmatpush1.bf16.msra.mxu0 %v16068_v8  ;;  %10991 = vmatprep.subr.bf16.mxu1 %v16073_v26  ;;  %v16159_v8 = vld [vmem:[%s16754_s25 + $0x14c4] ss:$8 sps:$4 sm:$0xff]  }
 0x53c   : > { %11975 = vmatprep.subr.bf16.mxu0 %v16076_v28  ;;  %v16162_v26 = vld [vmem:[%s16754_s25 + $0x2cc4] ss:$8 sps:$4 sm:$0xff]   ;;  %v16157_v28 = vld [vmem:[%s16754_s25 + $0x14c0] ss:$8 sps:$4 sm:$0xff]  }
 0x53e   : > { %10992 = vmatpush1.bf16.msra.mxu1 %v16071_v31  ;;  %v16160_v31 = vld [vmem:[%s16754_s25 + $0x2cc0] ss:$8 sps:$4 sm:$0xff]  }
 0x53f   : > { %11976 = vmatpush1.bf16.msra.mxu0 %v16074_v32  ;;  %10993 = vmatprep.subr.bf16.mxu1 %v16079_v33  ;;  %v16165_v32 = vld [vmem:[%s16754_s25 + $0x14d4] ss:$8 sps:$4 sm:$0xff]  }
 0x540   : > { %11977 = vmatprep.subr.bf16.mxu0 %v16082_v17  ;;  %v16168_v33 = vld [vmem:[%s16754_s25 + $0x2cd4] ss:$8 sps:$4 sm:$0xff]   ;;  %v16163_v17 = vld [vmem:[%s16754_s25 + $0x14d0] ss:$8 sps:$4 sm:$0xff]  }
 0x542   : > { %10994 = vmatpush1.bf16.msra.mxu1 %v16077_v18  ;;  %v16166_v18 = vld [vmem:[%s16754_s25 + $0x2cd0] ss:$8 sps:$4 sm:$0xff]  }
 0x543   : > { %11978 = vmatpush1.bf16.msra.mxu0 %v16080_v36  ;;  %11004 = vmatprep.subr.bf16.mxu1 %v16086_v38  ;;  %v16171_v36 = vld [vmem:[%s16754_s25 + $0x14e4] ss:$8 sps:$4 sm:$0xff]  }
 0x544   : > { %11988 = vmatprep.subr.bf16.mxu0 %v16090_v39  ;;  %v16174_v38 = vld [vmem:[%s16754_s25 + $0x2ce4] ss:$8 sps:$4 sm:$0xff]   ;;  %v16169_v39 = vld [vmem:[%s16754_s25 + $0x14e0] ss:$8 sps:$4 sm:$0xff]  }
 0x545   : > { %10996 = vmatmul.mubr.bf16.vlgmr.msra.gmra.mrb[0].mxu1 %v18321_v35  ;;  %v16097_v35 = vld [vmem:[%s16754_s25 + $0x1420] ss:$8 sps:$4 sm:$0xff]  }
 0x546   : > { %11980 = vmatmul.mubr.bf16.vlgmr.msra.gmra.mrb[0].mxu0 %v18324_v15  ;;  %11005 = vmatpush1.bf16.msra.mxu1 %v16084_v23  ;;  %v16100_v15 = vld [vmem:[%s16754_s25 + $0x2c20] ss:$8 sps:$4 sm:$0xff]  }
 0x547   : > { %11989 = vmatpush1.bf16.msra.mxu0 %v16088_v22  ;;  %11006 = vmatprep.subr.bf16.mxu1 %v16093_v25  ;;  %v16172_v23 = vld [vmem:[%s16754_s25 + $0x2ce0] ss:$8 sps:$4 sm:$0xff]   ;;  %v16177_v22 = vld [vmem:[%s16754_s25 + $0x14f4] ss:$8 sps:$4 sm:$0xff]  }
 0x548   : > { %11990 = vmatprep.subr.bf16.mxu0 %v16096_v24  ;;  %11036 = vmatprep.mubr.bf16.mxu1 %v2015_v29  ;;  %v16180_v25 = vld [vmem:[%s16754_s25 + $0x2cf4] ss:$8 sps:$4 sm:$0xff]   ;;  %v2000_v24 = vcombine.high %v18393_v51, %v18393_v51  ;;  %v2204_v29 = vcombine.high %v18396_v1, %v18396_v1  ;;  %v16181_v51 = vld [vmem:[%s16754_s25 + $0x1500] ss:$8 sps:$4 sm:$0xff]  }
 0x549   : > { %12020 = vmatprep.mubr.bf16.mxu0 %v2219_v34  ;;  %v16175_v34 = vld [vmem:[%s16754_s25 + $0x14f0] ss:$8 sps:$4 sm:$0xff]   ;;  %v16184_v1 = vld [vmem:[%s16754_s25 + $0x2d00] ss:$8 sps:$4 sm:$0xff]  }
 0x54a   : > { %11007 = vmatpush1.bf16.msra.mxu1 %v16091_v46  ;;  %v16178_v46 = vld [vmem:[%s16754_s25 + $0x2cf0] ss:$8 sps:$4 sm:$0xff]  }
 0x54b   : > { %11991 = vmatpush1.bf16.msra.mxu0 %v16094_v47  ;;  %11008 = vmatprep.subr.bf16.mxu1 %v16099_v48  ;;  %v16183_v47 = vld [vmem:[%s16754_s25 + $0x1504] ss:$8 sps:$4 sm:$0xff]  }
 0x54c   : > { %11992 = vmatprep.subr.bf16.mxu0 %v16102_v49  ;;  %v16186_v48 = vld [vmem:[%s16754_s25 + $0x2d04] ss:$8 sps:$4 sm:$0xff]   ;;  %v18485_v49 = vrot.slane %v2000_v24, %v16818_v50  ;;  %v16262_v24 = vld [vmem:[%s16754_s25 + $0x2dd0] ss:$8 sps:$4 sm:$0xff]  }
 0x54e   : > { %11009 = vmatpush1.bf16.msra.mxu1 %v16097_v35  ;;  %v18488_v35 = vrot.slane %v2204_v29, %v16818_v50  ;;  %v16267_v29 = vld [vmem:[%s16754_s25 + $0x15e4] ss:$8 sps:$4 sm:$0xff]  }
 0x54f   : > { %11993 = vmatpush1.bf16.msra.mxu0 %v16100_v15  ;;  %11010 = vmatprep.subr.bf16.mxu1 %v16105_v52  ;;  %v16189_v15 = vld [vmem:[%s16754_s25 + $0x1514] ss:$8 sps:$4 sm:$0xff]  }
 0x550   : > { %11994 = vmatprep.subr.bf16.mxu0 %v16108_v30  ;;  %v16192_v52 = vld [vmem:[%s16754_s25 + $0x2d14] ss:$8 sps:$4 sm:$0xff]   ;;  %v2016_v30 = vcombine.high %v18485_v49, %v18485_v49 }
 0x552   : > { %11011 = vmatpush1.bf16.msra.mxu1 %v16103_v53  ;;  %v2220_v53 = vcombine.high %v18488_v35, %v18488_v35 }
 0x553   : > { %11995 = vmatpush1.bf16.msra.mxu0 %v16106_v54  ;;  %11012 = vmatprep.subr.bf16.mxu1 %v16111_v55  ;;  %v16187_v54 = vld [vmem:[%s16754_s25 + $0x1510] ss:$8 sps:$4 sm:$0xff]  }
 0x554   : > { %11996 = vmatprep.subr.bf16.mxu0 %v16114_v42  ;;  %v16190_v55 = vld [vmem:[%s16754_s25 + $0x2d10] ss:$8 sps:$4 sm:$0xff]   ;;  %v16195_v42 = vld [vmem:[%s16754_s25 + $0x1524] ss:$8 sps:$4 sm:$0xff]  }
 0x556   : > { %11013 = vmatpush1.bf16.msra.mxu1 %v16109_v41  ;;  %v16198_v41 = vld [vmem:[%s16754_s25 + $0x2d24] ss:$8 sps:$4 sm:$0xff]  }
 0x557   : > { %11997 = vmatpush1.bf16.msra.mxu0 %v16112_v44  ;;  %11014 = vmatprep.subr.bf16.mxu1 %v16117_v43  ;;  %v16201_v44 = vld [vmem:[%s16754_s25 + $0x1534] ss:$8 sps:$4 sm:$0xff]  }
 0x558   : > { %11998 = vmatprep.subr.bf16.mxu0 %v16120_v60  ;;  %v16204_v43 = vld [vmem:[%s16754_s25 + $0x2d34] ss:$8 sps:$4 sm:$0xff]   ;;  %v16199_v60 = vld [vmem:[%s16754_s25 + $0x1530] ss:$8 sps:$4 sm:$0xff]  }
 0x55a   : > { %11015 = vmatpush1.bf16.msra.mxu1 %v16115_v61  ;;  %v16202_v61 = vld [vmem:[%s16754_s25 + $0x2d30] ss:$8 sps:$4 sm:$0xff]  }
 0x55b   : > { %11999 = vmatpush1.bf16.msra.mxu0 %v16118_v62  ;;  %11016 = vmatprep.subr.bf16.mxu1 %v16123_v63  ;;  %v16207_v62 = vld [vmem:[%s16754_s25 + $0x1544] ss:$8 sps:$4 sm:$0xff]  }
 0x55c   : > { %12000 = vmatprep.subr.bf16.mxu0 %v16126_v0  ;;  %v16210_v63 = vld [vmem:[%s16754_s25 + $0x2d44] ss:$8 sps:$4 sm:$0xff]   ;;  %v16205_v0 = vld [vmem:[%s16754_s25 + $0x1540] ss:$8 sps:$4 sm:$0xff]  }
 0x55e   : > { %11017 = vmatpush1.bf16.msra.mxu1 %v16121_v2  ;;  %v16208_v2 = vld [vmem:[%s16754_s25 + $0x2d40] ss:$8 sps:$4 sm:$0xff]  }
 0x55f   : > { %12001 = vmatpush1.bf16.msra.mxu0 %v16124_v37  ;;  %11018 = vmatprep.subr.bf16.mxu1 %v16129_v3  ;;  %v16213_v37 = vld [vmem:[%s16754_s25 + $0x1554] ss:$8 sps:$4 sm:$0xff]  }
 0x560   : > { %12002 = vmatprep.subr.bf16.mxu0 %v16132_v4  ;;  %v16216_v3 = vld [vmem:[%s16754_s25 + $0x2d54] ss:$8 sps:$4 sm:$0xff]   ;;  %v16211_v4 = vld [vmem:[%s16754_s25 + $0x1550] ss:$8 sps:$4 sm:$0xff]  }
 0x562   : > { %11019 = vmatpush1.bf16.msra.mxu1 %v16127_v5  ;;  %v16214_v5 = vld [vmem:[%s16754_s25 + $0x2d50] ss:$8 sps:$4 sm:$0xff]  }
 0x563   : > { %12003 = vmatpush1.bf16.msra.mxu0 %v16130_v57  ;;  %11020 = vmatprep.subr.bf16.mxu1 %v16135_v56  ;;  %v16219_v57 = vld [vmem:[%s16754_s25 + $0x1564] ss:$8 sps:$4 sm:$0xff]  }
 0x564   : > { %12004 = vmatprep.subr.bf16.mxu0 %v16138_v59  ;;  %v16222_v56 = vld [vmem:[%s16754_s25 + $0x2d64] ss:$8 sps:$4 sm:$0xff]   ;;  %v16217_v59 = vld [vmem:[%s16754_s25 + $0x1560] ss:$8 sps:$4 sm:$0xff]  }
 0x566   : > { %11021 = vmatpush1.bf16.msra.mxu1 %v16133_v58  ;;  %v16220_v58 = vld [vmem:[%s16754_s25 + $0x2d60] ss:$8 sps:$4 sm:$0xff]  }
 0x567   : > { %12005 = vmatpush1.bf16.msra.mxu0 %v16136_v10  ;;  %11022 = vmatprep.subr.bf16.mxu1 %v16141_v11  ;;  %v16225_v10 = vld [vmem:[%s16754_s25 + $0x1574] ss:$8 sps:$4 sm:$0xff]  }
 0x568   : > { %12006 = vmatprep.subr.bf16.mxu0 %v16144_v12  ;;  %v16228_v11 = vld [vmem:[%s16754_s25 + $0x2d74] ss:$8 sps:$4 sm:$0xff]   ;;  %v16223_v12 = vld [vmem:[%s16754_s25 + $0x1570] ss:$8 sps:$4 sm:$0xff]  }
 0x56a   : > { %11023 = vmatpush1.bf16.msra.mxu1 %v16139_v13  ;;  %v16226_v13 = vld [vmem:[%s16754_s25 + $0x2d70] ss:$8 sps:$4 sm:$0xff]  }
 0x56b   : > { %12007 = vmatpush1.bf16.msra.mxu0 %v16142_v14  ;;  %11024 = vmatprep.subr.bf16.mxu1 %v16147_v16  ;;  %v16231_v14 = vld [vmem:[%s16754_s25 + $0x1584] ss:$8 sps:$4 sm:$0xff]  }
 0x56c   : > { %12008 = vmatprep.subr.bf16.mxu0 %v16150_v27  ;;  %v16234_v16 = vld [vmem:[%s16754_s25 + $0x2d84] ss:$8 sps:$4 sm:$0xff]   ;;  %v16229_v27 = vld [vmem:[%s16754_s25 + $0x1580] ss:$8 sps:$4 sm:$0xff]  }
 0x56e   : > { %11025 = vmatpush1.bf16.msra.mxu1 %v16145_v19  ;;  %v16232_v19 = vld [vmem:[%s16754_s25 + $0x2d80] ss:$8 sps:$4 sm:$0xff]  }
 0x56f   : > { %12009 = vmatpush1.bf16.msra.mxu0 %v16148_v20  ;;  %11026 = vmatprep.subr.bf16.mxu1 %v16153_v21  ;;  %v16237_v20 = vld [vmem:[%s16754_s25 + $0x1594] ss:$8 sps:$4 sm:$0xff]  }
 0x570   : > { %12010 = vmatprep.subr.bf16.mxu0 %v16156_v7  ;;  %v16240_v21 = vld [vmem:[%s16754_s25 + $0x2d94] ss:$8 sps:$4 sm:$0xff]   ;;  %v16235_v7 = vld [vmem:[%s16754_s25 + $0x1590] ss:$8 sps:$4 sm:$0xff]  }
 0x572   : > { %11027 = vmatpush1.bf16.msra.mxu1 %v16151_v6  ;;  %v16238_v6 = vld [vmem:[%s16754_s25 + $0x2d90] ss:$8 sps:$4 sm:$0xff]  }
 0x573   : > { %12011 = vmatpush1.bf16.msra.mxu0 %v16154_v9  ;;  %11028 = vmatprep.subr.bf16.mxu1 %v16159_v8  ;;  %v16243_v9 = vld [vmem:[%s16754_s25 + $0x15a4] ss:$8 sps:$4 sm:$0xff]  }
 0x574   : > { %12012 = vmatprep.subr.bf16.mxu0 %v16162_v26  ;;  %v16246_v8 = vld [vmem:[%s16754_s25 + $0x2da4] ss:$8 sps:$4 sm:$0xff]   ;;  %v16241_v26 = vld [vmem:[%s16754_s25 + $0x15a0] ss:$8 sps:$4 sm:$0xff]  }
 0x576   : > { %11029 = vmatpush1.bf16.msra.mxu1 %v16157_v28  ;;  %v16244_v28 = vld [vmem:[%s16754_s25 + $0x2da0] ss:$8 sps:$4 sm:$0xff]  }
 0x577   : > { %12013 = vmatpush1.bf16.msra.mxu0 %v16160_v31  ;;  %11030 = vmatprep.subr.bf16.mxu1 %v16165_v32  ;;  %v16249_v31 = vld [vmem:[%s16754_s25 + $0x15b4] ss:$8 sps:$4 sm:$0xff]  }
 0x578   : > { %12014 = vmatprep.subr.bf16.mxu0 %v16168_v33  ;;  %v16252_v32 = vld [vmem:[%s16754_s25 + $0x2db4] ss:$8 sps:$4 sm:$0xff]   ;;  %v16247_v33 = vld [vmem:[%s16754_s25 + $0x15b0] ss:$8 sps:$4 sm:$0xff]  }
 0x57a   : > { %11031 = vmatpush1.bf16.msra.mxu1 %v16163_v17  ;;  %v16250_v17 = vld [vmem:[%s16754_s25 + $0x2db0] ss:$8 sps:$4 sm:$0xff]  }
 0x57b   : > { %12015 = vmatpush1.bf16.msra.mxu0 %v16166_v18  ;;  %11032 = vmatprep.subr.bf16.mxu1 %v16171_v36  ;;  %v16255_v18 = vld [vmem:[%s16754_s25 + $0x15c4] ss:$8 sps:$4 sm:$0xff]  }
 0x57c   : > { %12016 = vmatprep.subr.bf16.mxu0 %v16174_v38  ;;  %v16258_v36 = vld [vmem:[%s16754_s25 + $0x2dc4] ss:$8 sps:$4 sm:$0xff]   ;;  %v16253_v38 = vld [vmem:[%s16754_s25 + $0x15c0] ss:$8 sps:$4 sm:$0xff]  }
 0x57e   : > { %11033 = vmatpush1.bf16.msra.mxu1 %v16169_v39  ;;  %v16256_v39 = vld [vmem:[%s16754_s25 + $0x2dc0] ss:$8 sps:$4 sm:$0xff]  }
 0x57f   : > { %12017 = vmatpush1.bf16.msra.mxu0 %v16172_v23  ;;  %11034 = vmatprep.subr.bf16.mxu1 %v16177_v22  ;;  %v16261_v23 = vld [vmem:[%s16754_s25 + $0x15d4] ss:$8 sps:$4 sm:$0xff]  }
 0x580   : > { %12018 = vmatprep.subr.bf16.mxu0 %v16180_v25  ;;  %v16264_v22 = vld [vmem:[%s16754_s25 + $0x2dd4] ss:$8 sps:$4 sm:$0xff]   ;;  %v16259_v25 = vld [vmem:[%s16754_s25 + $0x15d0] ss:$8 sps:$4 sm:$0xff]  }
 0x582   : > { %11035 = vmatpush1.bf16.msra.mxu1 %v16175_v34  ;;  %v16270_v34 = vld [vmem:[%s16754_s25 + $0x2de4] ss:$8 sps:$4 sm:$0xff]  }
 0x583   : > { %12019 = vmatpush1.bf16.msra.mxu0 %v16178_v46  ;;  %11045 = vmatprep.subr.bf16.mxu1 %v16183_v47  ;;  %v16265_v46 = vld [vmem:[%s16754_s25 + $0x15e0] ss:$8 sps:$4 sm:$0xff]  }
 0x584   : > { %12029 = vmatprep.subr.bf16.mxu0 %v16186_v48  ;;  %v16268_v47 = vld [vmem:[%s16754_s25 + $0x2de0] ss:$8 sps:$4 sm:$0xff]   ;;  %v16273_v48 = vld [vmem:[%s16754_s25 + $0x15f4] ss:$8 sps:$4 sm:$0xff]  }
 0x585   : > { %11037 = vmatmul.mubr.bf16.vlgmr.msra.gmra.mrb[0].mxu1 %v18404_v40  ;;  %v16193_v40 = vld [vmem:[%s16754_s25 + $0x1520] ss:$8 sps:$4 sm:$0xff]  }
 0x586   : > { %12021 = vmatmul.mubr.bf16.vlgmr.msra.gmra.mrb[0].mxu0 %v18408_v45  ;;  %11046 = vmatpush1.bf16.msra.mxu1 %v16181_v51  ;;  %v16196_v45 = vld [vmem:[%s16754_s25 + $0x2d20] ss:$8 sps:$4 sm:$0xff]   ;;  %v16276_v51 = vld [vmem:[%s16754_s25 + $0x2df4] ss:$8 sps:$4 sm:$0xff]  }
 0x587   : > { %12030 = vmatpush1.bf16.msra.mxu0 %v16184_v1  ;;  %11047 = vmatprep.subr.bf16.mxu1 %v16189_v15  ;;  %v18557_v1 = vld [vmem:[%s16770_s23 + $0x58] sm:$0xff] }
 0x588   : > { %12031 = vmatprep.subr.bf16.mxu0 %v16192_v52  ;;  %11077 = vmatprep.mubr.bf16.mxu1 %v2016_v30  ;;  %v18560_v15 = vld [vmem:[%s16770_s23 + $0xb8] sm:$0xff] }
 0x589   : > { %12061 = vmatprep.mubr.bf16.mxu0 %v2220_v53  ;;  %v16271_v52 = vld [vmem:[%s16754_s25 + $0x15f0] ss:$8 sps:$4 sm:$0xff]   ;;  %v16280_v53 = vld [vmem:[%s16754_s25 + $0x1604] ss:$8 sps:$4 sm:$0xff]  }
 0x58a   : > { %11048 = vmatpush1.bf16.msra.mxu1 %v16187_v54  ;;  %v16274_v30 = vld [vmem:[%s16754_s25 + $0x2df0] ss:$8 sps:$4 sm:$0xff]   ;;  %v16284_v54 = vld [vmem:[%s16754_s25 + $0x2e04] ss:$8 sps:$4 sm:$0xff]  }
 0x58b   : > { %12032 = vmatpush1.bf16.msra.mxu0 %v16190_v55  ;;  %11049 = vmatprep.subr.bf16.mxu1 %v16195_v42  ;;  %v18568_v55 = vrot.slane %v18557_v1, %v16818_v50  ;;  %v18572_v42 = vrot.slane %v18560_v15, %v16818_v50 }
 0x58c   : > { %12033 = vmatprep.subr.bf16.mxu0 %v16198_v41  ;;  %v16278_v41 = vld [vmem:[%s16754_s25 + $0x1600] ss:$8 sps:$4 sm:$0xff]  }
 0x58e   : > { %11050 = vmatpush1.bf16.msra.mxu1 %v16193_v40  ;;  %v16282_v40 = vld [vmem:[%s16754_s25 + $0x2e00] ss:$8 sps:$4 sm:$0xff]  }
 0x58f   : > { %12034 = vmatpush1.bf16.msra.mxu0 %v16196_v45  ;;  %11051 = vmatprep.subr.bf16.mxu1 %v16201_v44  ;;  %v16287_v45 = vld [vmem:[%s16754_s25 + $0x1614] ss:$8 sps:$4 sm:$0xff]  }
 0x590   : > { %12035 = vmatprep.subr.bf16.mxu0 %v16204_v43  ;;  %v16290_v44 = vld [vmem:[%s16754_s25 + $0x2e14] ss:$8 sps:$4 sm:$0xff]   ;;  %v2032_v43 = vcombine.high %v18568_v55, %v18568_v55 }
 0x592   : > { %11052 = vmatpush1.bf16.msra.mxu1 %v16199_v60  ;;  %v2236_v60 = vcombine.high %v18572_v42, %v18572_v42 }
 0x593   : > { %12036 = vmatpush1.bf16.msra.mxu0 %v16202_v61  ;;  %11053 = vmatprep.subr.bf16.mxu1 %v16207_v62  ;;  %v16285_v61 = vld [vmem:[%s16754_s25 + $0x1610] ss:$8 sps:$4 sm:$0xff]  }
 0x594   : > { %12037 = vmatprep.subr.bf16.mxu0 %v16210_v63  ;;  %v16288_v62 = vld [vmem:[%s16754_s25 + $0x2e10] ss:$8 sps:$4 sm:$0xff]   ;;  %v16293_v63 = vld [vmem:[%s16754_s25 + $0x1624] ss:$8 sps:$4 sm:$0xff]  }
 0x596   : > { %11054 = vmatpush1.bf16.msra.mxu1 %v16205_v0  ;;  %v16296_v0 = vld [vmem:[%s16754_s25 + $0x2e24] ss:$8 sps:$4 sm:$0xff]  }
 0x597   : > { %12038 = vmatpush1.bf16.msra.mxu0 %v16208_v2  ;;  %11055 = vmatprep.subr.bf16.mxu1 %v16213_v37  ;;  %v16299_v2 = vld [vmem:[%s16754_s25 + $0x1634] ss:$8 sps:$4 sm:$0xff]  }
 0x598   : > { %12039 = vmatprep.subr.bf16.mxu0 %v16216_v3  ;;  %v16302_v37 = vld [vmem:[%s16754_s25 + $0x2e34] ss:$8 sps:$4 sm:$0xff]   ;;  %v16297_v3 = vld [vmem:[%s16754_s25 + $0x1630] ss:$8 sps:$4 sm:$0xff]  }
 0x59a   : > { %11056 = vmatpush1.bf16.msra.mxu1 %v16211_v4  ;;  %v16300_v4 = vld [vmem:[%s16754_s25 + $0x2e30] ss:$8 sps:$4 sm:$0xff]  }
 0x59b   : > { %12040 = vmatpush1.bf16.msra.mxu0 %v16214_v5  ;;  %11057 = vmatprep.subr.bf16.mxu1 %v16219_v57  ;;  %v16305_v5 = vld [vmem:[%s16754_s25 + $0x1644] ss:$8 sps:$4 sm:$0xff]  }
 0x59c   : > { %12041 = vmatprep.subr.bf16.mxu0 %v16222_v56  ;;  %v16308_v57 = vld [vmem:[%s16754_s25 + $0x2e44] ss:$8 sps:$4 sm:$0xff]   ;;  %v16303_v56 = vld [vmem:[%s16754_s25 + $0x1640] ss:$8 sps:$4 sm:$0xff]  }
 0x59e   : > { %11058 = vmatpush1.bf16.msra.mxu1 %v16217_v59  ;;  %v16306_v59 = vld [vmem:[%s16754_s25 + $0x2e40] ss:$8 sps:$4 sm:$0xff]  }
 0x59f   : > { %12042 = vmatpush1.bf16.msra.mxu0 %v16220_v58  ;;  %11059 = vmatprep.subr.bf16.mxu1 %v16225_v10  ;;  %v16311_v58 = vld [vmem:[%s16754_s25 + $0x1654] ss:$8 sps:$4 sm:$0xff]  }
 0x5a0   : > { %12043 = vmatprep.subr.bf16.mxu0 %v16228_v11  ;;  %v16314_v10 = vld [vmem:[%s16754_s25 + $0x2e54] ss:$8 sps:$4 sm:$0xff]   ;;  %v16309_v11 = vld [vmem:[%s16754_s25 + $0x1650] ss:$8 sps:$4 sm:$0xff]  }
 0x5a2   : > { %11060 = vmatpush1.bf16.msra.mxu1 %v16223_v12  ;;  %v16312_v12 = vld [vmem:[%s16754_s25 + $0x2e50] ss:$8 sps:$4 sm:$0xff]  }
 0x5a3   : > { %12044 = vmatpush1.bf16.msra.mxu0 %v16226_v13  ;;  %11061 = vmatprep.subr.bf16.mxu1 %v16231_v14  ;;  %v16317_v13 = vld [vmem:[%s16754_s25 + $0x1664] ss:$8 sps:$4 sm:$0xff]  }
 0x5a4   : > { %12045 = vmatprep.subr.bf16.mxu0 %v16234_v16  ;;  %v16320_v14 = vld [vmem:[%s16754_s25 + $0x2e64] ss:$8 sps:$4 sm:$0xff]   ;;  %v16315_v16 = vld [vmem:[%s16754_s25 + $0x1660] ss:$8 sps:$4 sm:$0xff]  }
 0x5a6   : > { %11062 = vmatpush1.bf16.msra.mxu1 %v16229_v27  ;;  %v16318_v27 = vld [vmem:[%s16754_s25 + $0x2e60] ss:$8 sps:$4 sm:$0xff]  }
 0x5a7   : > { %12046 = vmatpush1.bf16.msra.mxu0 %v16232_v19  ;;  %11063 = vmatprep.subr.bf16.mxu1 %v16237_v20  ;;  %v16323_v19 = vld [vmem:[%s16754_s25 + $0x1674] ss:$8 sps:$4 sm:$0xff]  }
 0x5a8   : > { %12047 = vmatprep.subr.bf16.mxu0 %v16240_v21  ;;  %v16326_v20 = vld [vmem:[%s16754_s25 + $0x2e74] ss:$8 sps:$4 sm:$0xff]   ;;  %v16321_v21 = vld [vmem:[%s16754_s25 + $0x1670] ss:$8 sps:$4 sm:$0xff]  }
 0x5aa   : > { %11064 = vmatpush1.bf16.msra.mxu1 %v16235_v7  ;;  %v16324_v7 = vld [vmem:[%s16754_s25 + $0x2e70] ss:$8 sps:$4 sm:$0xff]  }
 0x5ab   : > { %12048 = vmatpush1.bf16.msra.mxu0 %v16238_v6  ;;  %11065 = vmatprep.subr.bf16.mxu1 %v16243_v9  ;;  %v16329_v6 = vld [vmem:[%s16754_s25 + $0x1684] ss:$8 sps:$4 sm:$0xff]  }
 0x5ac   : > { %12049 = vmatprep.subr.bf16.mxu0 %v16246_v8  ;;  %v16332_v9 = vld [vmem:[%s16754_s25 + $0x2e84] ss:$8 sps:$4 sm:$0xff]   ;;  %v16327_v8 = vld [vmem:[%s16754_s25 + $0x1680] ss:$8 sps:$4 sm:$0xff]  }
 0x5ae   : > { %11066 = vmatpush1.bf16.msra.mxu1 %v16241_v26  ;;  %v16330_v26 = vld [vmem:[%s16754_s25 + $0x2e80] ss:$8 sps:$4 sm:$0xff]  }
 0x5af   : > { %12050 = vmatpush1.bf16.msra.mxu0 %v16244_v28  ;;  %11067 = vmatprep.subr.bf16.mxu1 %v16249_v31  ;;  %v16335_v28 = vld [vmem:[%s16754_s25 + $0x1694] ss:$8 sps:$4 sm:$0xff]  }
 0x5b0   : > { %12051 = vmatprep.subr.bf16.mxu0 %v16252_v32  ;;  %v16338_v31 = vld [vmem:[%s16754_s25 + $0x2e94] ss:$8 sps:$4 sm:$0xff]   ;;  %v16333_v32 = vld [vmem:[%s16754_s25 + $0x1690] ss:$8 sps:$4 sm:$0xff]  }
 0x5b2   : > { %11068 = vmatpush1.bf16.msra.mxu1 %v16247_v33  ;;  %v16336_v33 = vld [vmem:[%s16754_s25 + $0x2e90] ss:$8 sps:$4 sm:$0xff]  }
 0x5b3   : > { %12052 = vmatpush1.bf16.msra.mxu0 %v16250_v17  ;;  %11069 = vmatprep.subr.bf16.mxu1 %v16255_v18  ;;  %v16341_v17 = vld [vmem:[%s16754_s25 + $0x16a4] ss:$8 sps:$4 sm:$0xff]  }
 0x5b4   : > { %12053 = vmatprep.subr.bf16.mxu0 %v16258_v36  ;;  %v16344_v18 = vld [vmem:[%s16754_s25 + $0x2ea4] ss:$8 sps:$4 sm:$0xff]   ;;  %v16339_v36 = vld [vmem:[%s16754_s25 + $0x16a0] ss:$8 sps:$4 sm:$0xff]  }
 0x5b6   : > { %11070 = vmatpush1.bf16.msra.mxu1 %v16253_v38  ;;  %v16342_v38 = vld [vmem:[%s16754_s25 + $0x2ea0] ss:$8 sps:$4 sm:$0xff]  }
 0x5b7   : > { %12054 = vmatpush1.bf16.msra.mxu0 %v16256_v39  ;;  %11071 = vmatprep.subr.bf16.mxu1 %v16261_v23  ;;  %v16347_v39 = vld [vmem:[%s16754_s25 + $0x16b4] ss:$8 sps:$4 sm:$0xff]  }
 0x5b8   : > { %12055 = vmatprep.subr.bf16.mxu0 %v16264_v22  ;;  %v16350_v23 = vld [vmem:[%s16754_s25 + $0x2eb4] ss:$8 sps:$4 sm:$0xff]   ;;  %v16345_v22 = vld [vmem:[%s16754_s25 + $0x16b0] ss:$8 sps:$4 sm:$0xff]  }
 0x5ba   : > { %11072 = vmatpush1.bf16.msra.mxu1 %v16259_v25  ;;  %v16348_v25 = vld [vmem:[%s16754_s25 + $0x2eb0] ss:$8 sps:$4 sm:$0xff]  }
 0x5bb   : > { %12056 = vmatpush1.bf16.msra.mxu0 %v16262_v24  ;;  %11073 = vmatprep.subr.bf16.mxu1 %v16267_v29  ;;  %v16353_v24 = vld [vmem:[%s16754_s25 + $0x16c4] ss:$8 sps:$4 sm:$0xff]  }
 0x5bc   : > { %12057 = vmatprep.subr.bf16.mxu0 %v16270_v34  ;;  %v16356_v29 = vld [vmem:[%s16754_s25 + $0x2ec4] ss:$8 sps:$4 sm:$0xff]   ;;  %v16351_v34 = vld [vmem:[%s16754_s25 + $0x16c0] ss:$8 sps:$4 sm:$0xff]  }
 0x5be   : > { %11074 = vmatpush1.bf16.msra.mxu1 %v16265_v46  ;;  %v16354_v46 = vld [vmem:[%s16754_s25 + $0x2ec0] ss:$8 sps:$4 sm:$0xff]  }
 0x5bf   : > { %12058 = vmatpush1.bf16.msra.mxu0 %v16268_v47  ;;  %11075 = vmatprep.subr.bf16.mxu1 %v16273_v48  ;;  %v16359_v47 = vld [vmem:[%s16754_s25 + $0x16d4] ss:$8 sps:$4 sm:$0xff]  }
 0x5c0   : > { %12059 = vmatprep.subr.bf16.mxu0 %v16276_v51  ;;  %v16362_v48 = vld [vmem:[%s16754_s25 + $0x2ed4] ss:$8 sps:$4 sm:$0xff]   ;;  %v16357_v51 = vld [vmem:[%s16754_s25 + $0x16d0] ss:$8 sps:$4 sm:$0xff]  }
 0x5c2   : > { %11076 = vmatpush1.bf16.msra.mxu1 %v16271_v52  ;;  %v16360_v52 = vld [vmem:[%s16754_s25 + $0x2ed0] ss:$8 sps:$4 sm:$0xff]  }
 0x5c3   : > { %12060 = vmatpush1.bf16.msra.mxu0 %v16274_v30  ;;  %11086 = vmatprep.subr.bf16.mxu1 %v16280_v53  ;;  %v16365_v30 = vld [vmem:[%s16754_s25 + $0x16e4] ss:$8 sps:$4 sm:$0xff]  }
 0x5c4   : > { %12070 = vmatprep.subr.bf16.mxu0 %v16284_v54  ;;  %v16368_v53 = vld [vmem:[%s16754_s25 + $0x2ee4] ss:$8 sps:$4 sm:$0xff]   ;;  %v16363_v54 = vld [vmem:[%s16754_s25 + $0x16e0] ss:$8 sps:$4 sm:$0xff]  }
 0x5c5   : > { %11078 = vmatmul.mubr.bf16.vlgmr.msra.gmra.mrb[0].mxu1 %v18485_v49  ;;  %v16291_v49 = vld [vmem:[%s16754_s25 + $0x1620] ss:$8 sps:$4 sm:$0xff]  }
 0x5c6   : > { %12062 = vmatmul.mubr.bf16.vlgmr.msra.gmra.mrb[0].mxu0 %v18488_v35  ;;  %11087 = vmatpush1.bf16.msra.mxu1 %v16278_v41  ;;  %v16294_v35 = vld [vmem:[%s16754_s25 + $0x2e20] ss:$8 sps:$4 sm:$0xff]  }
 0x5c7   : > { %12071 = vmatpush1.bf16.msra.mxu0 %v16282_v40  ;;  %11088 = vmatprep.subr.bf16.mxu1 %v16287_v45  ;;  %v16366_v41 = vld [vmem:[%s16754_s25 + $0x2ee0] ss:$8 sps:$4 sm:$0xff]   ;;  %v16371_v40 = vld [vmem:[%s16754_s25 + $0x16f4] ss:$8 sps:$4 sm:$0xff]  }
 0x5c8   : > { %12072 = vmatprep.subr.bf16.mxu0 %v16290_v44  ;;  %11118 = vmatprep.mubr.bf16.mxu1 %v2032_v43  ;;  %v16374_v45 = vld [vmem:[%s16754_s25 + $0x2ef4] ss:$8 sps:$4 sm:$0xff]   ;;  %v2017_v44 = vcombine.high %v18557_v1, %v18557_v1  ;;  %v2221_v43 = vcombine.high %v18560_v15, %v18560_v15  ;;  %v16375_v1 = vld [vmem:[%s16754_s25 + $0x1700] ss:$8 sps:$4 sm:$0xff]  }
 0x5c9   : > { %12102 = vmatprep.mubr.bf16.mxu0 %v2236_v60  ;;  %v16369_v60 = vld [vmem:[%s16754_s25 + $0x16f0] ss:$8 sps:$4 sm:$0xff]   ;;  %v16378_v15 = vld [vmem:[%s16754_s25 + $0x2f00] ss:$8 sps:$4 sm:$0xff]  }
 0x5ca   : > { %11089 = vmatpush1.bf16.msra.mxu1 %v16285_v61  ;;  %v16372_v61 = vld [vmem:[%s16754_s25 + $0x2ef0] ss:$8 sps:$4 sm:$0xff]  }
 0x5cb   : > { %12073 = vmatpush1.bf16.msra.mxu0 %v16288_v62  ;;  %11090 = vmatprep.subr.bf16.mxu1 %v16293_v63  ;;  %v16377_v62 = vld [vmem:[%s16754_s25 + $0x1704] ss:$8 sps:$4 sm:$0xff]  }
 0x5cc   : > { %12074 = vmatprep.subr.bf16.mxu0 %v16296_v0  ;;  %v16380_v63 = vld [vmem:[%s16754_s25 + $0x2f04] ss:$8 sps:$4 sm:$0xff]   ;;  %v18649_v0 = vrot.slane %v2017_v44, %v16818_v50 }
 0x5cd   : > { %v16461_v44 = vld [vmem:[%s16754_s25 + $0x17e4] ss:$8 sps:$4 sm:$0xff]  }
 0x5ce   : > { %11091 = vmatpush1.bf16.msra.mxu1 %v16291_v49  ;;  %v18652_v49 = vrot.slane %v2221_v43, %v16818_v50  ;;  %v16381_v50 = vld [vmem:[%s16754_s25 + $0x1710] ss:$8 sps:$4 sm:$0xff]   ;;  %v16464_v43 = vld [vmem:[%s16754_s25 + $0x2fe4] ss:$8 sps:$4 sm:$0xff]  }
 0x5cf   : > { %12075 = vmatpush1.bf16.msra.mxu0 %v16294_v35  ;;  %11092 = vmatprep.subr.bf16.mxu1 %v16299_v2  ;;  %v16383_v35 = vld [vmem:[%s16754_s25 + $0x1714] ss:$8 sps:$4 sm:$0xff]  }
 0x5d0   : > { %12076 = vmatprep.subr.bf16.mxu0 %v16302_v37  ;;  %v16386_v2 = vld [vmem:[%s16754_s25 + $0x2f14] ss:$8 sps:$4 sm:$0xff]   ;;  %v2033_v37 = vcombine.high %v18649_v0, %v18649_v0 }
 0x5d2   : > { %11093 = vmatpush1.bf16.msra.mxu1 %v16297_v3  ;;  %v2237_v3 = vcombine.high %v18652_v49, %v18652_v49 }
 0x5d3   : > { %12077 = vmatpush1.bf16.msra.mxu0 %v16300_v4  ;;  %11094 = vmatprep.subr.bf16.mxu1 %v16305_v5  ;;  %v16384_v4 = vld [vmem:[%s16754_s25 + $0x2f10] ss:$8 sps:$4 sm:$0xff]   ;;  %v16389_v5 = vld [vmem:[%s16754_s25 + $0x1724] ss:$8 sps:$4 sm:$0xff]  }
 0x5d4   : > { %12078 = vmatprep.subr.bf16.mxu0 %v16308_v57  ;;  %v16392_v57 = vld [vmem:[%s16754_s25 + $0x2f24] ss:$8 sps:$4 sm:$0xff]  }
 0x5d6   : > { %11095 = vmatpush1.bf16.msra.mxu1 %v16303_v56  ;;  %v16395_v56 = vld [vmem:[%s16754_s25 + $0x1734] ss:$8 sps:$4 sm:$0xff]  }
 0x5d7   : > { %12079 = vmatpush1.bf16.msra.mxu0 %v16306_v59  ;;  %11096 = vmatprep.subr.bf16.mxu1 %v16311_v58  ;;  %v16398_v59 = vld [vmem:[%s16754_s25 + $0x2f34] ss:$8 sps:$4 sm:$0xff]   ;;  %v16393_v58 = vld [vmem:[%s16754_s25 + $0x1730] ss:$8 sps:$4 sm:$0xff]  }
 0x5d8   : > { %12080 = vmatprep.subr.bf16.mxu0 %v16314_v10  ;;  %v16396_v10 = vld [vmem:[%s16754_s25 + $0x2f30] ss:$8 sps:$4 sm:$0xff]  }
 0x5da   : > { %11097 = vmatpush1.bf16.msra.mxu1 %v16309_v11  ;;  %v16401_v11 = vld [vmem:[%s16754_s25 + $0x1744] ss:$8 sps:$4 sm:$0xff]  }
 0x5db   : > { %12081 = vmatpush1.bf16.msra.mxu0 %v16312_v12  ;;  %11098 = vmatprep.subr.bf16.mxu1 %v16317_v13  ;;  %v16404_v12 = vld [vmem:[%s16754_s25 + $0x2f44] ss:$8 sps:$4 sm:$0xff]   ;;  %v16399_v13 = vld [vmem:[%s16754_s25 + $0x1740] ss:$8 sps:$4 sm:$0xff]  }
 0x5dc   : > { %12082 = vmatprep.subr.bf16.mxu0 %v16320_v14  ;;  %v16402_v14 = vld [vmem:[%s16754_s25 + $0x2f40] ss:$8 sps:$4 sm:$0xff]  }
 0x5de   : > { %11099 = vmatpush1.bf16.msra.mxu1 %v16315_v16  ;;  %v16407_v16 = vld [vmem:[%s16754_s25 + $0x1754] ss:$8 sps:$4 sm:$0xff]  }
 0x5df   : > { %12083 = vmatpush1.bf16.msra.mxu0 %v16318_v27  ;;  %11100 = vmatprep.subr.bf16.mxu1 %v16323_v19  ;;  %v16410_v27 = vld [vmem:[%s16754_s25 + $0x2f54] ss:$8 sps:$4 sm:$0xff]   ;;  %v16405_v19 = vld [vmem:[%s16754_s25 + $0x1750] ss:$8 sps:$4 sm:$0xff]  }
 0x5e0   : > { %12084 = vmatprep.subr.bf16.mxu0 %v16326_v20  ;;  %v16408_v20 = vld [vmem:[%s16754_s25 + $0x2f50] ss:$8 sps:$4 sm:$0xff]  }
 0x5e2   : > { %11101 = vmatpush1.bf16.msra.mxu1 %v16321_v21  ;;  %v16413_v21 = vld [vmem:[%s16754_s25 + $0x1764] ss:$8 sps:$4 sm:$0xff]  }
 0x5e3   : > { %12085 = vmatpush1.bf16.msra.mxu0 %v16324_v7  ;;  %11102 = vmatprep.subr.bf16.mxu1 %v16329_v6  ;;  %v16416_v7 = vld [vmem:[%s16754_s25 + $0x2f64] ss:$8 sps:$4 sm:$0xff]   ;;  %v16411_v6 = vld [vmem:[%s16754_s25 + $0x1760] ss:$8 sps:$4 sm:$0xff]  }
 0x5e4   : > { %12086 = vmatprep.subr.bf16.mxu0 %v16332_v9  ;;  %v16414_v9 = vld [vmem:[%s16754_s25 + $0x2f60] ss:$8 sps:$4 sm:$0xff]  }
 0x5e6   : > { %11103 = vmatpush1.bf16.msra.mxu1 %v16327_v8  ;;  %v16419_v8 = vld [vmem:[%s16754_s25 + $0x1774] ss:$8 sps:$4 sm:$0xff]  }
 0x5e7   : > { %12087 = vmatpush1.bf16.msra.mxu0 %v16330_v26  ;;  %11104 = vmatprep.subr.bf16.mxu1 %v16335_v28  ;;  %v16422_v26 = vld [vmem:[%s16754_s25 + $0x2f74] ss:$8 sps:$4 sm:$0xff]   ;;  %v16417_v28 = vld [vmem:[%s16754_s25 + $0x1770] ss:$8 sps:$4 sm:$0xff]  }
 0x5e8   : > { %12088 = vmatprep.subr.bf16.mxu0 %v16338_v31  ;;  %v16420_v31 = vld [vmem:[%s16754_s25 + $0x2f70] ss:$8 sps:$4 sm:$0xff]  }
 0x5ea   : > { %11105 = vmatpush1.bf16.msra.mxu1 %v16333_v32  ;;  %v16425_v32 = vld [vmem:[%s16754_s25 + $0x1784] ss:$8 sps:$4 sm:$0xff]  }
 0x5eb   : > { %12089 = vmatpush1.bf16.msra.mxu0 %v16336_v33  ;;  %11106 = vmatprep.subr.bf16.mxu1 %v16341_v17  ;;  %v16428_v33 = vld [vmem:[%s16754_s25 + $0x2f84] ss:$8 sps:$4 sm:$0xff]   ;;  %v16423_v17 = vld [vmem:[%s16754_s25 + $0x1780] ss:$8 sps:$4 sm:$0xff]  }
 0x5ec   : > { %12090 = vmatprep.subr.bf16.mxu0 %v16344_v18  ;;  %v16426_v18 = vld [vmem:[%s16754_s25 + $0x2f80] ss:$8 sps:$4 sm:$0xff]  }
 0x5ee   : > { %11107 = vmatpush1.bf16.msra.mxu1 %v16339_v36  ;;  %v16431_v36 = vld [vmem:[%s16754_s25 + $0x1794] ss:$8 sps:$4 sm:$0xff]  }
 0x5ef   : > { %12091 = vmatpush1.bf16.msra.mxu0 %v16342_v38  ;;  %11108 = vmatprep.subr.bf16.mxu1 %v16347_v39  ;;  %v16434_v38 = vld [vmem:[%s16754_s25 + $0x2f94] ss:$8 sps:$4 sm:$0xff]   ;;  %v16429_v39 = vld [vmem:[%s16754_s25 + $0x1790] ss:$8 sps:$4 sm:$0xff]  }
 0x5f0   : > { %12092 = vmatprep.subr.bf16.mxu0 %v16350_v23  ;;  %v16432_v23 = vld [vmem:[%s16754_s25 + $0x2f90] ss:$8 sps:$4 sm:$0xff]  }
 0x5f2   : > { %11109 = vmatpush1.bf16.msra.mxu1 %v16345_v22  ;;  %v16437_v22 = vld [vmem:[%s16754_s25 + $0x17a4] ss:$8 sps:$4 sm:$0xff]  }
 0x5f3   : > { %12093 = vmatpush1.bf16.msra.mxu0 %v16348_v25  ;;  %11110 = vmatprep.subr.bf16.mxu1 %v16353_v24  ;;  %v16440_v25 = vld [vmem:[%s16754_s25 + $0x2fa4] ss:$8 sps:$4 sm:$0xff]   ;;  %v16435_v24 = vld [vmem:[%s16754_s25 + $0x17a0] ss:$8 sps:$4 sm:$0xff]  }
 0x5f4   : > { %12094 = vmatprep.subr.bf16.mxu0 %v16356_v29  ;;  %v16438_v29 = vld [vmem:[%s16754_s25 + $0x2fa0] ss:$8 sps:$4 sm:$0xff]  }
 0x5f6   : > { %11111 = vmatpush1.bf16.msra.mxu1 %v16351_v34  ;;  %v16443_v34 = vld [vmem:[%s16754_s25 + $0x17b4] ss:$8 sps:$4 sm:$0xff]  }
 0x5f7   : > { %12095 = vmatpush1.bf16.msra.mxu0 %v16354_v46  ;;  %11112 = vmatprep.subr.bf16.mxu1 %v16359_v47  ;;  %v16446_v46 = vld [vmem:[%s16754_s25 + $0x2fb4] ss:$8 sps:$4 sm:$0xff]   ;;  %v16441_v47 = vld [vmem:[%s16754_s25 + $0x17b0] ss:$8 sps:$4 sm:$0xff]  }
 0x5f8   : > { %12096 = vmatprep.subr.bf16.mxu0 %v16362_v48  ;;  %v16444_v48 = vld [vmem:[%s16754_s25 + $0x2fb0] ss:$8 sps:$4 sm:$0xff]  }
 0x5fa   : > { %11113 = vmatpush1.bf16.msra.mxu1 %v16357_v51  ;;  %v16449_v51 = vld [vmem:[%s16754_s25 + $0x17c4] ss:$8 sps:$4 sm:$0xff]  }
 0x5fb   : > { %12097 = vmatpush1.bf16.msra.mxu0 %v16360_v52  ;;  %11114 = vmatprep.subr.bf16.mxu1 %v16365_v30  ;;  %v16452_v52 = vld [vmem:[%s16754_s25 + $0x2fc4] ss:$8 sps:$4 sm:$0xff]   ;;  %v16447_v30 = vld [vmem:[%s16754_s25 + $0x17c0] ss:$8 sps:$4 sm:$0xff]  }
 0x5fc   : > { %12098 = vmatprep.subr.bf16.mxu0 %v16368_v53  ;;  %v16450_v53 = vld [vmem:[%s16754_s25 + $0x2fc0] ss:$8 sps:$4 sm:$0xff]  }
 0x5fe   : > { %11115 = vmatpush1.bf16.msra.mxu1 %v16363_v54  ;;  %v16455_v54 = vld [vmem:[%s16754_s25 + $0x17d4] ss:$8 sps:$4 sm:$0xff]  }
 0x5ff   : > { %12099 = vmatpush1.bf16.msra.mxu0 %v16366_v41  ;;  %11116 = vmatprep.subr.bf16.mxu1 %v16371_v40  ;;  %v16458_v41 = vld [vmem:[%s16754_s25 + $0x2fd4] ss:$8 sps:$4 sm:$0xff]   ;;  %v16453_v40 = vld [vmem:[%s16754_s25 + $0x17d0] ss:$8 sps:$4 sm:$0xff]  }
 0x600   : > { %12100 = vmatprep.subr.bf16.mxu0 %v16374_v45  ;;  %v16456_v45 = vld [vmem:[%s16754_s25 + $0x2fd0] ss:$8 sps:$4 sm:$0xff]  }
 0x602   : > { %11117 = vmatpush1.bf16.msra.mxu1 %v16369_v60  ;;  %v16459_v60 = vld [vmem:[%s16754_s25 + $0x17e0] ss:$8 sps:$4 sm:$0xff]  }
 0x603   : > { %12101 = vmatpush1.bf16.msra.mxu0 %v16372_v61  ;;  %11127 = vmatprep.subr.bf16.mxu1 %v16377_v62  ;;  %v16462_v61 = vld [vmem:[%s16754_s25 + $0x2fe0] ss:$8 sps:$4 sm:$0xff]   ;;  %v16467_v62 = vld [vmem:[%s16754_s25 + $0x17f4] ss:$8 sps:$4 sm:$0xff]  }
 0x604   : > { %12111 = vmatprep.subr.bf16.mxu0 %v16380_v63  ;;  %v16470_v63 = vld [vmem:[%s16754_s25 + $0x2ff4] ss:$8 sps:$4 sm:$0xff]  }
 0x605   : > { %11119 = vmatmul.mubr.bf16.vlgmr.msra.gmra.mrb[0].mxu1 %v18568_v55  ;;  %v16387_v55 = vld [vmem:[%s16754_s25 + $0x1720] ss:$8 sps:$4 sm:$0xff]  }
 0x606   : > { %12103 = vmatmul.mubr.bf16.vlgmr.msra.gmra.mrb[0].mxu0 %v18572_v42  ;;  %11128 = vmatpush1.bf16.msra.mxu1 %v16375_v1  ;;  %v16390_v42 = vld [vmem:[%s16754_s25 + $0x2f20] ss:$8 sps:$4 sm:$0xff]   ;;  %v16465_v1 = vld [vmem:[%s16754_s25 + $0x17f0] ss:$8 sps:$4 sm:$0xff]  }
 0x607   : > { %12112 = vmatpush1.bf16.msra.mxu0 %v16378_v15  ;;  %11129 = vmatprep.subr.bf16.mxu1 %v16383_v35  ;;  %v16468_v15 = vld [vmem:[%s16754_s25 + $0x2ff0] ss:$8 sps:$4 sm:$0xff]   ;;  %v16475_v35 = vld [vmem:[%s16754_s25 + $0x3004] ss:$8 sps:$4 sm:$0xff]  }
 0x608   : > { %12113 = vmatprep.subr.bf16.mxu0 %v16386_v2  ;;  %11159 = vmatprep.mubr.bf16.mxu1 %v2033_v37  ;;  %v18724_v2 = vld.sshfl [vmem:[%s16770_s23 + $0xc0] sm:$0x33 pattern:$0x76325410] }
 0x609   : > { %12143 = vmatprep.mubr.bf16.mxu0 %v2237_v3  ;;  %v16473_v37 = vld [vmem:[%s16754_s25 + $0x3000] ss:$8 sps:$4 sm:$0xff]   ;;  %v2245_v3 = vcombine.high %v18724_v2, %v18724_v2 }
 0x60a   : > { %11130 = vmatpush1.bf16.msra.mxu1 %v16381_v50  ;;  %v16478_v50 = vld [vmem:[%s16754_s25 + $0x3014] ss:$8 sps:$4 sm:$0xff]  }
 0x60b   : > { %12114 = vmatpush1.bf16.msra.mxu0 %v16384_v4  ;;  %11131 = vmatprep.subr.bf16.mxu1 %v16389_v5  ;;  %v16476_v4 = vld [vmem:[%s16754_s25 + $0x3010] ss:$8 sps:$4 sm:$0xff]   ;;  %v16481_v5 = vld [vmem:[%s16754_s25 + $0x3024] ss:$8 sps:$4 sm:$0xff]  }
 0x60c   : > { %12115 = vmatprep.subr.bf16.mxu0 %v16392_v57  ;;  %v16479_v57 = vld [vmem:[%s16754_s25 + $0x3020] ss:$8 sps:$4 sm:$0xff]  }
 0x60e   : > { %11132 = vmatpush1.bf16.msra.mxu1 %v16387_v55  ;;  %v16484_v55 = vld [vmem:[%s16754_s25 + $0x3034] ss:$8 sps:$4 sm:$0xff]  }
 0x60f   : > { %12116 = vmatpush1.bf16.msra.mxu0 %v16390_v42  ;;  %11133 = vmatprep.subr.bf16.mxu1 %v16395_v56  ;;  %v16482_v42 = vld [vmem:[%s16754_s25 + $0x3030] ss:$8 sps:$4 sm:$0xff]   ;;  %v16490_v56 = vld [vmem:[%s16754_s25 + $0x3054] ss:$8 sps:$4 sm:$0xff]  }
 0x610   : > { %12117 = vmatprep.subr.bf16.mxu0 %v16398_v59  ;;  %v16488_v59 = vld [vmem:[%s16754_s25 + $0x3050] ss:$8 sps:$4 sm:$0xff]  }
 0x612   : > { %11134 = vmatpush1.bf16.msra.mxu1 %v16393_v58  ;;  %v16493_v58 = vld [vmem:[%s16754_s25 + $0x3064] ss:$8 sps:$4 sm:$0xff]  }
 0x613   : > { %12118 = vmatpush1.bf16.msra.mxu0 %v16396_v10  ;;  %11135 = vmatprep.subr.bf16.mxu1 %v16401_v11  ;;  %v16491_v10 = vld [vmem:[%s16754_s25 + $0x3060] ss:$8 sps:$4 sm:$0xff]   ;;  %v16496_v11 = vld [vmem:[%s16754_s25 + $0x3074] ss:$8 sps:$4 sm:$0xff]  }
 0x614   : > { %12119 = vmatprep.subr.bf16.mxu0 %v16404_v12  ;;  %v16494_v12 = vld [vmem:[%s16754_s25 + $0x3070] ss:$8 sps:$4 sm:$0xff]  }
 0x616   : > { %11136 = vmatpush1.bf16.msra.mxu1 %v16399_v13  ;;  %v16499_v13 = vld [vmem:[%s16754_s25 + $0x3084] ss:$8 sps:$4 sm:$0xff]  }
 0x617   : > { %12120 = vmatpush1.bf16.msra.mxu0 %v16402_v14  ;;  %11137 = vmatprep.subr.bf16.mxu1 %v16407_v16  ;;  %v16497_v14 = vld [vmem:[%s16754_s25 + $0x3080] ss:$8 sps:$4 sm:$0xff]   ;;  %v16502_v16 = vld [vmem:[%s16754_s25 + $0x3094] ss:$8 sps:$4 sm:$0xff]  }
 0x618   : > { %12121 = vmatprep.subr.bf16.mxu0 %v16410_v27  ;;  %v16500_v27 = vld [vmem:[%s16754_s25 + $0x3090] ss:$8 sps:$4 sm:$0xff]  }
 0x61a   : > { %11138 = vmatpush1.bf16.msra.mxu1 %v16405_v19  ;;  %v16505_v19 = vld [vmem:[%s16754_s25 + $0x30a4] ss:$8 sps:$4 sm:$0xff]  }
 0x61b   : > { %12122 = vmatpush1.bf16.msra.mxu0 %v16408_v20  ;;  %11139 = vmatprep.subr.bf16.mxu1 %v16413_v21  ;;  %v16503_v20 = vld [vmem:[%s16754_s25 + $0x30a0] ss:$8 sps:$4 sm:$0xff]   ;;  %v16508_v21 = vld [vmem:[%s16754_s25 + $0x30b4] ss:$8 sps:$4 sm:$0xff]  }
 0x61c   : > { %12123 = vmatprep.subr.bf16.mxu0 %v16416_v7  ;;  %v16506_v7 = vld [vmem:[%s16754_s25 + $0x30b0] ss:$8 sps:$4 sm:$0xff]  }
 0x61e   : > { %11140 = vmatpush1.bf16.msra.mxu1 %v16411_v6  ;;  %v16511_v6 = vld [vmem:[%s16754_s25 + $0x30c4] ss:$8 sps:$4 sm:$0xff]  }
 0x61f   : > { %12124 = vmatpush1.bf16.msra.mxu0 %v16414_v9  ;;  %11141 = vmatprep.subr.bf16.mxu1 %v16419_v8  ;;  %v16509_v9 = vld [vmem:[%s16754_s25 + $0x30c0] ss:$8 sps:$4 sm:$0xff]   ;;  %v16514_v8 = vld [vmem:[%s16754_s25 + $0x30d4] ss:$8 sps:$4 sm:$0xff]  }
 0x620   : > { %12125 = vmatprep.subr.bf16.mxu0 %v16422_v26  ;;  %v16512_v26 = vld [vmem:[%s16754_s25 + $0x30d0] ss:$8 sps:$4 sm:$0xff]  }
 0x622   : > { %11142 = vmatpush1.bf16.msra.mxu1 %v16417_v28  ;;  %v16517_v28 = vld [vmem:[%s16754_s25 + $0x30e4] ss:$8 sps:$4 sm:$0xff]  }
 0x623   : > { %12126 = vmatpush1.bf16.msra.mxu0 %v16420_v31  ;;  %11143 = vmatprep.subr.bf16.mxu1 %v16425_v32  ;;  %v16515_v31 = vld [vmem:[%s16754_s25 + $0x30e0] ss:$8 sps:$4 sm:$0xff]   ;;  %v16520_v32 = vld [vmem:[%s16754_s25 + $0x30f4] ss:$8 sps:$4 sm:$0xff]  }
 0x624   : > { %12127 = vmatprep.subr.bf16.mxu0 %v16428_v33  ;;  %v16518_v33 = vld [vmem:[%s16754_s25 + $0x30f0] ss:$8 sps:$4 sm:$0xff]  }
 0x626   : > { %11144 = vmatpush1.bf16.msra.mxu1 %v16423_v17 }
 0x627   : > { %12128 = vmatpush1.bf16.msra.mxu0 %v16426_v18  ;;  %11145 = vmatprep.subr.bf16.mxu1 %v16431_v36 }
 0x628   : > { %12129 = vmatprep.subr.bf16.mxu0 %v16434_v38 }
 0x62a   : > { %11146 = vmatpush1.bf16.msra.mxu1 %v16429_v39 }
 0x62b   : > { %12130 = vmatpush1.bf16.msra.mxu0 %v16432_v23  ;;  %11147 = vmatprep.subr.bf16.mxu1 %v16437_v22 }
 0x62c   : > { %12131 = vmatprep.subr.bf16.mxu0 %v16440_v25 }
 0x62e   : > { %11148 = vmatpush1.bf16.msra.mxu1 %v16435_v24 }
 0x62f   : > { %12132 = vmatpush1.bf16.msra.mxu0 %v16438_v29  ;;  %11149 = vmatprep.subr.bf16.mxu1 %v16443_v34  ;;  %v211_v29 = vld [vmem:[%s16765_s26] sm:$0xff] }
 0x630   : > { %12133 = vmatprep.subr.bf16.mxu0 %v16446_v46 }
 0x632   : > { %11150 = vmatpush1.bf16.msra.mxu1 %v16441_v47 }
 0x633   : > { %12134 = vmatpush1.bf16.msra.mxu0 %v16444_v48  ;;  %11151 = vmatprep.subr.bf16.mxu1 %v16449_v51 }
 0x634   : > { %12135 = vmatprep.subr.bf16.mxu0 %v16452_v52 }
 0x636   : > { %11152 = vmatpush1.bf16.msra.mxu1 %v16447_v30 }
 0x637   : > { %12136 = vmatpush1.bf16.msra.mxu0 %v16450_v53  ;;  %11153 = vmatprep.subr.bf16.mxu1 %v16455_v54 }
 0x638   : > { %12137 = vmatprep.subr.bf16.mxu0 %v16458_v41 }
 0x63a   : > { %11154 = vmatpush1.bf16.msra.mxu1 %v16453_v40 }
 0x63b   : > { %12138 = vmatpush1.bf16.msra.mxu0 %v16456_v45  ;;  %11155 = vmatprep.subr.bf16.mxu1 %v16461_v44 }
 0x63c   : > { %12139 = vmatprep.subr.bf16.mxu0 %v16464_v43 }
 0x63e   : > { %11156 = vmatpush1.bf16.msra.mxu1 %v16459_v60 }
 0x63f   : > { %12140 = vmatpush1.bf16.msra.mxu0 %v16462_v61  ;;  %11157 = vmatprep.subr.bf16.mxu1 %v16467_v62 }
 0x640   : > { %12141 = vmatprep.subr.bf16.mxu0 %v16470_v63 }
 0x642   : > { %11158 = vmatpush1.bf16.msra.mxu1 %v16465_v1 }
 0x643   : > { %12142 = vmatpush1.bf16.msra.mxu0 %v16468_v15 }
 0x644   : > { %12152 = vmatprep.subr.bf16.mxu0 %v16475_v35 }
 0x645   : > { %11160 = vmatmul.mubr.bf16.vlgmr.msra.gmra.mrb[0].mxu1 %v18649_v0  ;;  %v16487_v0 = vld [vmem:[%s16754_s25 + $0x3044] ss:$8 sps:$4 sm:$0xff]  }
 0x646   : > { %12144 = vmatmul.mubr.bf16.vlgmr.msra.gmra.mrb[0].mxu0 %v18652_v49  ;;  %v16485_v49 = vld [vmem:[%s16754_s25 + $0x3040] ss:$8 sps:$4 sm:$0xff]  }
 0x647   : > { %12153 = vmatpush1.bf16.msra.mxu0 %v16473_v37  ;;  %12184 = vmatprep.mubr.bf16.mxu0 %v2245_v3 }
 0x648   : > { %12154 = vmatprep.subr.bf16.mxu0 %v16478_v50 }
 0x64b   : > { %12155 = vmatpush1.bf16.msra.mxu0 %v16476_v4 }
 0x64c   : > { %12156 = vmatprep.subr.bf16.mxu0 %v16481_v5 }
 0x64f   : > { %12157 = vmatpush1.bf16.msra.mxu0 %v16479_v57 }
 0x650   : > { %12158 = vmatprep.subr.bf16.mxu0 %v16484_v55 }
 0x653   : > { %12159 = vmatpush1.bf16.msra.mxu0 %v16482_v42 }
 0x654   : > { %12160 = vmatprep.subr.bf16.mxu0 %v16487_v0 }
 0x657   : > { %12161 = vmatpush1.bf16.msra.mxu0 %v16485_v49 }
 0x658   : > { %12162 = vmatprep.subr.bf16.mxu0 %v16490_v56 }
 0x65b   : > { %12163 = vmatpush1.bf16.msra.mxu0 %v16488_v59 }
 0x65c   : > { %12164 = vmatprep.subr.bf16.mxu0 %v16493_v58 }
 0x65f   : > { %12165 = vmatpush1.bf16.msra.mxu0 %v16491_v10 }
 0x660   : > { %12166 = vmatprep.subr.bf16.mxu0 %v16496_v11 }
 0x663   : > { %12167 = vmatpush1.bf16.msra.mxu0 %v16494_v12 }
 0x664   : > { %12168 = vmatprep.subr.bf16.mxu0 %v16499_v13 }
 0x667   : > { %12169 = vmatpush1.bf16.msra.mxu0 %v16497_v14 }
 0x668   : > { %12170 = vmatprep.subr.bf16.mxu0 %v16502_v16 }
 0x66b   : > { %12171 = vmatpush1.bf16.msra.mxu0 %v16500_v27 }
 0x66c   : > { %12172 = vmatprep.subr.bf16.mxu0 %v16505_v19 }
 0x66f   : > { %12173 = vmatpush1.bf16.msra.mxu0 %v16503_v20 }
 0x670   : > { %12174 = vmatprep.subr.bf16.mxu0 %v16508_v21 }
 0x673   : > { %12175 = vmatpush1.bf16.msra.mxu0 %v16506_v7 }
 0x674   : > { %12176 = vmatprep.subr.bf16.mxu0 %v16511_v6 }
 0x677   : > { %12177 = vmatpush1.bf16.msra.mxu0 %v16509_v9 }
 0x678   : > { %12178 = vmatprep.subr.bf16.mxu0 %v16514_v8 }
 0x67b   : > { %12179 = vmatpush1.bf16.msra.mxu0 %v16512_v26 }
 0x67c   : > { %12180 = vmatprep.subr.bf16.mxu0 %v16517_v28 }
 0x67f   : > { %12181 = vmatpush1.bf16.msra.mxu0 %v16515_v31 }
 0x680   : > { %12182 = vmatprep.subr.bf16.mxu0 %v16520_v32 }
 0x683   : > { %12183 = vmatpush1.bf16.msra.mxu0 %v16518_v33 }
 0x686   : > { %12185 = vmatmul.mubr.bf16.vlgmr.msra.gmra.mrb[0].mxu0 %v18724_v2 }
 0x718   : > { %v11161_v17 = vpop.f32.mrb[0].mxu1 }
 0x719   : > { %v11163_v18 = vpop.f32.mrb[1].mxu1 }
 0x71a   : > { %v11165_v36 = vpop.f32.mrb[2].mxu1 }
 0x71b   : > { %v11166_v38 = vpop.f32.mrb[3].mxu1 }
 0x759   : > { %v12186_v39 = vpop.f32.mrb[0].mxu0 }
 0x75a   : > { %v13877_v23 = vadd.f32 %v12186_v39, %v11161_v17  ;;  %v12188_v22 = vpop.f32.mrb[1].mxu0 }
 0x75b   : > { %v13878_v25 = vadd.f32 %v12188_v22, %v11163_v18  ;;  %v12190_v24 = vpop.f32.mrb[2].mxu0 }
 0x75c   : > { %v12191_v34 = vpop.f32.mrb[3].mxu0 }
 0x75d   : > { %v12195_v46 = vcombine.low %v13877_v23, %v13878_v25 }
 0x75f   : > { %v12197_v47 = vadd.f32 %v12195_v46, %v211_v29 }
 0x761   : > { %12198 = vst [vmem:[%s16765_s26] sm:$0xff] %v12197_v47 }
 0x762 PF: > { %s15_s16 = sadd.s32 1, %s16617_s16   ;;  %s18794_s9 = smov %s16593_s10 }
 0x763   : > { %p12_p6 = scmp.ge.s32.totalorder %s15_s16, 8   ;;  %s18795_s10 = smov %s16597_s11 }
 0x764   : > { %s18796_s11 = smov %s16707_s29  ;;  %s18797_s12 = smov %s16609_s14 }
 0x765   : > { %s18798_s13 = smov %s16613_s15  ;;  %s18799_s14 = smov %s18802_s18 }
 0x766   : > { %s18800_s15 = smov %s18806_s19  ;;  %14 = sbr.rel (!%p12_p6) target bundleno = 5 (0x5), region = 75 }
 0x76d   :  { %12221 = vsyncpa [#allocation3], 1 }
 0x76e   :  { %12223 = vsyncpa [#allocation3 + $0x1], 1 }

</bundles_post_ra>
